<compile_context>
chip_gen: v6e
topology: v6e:2x2x1
jax: 0.10.0
libtpu: 0.0.40
codegen_flags: <defaults>
</compile_context>

<pallas_src>
import jax
import jax.numpy as jnp
from jax.experimental import pallas as pl
from jax.experimental.pallas import tpu as pltpu


# --------------------------------- fused kernel --------------------------------- #
def _bilstm_fused_kernel(x_ref, len_ref, lab_ref, mask_ref,
                         wih_f_ref, b_f_ref, wih_b_ref, b_b_ref,
                         whh_f_ref, whh_b_ref, wtag_ref, btag_ref,
                         pred_ref, loss_ref, msum_ref,
                         gxf_ref, gxb_ref, hf_ref, hb_ref):
    T, BBLK, EP = x_ref.shape
    HP = whh_f_ref.shape[0]           # padded hidden size (multiple of 128)
    G4 = 4 * HP
    CP = wtag_ref.shape[1]            # padded tagset size (multiple of 128)
    N = T * BBLK

    # -------- Phase 1: hoisted input->gate projection (one big MXU matmul / dir) ----
    x2d = x_ref[...].reshape(N, EP)
    gxf_ref[...] = (jnp.dot(x2d, wih_f_ref[...], preferred_element_type=jnp.float32)
                    + b_f_ref[...]).reshape(T, BBLK, G4)
    gxb_ref[...] = (jnp.dot(x2d, wih_b_ref[...], preferred_element_type=jnp.float32)
                    + b_b_ref[...]).reshape(T, BBLK, G4)

    # Hoisted loads: weights / lengths read once, not per timestep.
    whh_f = whh_f_ref[...]
    whh_b = whh_b_ref[...]
    lens = len_ref[...]               # (BBLK, 1) int32
    mxu_dt = whh_f.dtype

    def cell(gates, c):
        # PyTorch gate order i, f, g, o; each slice is a whole 128-lane block.
        i = jax.nn.sigmoid(gates[:, 0 * HP:1 * HP])
        f = jax.nn.sigmoid(gates[:, 1 * HP:2 * HP])
        g = jnp.tanh(gates[:, 2 * HP:3 * HP])
        o = jax.nn.sigmoid(gates[:, 3 * HP:4 * HP])
        c_new = f * c + i * g
        h_new = o * jnp.tanh(c_new)
        return h_new, c_new

    zeros = jnp.zeros((BBLK, HP), jnp.float32)

    # -------- Phase 2: fused fwd + bwd recurrence (only h @ Whh on the serial path) --
    def step(k, carry):
        h_f, c_f, h_b, c_b = carry
        t_b = T - 1 - k
        gates_f = gxf_ref[k] + jnp.dot(h_f.astype(mxu_dt), whh_f,
                                       preferred_element_type=jnp.float32)
        gates_b = gxb_ref[t_b] + jnp.dot(h_b.astype(mxu_dt), whh_b,
                                         preferred_element_type=jnp.float32)
        hf_new, cf_new = cell(gates_f, c_f)
        hb_new, cb_new = cell(gates_b, c_b)
        valid_f = k < lens            # (BBLK, 1) packed-sequence mask
        valid_b = t_b < lens
        h_f = jnp.where(valid_f, hf_new, h_f)
        c_f = jnp.where(valid_f, cf_new, c_f)
        h_b = jnp.where(valid_b, hb_new, h_b)
        c_b = jnp.where(valid_b, cb_new, c_b)
        hf_ref[k] = h_f * valid_f.astype(jnp.float32)
        hb_ref[t_b] = h_b * valid_b.astype(jnp.float32)
        return (h_f, c_f, h_b, c_b)

    jax.lax.fori_loop(0, T, step, (zeros, zeros, zeros, zeros), unroll=True)

    # -------- Phase 3: head fused in the epilogue (hidden2tag + argmax + masked CE) --
    hf2d = hf_ref[...].reshape(N, HP).astype(mxu_dt)
    hb2d = hb_ref[...].reshape(N, HP).astype(mxu_dt)
    logits = (jnp.dot(hf2d, wtag_ref[0:HP, :], preferred_element_type=jnp.float32)
              + jnp.dot(hb2d, wtag_ref[HP:2 * HP, :], preferred_element_type=jnp.float32)
              + btag_ref[...]).reshape(T, BBLK, CP)

    mx = jnp.max(logits, axis=-1, keepdims=True)
    idx = jax.lax.broadcasted_iota(jnp.int32, (T, BBLK, CP), 2)
    # first-occurrence argmax (matches torch.argmax); padded classes carry -1e30 bias
    pred_ref[...] = jnp.min(jnp.where(logits == mx, idx, CP), axis=-1, keepdims=True)

    z = logits - mx
    lse = jnp.log(jnp.sum(jnp.exp(z), axis=-1, keepdims=True))          # (T,BBLK,1)
    onehot = (idx == lab_ref[...]).astype(jnp.float32)
    logp_label = jnp.sum(z * onehot, axis=-1, keepdims=True) - lse
    msk = mask_ref[...]
    loss_ref[...] = jnp.sum(-logp_label * msk).reshape(1, 1, 1)
    msum_ref[...] = jnp.sum(msk).reshape(1, 1, 1)


# ----------------------------------- wrapper ----------------------------------- #
def _round_up(x, m):
    return (x + m - 1) // m * m


def _pad_gate_mat(w, rows_pad, hp):
    """(rows, 4H) -> (rows_pad, 4*hp): scatter each gate block into its padded slot."""
    rows, four_h = w.shape
    h = four_h // 4
    out = jnp.zeros((rows_pad, 4, hp), w.dtype)
    out = out.at[:rows, :, :h].set(w.reshape(rows, 4, h))
    return out.reshape(rows_pad, 4 * hp)


def bilstm_forward(params, embedded, labels, lengths, mask, *,
                   mxu_dtype=jnp.float32, b_block=8):
    """embedded: (B,T,E) f32; labels: (B,T) int; lengths: (B,); mask: (B,T)."""
    assert b_block % 8 == 0
    B, T, E = embedded.shape
    H = params["whh_f"].shape[0]
    C = params["w_tag"].shape[1]

    LANE = 128
    Hp = _round_up(H, LANE)
    Ep = _round_up(E, LANE)
    Cp = _round_up(C, LANE)
    Bp = _round_up(max(B, b_block), b_block)
    NB = Bp // b_block

    # ---- pad activations to (T, Bp, Ep) time-major; padded rows have length 0 ----
    x_tm = jnp.transpose(embedded, (1, 0, 2)).astype(jnp.float32)
    x_tm = jnp.pad(x_tm, ((0, 0), (0, Bp - B), (0, Ep - E))).astype(mxu_dtype)
    lens_p = jnp.pad(lengths.astype(jnp.int32), (0, Bp - B)).reshape(Bp, 1)
    lab_tm = jnp.pad(jnp.transpose(labels.astype(jnp.int32)),
                     ((0, 0), (0, Bp - B)))[..., None]                     # (T,Bp,1)
    mask_tm = jnp.pad(jnp.transpose(mask.astype(jnp.float32)),
                      ((0, 0), (0, Bp - B)))[..., None]                    # (T,Bp,1)

    # ---- pad weights (zero-padding keeps the padded hidden state exactly zero) ----
    wih_f = _pad_gate_mat(params["wih_f"], Ep, Hp).astype(mxu_dtype)
    wih_b = _pad_gate_mat(params["wih_b"], Ep, Hp).astype(mxu_dtype)
    whh_f = _pad_gate_mat(params["whh_f"], Hp, Hp).astype(mxu_dtype)
    whh_b = _pad_gate_mat(params["whh_b"], Hp, Hp).astype(mxu_dtype)
    b_f = _pad_gate_mat(params["b_f"], 1, Hp).astype(jnp.float32)
    b_b = _pad_gate_mat(params["b_b"], 1, Hp).astype(jnp.float32)

    w_tag = jnp.zeros((2 * Hp, Cp), jnp.float32)
    w_tag = w_tag.at[:H, :C].set(params["w_tag"][:H])
    w_tag = w_tag.at[Hp:Hp + H, :C].set(params["w_tag"][H:])
    w_tag = w_tag.astype(mxu_dtype)
    b_tag = jnp.full((1, Cp), -1e30, jnp.float32).at[:, :C].set(params["b_tag"])

    in_specs = [
        pl.BlockSpec((T, b_block, Ep), lambda b: (0, b, 0)),   # x
        pl.BlockSpec((b_block, 1),     lambda b: (b, 0)),      # lengths
        pl.BlockSpec((T, b_block, 1),  lambda b: (0, b, 0)),   # labels
        pl.BlockSpec((T, b_block, 1),  lambda b: (0, b, 0)),   # mask
        pl.BlockSpec((Ep, 4 * Hp),     lambda b: (0, 0)),      # Wih fwd
        pl.BlockSpec((1, 4 * Hp),      lambda b: (0, 0)),      # bias fwd
        pl.BlockSpec((Ep, 4 * Hp),     lambda b: (0, 0)),      # Wih bwd
        pl.BlockSpec((1, 4 * Hp),      lambda b: (0, 0)),      # bias bwd
        pl.BlockSpec((Hp, 4 * Hp),     lambda b: (0, 0)),      # Whh fwd
        pl.BlockSpec((Hp, 4 * Hp),     lambda b: (0, 0)),      # Whh bwd
        pl.BlockSpec((2 * Hp, Cp),     lambda b: (0, 0)),      # hidden2tag W
        pl.BlockSpec((1, Cp),          lambda b: (0, 0)),      # hidden2tag b
    ]
    out_specs = (
        pl.BlockSpec((T, b_block, 1), lambda b: (0, b, 0)),    # pred (time-major)
        pl.BlockSpec((1, 1, 1),       lambda b: (b, 0, 0)),    # per-block loss sum
        pl.BlockSpec((1, 1, 1),       lambda b: (b, 0, 0)),    # per-block mask sum
    )
    scratch_shapes = [
        pltpu.VMEM((T, b_block, 4 * Hp), jnp.float32),         # gates_x fwd
        pltpu.VMEM((T, b_block, 4 * Hp), jnp.float32),         # gates_x bwd
        pltpu.VMEM((T, b_block, Hp), jnp.float32),             # h fwd per step
        pltpu.VMEM((T, b_block, Hp), jnp.float32),             # h bwd per step
    ]

    pred_tm, loss_parts, mask_parts = pl.pallas_call(
        _bilstm_fused_kernel,
        out_shape=(jax.ShapeDtypeStruct((T, Bp, 1), jnp.int32),
                   jax.ShapeDtypeStruct((NB, 1, 1), jnp.float32),
                   jax.ShapeDtypeStruct((NB, 1, 1), jnp.float32)),
        grid_spec=pltpu.PrefetchScalarGridSpec(
            num_scalar_prefetch=0,
            grid=(NB,),
            in_specs=in_specs,
            out_specs=out_specs,
            scratch_shapes=scratch_shapes),
        compiler_params=pltpu.CompilerParams(
            dimension_semantics=("parallel",)),
    )(x_tm, lens_p, lab_tm, mask_tm,
      wih_f, b_f, wih_b, b_b, whh_f, whh_b, w_tag, b_tag)

    # masked-mean CE (== CrossEntropyLoss when mask is all ones, as the reference
    # implicitly requires); guard against an all-zero mask.
    loss = jnp.sum(loss_parts) / jnp.maximum(jnp.sum(mask_parts), 1.0)
    pred_tag = jnp.transpose(pred_tm[:, :B, 0])                # (B, T)
    return loss, pred_tag


def init_params(key, vocab_size, emb_dim, hidden_dim, tagset_size):
    H = hidden_dim
    ks = jax.random.split(key, 11)
    s = 1.0 / jnp.sqrt(jnp.float32(H))

    def u(k, shape):
        return jax.random.uniform(k, shape, jnp.float32, -s, s)

    return dict(
        emb=0.1 * jax.random.normal(ks[0], (vocab_size, emb_dim), jnp.float32),
        # LSTM weights stored pre-transposed as (in, 4H); bias = b_ih + b_hh
        wih_f=u(ks[1], (emb_dim, 4 * H)),
        whh_f=u(ks[2], (H, 4 * H)),
        b_f=u(ks[3], (1, 4 * H)) + u(ks[4], (1, 4 * H)),
        wih_b=u(ks[5], (emb_dim, 4 * H)),
        whh_b=u(ks[6], (H, 4 * H)),
        b_b=u(ks[7], (1, 4 * H)) + u(ks[8], (1, 4 * H)),
        # hidden2tag stored as (2H, C)
        w_tag=u(ks[9], (2 * H, tagset_size)),
        b_tag=u(ks[10], (1, tagset_size)),
    )


if __name__ == "__main__":
    B, T = 2, 8
    vocab_size, emb_dim, hidden_dim, tagset_size = 100, 32, 32, 8

    key = jax.random.PRNGKey(0)
    kp, ksent, klab = jax.random.split(key, 3)
    params = init_params(kp, vocab_size, emb_dim, hidden_dim, tagset_size)

    sent = jax.random.randint(ksent, (B, T), 0, vocab_size, jnp.int32)
    labels = jax.random.randint(klab, (B, T), 0, tagset_size, jnp.int32)
    # full-length sequences so that masked logits align with labels.view(-1),
    # as the reference code implicitly requires
    lengths = jnp.full((B,), T, jnp.int32)
    mask = jnp.ones((B, T), jnp.float32)

    # TODO(synk): `Attention` is a constructor-injected external module; modeled here
    # as a deterministic embedding lookup producing embedded of shape (B, T, emb_dim).
    embedded = params["emb"][sent]

    # f32 operands preserve PyTorch numerics; pass mxu_dtype=jnp.bfloat16 on v6e/v7x
    # for full MXU throughput (elementwise gate/state math stays f32 in-kernel).
    loss, pred_tag = bilstm_forward(params, embedded, labels, lengths, mask)
    jax.block_until_ready((loss, pred_tag))
    print("KERNEL_OK")
</pallas_src>

<mosaic_0001>
module attributes {stable_mosaic.version = 11 : i64} {
  func.func @_bilstm_fused_kernel(%arg0: i32, %arg1: memref<8x8x128xf32, #tpu.memory_space<vmem>>, %arg2: memref<8x1xi32, #tpu.memory_space<vmem>>, %arg3: memref<8x8x1xi32, #tpu.memory_space<vmem>>, %arg4: memref<8x8x1xf32, #tpu.memory_space<vmem>>, %arg5: memref<128x512xf32, #tpu.memory_space<vmem>>, %arg6: memref<1x512xf32, #tpu.memory_space<vmem>>, %arg7: memref<128x512xf32, #tpu.memory_space<vmem>>, %arg8: memref<1x512xf32, #tpu.memory_space<vmem>>, %arg9: memref<128x512xf32, #tpu.memory_space<vmem>>, %arg10: memref<128x512xf32, #tpu.memory_space<vmem>>, %arg11: memref<256x128xf32, #tpu.memory_space<vmem>>, %arg12: memref<1x128xf32, #tpu.memory_space<vmem>>, %arg13: memref<8x8x1xi32, #tpu.memory_space<vmem>>, %arg14: memref<1x1x1xf32, #tpu.memory_space<vmem>>, %arg15: memref<1x1x1xf32, #tpu.memory_space<vmem>>, %arg16: memref<8x8x512xf32, #tpu.memory_space<vmem>>, %arg17: memref<8x8x512xf32, #tpu.memory_space<vmem>>, %arg18: memref<8x8x128xf32, #tpu.memory_space<vmem>>, %arg19: memref<8x8x128xf32, #tpu.memory_space<vmem>>) attributes {dimension_semantics = [#tpu.dimension_semantics<parallel>], iteration_bounds = array<i64: 1>, scalar_prefetch = 0 : i64, scratch_operands = 4 : i64, tpu.core_type = #tpu.core_type<tc>, window_params = [{transform_indices = @transform_0, window_bounds = array<i64: 8, 8, 128>}, {transform_indices = @transform_1, window_bounds = array<i64: 8, 1>}, {transform_indices = @transform_2, window_bounds = array<i64: 8, 8, 1>}, {transform_indices = @transform_3, window_bounds = array<i64: 8, 8, 1>}, {pipeline_mode = #tpu.pipeline_mode<synchronous>, transform_indices = @transform_4, window_bounds = array<i64: 128, 512>}, {pipeline_mode = #tpu.pipeline_mode<synchronous>, transform_indices = @transform_5, window_bounds = array<i64: 1, 512>}, {pipeline_mode = #tpu.pipeline_mode<synchronous>, transform_indices = @transform_6, window_bounds = array<i64: 128, 512>}, {pipeline_mode = #tpu.pipeline_mode<synchronous>, transform_indices = @transform_7, window_bounds = array<i64: 1, 512>}, {pipeline_mode = #tpu.pipeline_mode<synchronous>, transform_indices = @transform_8, window_bounds = array<i64: 128, 512>}, {pipeline_mode = #tpu.pipeline_mode<synchronous>, transform_indices = @transform_9, window_bounds = array<i64: 128, 512>}, {pipeline_mode = #tpu.pipeline_mode<synchronous>, transform_indices = @transform_10, window_bounds = array<i64: 256, 128>}, {pipeline_mode = #tpu.pipeline_mode<synchronous>, transform_indices = @transform_11, window_bounds = array<i64: 1, 128>}, {transform_indices = @transform_12, window_bounds = array<i64: 8, 8, 1>}, {transform_indices = @transform_13, window_bounds = array<i64: 1, 1, 1>}, {transform_indices = @transform_14, window_bounds = array<i64: 1, 1, 1>}]} {
    %c0 = arith.constant 0 : index
    %c0_0 = arith.constant 0 : index
    %c0_1 = arith.constant 0 : index
    %0 = vector.load %arg1[%c0, %c0_0, %c0_1] : memref<8x8x128xf32, #tpu.memory_space<vmem>>, vector<8x8x128xf32>
    %1 = vector.shape_cast %0 : vector<8x8x128xf32> to vector<64x128xf32>
    %c0_2 = arith.constant 0 : index
    %c0_3 = arith.constant 0 : index
    %2 = vector.load %arg5[%c0_2, %c0_3] : memref<128x512xf32, #tpu.memory_space<vmem>>, vector<128x512xf32>
    %cst = arith.constant dense<0.000000e+00> : vector<64x512xf32>
    %3 = tpu.matmul %1, %2, %cst {dimension_numbers = #tpu.dot_dimension_numbers<[1], [0], [0], [1], [0, 0, 1, 1], [], []>} : vector<64x128xf32>, vector<128x512xf32>, vector<64x512xf32> -> vector<64x512xf32>
    %c0_4 = arith.constant 0 : index
    %c0_5 = arith.constant 0 : index
    %4 = vector.load %arg6[%c0_4, %c0_5] : memref<1x512xf32, #tpu.memory_space<vmem>>, vector<1x512xf32>
    %5 = vector.broadcast %4 : vector<1x512xf32> to vector<64x512xf32>
    %6 = arith.addf %3, %5 : vector<64x512xf32>
    %7 = vector.shape_cast %6 : vector<64x512xf32> to vector<8x8x512xf32>
    %c0_6 = arith.constant 0 : index
    %c0_7 = arith.constant 0 : index
    %c0_8 = arith.constant 0 : index
    %8 = vector.load %arg16[%c0_6, %c0_7, %c0_8] : memref<8x8x512xf32, #tpu.memory_space<vmem>>, vector<8x8x512xf32>
    tpu.vector_store %arg16[%c0_6, %c0_7, %c0_8], %7 {strides = array<i32>} : memref<8x8x512xf32, #tpu.memory_space<vmem>>, vector<8x8x512xf32>,
    %c0_9 = arith.constant 0 : index
    %c0_10 = arith.constant 0 : index
    %9 = vector.load %arg7[%c0_9, %c0_10] : memref<128x512xf32, #tpu.memory_space<vmem>>, vector<128x512xf32>
    %cst_11 = arith.constant dense<0.000000e+00> : vector<64x512xf32>
    %10 = tpu.matmul %1, %9, %cst_11 {dimension_numbers = #tpu.dot_dimension_numbers<[1], [0], [0], [1], [0, 0, 1, 1], [], []>} : vector<64x128xf32>, vector<128x512xf32>, vector<64x512xf32> -> vector<64x512xf32>
    %c0_12 = arith.constant 0 : index
    %c0_13 = arith.constant 0 : index
    %11 = vector.load %arg8[%c0_12, %c0_13] : memref<1x512xf32, #tpu.memory_space<vmem>>, vector<1x512xf32>
    %12 = vector.broadcast %11 : vector<1x512xf32> to vector<64x512xf32>
    %13 = arith.addf %10, %12 : vector<64x512xf32>
    %14 = vector.shape_cast %13 : vector<64x512xf32> to vector<8x8x512xf32>
    %c0_14 = arith.constant 0 : index
    %c0_15 = arith.constant 0 : index
    %c0_16 = arith.constant 0 : index
    %15 = vector.load %arg17[%c0_14, %c0_15, %c0_16] : memref<8x8x512xf32, #tpu.memory_space<vmem>>, vector<8x8x512xf32>
    tpu.vector_store %arg17[%c0_14, %c0_15, %c0_16], %14 {strides = array<i32>} : memref<8x8x512xf32, #tpu.memory_space<vmem>>, vector<8x8x512xf32>,
    %c0_17 = arith.constant 0 : index
    %c0_18 = arith.constant 0 : index
    %16 = vector.load %arg9[%c0_17, %c0_18] : memref<128x512xf32, #tpu.memory_space<vmem>>, vector<128x512xf32>
    %c0_19 = arith.constant 0 : index
    %c0_20 = arith.constant 0 : index
    %17 = vector.load %arg10[%c0_19, %c0_20] : memref<128x512xf32, #tpu.memory_space<vmem>>, vector<128x512xf32>
    %c0_21 = arith.constant 0 : index
    %c0_22 = arith.constant 0 : index
    %18 = vector.load %arg2[%c0_21, %c0_22] : memref<8x1xi32, #tpu.memory_space<vmem>>, vector<8x1xi32>
    %cst_23 = arith.constant 0.000000e+00 : f32
    %19 = vector.broadcast %cst_23 : f32 to vector<8x128xf32>
    %c0_i32 = arith.constant 0 : i32
    %c7_i32 = arith.constant 7 : i32
    %20 = arith.subi %c7_i32, %c0_i32 : i32
    %21 = arith.index_cast %c0_i32 : i32 to index
    %c0_24 = arith.constant 0 : index
    %c0_25 = arith.constant 0 : index
    %22 = vector.load %arg16[%21, %c0_24, %c0_25] : memref<8x8x512xf32, #tpu.memory_space<vmem>>, vector<1x8x512xf32>
    %23 = vector.shape_cast %22 : vector<1x8x512xf32> to vector<8x512xf32>
    %cst_26 = arith.constant dense<0.000000e+00> : vector<8x512xf32>
    %24 = tpu.matmul %19, %16, %cst_26 {dimension_numbers = #tpu.dot_dimension_numbers<[1], [0], [0], [1], [0, 0, 1, 1], [], []>} : vector<8x128xf32>, vector<128x512xf32>, vector<8x512xf32> -> vector<8x512xf32>
    %25 = arith.addf %23, %24 : vector<8x512xf32>
    %26 = arith.index_cast %20 : i32 to index
    %c0_27 = arith.constant 0 : index
    %c0_28 = arith.constant 0 : index
    %27 = vector.load %arg17[%26, %c0_27, %c0_28] : memref<8x8x512xf32, #tpu.memory_space<vmem>>, vector<1x8x512xf32>
    %28 = vector.shape_cast %27 : vector<1x8x512xf32> to vector<8x512xf32>
    %cst_29 = arith.constant dense<0.000000e+00> : vector<8x512xf32>
    %29 = tpu.matmul %19, %17, %cst_29 {dimension_numbers = #tpu.dot_dimension_numbers<[1], [0], [0], [1], [0, 0, 1, 1], [], []>} : vector<8x128xf32>, vector<128x512xf32>, vector<8x512xf32> -> vector<8x512xf32>
    %30 = arith.addf %28, %29 : vector<8x512xf32>
    %31 = vector.extract_strided_slice %25 {offsets = [0, 0], sizes = [8, 128], strides = [1, 1]} : vector<8x512xf32> to vector<8x128xf32>
    %32 = arith.negf %31 : vector<8x128xf32>
    %33 = math.exp %32 : vector<8x128xf32>
    %cst_30 = arith.constant 1.000000e+00 : f32
    %34 = vector.broadcast %cst_30 : f32 to vector<8x128xf32>
    %35 = arith.addf %34, %33 : vector<8x128xf32>
    %36 = arith.divf %34, %35 : vector<8x128xf32>
    %37 = vector.extract_strided_slice %25 {offsets = [0, 128], sizes = [8, 128], strides = [1, 1]} : vector<8x512xf32> to vector<8x128xf32>
    %38 = arith.negf %37 : vector<8x128xf32>
    %39 = math.exp %38 : vector<8x128xf32>
    %cst_31 = arith.constant 1.000000e+00 : f32
    %40 = vector.broadcast %cst_31 : f32 to vector<8x128xf32>
    %41 = arith.addf %40, %39 : vector<8x128xf32>
    %42 = arith.divf %40, %41 : vector<8x128xf32>
    %43 = vector.extract_strided_slice %25 {offsets = [0, 256], sizes = [8, 128], strides = [1, 1]} : vector<8x512xf32> to vector<8x128xf32>
    %44 = math.tanh %43 : vector<8x128xf32>
    %45 = vector.extract_strided_slice %25 {offsets = [0, 384], sizes = [8, 128], strides = [1, 1]} : vector<8x512xf32> to vector<8x128xf32>
    %46 = arith.negf %45 : vector<8x128xf32>
    %47 = math.exp %46 : vector<8x128xf32>
    %cst_32 = arith.constant 1.000000e+00 : f32
    %48 = vector.broadcast %cst_32 : f32 to vector<8x128xf32>
    %49 = arith.addf %48, %47 : vector<8x128xf32>
    %50 = arith.divf %48, %49 : vector<8x128xf32>
    %51 = arith.mulf %42, %19 : vector<8x128xf32>
    %52 = arith.mulf %36, %44 : vector<8x128xf32>
    %53 = arith.addf %51, %52 : vector<8x128xf32>
    %54 = math.tanh %53 : vector<8x128xf32>
    %55 = arith.mulf %50, %54 : vector<8x128xf32>
    %56 = vector.extract_strided_slice %30 {offsets = [0, 0], sizes = [8, 128], strides = [1, 1]} : vector<8x512xf32> to vector<8x128xf32>
    %57 = arith.negf %56 : vector<8x128xf32>
    %58 = math.exp %57 : vector<8x128xf32>
    %cst_33 = arith.constant 1.000000e+00 : f32
    %59 = vector.broadcast %cst_33 : f32 to vector<8x128xf32>
    %60 = arith.addf %59, %58 : vector<8x128xf32>
    %61 = arith.divf %59, %60 : vector<8x128xf32>
    %62 = vector.extract_strided_slice %30 {offsets = [0, 128], sizes = [8, 128], strides = [1, 1]} : vector<8x512xf32> to vector<8x128xf32>
    %63 = arith.negf %62 : vector<8x128xf32>
    %64 = math.exp %63 : vector<8x128xf32>
    %cst_34 = arith.constant 1.000000e+00 : f32
    %65 = vector.broadcast %cst_34 : f32 to vector<8x128xf32>
    %66 = arith.addf %65, %64 : vector<8x128xf32>
    %67 = arith.divf %65, %66 : vector<8x128xf32>
    %68 = vector.extract_strided_slice %30 {offsets = [0, 256], sizes = [8, 128], strides = [1, 1]} : vector<8x512xf32> to vector<8x128xf32>
    %69 = math.tanh %68 : vector<8x128xf32>
    %70 = vector.extract_strided_slice %30 {offsets = [0, 384], sizes = [8, 128], strides = [1, 1]} : vector<8x512xf32> to vector<8x128xf32>
    %71 = arith.negf %70 : vector<8x128xf32>
    %72 = math.exp %71 : vector<8x128xf32>
    %cst_35 = arith.constant 1.000000e+00 : f32
    %73 = vector.broadcast %cst_35 : f32 to vector<8x128xf32>
    %74 = arith.addf %73, %72 : vector<8x128xf32>
    %75 = arith.divf %73, %74 : vector<8x128xf32>
    %76 = arith.mulf %67, %19 : vector<8x128xf32>
    %77 = arith.mulf %61, %69 : vector<8x128xf32>
    %78 = arith.addf %76, %77 : vector<8x128xf32>
    %79 = math.tanh %78 : vector<8x128xf32>
    %80 = arith.mulf %75, %79 : vector<8x128xf32>
    %81 = vector.broadcast %c0_i32 : i32 to vector<8x1xi32>
    %82 = arith.cmpi slt, %81, %18 : vector<8x1xi32>
    %83 = vector.broadcast %20 : i32 to vector<8x1xi32>
    %84 = arith.cmpi slt, %83, %18 : vector<8x1xi32>
    %85 = vector.shape_cast %82 : vector<8x1xi1> to vector<8x1xi1>
    %86 = vector.broadcast %85 : vector<8x1xi1> to vector<8x128xi1>
    %87 = arith.select %86, %55, %19 : vector<8x128xi1>, vector<8x128xf32>
    %88 = vector.shape_cast %82 : vector<8x1xi1> to vector<8x1xi1>
    %89 = vector.broadcast %88 : vector<8x1xi1> to vector<8x128xi1>
    %90 = arith.select %89, %53, %19 : vector<8x128xi1>, vector<8x128xf32>
    %91 = vector.shape_cast %84 : vector<8x1xi1> to vector<8x1xi1>
    %92 = vector.broadcast %91 : vector<8x1xi1> to vector<8x128xi1>
    %93 = arith.select %92, %80, %19 : vector<8x128xi1>, vector<8x128xf32>
    %94 = vector.shape_cast %84 : vector<8x1xi1> to vector<8x1xi1>
    %95 = vector.broadcast %94 : vector<8x1xi1> to vector<8x128xi1>
    %96 = arith.select %95, %78, %19 : vector<8x128xi1>, vector<8x128xf32>
    %97 = arith.extui %82 : vector<8x1xi1> to vector<8x1xi32>
    %98 = arith.sitofp %97 : vector<8x1xi32> to vector<8x1xf32>
    %99 = vector.broadcast %98 : vector<8x1xf32> to vector<8x128xf32>
    %100 = arith.mulf %87, %99 : vector<8x128xf32>
    %101 = arith.index_cast %c0_i32 : i32 to index
    %c0_36 = arith.constant 0 : index
    %c0_37 = arith.constant 0 : index
    %102 = vector.load %arg18[%101, %c0_36, %c0_37] : memref<8x8x128xf32, #tpu.memory_space<vmem>>, vector<1x8x128xf32>
    %103 = vector.shape_cast %102 : vector<1x8x128xf32> to vector<8x128xf32>
    %104 = vector.shape_cast %100 : vector<8x128xf32> to vector<1x8x128xf32>
    tpu.vector_store %arg18[%101, %c0_36, %c0_37], %104 {strides = array<i32>} : memref<8x8x128xf32, #tpu.memory_space<vmem>>, vector<1x8x128xf32>,
    %105 = arith.extui %84 : vector<8x1xi1> to vector<8x1xi32>
    %106 = arith.sitofp %105 : vector<8x1xi32> to vector<8x1xf32>
    %107 = vector.broadcast %106 : vector<8x1xf32> to vector<8x128xf32>
    %108 = arith.mulf %93, %107 : vector<8x128xf32>
    %109 = arith.index_cast %20 : i32 to index
    %c0_38 = arith.constant 0 : index
    %c0_39 = arith.constant 0 : index
    %110 = vector.load %arg19[%109, %c0_38, %c0_39] : memref<8x8x128xf32, #tpu.memory_space<vmem>>, vector<1x8x128xf32>
    %111 = vector.shape_cast %110 : vector<1x8x128xf32> to vector<8x128xf32>
    %112 = vector.shape_cast %108 : vector<8x128xf32> to vector<1x8x128xf32>
    tpu.vector_store %arg19[%109, %c0_38, %c0_39], %112 {strides = array<i32>} : memref<8x8x128xf32, #tpu.memory_space<vmem>>, vector<1x8x128xf32>,
    %c1_i32 = arith.constant 1 : i32
    %c7_i32_40 = arith.constant 7 : i32
    %113 = arith.subi %c7_i32_40, %c1_i32 : i32
    %114 = arith.index_cast %c1_i32 : i32 to index
    %c0_41 = arith.constant 0 : index
    %c0_42 = arith.constant 0 : index
    %115 = vector.load %arg16[%114, %c0_41, %c0_42] : memref<8x8x512xf32, #tpu.memory_space<vmem>>, vector<1x8x512xf32>
    %116 = vector.shape_cast %115 : vector<1x8x512xf32> to vector<8x512xf32>
    %cst_43 = arith.constant dense<0.000000e+00> : vector<8x512xf32>
    %117 = tpu.matmul %87, %16, %cst_43 {dimension_numbers = #tpu.dot_dimension_numbers<[1], [0], [0], [1], [0, 0, 1, 1], [], []>} : vector<8x128xf32>, vector<128x512xf32>, vector<8x512xf32> -> vector<8x512xf32>
    %118 = arith.addf %116, %117 : vector<8x512xf32>
    %119 = arith.index_cast %113 : i32 to index
    %c0_44 = arith.constant 0 : index
    %c0_45 = arith.constant 0 : index
    %120 = vector.load %arg17[%119, %c0_44, %c0_45] : memref<8x8x512xf32, #tpu.memory_space<vmem>>, vector<1x8x512xf32>
    %121 = vector.shape_cast %120 : vector<1x8x512xf32> to vector<8x512xf32>
    %cst_46 = arith.constant dense<0.000000e+00> : vector<8x512xf32>
    %122 = tpu.matmul %93, %17, %cst_46 {dimension_numbers = #tpu.dot_dimension_numbers<[1], [0], [0], [1], [0, 0, 1, 1], [], []>} : vector<8x128xf32>, vector<128x512xf32>, vector<8x512xf32> -> vector<8x512xf32>
    %123 = arith.addf %121, %122 : vector<8x512xf32>
    %124 = vector.extract_strided_slice %118 {offsets = [0, 0], sizes = [8, 128], strides = [1, 1]} : vector<8x512xf32> to vector<8x128xf32>
    %125 = arith.negf %124 : vector<8x128xf32>
    %126 = math.exp %125 : vector<8x128xf32>
    %cst_47 = arith.constant 1.000000e+00 : f32
    %127 = vector.broadcast %cst_47 : f32 to vector<8x128xf32>
    %128 = arith.addf %127, %126 : vector<8x128xf32>
    %129 = arith.divf %127, %128 : vector<8x128xf32>
    %130 = vector.extract_strided_slice %118 {offsets = [0, 128], sizes = [8, 128], strides = [1, 1]} : vector<8x512xf32> to vector<8x128xf32>
    %131 = arith.negf %130 : vector<8x128xf32>
    %132 = math.exp %131 : vector<8x128xf32>
    %cst_48 = arith.constant 1.000000e+00 : f32
    %133 = vector.broadcast %cst_48 : f32 to vector<8x128xf32>
    %134 = arith.addf %133, %132 : vector<8x128xf32>
    %135 = arith.divf %133, %134 : vector<8x128xf32>
    %136 = vector.extract_strided_slice %118 {offsets = [0, 256], sizes = [8, 128], strides = [1, 1]} : vector<8x512xf32> to vector<8x128xf32>
    %137 = math.tanh %136 : vector<8x128xf32>
    %138 = vector.extract_strided_slice %118 {offsets = [0, 384], sizes = [8, 128], strides = [1, 1]} : vector<8x512xf32> to vector<8x128xf32>
    %139 = arith.negf %138 : vector<8x128xf32>
    %140 = math.exp %139 : vector<8x128xf32>
    %cst_49 = arith.constant 1.000000e+00 : f32
    %141 = vector.broadcast %cst_49 : f32 to vector<8x128xf32>
    %142 = arith.addf %141, %140 : vector<8x128xf32>
    %143 = arith.divf %141, %142 : vector<8x128xf32>
    %144 = arith.mulf %135, %90 : vector<8x128xf32>
    %145 = arith.mulf %129, %137 : vector<8x128xf32>
    %146 = arith.addf %144, %145 : vector<8x128xf32>
    %147 = math.tanh %146 : vector<8x128xf32>
    %148 = arith.mulf %143, %147 : vector<8x128xf32>
    %149 = vector.extract_strided_slice %123 {offsets = [0, 0], sizes = [8, 128], strides = [1, 1]} : vector<8x512xf32> to vector<8x128xf32>
    %150 = arith.negf %149 : vector<8x128xf32>
    %151 = math.exp %150 : vector<8x128xf32>
    %cst_50 = arith.constant 1.000000e+00 : f32
    %152 = vector.broadcast %cst_50 : f32 to vector<8x128xf32>
    %153 = arith.addf %152, %151 : vector<8x128xf32>
    %154 = arith.divf %152, %153 : vector<8x128xf32>
    %155 = vector.extract_strided_slice %123 {offsets = [0, 128], sizes = [8, 128], strides = [1, 1]} : vector<8x512xf32> to vector<8x128xf32>
    %156 = arith.negf %155 : vector<8x128xf32>
    %157 = math.exp %156 : vector<8x128xf32>
    %cst_51 = arith.constant 1.000000e+00 : f32
    %158 = vector.broadcast %cst_51 : f32 to vector<8x128xf32>
    %159 = arith.addf %158, %157 : vector<8x128xf32>
    %160 = arith.divf %158, %159 : vector<8x128xf32>
    %161 = vector.extract_strided_slice %123 {offsets = [0, 256], sizes = [8, 128], strides = [1, 1]} : vector<8x512xf32> to vector<8x128xf32>
    %162 = math.tanh %161 : vector<8x128xf32>
    %163 = vector.extract_strided_slice %123 {offsets = [0, 384], sizes = [8, 128], strides = [1, 1]} : vector<8x512xf32> to vector<8x128xf32>
    %164 = arith.negf %163 : vector<8x128xf32>
    %165 = math.exp %164 : vector<8x128xf32>
    %cst_52 = arith.constant 1.000000e+00 : f32
    %166 = vector.broadcast %cst_52 : f32 to vector<8x128xf32>
    %167 = arith.addf %166, %165 : vector<8x128xf32>
    %168 = arith.divf %166, %167 : vector<8x128xf32>
    %169 = arith.mulf %160, %96 : vector<8x128xf32>
    %170 = arith.mulf %154, %162 : vector<8x128xf32>
    %171 = arith.addf %169, %170 : vector<8x128xf32>
    %172 = math.tanh %171 : vector<8x128xf32>
    %173 = arith.mulf %168, %172 : vector<8x128xf32>
    %174 = vector.broadcast %c1_i32 : i32 to vector<8x1xi32>
    %175 = arith.cmpi slt, %174, %18 : vector<8x1xi32>
    %176 = vector.broadcast %113 : i32 to vector<8x1xi32>
    %177 = arith.cmpi slt, %176, %18 : vector<8x1xi32>
    %178 = vector.shape_cast %175 : vector<8x1xi1> to vector<8x1xi1>
    %179 = vector.broadcast %178 : vector<8x1xi1> to vector<8x128xi1>
    %180 = arith.select %179, %148, %87 : vector<8x128xi1>, vector<8x128xf32>
    %181 = vector.shape_cast %175 : vector<8x1xi1> to vector<8x1xi1>
    %182 = vector.broadcast %181 : vector<8x1xi1> to vector<8x128xi1>
    %183 = arith.select %182, %146, %90 : vector<8x128xi1>, vector<8x128xf32>
    %184 = vector.shape_cast %177 : vector<8x1xi1> to vector<8x1xi1>
    %185 = vector.broadcast %184 : vector<8x1xi1> to vector<8x128xi1>
    %186 = arith.select %185, %173, %93 : vector<8x128xi1>, vector<8x128xf32>
    %187 = vector.shape_cast %177 : vector<8x1xi1> to vector<8x1xi1>
    %188 = vector.broadcast %187 : vector<8x1xi1> to vector<8x128xi1>
    %189 = arith.select %188, %171, %96 : vector<8x128xi1>, vector<8x128xf32>
    %190 = arith.extui %175 : vector<8x1xi1> to vector<8x1xi32>
    %191 = arith.sitofp %190 : vector<8x1xi32> to vector<8x1xf32>
    %192 = vector.broadcast %191 : vector<8x1xf32> to vector<8x128xf32>
    %193 = arith.mulf %180, %192 : vector<8x128xf32>
    %194 = arith.index_cast %c1_i32 : i32 to index
    %c0_53 = arith.constant 0 : index
    %c0_54 = arith.constant 0 : index
    %195 = vector.load %arg18[%194, %c0_53, %c0_54] : memref<8x8x128xf32, #tpu.memory_space<vmem>>, vector<1x8x128xf32>
    %196 = vector.shape_cast %195 : vector<1x8x128xf32> to vector<8x128xf32>
    %197 = vector.shape_cast %193 : vector<8x128xf32> to vector<1x8x128xf32>
    tpu.vector_store %arg18[%194, %c0_53, %c0_54], %197 {strides = array<i32>} : memref<8x8x128xf32, #tpu.memory_space<vmem>>, vector<1x8x128xf32>,
    %198 = arith.extui %177 : vector<8x1xi1> to vector<8x1xi32>
    %199 = arith.sitofp %198 : vector<8x1xi32> to vector<8x1xf32>
    %200 = vector.broadcast %199 : vector<8x1xf32> to vector<8x128xf32>
    %201 = arith.mulf %186, %200 : vector<8x128xf32>
    %202 = arith.index_cast %113 : i32 to index
    %c0_55 = arith.constant 0 : index
    %c0_56 = arith.constant 0 : index
    %203 = vector.load %arg19[%202, %c0_55, %c0_56] : memref<8x8x128xf32, #tpu.memory_space<vmem>>, vector<1x8x128xf32>
    %204 = vector.shape_cast %203 : vector<1x8x128xf32> to vector<8x128xf32>
    %205 = vector.shape_cast %201 : vector<8x128xf32> to vector<1x8x128xf32>
    tpu.vector_store %arg19[%202, %c0_55, %c0_56], %205 {strides = array<i32>} : memref<8x8x128xf32, #tpu.memory_space<vmem>>, vector<1x8x128xf32>,
    %c2_i32 = arith.constant 2 : i32
    %c7_i32_57 = arith.constant 7 : i32
    %206 = arith.subi %c7_i32_57, %c2_i32 : i32
    %207 = arith.index_cast %c2_i32 : i32 to index
    %c0_58 = arith.constant 0 : index
    %c0_59 = arith.constant 0 : index
    %208 = vector.load %arg16[%207, %c0_58, %c0_59] : memref<8x8x512xf32, #tpu.memory_space<vmem>>, vector<1x8x512xf32>
    %209 = vector.shape_cast %208 : vector<1x8x512xf32> to vector<8x512xf32>
    %cst_60 = arith.constant dense<0.000000e+00> : vector<8x512xf32>
    %210 = tpu.matmul %180, %16, %cst_60 {dimension_numbers = #tpu.dot_dimension_numbers<[1], [0], [0], [1], [0, 0, 1, 1], [], []>} : vector<8x128xf32>, vector<128x512xf32>, vector<8x512xf32> -> vector<8x512xf32>
    %211 = arith.addf %209, %210 : vector<8x512xf32>
    %212 = arith.index_cast %206 : i32 to index
    %c0_61 = arith.constant 0 : index
    %c0_62 = arith.constant 0 : index
    %213 = vector.load %arg17[%212, %c0_61, %c0_62] : memref<8x8x512xf32, #tpu.memory_space<vmem>>, vector<1x8x512xf32>
    %214 = vector.shape_cast %213 : vector<1x8x512xf32> to vector<8x512xf32>
    %cst_63 = arith.constant dense<0.000000e+00> : vector<8x512xf32>
    %215 = tpu.matmul %186, %17, %cst_63 {dimension_numbers = #tpu.dot_dimension_numbers<[1], [0], [0], [1], [0, 0, 1, 1], [], []>} : vector<8x128xf32>, vector<128x512xf32>, vector<8x512xf32> -> vector<8x512xf32>
    %216 = arith.addf %214, %215 : vector<8x512xf32>
    %217 = vector.extract_strided_slice %211 {offsets = [0, 0], sizes = [8, 128], strides = [1, 1]} : vector<8x512xf32> to vector<8x128xf32>
    %218 = arith.negf %217 : vector<8x128xf32>
    %219 = math.exp %218 : vector<8x128xf32>
    %cst_64 = arith.constant 1.000000e+00 : f32
    %220 = vector.broadcast %cst_64 : f32 to vector<8x128xf32>
    %221 = arith.addf %220, %219 : vector<8x128xf32>
    %222 = arith.divf %220, %221 : vector<8x128xf32>
    %223 = vector.extract_strided_slice %211 {offsets = [0, 128], sizes = [8, 128], strides = [1, 1]} : vector<8x512xf32> to vector<8x128xf32>
    %224 = arith.negf %223 : vector<8x128xf32>
    %225 = math.exp %224 : vector<8x128xf32>
    %cst_65 = arith.constant 1.000000e+00 : f32
    %226 = vector.broadcast %cst_65 : f32 to vector<8x128xf32>
    %227 = arith.addf %226, %225 : vector<8x128xf32>
    %228 = arith.divf %226, %227 : vector<8x128xf32>
    %229 = vector.extract_strided_slice %211 {offsets = [0, 256], sizes = [8, 128], strides = [1, 1]} : vector<8x512xf32> to vector<8x128xf32>
    %230 = math.tanh %229 : vector<8x128xf32>
    %231 = vector.extract_strided_slice %211 {offsets = [0, 384], sizes = [8, 128], strides = [1, 1]} : vector<8x512xf32> to vector<8x128xf32>
    %232 = arith.negf %231 : vector<8x128xf32>
    %233 = math.exp %232 : vector<8x128xf32>
    %cst_66 = arith.constant 1.000000e+00 : f32
    %234 = vector.broadcast %cst_66 : f32 to vector<8x128xf32>
    %235 = arith.addf %234, %233 : vector<8x128xf32>
    %236 = arith.divf %234, %235 : vector<8x128xf32>
    %237 = arith.mulf %228, %183 : vector<8x128xf32>
    %238 = arith.mulf %222, %230 : vector<8x128xf32>
    %239 = arith.addf %237, %238 : vector<8x128xf32>
    %240 = math.tanh %239 : vector<8x128xf32>
    %241 = arith.mulf %236, %240 : vector<8x128xf32>
    %242 = vector.extract_strided_slice %216 {offsets = [0, 0], sizes = [8, 128], strides = [1, 1]} : vector<8x512xf32> to vector<8x128xf32>
    %243 = arith.negf %242 : vector<8x128xf32>
    %244 = math.exp %243 : vector<8x128xf32>
    %cst_67 = arith.constant 1.000000e+00 : f32
    %245 = vector.broadcast %cst_67 : f32 to vector<8x128xf32>
    %246 = arith.addf %245, %244 : vector<8x128xf32>
    %247 = arith.divf %245, %246 : vector<8x128xf32>
    %248 = vector.extract_strided_slice %216 {offsets = [0, 128], sizes = [8, 128], strides = [1, 1]} : vector<8x512xf32> to vector<8x128xf32>
    %249 = arith.negf %248 : vector<8x128xf32>
    %250 = math.exp %249 : vector<8x128xf32>
    %cst_68 = arith.constant 1.000000e+00 : f32
    %251 = vector.broadcast %cst_68 : f32 to vector<8x128xf32>
    %252 = arith.addf %251, %250 : vector<8x128xf32>
    %253 = arith.divf %251, %252 : vector<8x128xf32>
    %254 = vector.extract_strided_slice %216 {offsets = [0, 256], sizes = [8, 128], strides = [1, 1]} : vector<8x512xf32> to vector<8x128xf32>
    %255 = math.tanh %254 : vector<8x128xf32>
    %256 = vector.extract_strided_slice %216 {offsets = [0, 384], sizes = [8, 128], strides = [1, 1]} : vector<8x512xf32> to vector<8x128xf32>
    %257 = arith.negf %256 : vector<8x128xf32>
    %258 = math.exp %257 : vector<8x128xf32>
    %cst_69 = arith.constant 1.000000e+00 : f32
    %259 = vector.broadcast %cst_69 : f32 to vector<8x128xf32>
    %260 = arith.addf %259, %258 : vector<8x128xf32>
    %261 = arith.divf %259, %260 : vector<8x128xf32>
    %262 = arith.mulf %253, %189 : vector<8x128xf32>
    %263 = arith.mulf %247, %255 : vector<8x128xf32>
    %264 = arith.addf %262, %263 : vector<8x128xf32>
    %265 = math.tanh %264 : vector<8x128xf32>
    %266 = arith.mulf %261, %265 : vector<8x128xf32>
    %267 = vector.broadcast %c2_i32 : i32 to vector<8x1xi32>
    %268 = arith.cmpi slt, %267, %18 : vector<8x1xi32>
    %269 = vector.broadcast %206 : i32 to vector<8x1xi32>
    %270 = arith.cmpi slt, %269, %18 : vector<8x1xi32>
    %271 = vector.shape_cast %268 : vector<8x1xi1> to vector<8x1xi1>
    %272 = vector.broadcast %271 : vector<8x1xi1> to vector<8x128xi1>
    %273 = arith.select %272, %241, %180 : vector<8x128xi1>, vector<8x128xf32>
    %274 = vector.shape_cast %268 : vector<8x1xi1> to vector<8x1xi1>
    %275 = vector.broadcast %274 : vector<8x1xi1> to vector<8x128xi1>
    %276 = arith.select %275, %239, %183 : vector<8x128xi1>, vector<8x128xf32>
    %277 = vector.shape_cast %270 : vector<8x1xi1> to vector<8x1xi1>
    %278 = vector.broadcast %277 : vector<8x1xi1> to vector<8x128xi1>
    %279 = arith.select %278, %266, %186 : vector<8x128xi1>, vector<8x128xf32>
    %280 = vector.shape_cast %270 : vector<8x1xi1> to vector<8x1xi1>
    %281 = vector.broadcast %280 : vector<8x1xi1> to vector<8x128xi1>
    %282 = arith.select %281, %264, %189 : vector<8x128xi1>, vector<8x128xf32>
    %283 = arith.extui %268 : vector<8x1xi1> to vector<8x1xi32>
    %284 = arith.sitofp %283 : vector<8x1xi32> to vector<8x1xf32>
    %285 = vector.broadcast %284 : vector<8x1xf32> to vector<8x128xf32>
    %286 = arith.mulf %273, %285 : vector<8x128xf32>
    %287 = arith.index_cast %c2_i32 : i32 to index
    %c0_70 = arith.constant 0 : index
    %c0_71 = arith.constant 0 : index
    %288 = vector.load %arg18[%287, %c0_70, %c0_71] : memref<8x8x128xf32, #tpu.memory_space<vmem>>, vector<1x8x128xf32>
    %289 = vector.shape_cast %288 : vector<1x8x128xf32> to vector<8x128xf32>
    %290 = vector.shape_cast %286 : vector<8x128xf32> to vector<1x8x128xf32>
    tpu.vector_store %arg18[%287, %c0_70, %c0_71], %290 {strides = array<i32>} : memref<8x8x128xf32, #tpu.memory_space<vmem>>, vector<1x8x128xf32>,
    %291 = arith.extui %270 : vector<8x1xi1> to vector<8x1xi32>
    %292 = arith.sitofp %291 : vector<8x1xi32> to vector<8x1xf32>
    %293 = vector.broadcast %292 : vector<8x1xf32> to vector<8x128xf32>
    %294 = arith.mulf %279, %293 : vector<8x128xf32>
    %295 = arith.index_cast %206 : i32 to index
    %c0_72 = arith.constant 0 : index
    %c0_73 = arith.constant 0 : index
    %296 = vector.load %arg19[%295, %c0_72, %c0_73] : memref<8x8x128xf32, #tpu.memory_space<vmem>>, vector<1x8x128xf32>
    %297 = vector.shape_cast %296 : vector<1x8x128xf32> to vector<8x128xf32>
    %298 = vector.shape_cast %294 : vector<8x128xf32> to vector<1x8x128xf32>
    tpu.vector_store %arg19[%295, %c0_72, %c0_73], %298 {strides = array<i32>} : memref<8x8x128xf32, #tpu.memory_space<vmem>>, vector<1x8x128xf32>,
    %c3_i32 = arith.constant 3 : i32
    %c7_i32_74 = arith.constant 7 : i32
    %299 = arith.subi %c7_i32_74, %c3_i32 : i32
    %300 = arith.index_cast %c3_i32 : i32 to index
    %c0_75 = arith.constant 0 : index
    %c0_76 = arith.constant 0 : index
    %301 = vector.load %arg16[%300, %c0_75, %c0_76] : memref<8x8x512xf32, #tpu.memory_space<vmem>>, vector<1x8x512xf32>
    %302 = vector.shape_cast %301 : vector<1x8x512xf32> to vector<8x512xf32>
    %cst_77 = arith.constant dense<0.000000e+00> : vector<8x512xf32>
    %303 = tpu.matmul %273, %16, %cst_77 {dimension_numbers = #tpu.dot_dimension_numbers<[1], [0], [0], [1], [0, 0, 1, 1], [], []>} : vector<8x128xf32>, vector<128x512xf32>, vector<8x512xf32> -> vector<8x512xf32>
    %304 = arith.addf %302, %303 : vector<8x512xf32>
    %305 = arith.index_cast %299 : i32 to index
    %c0_78 = arith.constant 0 : index
    %c0_79 = arith.constant 0 : index
    %306 = vector.load %arg17[%305, %c0_78, %c0_79] : memref<8x8x512xf32, #tpu.memory_space<vmem>>, vector<1x8x512xf32>
    %307 = vector.shape_cast %306 : vector<1x8x512xf32> to vector<8x512xf32>
    %cst_80 = arith.constant dense<0.000000e+00> : vector<8x512xf32>
    %308 = tpu.matmul %279, %17, %cst_80 {dimension_numbers = #tpu.dot_dimension_numbers<[1], [0], [0], [1], [0, 0, 1, 1], [], []>} : vector<8x128xf32>, vector<128x512xf32>, vector<8x512xf32> -> vector<8x512xf32>
    %309 = arith.addf %307, %308 : vector<8x512xf32>
    %310 = vector.extract_strided_slice %304 {offsets = [0, 0], sizes = [8, 128], strides = [1, 1]} : vector<8x512xf32> to vector<8x128xf32>
    %311 = arith.negf %310 : vector<8x128xf32>
    %312 = math.exp %311 : vector<8x128xf32>
    %cst_81 = arith.constant 1.000000e+00 : f32
    %313 = vector.broadcast %cst_81 : f32 to vector<8x128xf32>
    %314 = arith.addf %313, %312 : vector<8x128xf32>
    %315 = arith.divf %313, %314 : vector<8x128xf32>
    %316 = vector.extract_strided_slice %304 {offsets = [0, 128], sizes = [8, 128], strides = [1, 1]} : vector<8x512xf32> to vector<8x128xf32>
    %317 = arith.negf %316 : vector<8x128xf32>
    %318 = math.exp %317 : vector<8x128xf32>
    %cst_82 = arith.constant 1.000000e+00 : f32
    %319 = vector.broadcast %cst_82 : f32 to vector<8x128xf32>
    %320 = arith.addf %319, %318 : vector<8x128xf32>
    %321 = arith.divf %319, %320 : vector<8x128xf32>
    %322 = vector.extract_strided_slice %304 {offsets = [0, 256], sizes = [8, 128], strides = [1, 1]} : vector<8x512xf32> to vector<8x128xf32>
    %323 = math.tanh %322 : vector<8x128xf32>
    %324 = vector.extract_strided_slice %304 {offsets = [0, 384], sizes = [8, 128], strides = [1, 1]} : vector<8x512xf32> to vector<8x128xf32>
    %325 = arith.negf %324 : vector<8x128xf32>
    %326 = math.exp %325 : vector<8x128xf32>
    %cst_83 = arith.constant 1.000000e+00 : f32
    %327 = vector.broadcast %cst_83 : f32 to vector<8x128xf32>
    %328 = arith.addf %327, %326 : vector<8x128xf32>
    %329 = arith.divf %327, %328 : vector<8x128xf32>
    %330 = arith.mulf %321, %276 : vector<8x128xf32>
    %331 = arith.mulf %315, %323 : vector<8x128xf32>
    %332 = arith.addf %330, %331 : vector<8x128xf32>
    %333 = math.tanh %332 : vector<8x128xf32>
    %334 = arith.mulf %329, %333 : vector<8x128xf32>
    %335 = vector.extract_strided_slice %309 {offsets = [0, 0], sizes = [8, 128], strides = [1, 1]} : vector<8x512xf32> to vector<8x128xf32>
    %336 = arith.negf %335 : vector<8x128xf32>
    %337 = math.exp %336 : vector<8x128xf32>
    %cst_84 = arith.constant 1.000000e+00 : f32
    %338 = vector.broadcast %cst_84 : f32 to vector<8x128xf32>
    %339 = arith.addf %338, %337 : vector<8x128xf32>
    %340 = arith.divf %338, %339 : vector<8x128xf32>
    %341 = vector.extract_strided_slice %309 {offsets = [0, 128], sizes = [8, 128], strides = [1, 1]} : vector<8x512xf32> to vector<8x128xf32>
    %342 = arith.negf %341 : vector<8x128xf32>
    %343 = math.exp %342 : vector<8x128xf32>
    %cst_85 = arith.constant 1.000000e+00 : f32
    %344 = vector.broadcast %cst_85 : f32 to vector<8x128xf32>
    %345 = arith.addf %344, %343 : vector<8x128xf32>
    %346 = arith.divf %344, %345 : vector<8x128xf32>
    %347 = vector.extract_strided_slice %309 {offsets = [0, 256], sizes = [8, 128], strides = [1, 1]} : vector<8x512xf32> to vector<8x128xf32>
    %348 = math.tanh %347 : vector<8x128xf32>
    %349 = vector.extract_strided_slice %309 {offsets = [0, 384], sizes = [8, 128], strides = [1, 1]} : vector<8x512xf32> to vector<8x128xf32>
    %350 = arith.negf %349 : vector<8x128xf32>
    %351 = math.exp %350 : vector<8x128xf32>
    %cst_86 = arith.constant 1.000000e+00 : f32
    %352 = vector.broadcast %cst_86 : f32 to vector<8x128xf32>
    %353 = arith.addf %352, %351 : vector<8x128xf32>
    %354 = arith.divf %352, %353 : vector<8x128xf32>
    %355 = arith.mulf %346, %282 : vector<8x128xf32>
    %356 = arith.mulf %340, %348 : vector<8x128xf32>
    %357 = arith.addf %355, %356 : vector<8x128xf32>
    %358 = math.tanh %357 : vector<8x128xf32>
    %359 = arith.mulf %354, %358 : vector<8x128xf32>
    %360 = vector.broadcast %c3_i32 : i32 to vector<8x1xi32>
    %361 = arith.cmpi slt, %360, %18 : vector<8x1xi32>
    %362 = vector.broadcast %299 : i32 to vector<8x1xi32>
    %363 = arith.cmpi slt, %362, %18 : vector<8x1xi32>
    %364 = vector.shape_cast %361 : vector<8x1xi1> to vector<8x1xi1>
    %365 = vector.broadcast %364 : vector<8x1xi1> to vector<8x128xi1>
    %366 = arith.select %365, %334, %273 : vector<8x128xi1>, vector<8x128xf32>
    %367 = vector.shape_cast %361 : vector<8x1xi1> to vector<8x1xi1>
    %368 = vector.broadcast %367 : vector<8x1xi1> to vector<8x128xi1>
    %369 = arith.select %368, %332, %276 : vector<8x128xi1>, vector<8x128xf32>
    %370 = vector.shape_cast %363 : vector<8x1xi1> to vector<8x1xi1>
    %371 = vector.broadcast %370 : vector<8x1xi1> to vector<8x128xi1>
    %372 = arith.select %371, %359, %279 : vector<8x128xi1>, vector<8x128xf32>
    %373 = vector.shape_cast %363 : vector<8x1xi1> to vector<8x1xi1>
    %374 = vector.broadcast %373 : vector<8x1xi1> to vector<8x128xi1>
    %375 = arith.select %374, %357, %282 : vector<8x128xi1>, vector<8x128xf32>
    %376 = arith.extui %361 : vector<8x1xi1> to vector<8x1xi32>
    %377 = arith.sitofp %376 : vector<8x1xi32> to vector<8x1xf32>
    %378 = vector.broadcast %377 : vector<8x1xf32> to vector<8x128xf32>
    %379 = arith.mulf %366, %378 : vector<8x128xf32>
    %380 = arith.index_cast %c3_i32 : i32 to index
    %c0_87 = arith.constant 0 : index
    %c0_88 = arith.constant 0 : index
    %381 = vector.load %arg18[%380, %c0_87, %c0_88] : memref<8x8x128xf32, #tpu.memory_space<vmem>>, vector<1x8x128xf32>
    %382 = vector.shape_cast %381 : vector<1x8x128xf32> to vector<8x128xf32>
    %383 = vector.shape_cast %379 : vector<8x128xf32> to vector<1x8x128xf32>
    tpu.vector_store %arg18[%380, %c0_87, %c0_88], %383 {strides = array<i32>} : memref<8x8x128xf32, #tpu.memory_space<vmem>>, vector<1x8x128xf32>,
    %384 = arith.extui %363 : vector<8x1xi1> to vector<8x1xi32>
    %385 = arith.sitofp %384 : vector<8x1xi32> to vector<8x1xf32>
    %386 = vector.broadcast %385 : vector<8x1xf32> to vector<8x128xf32>
    %387 = arith.mulf %372, %386 : vector<8x128xf32>
    %388 = arith.index_cast %299 : i32 to index
    %c0_89 = arith.constant 0 : index
    %c0_90 = arith.constant 0 : index
    %389 = vector.load %arg19[%388, %c0_89, %c0_90] : memref<8x8x128xf32, #tpu.memory_space<vmem>>, vector<1x8x128xf32>
    %390 = vector.shape_cast %389 : vector<1x8x128xf32> to vector<8x128xf32>
    %391 = vector.shape_cast %387 : vector<8x128xf32> to vector<1x8x128xf32>
    tpu.vector_store %arg19[%388, %c0_89, %c0_90], %391 {strides = array<i32>} : memref<8x8x128xf32, #tpu.memory_space<vmem>>, vector<1x8x128xf32>,
    %c4_i32 = arith.constant 4 : i32
    %c7_i32_91 = arith.constant 7 : i32
    %392 = arith.subi %c7_i32_91, %c4_i32 : i32
    %393 = arith.index_cast %c4_i32 : i32 to index
    %c0_92 = arith.constant 0 : index
    %c0_93 = arith.constant 0 : index
    %394 = vector.load %arg16[%393, %c0_92, %c0_93] : memref<8x8x512xf32, #tpu.memory_space<vmem>>, vector<1x8x512xf32>
    %395 = vector.shape_cast %394 : vector<1x8x512xf32> to vector<8x512xf32>
    %cst_94 = arith.constant dense<0.000000e+00> : vector<8x512xf32>
    %396 = tpu.matmul %366, %16, %cst_94 {dimension_numbers = #tpu.dot_dimension_numbers<[1], [0], [0], [1], [0, 0, 1, 1], [], []>} : vector<8x128xf32>, vector<128x512xf32>, vector<8x512xf32> -> vector<8x512xf32>
    %397 = arith.addf %395, %396 : vector<8x512xf32>
    %398 = arith.index_cast %392 : i32 to index
    %c0_95 = arith.constant 0 : index
    %c0_96 = arith.constant 0 : index
    %399 = vector.load %arg17[%398, %c0_95, %c0_96] : memref<8x8x512xf32, #tpu.memory_space<vmem>>, vector<1x8x512xf32>
    %400 = vector.shape_cast %399 : vector<1x8x512xf32> to vector<8x512xf32>
    %cst_97 = arith.constant dense<0.000000e+00> : vector<8x512xf32>
    %401 = tpu.matmul %372, %17, %cst_97 {dimension_numbers = #tpu.dot_dimension_numbers<[1], [0], [0], [1], [0, 0, 1, 1], [], []>} : vector<8x128xf32>, vector<128x512xf32>, vector<8x512xf32> -> vector<8x512xf32>
    %402 = arith.addf %400, %401 : vector<8x512xf32>
    %403 = vector.extract_strided_slice %397 {offsets = [0, 0], sizes = [8, 128], strides = [1, 1]} : vector<8x512xf32> to vector<8x128xf32>
    %404 = arith.negf %403 : vector<8x128xf32>
    %405 = math.exp %404 : vector<8x128xf32>
    %cst_98 = arith.constant 1.000000e+00 : f32
    %406 = vector.broadcast %cst_98 : f32 to vector<8x128xf32>
    %407 = arith.addf %406, %405 : vector<8x128xf32>
    %408 = arith.divf %406, %407 : vector<8x128xf32>
    %409 = vector.extract_strided_slice %397 {offsets = [0, 128], sizes = [8, 128], strides = [1, 1]} : vector<8x512xf32> to vector<8x128xf32>
    %410 = arith.negf %409 : vector<8x128xf32>
    %411 = math.exp %410 : vector<8x128xf32>
    %cst_99 = arith.constant 1.000000e+00 : f32
    %412 = vector.broadcast %cst_99 : f32 to vector<8x128xf32>
    %413 = arith.addf %412, %411 : vector<8x128xf32>
    %414 = arith.divf %412, %413 : vector<8x128xf32>
    %415 = vector.extract_strided_slice %397 {offsets = [0, 256], sizes = [8, 128], strides = [1, 1]} : vector<8x512xf32> to vector<8x128xf32>
    %416 = math.tanh %415 : vector<8x128xf32>
    %417 = vector.extract_strided_slice %397 {offsets = [0, 384], sizes = [8, 128], strides = [1, 1]} : vector<8x512xf32> to vector<8x128xf32>
    %418 = arith.negf %417 : vector<8x128xf32>
    %419 = math.exp %418 : vector<8x128xf32>
    %cst_100 = arith.constant 1.000000e+00 : f32
    %420 = vector.broadcast %cst_100 : f32 to vector<8x128xf32>
    %421 = arith.addf %420, %419 : vector<8x128xf32>
    %422 = arith.divf %420, %421 : vector<8x128xf32>
    %423 = arith.mulf %414, %369 : vector<8x128xf32>
    %424 = arith.mulf %408, %416 : vector<8x128xf32>
    %425 = arith.addf %423, %424 : vector<8x128xf32>
    %426 = math.tanh %425 : vector<8x128xf32>
    %427 = arith.mulf %422, %426 : vector<8x128xf32>
    %428 = vector.extract_strided_slice %402 {offsets = [0, 0], sizes = [8, 128], strides = [1, 1]} : vector<8x512xf32> to vector<8x128xf32>
    %429 = arith.negf %428 : vector<8x128xf32>
    %430 = math.exp %429 : vector<8x128xf32>
    %cst_101 = arith.constant 1.000000e+00 : f32
    %431 = vector.broadcast %cst_101 : f32 to vector<8x128xf32>
    %432 = arith.addf %431, %430 : vector<8x128xf32>
    %433 = arith.divf %431, %432 : vector<8x128xf32>
    %434 = vector.extract_strided_slice %402 {offsets = [0, 128], sizes = [8, 128], strides = [1, 1]} : vector<8x512xf32> to vector<8x128xf32>
    %435 = arith.negf %434 : vector<8x128xf32>
    %436 = math.exp %435 : vector<8x128xf32>
    %cst_102 = arith.constant 1.000000e+00 : f32
    %437 = vector.broadcast %cst_102 : f32 to vector<8x128xf32>
    %438 = arith.addf %437, %436 : vector<8x128xf32>
    %439 = arith.divf %437, %438 : vector<8x128xf32>
    %440 = vector.extract_strided_slice %402 {offsets = [0, 256], sizes = [8, 128], strides = [1, 1]} : vector<8x512xf32> to vector<8x128xf32>
    %441 = math.tanh %440 : vector<8x128xf32>
    %442 = vector.extract_strided_slice %402 {offsets = [0, 384], sizes = [8, 128], strides = [1, 1]} : vector<8x512xf32> to vector<8x128xf32>
    %443 = arith.negf %442 : vector<8x128xf32>
    %444 = math.exp %443 : vector<8x128xf32>
    %cst_103 = arith.constant 1.000000e+00 : f32
    %445 = vector.broadcast %cst_103 : f32 to vector<8x128xf32>
    %446 = arith.addf %445, %444 : vector<8x128xf32>
    %447 = arith.divf %445, %446 : vector<8x128xf32>
    %448 = arith.mulf %439, %375 : vector<8x128xf32>
    %449 = arith.mulf %433, %441 : vector<8x128xf32>
    %450 = arith.addf %448, %449 : vector<8x128xf32>
    %451 = math.tanh %450 : vector<8x128xf32>
    %452 = arith.mulf %447, %451 : vector<8x128xf32>
    %453 = vector.broadcast %c4_i32 : i32 to vector<8x1xi32>
    %454 = arith.cmpi slt, %453, %18 : vector<8x1xi32>
    %455 = vector.broadcast %392 : i32 to vector<8x1xi32>
    %456 = arith.cmpi slt, %455, %18 : vector<8x1xi32>
    %457 = vector.shape_cast %454 : vector<8x1xi1> to vector<8x1xi1>
    %458 = vector.broadcast %457 : vector<8x1xi1> to vector<8x128xi1>
    %459 = arith.select %458, %427, %366 : vector<8x128xi1>, vector<8x128xf32>
    %460 = vector.shape_cast %454 : vector<8x1xi1> to vector<8x1xi1>
    %461 = vector.broadcast %460 : vector<8x1xi1> to vector<8x128xi1>
    %462 = arith.select %461, %425, %369 : vector<8x128xi1>, vector<8x128xf32>
    %463 = vector.shape_cast %456 : vector<8x1xi1> to vector<8x1xi1>
    %464 = vector.broadcast %463 : vector<8x1xi1> to vector<8x128xi1>
    %465 = arith.select %464, %452, %372 : vector<8x128xi1>, vector<8x128xf32>
    %466 = vector.shape_cast %456 : vector<8x1xi1> to vector<8x1xi1>
    %467 = vector.broadcast %466 : vector<8x1xi1> to vector<8x128xi1>
    %468 = arith.select %467, %450, %375 : vector<8x128xi1>, vector<8x128xf32>
    %469 = arith.extui %454 : vector<8x1xi1> to vector<8x1xi32>
    %470 = arith.sitofp %469 : vector<8x1xi32> to vector<8x1xf32>
    %471 = vector.broadcast %470 : vector<8x1xf32> to vector<8x128xf32>
    %472 = arith.mulf %459, %471 : vector<8x128xf32>
    %473 = arith.index_cast %c4_i32 : i32 to index
    %c0_104 = arith.constant 0 : index
    %c0_105 = arith.constant 0 : index
    %474 = vector.load %arg18[%473, %c0_104, %c0_105] : memref<8x8x128xf32, #tpu.memory_space<vmem>>, vector<1x8x128xf32>
    %475 = vector.shape_cast %474 : vector<1x8x128xf32> to vector<8x128xf32>
    %476 = vector.shape_cast %472 : vector<8x128xf32> to vector<1x8x128xf32>
    tpu.vector_store %arg18[%473, %c0_104, %c0_105], %476 {strides = array<i32>} : memref<8x8x128xf32, #tpu.memory_space<vmem>>, vector<1x8x128xf32>,
    %477 = arith.extui %456 : vector<8x1xi1> to vector<8x1xi32>
    %478 = arith.sitofp %477 : vector<8x1xi32> to vector<8x1xf32>
    %479 = vector.broadcast %478 : vector<8x1xf32> to vector<8x128xf32>
    %480 = arith.mulf %465, %479 : vector<8x128xf32>
    %481 = arith.index_cast %392 : i32 to index
    %c0_106 = arith.constant 0 : index
    %c0_107 = arith.constant 0 : index
    %482 = vector.load %arg19[%481, %c0_106, %c0_107] : memref<8x8x128xf32, #tpu.memory_space<vmem>>, vector<1x8x128xf32>
    %483 = vector.shape_cast %482 : vector<1x8x128xf32> to vector<8x128xf32>
    %484 = vector.shape_cast %480 : vector<8x128xf32> to vector<1x8x128xf32>
    tpu.vector_store %arg19[%481, %c0_106, %c0_107], %484 {strides = array<i32>} : memref<8x8x128xf32, #tpu.memory_space<vmem>>, vector<1x8x128xf32>,
    %c5_i32 = arith.constant 5 : i32
    %c7_i32_108 = arith.constant 7 : i32
    %485 = arith.subi %c7_i32_108, %c5_i32 : i32
    %486 = arith.index_cast %c5_i32 : i32 to index
    %c0_109 = arith.constant 0 : index
    %c0_110 = arith.constant 0 : index
    %487 = vector.load %arg16[%486, %c0_109, %c0_110] : memref<8x8x512xf32, #tpu.memory_space<vmem>>, vector<1x8x512xf32>
    %488 = vector.shape_cast %487 : vector<1x8x512xf32> to vector<8x512xf32>
    %cst_111 = arith.constant dense<0.000000e+00> : vector<8x512xf32>
    %489 = tpu.matmul %459, %16, %cst_111 {dimension_numbers = #tpu.dot_dimension_numbers<[1], [0], [0], [1], [0, 0, 1, 1], [], []>} : vector<8x128xf32>, vector<128x512xf32>, vector<8x512xf32> -> vector<8x512xf32>
    %490 = arith.addf %488, %489 : vector<8x512xf32>
    %491 = arith.index_cast %485 : i32 to index
    %c0_112 = arith.constant 0 : index
    %c0_113 = arith.constant 0 : index
    %492 = vector.load %arg17[%491, %c0_112, %c0_113] : memref<8x8x512xf32, #tpu.memory_space<vmem>>, vector<1x8x512xf32>
    %493 = vector.shape_cast %492 : vector<1x8x512xf32> to vector<8x512xf32>
    %cst_114 = arith.constant dense<0.000000e+00> : vector<8x512xf32>
    %494 = tpu.matmul %465, %17, %cst_114 {dimension_numbers = #tpu.dot_dimension_numbers<[1], [0], [0], [1], [0, 0, 1, 1], [], []>} : vector<8x128xf32>, vector<128x512xf32>, vector<8x512xf32> -> vector<8x512xf32>
    %495 = arith.addf %493, %494 : vector<8x512xf32>
    %496 = vector.extract_strided_slice %490 {offsets = [0, 0], sizes = [8, 128], strides = [1, 1]} : vector<8x512xf32> to vector<8x128xf32>
    %497 = arith.negf %496 : vector<8x128xf32>
    %498 = math.exp %497 : vector<8x128xf32>
    %cst_115 = arith.constant 1.000000e+00 : f32
    %499 = vector.broadcast %cst_115 : f32 to vector<8x128xf32>
    %500 = arith.addf %499, %498 : vector<8x128xf32>
    %501 = arith.divf %499, %500 : vector<8x128xf32>
    %502 = vector.extract_strided_slice %490 {offsets = [0, 128], sizes = [8, 128], strides = [1, 1]} : vector<8x512xf32> to vector<8x128xf32>
    %503 = arith.negf %502 : vector<8x128xf32>
    %504 = math.exp %503 : vector<8x128xf32>
    %cst_116 = arith.constant 1.000000e+00 : f32
    %505 = vector.broadcast %cst_116 : f32 to vector<8x128xf32>
    %506 = arith.addf %505, %504 : vector<8x128xf32>
    %507 = arith.divf %505, %506 : vector<8x128xf32>
    %508 = vector.extract_strided_slice %490 {offsets = [0, 256], sizes = [8, 128], strides = [1, 1]} : vector<8x512xf32> to vector<8x128xf32>
    %509 = math.tanh %508 : vector<8x128xf32>
    %510 = vector.extract_strided_slice %490 {offsets = [0, 384], sizes = [8, 128], strides = [1, 1]} : vector<8x512xf32> to vector<8x128xf32>
    %511 = arith.negf %510 : vector<8x128xf32>
    %512 = math.exp %511 : vector<8x128xf32>
    %cst_117 = arith.constant 1.000000e+00 : f32
    %513 = vector.broadcast %cst_117 : f32 to vector<8x128xf32>
    %514 = arith.addf %513, %512 : vector<8x128xf32>
    %515 = arith.divf %513, %514 : vector<8x128xf32>
    %516 = arith.mulf %507, %462 : vector<8x128xf32>
    %517 = arith.mulf %501, %509 : vector<8x128xf32>
    %518 = arith.addf %516, %517 : vector<8x128xf32>
    %519 = math.tanh %518 : vector<8x128xf32>
    %520 = arith.mulf %515, %519 : vector<8x128xf32>
    %521 = vector.extract_strided_slice %495 {offsets = [0, 0], sizes = [8, 128], strides = [1, 1]} : vector<8x512xf32> to vector<8x128xf32>
    %522 = arith.negf %521 : vector<8x128xf32>
    %523 = math.exp %522 : vector<8x128xf32>
    %cst_118 = arith.constant 1.000000e+00 : f32
    %524 = vector.broadcast %cst_118 : f32 to vector<8x128xf32>
    %525 = arith.addf %524, %523 : vector<8x128xf32>
    %526 = arith.divf %524, %525 : vector<8x128xf32>
    %527 = vector.extract_strided_slice %495 {offsets = [0, 128], sizes = [8, 128], strides = [1, 1]} : vector<8x512xf32> to vector<8x128xf32>
    %528 = arith.negf %527 : vector<8x128xf32>
    %529 = math.exp %528 : vector<8x128xf32>
    %cst_119 = arith.constant 1.000000e+00 : f32
    %530 = vector.broadcast %cst_119 : f32 to vector<8x128xf32>
    %531 = arith.addf %530, %529 : vector<8x128xf32>
    %532 = arith.divf %530, %531 : vector<8x128xf32>
    %533 = vector.extract_strided_slice %495 {offsets = [0, 256], sizes = [8, 128], strides = [1, 1]} : vector<8x512xf32> to vector<8x128xf32>
    %534 = math.tanh %533 : vector<8x128xf32>
    %535 = vector.extract_strided_slice %495 {offsets = [0, 384], sizes = [8, 128], strides = [1, 1]} : vector<8x512xf32> to vector<8x128xf32>
    %536 = arith.negf %535 : vector<8x128xf32>
    %537 = math.exp %536 : vector<8x128xf32>
    %cst_120 = arith.constant 1.000000e+00 : f32
    %538 = vector.broadcast %cst_120 : f32 to vector<8x128xf32>
    %539 = arith.addf %538, %537 : vector<8x128xf32>
    %540 = arith.divf %538, %539 : vector<8x128xf32>
    %541 = arith.mulf %532, %468 : vector<8x128xf32>
    %542 = arith.mulf %526, %534 : vector<8x128xf32>
    %543 = arith.addf %541, %542 : vector<8x128xf32>
    %544 = math.tanh %543 : vector<8x128xf32>
    %545 = arith.mulf %540, %544 : vector<8x128xf32>
    %546 = vector.broadcast %c5_i32 : i32 to vector<8x1xi32>
    %547 = arith.cmpi slt, %546, %18 : vector<8x1xi32>
    %548 = vector.broadcast %485 : i32 to vector<8x1xi32>
    %549 = arith.cmpi slt, %548, %18 : vector<8x1xi32>
    %550 = vector.shape_cast %547 : vector<8x1xi1> to vector<8x1xi1>
    %551 = vector.broadcast %550 : vector<8x1xi1> to vector<8x128xi1>
    %552 = arith.select %551, %520, %459 : vector<8x128xi1>, vector<8x128xf32>
    %553 = vector.shape_cast %547 : vector<8x1xi1> to vector<8x1xi1>
    %554 = vector.broadcast %553 : vector<8x1xi1> to vector<8x128xi1>
    %555 = arith.select %554, %518, %462 : vector<8x128xi1>, vector<8x128xf32>
    %556 = vector.shape_cast %549 : vector<8x1xi1> to vector<8x1xi1>
    %557 = vector.broadcast %556 : vector<8x1xi1> to vector<8x128xi1>
    %558 = arith.select %557, %545, %465 : vector<8x128xi1>, vector<8x128xf32>
    %559 = vector.shape_cast %549 : vector<8x1xi1> to vector<8x1xi1>
    %560 = vector.broadcast %559 : vector<8x1xi1> to vector<8x128xi1>
    %561 = arith.select %560, %543, %468 : vector<8x128xi1>, vector<8x128xf32>
    %562 = arith.extui %547 : vector<8x1xi1> to vector<8x1xi32>
    %563 = arith.sitofp %562 : vector<8x1xi32> to vector<8x1xf32>
    %564 = vector.broadcast %563 : vector<8x1xf32> to vector<8x128xf32>
    %565 = arith.mulf %552, %564 : vector<8x128xf32>
    %566 = arith.index_cast %c5_i32 : i32 to index
    %c0_121 = arith.constant 0 : index
    %c0_122 = arith.constant 0 : index
    %567 = vector.load %arg18[%566, %c0_121, %c0_122] : memref<8x8x128xf32, #tpu.memory_space<vmem>>, vector<1x8x128xf32>
    %568 = vector.shape_cast %567 : vector<1x8x128xf32> to vector<8x128xf32>
    %569 = vector.shape_cast %565 : vector<8x128xf32> to vector<1x8x128xf32>
    tpu.vector_store %arg18[%566, %c0_121, %c0_122], %569 {strides = array<i32>} : memref<8x8x128xf32, #tpu.memory_space<vmem>>, vector<1x8x128xf32>,
    %570 = arith.extui %549 : vector<8x1xi1> to vector<8x1xi32>
    %571 = arith.sitofp %570 : vector<8x1xi32> to vector<8x1xf32>
    %572 = vector.broadcast %571 : vector<8x1xf32> to vector<8x128xf32>
    %573 = arith.mulf %558, %572 : vector<8x128xf32>
    %574 = arith.index_cast %485 : i32 to index
    %c0_123 = arith.constant 0 : index
    %c0_124 = arith.constant 0 : index
    %575 = vector.load %arg19[%574, %c0_123, %c0_124] : memref<8x8x128xf32, #tpu.memory_space<vmem>>, vector<1x8x128xf32>
    %576 = vector.shape_cast %575 : vector<1x8x128xf32> to vector<8x128xf32>
    %577 = vector.shape_cast %573 : vector<8x128xf32> to vector<1x8x128xf32>
    tpu.vector_store %arg19[%574, %c0_123, %c0_124], %577 {strides = array<i32>} : memref<8x8x128xf32, #tpu.memory_space<vmem>>, vector<1x8x128xf32>,
    %c6_i32 = arith.constant 6 : i32
    %c7_i32_125 = arith.constant 7 : i32
    %578 = arith.subi %c7_i32_125, %c6_i32 : i32
    %579 = arith.index_cast %c6_i32 : i32 to index
    %c0_126 = arith.constant 0 : index
    %c0_127 = arith.constant 0 : index
    %580 = vector.load %arg16[%579, %c0_126, %c0_127] : memref<8x8x512xf32, #tpu.memory_space<vmem>>, vector<1x8x512xf32>
    %581 = vector.shape_cast %580 : vector<1x8x512xf32> to vector<8x512xf32>
    %cst_128 = arith.constant dense<0.000000e+00> : vector<8x512xf32>
    %582 = tpu.matmul %552, %16, %cst_128 {dimension_numbers = #tpu.dot_dimension_numbers<[1], [0], [0], [1], [0, 0, 1, 1], [], []>} : vector<8x128xf32>, vector<128x512xf32>, vector<8x512xf32> -> vector<8x512xf32>
    %583 = arith.addf %581, %582 : vector<8x512xf32>
    %584 = arith.index_cast %578 : i32 to index
    %c0_129 = arith.constant 0 : index
    %c0_130 = arith.constant 0 : index
    %585 = vector.load %arg17[%584, %c0_129, %c0_130] : memref<8x8x512xf32, #tpu.memory_space<vmem>>, vector<1x8x512xf32>
    %586 = vector.shape_cast %585 : vector<1x8x512xf32> to vector<8x512xf32>
    %cst_131 = arith.constant dense<0.000000e+00> : vector<8x512xf32>
    %587 = tpu.matmul %558, %17, %cst_131 {dimension_numbers = #tpu.dot_dimension_numbers<[1], [0], [0], [1], [0, 0, 1, 1], [], []>} : vector<8x128xf32>, vector<128x512xf32>, vector<8x512xf32> -> vector<8x512xf32>
    %588 = arith.addf %586, %587 : vector<8x512xf32>
    %589 = vector.extract_strided_slice %583 {offsets = [0, 0], sizes = [8, 128], strides = [1, 1]} : vector<8x512xf32> to vector<8x128xf32>
    %590 = arith.negf %589 : vector<8x128xf32>
    %591 = math.exp %590 : vector<8x128xf32>
    %cst_132 = arith.constant 1.000000e+00 : f32
    %592 = vector.broadcast %cst_132 : f32 to vector<8x128xf32>
    %593 = arith.addf %592, %591 : vector<8x128xf32>
    %594 = arith.divf %592, %593 : vector<8x128xf32>
    %595 = vector.extract_strided_slice %583 {offsets = [0, 128], sizes = [8, 128], strides = [1, 1]} : vector<8x512xf32> to vector<8x128xf32>
    %596 = arith.negf %595 : vector<8x128xf32>
    %597 = math.exp %596 : vector<8x128xf32>
    %cst_133 = arith.constant 1.000000e+00 : f32
    %598 = vector.broadcast %cst_133 : f32 to vector<8x128xf32>
    %599 = arith.addf %598, %597 : vector<8x128xf32>
    %600 = arith.divf %598, %599 : vector<8x128xf32>
    %601 = vector.extract_strided_slice %583 {offsets = [0, 256], sizes = [8, 128], strides = [1, 1]} : vector<8x512xf32> to vector<8x128xf32>
    %602 = math.tanh %601 : vector<8x128xf32>
    %603 = vector.extract_strided_slice %583 {offsets = [0, 384], sizes = [8, 128], strides = [1, 1]} : vector<8x512xf32> to vector<8x128xf32>
    %604 = arith.negf %603 : vector<8x128xf32>
    %605 = math.exp %604 : vector<8x128xf32>
    %cst_134 = arith.constant 1.000000e+00 : f32
    %606 = vector.broadcast %cst_134 : f32 to vector<8x128xf32>
    %607 = arith.addf %606, %605 : vector<8x128xf32>
    %608 = arith.divf %606, %607 : vector<8x128xf32>
    %609 = arith.mulf %600, %555 : vector<8x128xf32>
    %610 = arith.mulf %594, %602 : vector<8x128xf32>
    %611 = arith.addf %609, %610 : vector<8x128xf32>
    %612 = math.tanh %611 : vector<8x128xf32>
    %613 = arith.mulf %608, %612 : vector<8x128xf32>
    %614 = vector.extract_strided_slice %588 {offsets = [0, 0], sizes = [8, 128], strides = [1, 1]} : vector<8x512xf32> to vector<8x128xf32>
    %615 = arith.negf %614 : vector<8x128xf32>
    %616 = math.exp %615 : vector<8x128xf32>
    %cst_135 = arith.constant 1.000000e+00 : f32
    %617 = vector.broadcast %cst_135 : f32 to vector<8x128xf32>
    %618 = arith.addf %617, %616 : vector<8x128xf32>
    %619 = arith.divf %617, %618 : vector<8x128xf32>
    %620 = vector.extract_strided_slice %588 {offsets = [0, 128], sizes = [8, 128], strides = [1, 1]} : vector<8x512xf32> to vector<8x128xf32>
    %621 = arith.negf %620 : vector<8x128xf32>
    %622 = math.exp %621 : vector<8x128xf32>
    %cst_136 = arith.constant 1.000000e+00 : f32
    %623 = vector.broadcast %cst_136 : f32 to vector<8x128xf32>
    %624 = arith.addf %623, %622 : vector<8x128xf32>
    %625 = arith.divf %623, %624 : vector<8x128xf32>
    %626 = vector.extract_strided_slice %588 {offsets = [0, 256], sizes = [8, 128], strides = [1, 1]} : vector<8x512xf32> to vector<8x128xf32>
    %627 = math.tanh %626 : vector<8x128xf32>
    %628 = vector.extract_strided_slice %588 {offsets = [0, 384], sizes = [8, 128], strides = [1, 1]} : vector<8x512xf32> to vector<8x128xf32>
    %629 = arith.negf %628 : vector<8x128xf32>
    %630 = math.exp %629 : vector<8x128xf32>
    %cst_137 = arith.constant 1.000000e+00 : f32
    %631 = vector.broadcast %cst_137 : f32 to vector<8x128xf32>
    %632 = arith.addf %631, %630 : vector<8x128xf32>
    %633 = arith.divf %631, %632 : vector<8x128xf32>
    %634 = arith.mulf %625, %561 : vector<8x128xf32>
    %635 = arith.mulf %619, %627 : vector<8x128xf32>
    %636 = arith.addf %634, %635 : vector<8x128xf32>
    %637 = math.tanh %636 : vector<8x128xf32>
    %638 = arith.mulf %633, %637 : vector<8x128xf32>
    %639 = vector.broadcast %c6_i32 : i32 to vector<8x1xi32>
    %640 = arith.cmpi slt, %639, %18 : vector<8x1xi32>
    %641 = vector.broadcast %578 : i32 to vector<8x1xi32>
    %642 = arith.cmpi slt, %641, %18 : vector<8x1xi32>
    %643 = vector.shape_cast %640 : vector<8x1xi1> to vector<8x1xi1>
    %644 = vector.broadcast %643 : vector<8x1xi1> to vector<8x128xi1>
    %645 = arith.select %644, %613, %552 : vector<8x128xi1>, vector<8x128xf32>
    %646 = vector.shape_cast %640 : vector<8x1xi1> to vector<8x1xi1>
    %647 = vector.broadcast %646 : vector<8x1xi1> to vector<8x128xi1>
    %648 = arith.select %647, %611, %555 : vector<8x128xi1>, vector<8x128xf32>
    %649 = vector.shape_cast %642 : vector<8x1xi1> to vector<8x1xi1>
    %650 = vector.broadcast %649 : vector<8x1xi1> to vector<8x128xi1>
    %651 = arith.select %650, %638, %558 : vector<8x128xi1>, vector<8x128xf32>
    %652 = vector.shape_cast %642 : vector<8x1xi1> to vector<8x1xi1>
    %653 = vector.broadcast %652 : vector<8x1xi1> to vector<8x128xi1>
    %654 = arith.select %653, %636, %561 : vector<8x128xi1>, vector<8x128xf32>
    %655 = arith.extui %640 : vector<8x1xi1> to vector<8x1xi32>
    %656 = arith.sitofp %655 : vector<8x1xi32> to vector<8x1xf32>
    %657 = vector.broadcast %656 : vector<8x1xf32> to vector<8x128xf32>
    %658 = arith.mulf %645, %657 : vector<8x128xf32>
    %659 = arith.index_cast %c6_i32 : i32 to index
    %c0_138 = arith.constant 0 : index
    %c0_139 = arith.constant 0 : index
    %660 = vector.load %arg18[%659, %c0_138, %c0_139] : memref<8x8x128xf32, #tpu.memory_space<vmem>>, vector<1x8x128xf32>
    %661 = vector.shape_cast %660 : vector<1x8x128xf32> to vector<8x128xf32>
    %662 = vector.shape_cast %658 : vector<8x128xf32> to vector<1x8x128xf32>
    tpu.vector_store %arg18[%659, %c0_138, %c0_139], %662 {strides = array<i32>} : memref<8x8x128xf32, #tpu.memory_space<vmem>>, vector<1x8x128xf32>,
    %663 = arith.extui %642 : vector<8x1xi1> to vector<8x1xi32>
    %664 = arith.sitofp %663 : vector<8x1xi32> to vector<8x1xf32>
    %665 = vector.broadcast %664 : vector<8x1xf32> to vector<8x128xf32>
    %666 = arith.mulf %651, %665 : vector<8x128xf32>
    %667 = arith.index_cast %578 : i32 to index
    %c0_140 = arith.constant 0 : index
    %c0_141 = arith.constant 0 : index
    %668 = vector.load %arg19[%667, %c0_140, %c0_141] : memref<8x8x128xf32, #tpu.memory_space<vmem>>, vector<1x8x128xf32>
    %669 = vector.shape_cast %668 : vector<1x8x128xf32> to vector<8x128xf32>
    %670 = vector.shape_cast %666 : vector<8x128xf32> to vector<1x8x128xf32>
    tpu.vector_store %arg19[%667, %c0_140, %c0_141], %670 {strides = array<i32>} : memref<8x8x128xf32, #tpu.memory_space<vmem>>, vector<1x8x128xf32>,
    %c7_i32_142 = arith.constant 7 : i32
    %c7_i32_143 = arith.constant 7 : i32
    %671 = arith.subi %c7_i32_143, %c7_i32_142 : i32
    %672 = arith.index_cast %c7_i32_142 : i32 to index
    %c0_144 = arith.constant 0 : index
    %c0_145 = arith.constant 0 : index
    %673 = vector.load %arg16[%672, %c0_144, %c0_145] : memref<8x8x512xf32, #tpu.memory_space<vmem>>, vector<1x8x512xf32>
    %674 = vector.shape_cast %673 : vector<1x8x512xf32> to vector<8x512xf32>
    %cst_146 = arith.constant dense<0.000000e+00> : vector<8x512xf32>
    %675 = tpu.matmul %645, %16, %cst_146 {dimension_numbers = #tpu.dot_dimension_numbers<[1], [0], [0], [1], [0, 0, 1, 1], [], []>} : vector<8x128xf32>, vector<128x512xf32>, vector<8x512xf32> -> vector<8x512xf32>
    %676 = arith.addf %674, %675 : vector<8x512xf32>
    %677 = arith.index_cast %671 : i32 to index
    %c0_147 = arith.constant 0 : index
    %c0_148 = arith.constant 0 : index
    %678 = vector.load %arg17[%677, %c0_147, %c0_148] : memref<8x8x512xf32, #tpu.memory_space<vmem>>, vector<1x8x512xf32>
    %679 = vector.shape_cast %678 : vector<1x8x512xf32> to vector<8x512xf32>
    %cst_149 = arith.constant dense<0.000000e+00> : vector<8x512xf32>
    %680 = tpu.matmul %651, %17, %cst_149 {dimension_numbers = #tpu.dot_dimension_numbers<[1], [0], [0], [1], [0, 0, 1, 1], [], []>} : vector<8x128xf32>, vector<128x512xf32>, vector<8x512xf32> -> vector<8x512xf32>
    %681 = arith.addf %679, %680 : vector<8x512xf32>
    %682 = vector.extract_strided_slice %676 {offsets = [0, 0], sizes = [8, 128], strides = [1, 1]} : vector<8x512xf32> to vector<8x128xf32>
    %683 = arith.negf %682 : vector<8x128xf32>
    %684 = math.exp %683 : vector<8x128xf32>
    %cst_150 = arith.constant 1.000000e+00 : f32
    %685 = vector.broadcast %cst_150 : f32 to vector<8x128xf32>
    %686 = arith.addf %685, %684 : vector<8x128xf32>
    %687 = arith.divf %685, %686 : vector<8x128xf32>
    %688 = vector.extract_strided_slice %676 {offsets = [0, 128], sizes = [8, 128], strides = [1, 1]} : vector<8x512xf32> to vector<8x128xf32>
    %689 = arith.negf %688 : vector<8x128xf32>
    %690 = math.exp %689 : vector<8x128xf32>
    %cst_151 = arith.constant 1.000000e+00 : f32
    %691 = vector.broadcast %cst_151 : f32 to vector<8x128xf32>
    %692 = arith.addf %691, %690 : vector<8x128xf32>
    %693 = arith.divf %691, %692 : vector<8x128xf32>
    %694 = vector.extract_strided_slice %676 {offsets = [0, 256], sizes = [8, 128], strides = [1, 1]} : vector<8x512xf32> to vector<8x128xf32>
    %695 = math.tanh %694 : vector<8x128xf32>
    %696 = vector.extract_strided_slice %676 {offsets = [0, 384], sizes = [8, 128], strides = [1, 1]} : vector<8x512xf32> to vector<8x128xf32>
    %697 = arith.negf %696 : vector<8x128xf32>
    %698 = math.exp %697 : vector<8x128xf32>
    %cst_152 = arith.constant 1.000000e+00 : f32
    %699 = vector.broadcast %cst_152 : f32 to vector<8x128xf32>
    %700 = arith.addf %699, %698 : vector<8x128xf32>
    %701 = arith.divf %699, %700 : vector<8x128xf32>
    %702 = arith.mulf %693, %648 : vector<8x128xf32>
    %703 = arith.mulf %687, %695 : vector<8x128xf32>
    %704 = arith.addf %702, %703 : vector<8x128xf32>
    %705 = math.tanh %704 : vector<8x128xf32>
    %706 = arith.mulf %701, %705 : vector<8x128xf32>
    %707 = vector.extract_strided_slice %681 {offsets = [0, 0], sizes = [8, 128], strides = [1, 1]} : vector<8x512xf32> to vector<8x128xf32>
    %708 = arith.negf %707 : vector<8x128xf32>
    %709 = math.exp %708 : vector<8x128xf32>
    %cst_153 = arith.constant 1.000000e+00 : f32
    %710 = vector.broadcast %cst_153 : f32 to vector<8x128xf32>
    %711 = arith.addf %710, %709 : vector<8x128xf32>
    %712 = arith.divf %710, %711 : vector<8x128xf32>
    %713 = vector.extract_strided_slice %681 {offsets = [0, 128], sizes = [8, 128], strides = [1, 1]} : vector<8x512xf32> to vector<8x128xf32>
    %714 = arith.negf %713 : vector<8x128xf32>
    %715 = math.exp %714 : vector<8x128xf32>
    %cst_154 = arith.constant 1.000000e+00 : f32
    %716 = vector.broadcast %cst_154 : f32 to vector<8x128xf32>
    %717 = arith.addf %716, %715 : vector<8x128xf32>
    %718 = arith.divf %716, %717 : vector<8x128xf32>
    %719 = vector.extract_strided_slice %681 {offsets = [0, 256], sizes = [8, 128], strides = [1, 1]} : vector<8x512xf32> to vector<8x128xf32>
    %720 = math.tanh %719 : vector<8x128xf32>
    %721 = vector.extract_strided_slice %681 {offsets = [0, 384], sizes = [8, 128], strides = [1, 1]} : vector<8x512xf32> to vector<8x128xf32>
    %722 = arith.negf %721 : vector<8x128xf32>
    %723 = math.exp %722 : vector<8x128xf32>
    %cst_155 = arith.constant 1.000000e+00 : f32
    %724 = vector.broadcast %cst_155 : f32 to vector<8x128xf32>
    %725 = arith.addf %724, %723 : vector<8x128xf32>
    %726 = arith.divf %724, %725 : vector<8x128xf32>
    %727 = arith.mulf %718, %654 : vector<8x128xf32>
    %728 = arith.mulf %712, %720 : vector<8x128xf32>
    %729 = arith.addf %727, %728 : vector<8x128xf32>
    %730 = math.tanh %729 : vector<8x128xf32>
    %731 = arith.mulf %726, %730 : vector<8x128xf32>
    %732 = vector.broadcast %c7_i32_142 : i32 to vector<8x1xi32>
    %733 = arith.cmpi slt, %732, %18 : vector<8x1xi32>
    %734 = vector.broadcast %671 : i32 to vector<8x1xi32>
    %735 = arith.cmpi slt, %734, %18 : vector<8x1xi32>
    %736 = vector.shape_cast %733 : vector<8x1xi1> to vector<8x1xi1>
    %737 = vector.broadcast %736 : vector<8x1xi1> to vector<8x128xi1>
    %738 = arith.select %737, %706, %645 : vector<8x128xi1>, vector<8x128xf32>
    %739 = vector.shape_cast %733 : vector<8x1xi1> to vector<8x1xi1>
    %740 = vector.broadcast %739 : vector<8x1xi1> to vector<8x128xi1>
    %741 = arith.select %740, %704, %648 : vector<8x128xi1>, vector<8x128xf32>
    %742 = vector.shape_cast %735 : vector<8x1xi1> to vector<8x1xi1>
    %743 = vector.broadcast %742 : vector<8x1xi1> to vector<8x128xi1>
    %744 = arith.select %743, %731, %651 : vector<8x128xi1>, vector<8x128xf32>
    %745 = vector.shape_cast %735 : vector<8x1xi1> to vector<8x1xi1>
    %746 = vector.broadcast %745 : vector<8x1xi1> to vector<8x128xi1>
    %747 = arith.select %746, %729, %654 : vector<8x128xi1>, vector<8x128xf32>
    %748 = arith.extui %733 : vector<8x1xi1> to vector<8x1xi32>
    %749 = arith.sitofp %748 : vector<8x1xi32> to vector<8x1xf32>
    %750 = vector.broadcast %749 : vector<8x1xf32> to vector<8x128xf32>
    %751 = arith.mulf %738, %750 : vector<8x128xf32>
    %752 = arith.index_cast %c7_i32_142 : i32 to index
    %c0_156 = arith.constant 0 : index
    %c0_157 = arith.constant 0 : index
    %753 = vector.load %arg18[%752, %c0_156, %c0_157] : memref<8x8x128xf32, #tpu.memory_space<vmem>>, vector<1x8x128xf32>
    %754 = vector.shape_cast %753 : vector<1x8x128xf32> to vector<8x128xf32>
    %755 = vector.shape_cast %751 : vector<8x128xf32> to vector<1x8x128xf32>
    tpu.vector_store %arg18[%752, %c0_156, %c0_157], %755 {strides = array<i32>} : memref<8x8x128xf32, #tpu.memory_space<vmem>>, vector<1x8x128xf32>,
    %756 = arith.extui %735 : vector<8x1xi1> to vector<8x1xi32>
    %757 = arith.sitofp %756 : vector<8x1xi32> to vector<8x1xf32>
    %758 = vector.broadcast %757 : vector<8x1xf32> to vector<8x128xf32>
    %759 = arith.mulf %744, %758 : vector<8x128xf32>
    %760 = arith.index_cast %671 : i32 to index
    %c0_158 = arith.constant 0 : index
    %c0_159 = arith.constant 0 : index
    %761 = vector.load %arg19[%760, %c0_158, %c0_159] : memref<8x8x128xf32, #tpu.memory_space<vmem>>, vector<1x8x128xf32>
    %762 = vector.shape_cast %761 : vector<1x8x128xf32> to vector<8x128xf32>
    %763 = vector.shape_cast %759 : vector<8x128xf32> to vector<1x8x128xf32>
    tpu.vector_store %arg19[%760, %c0_158, %c0_159], %763 {strides = array<i32>} : memref<8x8x128xf32, #tpu.memory_space<vmem>>, vector<1x8x128xf32>,
    %c8_i32 = arith.constant 8 : i32
    %c0_160 = arith.constant 0 : index
    %c0_161 = arith.constant 0 : index
    %c0_162 = arith.constant 0 : index
    %764 = vector.load %arg18[%c0_160, %c0_161, %c0_162] : memref<8x8x128xf32, #tpu.memory_space<vmem>>, vector<8x8x128xf32>
    %765 = vector.shape_cast %764 : vector<8x8x128xf32> to vector<64x128xf32>
    %c0_163 = arith.constant 0 : index
    %c0_164 = arith.constant 0 : index
    %c0_165 = arith.constant 0 : index
    %766 = vector.load %arg19[%c0_163, %c0_164, %c0_165] : memref<8x8x128xf32, #tpu.memory_space<vmem>>, vector<8x8x128xf32>
    %767 = vector.shape_cast %766 : vector<8x8x128xf32> to vector<64x128xf32>
    %c0_166 = arith.constant 0 : index
    %c0_167 = arith.constant 0 : index
    %768 = vector.load %arg11[%c0_166, %c0_167] : memref<256x128xf32, #tpu.memory_space<vmem>>, vector<128x128xf32>
    %cst_168 = arith.constant dense<0.000000e+00> : vector<64x128xf32>
    %769 = tpu.matmul %765, %768, %cst_168 {dimension_numbers = #tpu.dot_dimension_numbers<[1], [0], [0], [1], [0, 0, 1, 1], [], []>} : vector<64x128xf32>, vector<128x128xf32>, vector<64x128xf32> -> vector<64x128xf32>
    %c128 = arith.constant 128 : index
    %c0_169 = arith.constant 0 : index
    %770 = vector.load %arg11[%c128, %c0_169] : memref<256x128xf32, #tpu.memory_space<vmem>>, vector<128x128xf32>
    %cst_170 = arith.constant dense<0.000000e+00> : vector<64x128xf32>
    %771 = tpu.matmul %767, %770, %cst_170 {dimension_numbers = #tpu.dot_dimension_numbers<[1], [0], [0], [1], [0, 0, 1, 1], [], []>} : vector<64x128xf32>, vector<128x128xf32>, vector<64x128xf32> -> vector<64x128xf32>
    %772 = arith.addf %769, %771 : vector<64x128xf32>
    %c0_171 = arith.constant 0 : index
    %c0_172 = arith.constant 0 : index
    %773 = vector.load %arg12[%c0_171, %c0_172] : memref<1x128xf32, #tpu.memory_space<vmem>>, vector<1x128xf32>
    %774 = vector.broadcast %773 : vector<1x128xf32> to vector<64x128xf32>
    %775 = arith.addf %772, %774 : vector<64x128xf32>
    %776 = vector.shape_cast %775 : vector<64x128xf32> to vector<8x8x128xf32>
    %cst_173 = arith.constant dense<0xFF800000> : vector<8x8xf32>
    %777 = vector.multi_reduction <maximumf>, %776, %cst_173 [2] : vector<8x8x128xf32> to vector<8x8xf32>
    %778 = vector.shape_cast %777 : vector<8x8xf32> to vector<8x8x1xf32>
    %779 = tpu.iota {dimensions = array<i32: 2>} : vector<8x8x128xi32>
    %780 = vector.broadcast %778 : vector<8x8x1xf32> to vector<8x8x128xf32>
    %781 = arith.cmpf oeq, %776, %780 : vector<8x8x128xf32>
    %c128_i32 = arith.constant 128 : i32
    %782 = vector.broadcast %c128_i32 : i32 to vector<8x8x128xi32>
    %783 = arith.select %781, %779, %782 : vector<8x8x128xi1>, vector<8x8x128xi32>
    %cst_174 = arith.constant dense<2147483647> : vector<8x8xi32>
    %784 = vector.multi_reduction <minsi>, %783, %cst_174 [2] : vector<8x8x128xi32> to vector<8x8xi32>
    %785 = vector.shape_cast %784 : vector<8x8xi32> to vector<8x8x1xi32>
    %c0_175 = arith.constant 0 : index
    %c0_176 = arith.constant 0 : index
    %c0_177 = arith.constant 0 : index
    %786 = vector.load %arg13[%c0_175, %c0_176, %c0_177] : memref<8x8x1xi32, #tpu.memory_space<vmem>>, vector<8x8x1xi32>
    tpu.vector_store %arg13[%c0_175, %c0_176, %c0_177], %785 {strides = array<i32>} : memref<8x8x1xi32, #tpu.memory_space<vmem>>, vector<8x8x1xi32>,
    %787 = vector.broadcast %778 : vector<8x8x1xf32> to vector<8x8x128xf32>
    %788 = arith.subf %776, %787 : vector<8x8x128xf32>
    %789 = math.exp %788 : vector<8x8x128xf32>
    %cst_178 = arith.constant dense<0.000000e+00> : vector<8x8xf32>
    %790 = vector.multi_reduction <add>, %789, %cst_178 [2] : vector<8x8x128xf32> to vector<8x8xf32>
    %791 = vector.shape_cast %790 : vector<8x8xf32> to vector<8x8x1xf32>
    %792 = math.log %791 : vector<8x8x1xf32>
    %c0_179 = arith.constant 0 : index
    %c0_180 = arith.constant 0 : index
    %c0_181 = arith.constant 0 : index
    %793 = vector.load %arg3[%c0_179, %c0_180, %c0_181] : memref<8x8x1xi32, #tpu.memory_space<vmem>>, vector<8x8x1xi32>
    %794 = vector.broadcast %793 : vector<8x8x1xi32> to vector<8x8x128xi32>
    %795 = arith.cmpi eq, %779, %794 : vector<8x8x128xi32>
    %796 = arith.extui %795 : vector<8x8x128xi1> to vector<8x8x128xi32>
    %797 = arith.sitofp %796 : vector<8x8x128xi32> to vector<8x8x128xf32>
    %798 = arith.mulf %788, %797 : vector<8x8x128xf32>
    %cst_182 = arith.constant dense<0.000000e+00> : vector<8x8xf32>
    %799 = vector.multi_reduction <add>, %798, %cst_182 [2] : vector<8x8x128xf32> to vector<8x8xf32>
    %800 = vector.shape_cast %799 : vector<8x8xf32> to vector<8x8x1xf32>
    %801 = arith.subf %800, %792 : vector<8x8x1xf32>
    %c0_183 = arith.constant 0 : index
    %c0_184 = arith.constant 0 : index
    %c0_185 = arith.constant 0 : index
    %802 = vector.load %arg4[%c0_183, %c0_184, %c0_185] : memref<8x8x1xf32, #tpu.memory_space<vmem>>, vector<8x8x1xf32>
    %cst_186 = arith.constant 0.000000e+00 : f32
    %803 = vector.broadcast %cst_186 : f32 to vector<8x8x1xf32>
    %804 = arith.subf %803, %801 : vector<8x8x1xf32>
    %805 = arith.mulf %804, %802 : vector<8x8x1xf32>
    %806 = vector.shape_cast %805 : vector<8x8x1xf32> to vector<1x8x8x1xf32>
    %cst_187 = arith.constant dense<0.000000e+00> : vector<1xf32>
    %807 = vector.multi_reduction <add>, %806, %cst_187 [1, 2, 3] : vector<1x8x8x1xf32> to vector<1xf32>
    %808 = vector.shape_cast %807 : vector<1xf32> to vector<1x1x1x1xf32>
    %809 = vector.extract %808[0, 0, 0, 0] : f32 from vector<1x1x1x1xf32>
    %810 = vector.broadcast %809 : f32 to vector<1x1x1xf32>
    %c0_188 = arith.constant 0 : index
    %c0_189 = arith.constant 0 : index
    %c0_190 = arith.constant 0 : index
    %811 = vector.load %arg14[%c0_188, %c0_189, %c0_190] : memref<1x1x1xf32, #tpu.memory_space<vmem>>, vector<1x1x1xf32>
    tpu.vector_store %arg14[%c0_188, %c0_189, %c0_190], %810 {strides = array<i32>} : memref<1x1x1xf32, #tpu.memory_space<vmem>>, vector<1x1x1xf32>,
    %812 = vector.shape_cast %802 : vector<8x8x1xf32> to vector<1x8x8x1xf32>
    %cst_191 = arith.constant dense<0.000000e+00> : vector<1xf32>
    %813 = vector.multi_reduction <add>, %812, %cst_191 [1, 2, 3] : vector<1x8x8x1xf32> to vector<1xf32>
    %814 = vector.shape_cast %813 : vector<1xf32> to vector<1x1x1x1xf32>
    %815 = vector.extract %814[0, 0, 0, 0] : f32 from vector<1x1x1x1xf32>
    %816 = vector.broadcast %815 : f32 to vector<1x1x1xf32>
    %c0_192 = arith.constant 0 : index
    %c0_193 = arith.constant 0 : index
    %c0_194 = arith.constant 0 : index
    %817 = vector.load %arg15[%c0_192, %c0_193, %c0_194] : memref<1x1x1xf32, #tpu.memory_space<vmem>>, vector<1x1x1xf32>
    tpu.vector_store %arg15[%c0_192, %c0_193, %c0_194], %816 {strides = array<i32>} : memref<1x1x1xf32, #tpu.memory_space<vmem>>, vector<1x1x1xf32>,
    return
  }
  func.func @transform_0(%arg0: i32) -> (i32, i32, i32) {
    %c0_i32 = arith.constant 0 : i32
    %c0_i32_0 = arith.constant 0 : i32
    %c0_i32_1 = arith.constant 0 : i32
    return %c0_i32, %arg0, %c0_i32_0 : i32, i32, i32
  }
  func.func @transform_1(%arg0: i32) -> (i32, i32) {
    %c0_i32 = arith.constant 0 : i32
    %c0_i32_0 = arith.constant 0 : i32
    return %arg0, %c0_i32 : i32, i32
  }
  func.func @transform_2(%arg0: i32) -> (i32, i32, i32) {
    %c0_i32 = arith.constant 0 : i32
    %c0_i32_0 = arith.constant 0 : i32
    %c0_i32_1 = arith.constant 0 : i32
    return %c0_i32, %arg0, %c0_i32_0 : i32, i32, i32
  }
  func.func @transform_3(%arg0: i32) -> (i32, i32, i32) {
    %c0_i32 = arith.constant 0 : i32
    %c0_i32_0 = arith.constant 0 : i32
    %c0_i32_1 = arith.constant 0 : i32
    return %c0_i32, %arg0, %c0_i32_0 : i32, i32, i32
  }
  func.func @transform_4(%arg0: i32) -> (i32, i32) {
    %c0_i32 = arith.constant 0 : i32
    %c0_i32_0 = arith.constant 0 : i32
    %c0_i32_1 = arith.constant 0 : i32
    return %c0_i32, %c0_i32_0 : i32, i32
  }
  func.func @transform_5(%arg0: i32) -> (i32, i32) {
    %c0_i32 = arith.constant 0 : i32
    %c0_i32_0 = arith.constant 0 : i32
    %c0_i32_1 = arith.constant 0 : i32
    return %c0_i32, %c0_i32_0 : i32, i32
  }
  func.func @transform_6(%arg0: i32) -> (i32, i32) {
    %c0_i32 = arith.constant 0 : i32
    %c0_i32_0 = arith.constant 0 : i32
    %c0_i32_1 = arith.constant 0 : i32
    return %c0_i32, %c0_i32_0 : i32, i32
  }
  func.func @transform_7(%arg0: i32) -> (i32, i32) {
    %c0_i32 = arith.constant 0 : i32
    %c0_i32_0 = arith.constant 0 : i32
    %c0_i32_1 = arith.constant 0 : i32
    return %c0_i32, %c0_i32_0 : i32, i32
  }
  func.func @transform_8(%arg0: i32) -> (i32, i32) {
    %c0_i32 = arith.constant 0 : i32
    %c0_i32_0 = arith.constant 0 : i32
    %c0_i32_1 = arith.constant 0 : i32
    return %c0_i32, %c0_i32_0 : i32, i32
  }
  func.func @transform_9(%arg0: i32) -> (i32, i32) {
    %c0_i32 = arith.constant 0 : i32
    %c0_i32_0 = arith.constant 0 : i32
    %c0_i32_1 = arith.constant 0 : i32
    return %c0_i32, %c0_i32_0 : i32, i32
  }
  func.func @transform_10(%arg0: i32) -> (i32, i32) {
    %c0_i32 = arith.constant 0 : i32
    %c0_i32_0 = arith.constant 0 : i32
    %c0_i32_1 = arith.constant 0 : i32
    return %c0_i32, %c0_i32_0 : i32, i32
  }
  func.func @transform_11(%arg0: i32) -> (i32, i32) {
    %c0_i32 = arith.constant 0 : i32
    %c0_i32_0 = arith.constant 0 : i32
    %c0_i32_1 = arith.constant 0 : i32
    return %c0_i32, %c0_i32_0 : i32, i32
  }
  func.func @transform_12(%arg0: i32) -> (i32, i32, i32) {
    %c0_i32 = arith.constant 0 : i32
    %c0_i32_0 = arith.constant 0 : i32
    %c0_i32_1 = arith.constant 0 : i32
    return %c0_i32, %arg0, %c0_i32_0 : i32, i32, i32
  }
  func.func @transform_13(%arg0: i32) -> (i32, i32, i32) {
    %c0_i32 = arith.constant 0 : i32
    %c0_i32_0 = arith.constant 0 : i32
    %c0_i32_1 = arith.constant 0 : i32
    return %arg0, %c0_i32, %c0_i32_0 : i32, i32, i32
  }
  func.func @transform_14(%arg0: i32) -> (i32, i32, i32) {
    %c0_i32 = arith.constant 0 : i32
    %c0_i32_0 = arith.constant 0 : i32
    %c0_i32_1 = arith.constant 0 : i32
    return %arg0, %c0_i32, %c0_i32_0 : i32, i32, i32
  }
}

</mosaic_0001>

<bundles_post_ra>
// kernel: tpu_custom_call.1
= control target key start
LH: loop header
LB: loop body
LE: loop exit
PB: predicated region body
PF: predicated region fallthrough
CT: control target
= control target key end

     0   :  { %20 = vsyncpa [#allocation7], 0  ;;  %s8554_s0 = inlined_call_operand.vmem [shape: f32[8,8,128], index: 0, kind: input, shape index: {}]   ;;  %s8555_s1 = inlined_call_operand.vmem [shape: s32[8,1], index: 1, kind: input, shape index: {}]   ;;  %s8556_s2 = inlined_call_operand.vmem [shape: s32[8,8,1], index: 2, kind: input, shape index: {}]   ;;  %s8557_s3 = inlined_call_operand.vmem [shape: f32[8,8,1], index: 3, kind: input, shape index: {}]   ;;  %s8558_s4 = inlined_call_operand.hbm [shape: f32[128,512], index: 4, kind: input, shape index: {}]   ;;  %s8559_s5 = inlined_call_operand.vmem [shape: f32[1,512], index: 5, kind: input, shape index: {}]   ;;  %s8560_s6 = inlined_call_operand.hbm [shape: f32[128,512], index: 6, kind: input, shape index: {}]   ;;  %s8561_s7 = inlined_call_operand.vmem [shape: f32[1,512], index: 7, kind: input, shape index: {}]   ;;  %s8562_s8 = inlined_call_operand.hbm [shape: f32[128,512], index: 8, kind: input, shape index: {}]   ;;  %s8563_s9 = inlined_call_operand.hbm [shape: f32[128,512], index: 9, kind: input, shape index: {}]   ;;  %s8564_s10 = inlined_call_operand.hbm [shape: f32[256,128], index: 10, kind: input, shape index: {}]   ;;  %s8565_s11 = inlined_call_operand.vmem [shape: f32[1,128], index: 11, kind: input, shape index: {}]   ;;  %s8566_s12 = inlined_call_operand.vmem [shape: s32[8,8,1], index: 12, kind: output, shape index: {0}]   ;;  %s8567_s13 = inlined_call_operand.hbm [shape: f32[1,1,1], index: 13, kind: output, shape index: {1}]   ;;  %s8568_s14 = inlined_call_operand.hbm [shape: f32[1,1,1], index: 14, kind: output, shape index: {2}]  }
   0x1   :  { %21 = vsyncpa [#allocation10], 0 }
   0x2   :  { %22 = vsyncpa [#allocation13], 0 }
   0x3   :  { %23 = vsyncpa [#allocation8], 0 }
   0x4   :  { %24 = vsyncpa [#allocation17], 0  ;;  %s5531_s29 = smov [#allocation9]   ;;  %s5532_s15 = smov [#allocation12]  }
   0x5   :  { %s52_s30 = sshll.u32 %s5531_s29, 4  ;;  %s78_s16 = sshll.u32 %s5532_s15, 4  ;;  %s53_s30 = int_to_ptr.vmem [resolvable:$true] %s52_s30  ;;  %s79_s16 = int_to_ptr.vmem [resolvable:$true] %s78_s16 }
   0x6   :  { %s5389_s17 = scalar_lea.vmem %s53_s30, 8192  ;;  %p5394_p1 = scmp.lt.s32.totalorder %s53_s30, %s53_s30 }
   0x7   :  { %p5390_p0 = scmp.ne.s32.totalorder %s53_s30, %s5389_s17  ;;  %p5395_p2 = scmp.lt.s32.totalorder %s5389_s17, %s5389_s17 }
   0x9   :  { %p5396_p3 = por %p5395_p2, %p5394_p1 }
   0xb   :  { %p5397_p4 = pnand %p5396_p3, %p5390_p0 }
   0xd   :  { %5400 = shalt.err (!%p5397_p4)
}
   0xe   :  { %s5533_s18 = smov 512   ;;  %s5534_s19 = smov 32  }
   0xf   :  { %58 = dma.hbm_to_vmem [thread:$0]  %s8560_s6, 8192, %s53_s30, [#allocation10], %s5533_s18, %s5533_s18, %s5534_s19  }
  0x10   :  { %s5409_s22 = scalar_lea.vmem %s79_s16, 8192  ;;  %p5414_p6 = scmp.lt.s32.totalorder %s79_s16, %s79_s16 }
  0x11   :  { %p5410_p5 = scmp.ne.s32.totalorder %s79_s16, %s5409_s22  ;;  %p5415_p7 = scmp.lt.s32.totalorder %s5409_s22, %s5409_s22 }
  0x13   :  { %p5416_p8 = por %p5415_p7, %p5414_p6 }
  0x15   :  { %p5417_p9 = pnand %p5416_p8, %p5410_p5 }
  0x17   :  { %5420 = shalt.err (!%p5417_p9)
}
  0x18   :  { %84 = dma.hbm_to_vmem [thread:$0]  %s8563_s9, 8192, %s79_s16, [#allocation13], %s5533_s18, %s5533_s18, %s5534_s19  }
  0x19   :  { %s5535_s25 = smov [#allocation6]   ;;  %s5536_s27 = smov [#allocation11]  }
  0x1a   :  { %s38_s26 = sshll.u32 %s5535_s25, 4  ;;  %s66_s28 = sshll.u32 %s5536_s27, 4  ;;  %s39_s26 = int_to_ptr.vmem [resolvable:$true] %s38_s26  ;;  %s67_s28 = int_to_ptr.vmem [resolvable:$true] %s66_s28 }
  0x1b   :  { %s5429_s6 = scalar_lea.vmem %s39_s26, 8192  ;;  %p5434_p11 = scmp.lt.s32.totalorder %s39_s26, %s39_s26 }
  0x1c   :  { %p5430_p10 = scmp.ne.s32.totalorder %s39_s26, %s5429_s6  ;;  %p5435_p12 = scmp.lt.s32.totalorder %s5429_s6, %s5429_s6 }
  0x1e   :  { %p5436_p13 = por %p5435_p12, %p5434_p11 }
  0x20   :  { %p5437_p0 = pnand %p5436_p13, %p5430_p10 }
  0x22   :  { %5440 = shalt.err (!%p5437_p0)
}
  0x23   :  { %44 = dma.hbm_to_vmem [thread:$0]  %s8558_s4, 8192, %s39_s26, [#allocation7], %s5533_s18, %s5533_s18, %s5534_s19  }
  0x24   :  { %s5449_s9 = scalar_lea.vmem %s67_s28, 8192  ;;  %p5454_p2 = scmp.lt.s32.totalorder %s67_s28, %s67_s28 }
  0x25   :  { %p5450_p1 = scmp.ne.s32.totalorder %s67_s28, %s5449_s9  ;;  %p5455_p3 = scmp.lt.s32.totalorder %s5449_s9, %s5449_s9 }
  0x27   :  { %p5456_p4 = por %p5455_p3, %p5454_p2 }
  0x29   :  { %p5457_p5 = pnand %p5456_p4, %p5450_p1 }
  0x2b   :  { %5460 = shalt.err (!%p5457_p5)
}
  0x2c   :  { %72 = dma.hbm_to_vmem [thread:$0]  %s8562_s8, 8192, %s67_s28, [#allocation10], %s5533_s18, %s5533_s18, %s5534_s19  }
  0x2d   :  { %s5537_s17 = smov [#allocation14]  }
  0x2e   :  { %s90_s20 = sshll.u32 %s5537_s17, 4  ;;  %s91_s20 = int_to_ptr.vmem [resolvable:$true] %s90_s20 }
  0x2f   :  { %s5469_s21 = scalar_lea.vmem %s91_s20, 4096  ;;  %p5474_p7 = scmp.lt.s32.totalorder %s91_s20, %s91_s20 }
  0x30   :  { %p5470_p6 = scmp.ne.s32.totalorder %s91_s20, %s5469_s21  ;;  %p5475_p8 = scmp.lt.s32.totalorder %s5469_s21, %s5469_s21 }
  0x32   :  { %p5476_p9 = por %p5475_p8, %p5474_p7 }
  0x34   :  { %p5477_p10 = pnand %p5476_p9, %p5470_p6 }
  0x36   :  { %5480 = shalt.err (!%p5477_p10)
}
  0x37   :  { %s5538_s4 = smov 128   ;;  %s5539_s22 = smov 8  }
  0x38   :  { %96 = dma.hbm_to_vmem [thread:$0]  %s8564_s10, 4096, %s91_s20, [#allocation13], %s5538_s4, %s5538_s4, %s5539_s22  }
  0x39   :  { %5521 = dma.done.wait [#allocation7], 8192  }
  0x3a   :  { %5522 = vsyncadd [#allocation7], 4294959104 }
  0x3b   :  { %5523 = dma.done.wait [#allocation10], 16384  }
  0x3c   :  { %5524 = vsyncadd [#allocation10], 4294950912 }
  0x3d   :  { %5525 = dma.done.wait [#allocation13], 12288  }
  0x3e   :  { %5526 = vsyncadd [#allocation13], 4294955008  ;;  %v8569_v0 = vmov 0.0   ;;  %v183_v1 = vld [vmem:[#allocation6 + $0x1e8] sm:$0xff]  ;;  %v185_v2 = vld [vmem:[#allocation6 + $0x1f8] sm:$0xff]  ;;  %s5542_s21 = smov [#allocation15]  }
  0x3f   :  { %272 = vmatprep.mubr.f32.mxu0 %v8569_v0  ;;  %385 = vmatprep.mubr.f32.mxu1 %v8569_v0  ;;  %v182_v3 = vld [vmem:[#allocation6 + $0x1e0] sm:$0xff]  ;;  %v184_v4 = vld [vmem:[#allocation6 + $0x1f0] sm:$0xff]  ;;  %v179_v5 = vld [vmem:[#allocation6 + $0x1c8] sm:$0xff]  ;;  %s5543_s4 = smov [#allocation16]  }
  0x40   :  { %208 = vmatprep.subr.mxu0 %v183_v1  ;;  %321 = vmatprep.subr.mxu1 %v185_v2  ;;  %v181_v6 = vld [vmem:[#allocation6 + $0x1d8] sm:$0xff]  ;;  %v178_v7 = vld [vmem:[#allocation6 + $0x1c0] sm:$0xff]  ;;  %v180_v8 = vld [vmem:[#allocation6 + $0x1d0] sm:$0xff]  ;;  %s4576_s22 = sshll.u32 %s5543_s4, 4  ;;  %s4577_s22 = int_to_ptr.vmem [resolvable:$true] %s4576_s22 }
  0x41   :  { %209 = vmatpush1.msra.mxu0 %v182_v3  ;;  %322 = vmatpush1.msra.mxu1 %v184_v4  ;;  %v175_v9 = vld [vmem:[#allocation6 + $0x1a8] sm:$0xff]  ;;  %v177_v10 = vld [vmem:[#allocation6 + $0x1b8] sm:$0xff]  ;;  %v174_v11 = vld [vmem:[#allocation6 + $0x1a0] sm:$0xff] }
  0x42   :  { %210 = vmatprep.subr.mxu0 %v179_v5  ;;  %323 = vmatprep.subr.mxu1 %v181_v6  ;;  %v176_v12 = vld [vmem:[#allocation6 + $0x1b0] sm:$0xff]  ;;  %v171_v13 = vld [vmem:[#allocation6 + $0x188] sm:$0xff]  ;;  %v173_v14 = vld [vmem:[#allocation6 + $0x198] sm:$0xff] }
  0x43   :  { %211 = vmatpush1.msra.mxu0 %v178_v7  ;;  %324 = vmatpush1.msra.mxu1 %v180_v8  ;;  %v170_v15 = vld [vmem:[#allocation6 + $0x180] sm:$0xff]  ;;  %v172_v16 = vld [vmem:[#allocation6 + $0x190] sm:$0xff]  ;;  %v167_v17 = vld [vmem:[#allocation6 + $0x168] sm:$0xff] }
  0x44   :  { %212 = vmatprep.subr.mxu0 %v175_v9  ;;  %325 = vmatprep.subr.mxu1 %v177_v10  ;;  %v169_v18 = vld [vmem:[#allocation6 + $0x178] sm:$0xff]  ;;  %v166_v19 = vld [vmem:[#allocation6 + $0x160] sm:$0xff]  ;;  %v168_v20 = vld [vmem:[#allocation6 + $0x170] sm:$0xff] }
  0x45   :  { %213 = vmatpush1.msra.mxu0 %v174_v11  ;;  %326 = vmatpush1.msra.mxu1 %v176_v12  ;;  %v163_v21 = vld [vmem:[#allocation6 + $0x148] sm:$0xff]  ;;  %v165_v22 = vld [vmem:[#allocation6 + $0x158] sm:$0xff]  ;;  %v162_v23 = vld [vmem:[#allocation6 + $0x140] sm:$0xff] }
  0x46   :  { %214 = vmatprep.subr.mxu0 %v171_v13  ;;  %327 = vmatprep.subr.mxu1 %v173_v14  ;;  %v164_v24 = vld [vmem:[#allocation6 + $0x150] sm:$0xff]  ;;  %v159_v25 = vld [vmem:[#allocation6 + $0x128] sm:$0xff]  ;;  %v161_v26 = vld [vmem:[#allocation6 + $0x138] sm:$0xff] }
  0x47   :  { %215 = vmatpush1.msra.mxu0 %v170_v15  ;;  %328 = vmatpush1.msra.mxu1 %v172_v16  ;;  %v158_v27 = vld [vmem:[#allocation6 + $0x120] sm:$0xff]  ;;  %v160_v28 = vld [vmem:[#allocation6 + $0x130] sm:$0xff]  ;;  %v155_v29 = vld [vmem:[#allocation6 + $0x108] sm:$0xff] }
  0x48   :  { %216 = vmatprep.subr.mxu0 %v167_v17  ;;  %329 = vmatprep.subr.mxu1 %v169_v18  ;;  %v157_v30 = vld [vmem:[#allocation6 + $0x118] sm:$0xff]  ;;  %v154_v31 = vld [vmem:[#allocation6 + $0x100] sm:$0xff]  ;;  %v156_v32 = vld [vmem:[#allocation6 + $0x110] sm:$0xff] }
  0x49   :  { %217 = vmatpush1.msra.mxu0 %v166_v19  ;;  %330 = vmatpush1.msra.mxu1 %v168_v20  ;;  %v151_v33 = vld [vmem:[#allocation6 + $0xe8] sm:$0xff]  ;;  %v153_v34 = vld [vmem:[#allocation6 + $0xf8] sm:$0xff]  ;;  %v150_v35 = vld [vmem:[#allocation6 + $0xe0] sm:$0xff] }
  0x4a   :  { %218 = vmatprep.subr.mxu0 %v163_v21  ;;  %331 = vmatprep.subr.mxu1 %v165_v22  ;;  %v152_v36 = vld [vmem:[#allocation6 + $0xf0] sm:$0xff]  ;;  %v147_v37 = vld [vmem:[#allocation6 + $0xc8] sm:$0xff]  ;;  %v149_v38 = vld [vmem:[#allocation6 + $0xd8] sm:$0xff] }
  0x4b   :  { %219 = vmatpush1.msra.mxu0 %v162_v23  ;;  %332 = vmatpush1.msra.mxu1 %v164_v24  ;;  %v146_v39 = vld [vmem:[#allocation6 + $0xc0] sm:$0xff]  ;;  %v148_v40 = vld [vmem:[#allocation6 + $0xd0] sm:$0xff]  ;;  %v143_v41 = vld [vmem:[#allocation6 + $0xa8] sm:$0xff] }
  0x4c   :  { %220 = vmatprep.subr.mxu0 %v159_v25  ;;  %333 = vmatprep.subr.mxu1 %v161_v26  ;;  %v145_v42 = vld [vmem:[#allocation6 + $0xb8] sm:$0xff]  ;;  %v142_v43 = vld [vmem:[#allocation6 + $0xa0] sm:$0xff]  ;;  %v144_v44 = vld [vmem:[#allocation6 + $0xb0] sm:$0xff] }
  0x4d   :  { %221 = vmatpush1.msra.mxu0 %v158_v27  ;;  %334 = vmatpush1.msra.mxu1 %v160_v28  ;;  %v139_v45 = vld [vmem:[#allocation6 + $0x88] sm:$0xff]  ;;  %v141_v46 = vld [vmem:[#allocation6 + $0x98] sm:$0xff]  ;;  %v138_v47 = vld [vmem:[#allocation6 + $0x80] sm:$0xff] }
  0x4e   :  { %222 = vmatprep.subr.mxu0 %v155_v29  ;;  %335 = vmatprep.subr.mxu1 %v157_v30  ;;  %v140_v48 = vld [vmem:[#allocation6 + $0x90] sm:$0xff]  ;;  %v135_v49 = vld [vmem:[#allocation6 + $0x68] sm:$0xff]  ;;  %v137_v50 = vld [vmem:[#allocation6 + $0x78] sm:$0xff] }
  0x4f   :  { %223 = vmatpush1.msra.mxu0 %v154_v31  ;;  %336 = vmatpush1.msra.mxu1 %v156_v32  ;;  %v134_v51 = vld [vmem:[#allocation6 + $0x60] sm:$0xff]  ;;  %v136_v52 = vld [vmem:[#allocation6 + $0x70] sm:$0xff]  ;;  %v131_v53 = vld [vmem:[#allocation6 + $0x48] sm:$0xff] }
  0x50   :  { %224 = vmatprep.subr.mxu0 %v151_v33  ;;  %337 = vmatprep.subr.mxu1 %v153_v34  ;;  %v133_v54 = vld [vmem:[#allocation6 + $0x58] sm:$0xff]  ;;  %v130_v55 = vld [vmem:[#allocation6 + $0x40] sm:$0xff]  ;;  %v132_v56 = vld [vmem:[#allocation6 + $0x50] sm:$0xff] }
  0x51   :  { %225 = vmatpush1.msra.mxu0 %v150_v35  ;;  %338 = vmatpush1.msra.mxu1 %v152_v36  ;;  %v127_v57 = vld [vmem:[#allocation6 + $0x28] sm:$0xff]  ;;  %v129_v58 = vld [vmem:[#allocation6 + $0x38] sm:$0xff]  ;;  %v126_v59 = vld [vmem:[#allocation6 + $0x20] sm:$0xff] }
  0x52   :  { %226 = vmatprep.subr.mxu0 %v147_v37  ;;  %339 = vmatprep.subr.mxu1 %v149_v38  ;;  %v128_v60 = vld [vmem:[#allocation6 + $0x30] sm:$0xff]  ;;  %v123_v61 = vld [vmem:[#allocation6 + $0x8] sm:$0xff]  ;;  %v125_v62 = vld [vmem:[#allocation6 + $0x18] sm:$0xff] }
  0x53   :  { %227 = vmatpush1.msra.mxu0 %v146_v39  ;;  %340 = vmatpush1.msra.mxu1 %v148_v40  ;;  %v122_v63 = vld [vmem:[#allocation6] sm:$0xff]  ;;  %v124_v1 = vld [vmem:[#allocation6 + $0x10] sm:$0xff]  ;;  %v527_v3 = vld [vmem:[#allocation9 + $0x1e8] sm:$0xff] }
  0x54   :  { %228 = vmatprep.subr.mxu0 %v143_v41  ;;  %341 = vmatprep.subr.mxu1 %v145_v42  ;;  %v5651_v2 = vld [vmem:[%s8554_s0] sm:$0xff]  ;;  %v529_v4 = vld [vmem:[#allocation9 + $0x1f8] sm:$0xff]  ;;  %v528_v6 = vld [vmem:[#allocation9 + $0x1f0] sm:$0xff] }
  0x55   :  { %229 = vmatpush1.msra.mxu0 %v142_v43  ;;  %342 = vmatpush1.msra.mxu1 %v144_v44  ;;  %v526_v5 = vld [vmem:[#allocation9 + $0x1e0] sm:$0xff]  ;;  %v523_v7 = vld [vmem:[#allocation9 + $0x1c8] sm:$0xff]  ;;  %v525_v8 = vld [vmem:[#allocation9 + $0x1d8] sm:$0xff] }
  0x56   :  { %230 = vmatprep.subr.mxu0 %v139_v45  ;;  %343 = vmatprep.subr.mxu1 %v141_v46  ;;  %v522_v9 = vld [vmem:[#allocation9 + $0x1c0] sm:$0xff]  ;;  %v524_v10 = vld [vmem:[#allocation9 + $0x1d0] sm:$0xff]  ;;  %v5658_v11 = vld [vmem:[%s8554_s0 + $0x8] sm:$0xff] }
  0x57   :  { %231 = vmatpush1.msra.mxu0 %v138_v47  ;;  %344 = vmatpush1.msra.mxu1 %v140_v48  ;;  %v519_v12 = vld [vmem:[#allocation9 + $0x1a8] sm:$0xff]  ;;  %v521_v13 = vld [vmem:[#allocation9 + $0x1b8] sm:$0xff]  ;;  %v518_v14 = vld [vmem:[#allocation9 + $0x1a0] sm:$0xff] }
  0x58   :  { %232 = vmatprep.subr.mxu0 %v135_v49  ;;  %345 = vmatprep.subr.mxu1 %v137_v50  ;;  %v520_v15 = vld [vmem:[#allocation9 + $0x1b0] sm:$0xff]  ;;  %v515_v16 = vld [vmem:[#allocation9 + $0x188] sm:$0xff]  ;;  %v517_v17 = vld [vmem:[#allocation9 + $0x198] sm:$0xff] }
  0x59   :  { %233 = vmatpush1.msra.mxu0 %v134_v51  ;;  %346 = vmatpush1.msra.mxu1 %v136_v52  ;;  %v514_v18 = vld [vmem:[#allocation9 + $0x180] sm:$0xff]  ;;  %v516_v19 = vld [vmem:[#allocation9 + $0x190] sm:$0xff]  ;;  %v511_v21 = vld [vmem:[#allocation9 + $0x168] sm:$0xff] }
  0x5a   :  { %234 = vmatprep.subr.mxu0 %v131_v53  ;;  %347 = vmatprep.subr.mxu1 %v133_v54  ;;  %v5667_v20 = vld [vmem:[%s8554_s0 + $0x10] sm:$0xff]  ;;  %v513_v22 = vld [vmem:[#allocation9 + $0x178] sm:$0xff]  ;;  %v510_v23 = vld [vmem:[#allocation9 + $0x160] sm:$0xff] }
  0x5b   :  { %235 = vmatpush1.msra.mxu0 %v130_v55  ;;  %348 = vmatpush1.msra.mxu1 %v132_v56  ;;  %v512_v24 = vld [vmem:[#allocation9 + $0x170] sm:$0xff]  ;;  %v507_v25 = vld [vmem:[#allocation9 + $0x148] sm:$0xff]  ;;  %v509_v26 = vld [vmem:[#allocation9 + $0x158] sm:$0xff] }
  0x5c   :  { %236 = vmatprep.subr.mxu0 %v127_v57  ;;  %349 = vmatprep.subr.mxu1 %v129_v58  ;;  %v506_v27 = vld [vmem:[#allocation9 + $0x140] sm:$0xff]  ;;  %v508_v28 = vld [vmem:[#allocation9 + $0x150] sm:$0xff]  ;;  %v5676_v29 = vld [vmem:[%s8554_s0 + $0x18] sm:$0xff] }
  0x5d   :  { %237 = vmatpush1.msra.mxu0 %v126_v59  ;;  %350 = vmatpush1.msra.mxu1 %v128_v60  ;;  %v503_v30 = vld [vmem:[#allocation9 + $0x128] sm:$0xff]  ;;  %v505_v31 = vld [vmem:[#allocation9 + $0x138] sm:$0xff]  ;;  %v502_v32 = vld [vmem:[#allocation9 + $0x120] sm:$0xff] }
  0x5e   :  { %238 = vmatprep.subr.mxu0 %v123_v61  ;;  %351 = vmatprep.subr.mxu1 %v125_v62  ;;  %v504_v33 = vld [vmem:[#allocation9 + $0x130] sm:$0xff]  ;;  %v499_v34 = vld [vmem:[#allocation9 + $0x108] sm:$0xff]  ;;  %v501_v35 = vld [vmem:[#allocation9 + $0x118] sm:$0xff] }
  0x5f   :  { %239 = vmatpush1.msra.mxu0 %v122_v63  ;;  %352 = vmatpush1.msra.mxu1 %v124_v1  ;;  %v498_v36 = vld [vmem:[#allocation9 + $0x100] sm:$0xff]  ;;  %v500_v37 = vld [vmem:[#allocation9 + $0x110] sm:$0xff]  ;;  %v495_v39 = vld [vmem:[#allocation9 + $0xe8] sm:$0xff] }
  0x60   :  { %273 = vmatmul.mubr.f32.vlgmr.msra.gmra.mxu0 %v5651_v2  ;;  %386 = vmatmul.mubr.f32.vlgmr.msra.gmra.mxu1 %v5651_v2  ;;  %v5685_v38 = vld [vmem:[%s8554_s0 + $0x20] sm:$0xff]  ;;  %v497_v40 = vld [vmem:[#allocation9 + $0xf8] sm:$0xff]  ;;  %v496_v42 = vld [vmem:[#allocation9 + $0xf0] sm:$0xff] }
  0x61   :  { %552 = vmatprep.subr.mxu0 %v527_v3  ;;  %665 = vmatprep.subr.mxu1 %v529_v4  ;;  %v494_v41 = vld [vmem:[#allocation9 + $0xe0] sm:$0xff]  ;;  %v491_v43 = vld [vmem:[#allocation9 + $0xc8] sm:$0xff]  ;;  %v493_v44 = vld [vmem:[#allocation9 + $0xd8] sm:$0xff] }
  0x62   :  { %553 = vmatpush1.msra.mxu0 %v526_v5  ;;  %666 = vmatpush1.msra.mxu1 %v528_v6  ;;  %v490_v45 = vld [vmem:[#allocation9 + $0xc0] sm:$0xff]  ;;  %v492_v46 = vld [vmem:[#allocation9 + $0xd0] sm:$0xff]  ;;  %v5694_v47 = vld [vmem:[%s8554_s0 + $0x28] sm:$0xff] }
  0x63   :  { %554 = vmatprep.subr.mxu0 %v523_v7  ;;  %667 = vmatprep.subr.mxu1 %v525_v8  ;;  %v487_v48 = vld [vmem:[#allocation9 + $0xa8] sm:$0xff]  ;;  %v489_v49 = vld [vmem:[#allocation9 + $0xb8] sm:$0xff]  ;;  %v486_v50 = vld [vmem:[#allocation9 + $0xa0] sm:$0xff] }
  0x64   :  { %278 = vmatprep.mubr.f32.mxu0 %v8569_v0  ;;  %391 = vmatprep.mubr.f32.mxu1 %v8569_v0  ;;  %v488_v51 = vld [vmem:[#allocation9 + $0xb0] sm:$0xff]  ;;  %v483_v52 = vld [vmem:[#allocation9 + $0x88] sm:$0xff]  ;;  %v485_v53 = vld [vmem:[#allocation9 + $0x98] sm:$0xff] }
  0x65   :  { %555 = vmatpush1.msra.mxu0 %v522_v9  ;;  %668 = vmatpush1.msra.mxu1 %v524_v10  ;;  %v482_v54 = vld [vmem:[#allocation9 + $0x80] sm:$0xff]  ;;  %v484_v55 = vld [vmem:[#allocation9 + $0x90] sm:$0xff]  ;;  %v479_v57 = vld [vmem:[#allocation9 + $0x68] sm:$0xff] }
  0x66   :  { %279 = vmatmul.mubr.f32.gmra.mxu0 %v5658_v11  ;;  %392 = vmatmul.mubr.f32.gmra.mxu1 %v5658_v11  ;;  %v5703_v56 = vld [vmem:[%s8554_s0 + $0x30] sm:$0xff]  ;;  %v481_v58 = vld [vmem:[#allocation9 + $0x78] sm:$0xff]  ;;  %v478_v59 = vld [vmem:[#allocation9 + $0x60] sm:$0xff] }
  0x67   :  { %556 = vmatprep.subr.mxu0 %v519_v12  ;;  %669 = vmatprep.subr.mxu1 %v521_v13  ;;  %v480_v60 = vld [vmem:[#allocation9 + $0x70] sm:$0xff]  ;;  %v475_v61 = vld [vmem:[#allocation9 + $0x48] sm:$0xff]  ;;  %v477_v62 = vld [vmem:[#allocation9 + $0x58] sm:$0xff] }
  0x68   :  { %557 = vmatpush1.msra.mxu0 %v518_v14  ;;  %670 = vmatpush1.msra.mxu1 %v520_v15  ;;  %v474_v63 = vld [vmem:[#allocation9 + $0x40] sm:$0xff]  ;;  %v476_v1 = vld [vmem:[#allocation9 + $0x50] sm:$0xff]  ;;  %v5712_v3 = vld [vmem:[%s8554_s0 + $0x38] sm:$0xff] }
  0x69   :  { %558 = vmatprep.subr.mxu0 %v515_v16  ;;  %671 = vmatprep.subr.mxu1 %v517_v17  ;;  %v471_v4 = vld [vmem:[#allocation9 + $0x28] sm:$0xff]  ;;  %v473_v5 = vld [vmem:[#allocation9 + $0x38] sm:$0xff]  ;;  %v470_v6 = vld [vmem:[#allocation9 + $0x20] sm:$0xff] }
  0x6a   :  { %284 = vmatprep.mubr.f32.mxu0 %v8569_v0  ;;  %397 = vmatprep.mubr.f32.mxu1 %v8569_v0  ;;  %v472_v7 = vld [vmem:[#allocation9 + $0x30] sm:$0xff]  ;;  %v467_v8 = vld [vmem:[#allocation9 + $0x8] sm:$0xff]  ;;  %v469_v9 = vld [vmem:[#allocation9 + $0x18] sm:$0xff] }
  0x6b   :  { %559 = vmatpush1.msra.mxu0 %v514_v18  ;;  %672 = vmatpush1.msra.mxu1 %v516_v19  ;;  %v466_v10 = vld [vmem:[#allocation9] sm:$0xff]  ;;  %v468_v12 = vld [vmem:[#allocation9 + $0x10] sm:$0xff]  ;;  %v5719_v13 = vld [vmem:[#allocation11 + $0x1e8] sm:$0xff] }
  0x6c   :  { %285 = vmatmul.mubr.f32.gmra.mxu0 %v5667_v20  ;;  %398 = vmatmul.mubr.f32.gmra.mxu1 %v5667_v20  ;;  %v5721_v14 = vld [vmem:[#allocation11 + $0x1f8] sm:$0xff]  ;;  %v5724_v15 = vld [vmem:[#allocation11 + $0x1e0] sm:$0xff]  ;;  %v5726_v16 = vld [vmem:[#allocation11 + $0x1f0] sm:$0xff] }
  0x6d   :  { %560 = vmatprep.subr.mxu0 %v511_v21  ;;  %673 = vmatprep.subr.mxu1 %v513_v22  ;;  %v5730_v17 = vld [vmem:[#allocation11 + $0x1c8] sm:$0xff]  ;;  %v5732_v18 = vld [vmem:[#allocation11 + $0x1d8] sm:$0xff]  ;;  %v5738_v19 = vld [vmem:[#allocation11 + $0x1c0] sm:$0xff] }
  0x6e   :  { %561 = vmatpush1.msra.mxu0 %v510_v23  ;;  %674 = vmatpush1.msra.mxu1 %v512_v24  ;;  %v5740_v21 = vld [vmem:[#allocation11 + $0x1d0] sm:$0xff]  ;;  %v5748_v22 = vld [vmem:[#allocation11 + $0x1b8] sm:$0xff]  ;;  %v5752_v23 = vld [vmem:[#allocation11 + $0x1a0] sm:$0xff] }
  0x6f   :  { %562 = vmatprep.subr.mxu0 %v507_v25  ;;  %675 = vmatprep.subr.mxu1 %v509_v26  ;;  %v5754_v24 = vld [vmem:[#allocation11 + $0x1b0] sm:$0xff]  ;;  %v5758_v25 = vld [vmem:[#allocation11 + $0x188] sm:$0xff]  ;;  %v5760_v26 = vld [vmem:[#allocation11 + $0x198] sm:$0xff] }
  0x70   :  { %290 = vmatprep.mubr.f32.mxu0 %v8569_v0  ;;  %403 = vmatprep.mubr.f32.mxu1 %v8569_v0 }
  0x71   :  { %563 = vmatpush1.msra.mxu0 %v506_v27  ;;  %676 = vmatpush1.msra.mxu1 %v508_v28  ;;  %v5766_v27 = vld [vmem:[#allocation11 + $0x180] sm:$0xff]  ;;  %v5768_v28 = vld [vmem:[#allocation11 + $0x190] sm:$0xff] }
  0x72   :  { %291 = vmatmul.mubr.f32.gmra.mxu0 %v5676_v29  ;;  %404 = vmatmul.mubr.f32.gmra.mxu1 %v5676_v29 }
  0x73   :  { %564 = vmatprep.subr.mxu0 %v503_v30  ;;  %677 = vmatprep.subr.mxu1 %v505_v31  ;;  %v5776_v30 = vld [vmem:[#allocation11 + $0x178] sm:$0xff]  ;;  %v5780_v31 = vld [vmem:[#allocation11 + $0x160] sm:$0xff] }
  0x74   :  { %565 = vmatpush1.msra.mxu0 %v502_v32  ;;  %678 = vmatpush1.msra.mxu1 %v504_v33  ;;  %v5782_v32 = vld [vmem:[#allocation11 + $0x170] sm:$0xff]  ;;  %v5786_v33 = vld [vmem:[#allocation11 + $0x148] sm:$0xff] }
  0x75   :  { %566 = vmatprep.subr.mxu0 %v499_v34  ;;  %679 = vmatprep.subr.mxu1 %v501_v35  ;;  %v5788_v34 = vld [vmem:[#allocation11 + $0x158] sm:$0xff]  ;;  %v5794_v35 = vld [vmem:[#allocation11 + $0x140] sm:$0xff] }
  0x76   :  { %296 = vmatprep.mubr.f32.mxu0 %v8569_v0  ;;  %409 = vmatprep.mubr.f32.mxu1 %v8569_v0 }
  0x77   :  { %567 = vmatpush1.msra.mxu0 %v498_v36  ;;  %680 = vmatpush1.msra.mxu1 %v500_v37  ;;  %v5796_v36 = vld [vmem:[#allocation11 + $0x150] sm:$0xff]  ;;  %v5804_v37 = vld [vmem:[#allocation11 + $0x138] sm:$0xff] }
  0x78   :  { %297 = vmatmul.mubr.f32.gmra.mxu0 %v5685_v38  ;;  %410 = vmatmul.mubr.f32.gmra.mxu1 %v5685_v38 }
  0x79   :  { %568 = vmatprep.subr.mxu0 %v495_v39  ;;  %681 = vmatprep.subr.mxu1 %v497_v40  ;;  %v5808_v39 = vld [vmem:[#allocation11 + $0x120] sm:$0xff]  ;;  %v5810_v40 = vld [vmem:[#allocation11 + $0x130] sm:$0xff] }
  0x7a   :  { %569 = vmatpush1.msra.mxu0 %v494_v41  ;;  %682 = vmatpush1.msra.mxu1 %v496_v42  ;;  %v5814_v41 = vld [vmem:[#allocation11 + $0x108] sm:$0xff]  ;;  %v5816_v42 = vld [vmem:[#allocation11 + $0x118] sm:$0xff] }
  0x7b   :  { %570 = vmatprep.subr.mxu0 %v491_v43  ;;  %683 = vmatprep.subr.mxu1 %v493_v44  ;;  %v5822_v43 = vld [vmem:[#allocation11 + $0x100] sm:$0xff]  ;;  %v5824_v44 = vld [vmem:[#allocation11 + $0x110] sm:$0xff] }
  0x7c   :  { %302 = vmatprep.mubr.f32.mxu0 %v8569_v0  ;;  %415 = vmatprep.mubr.f32.mxu1 %v8569_v0 }
  0x7d   :  { %571 = vmatpush1.msra.mxu0 %v490_v45  ;;  %684 = vmatpush1.msra.mxu1 %v492_v46  ;;  %v5832_v45 = vld [vmem:[#allocation11 + $0xf8] sm:$0xff]  ;;  %v5836_v46 = vld [vmem:[#allocation11 + $0xe0] sm:$0xff] }
  0x7e   :  { %303 = vmatmul.mubr.f32.gmra.mxu0 %v5694_v47  ;;  %416 = vmatmul.mubr.f32.gmra.mxu1 %v5694_v47 }
  0x7f   :  { %572 = vmatprep.subr.mxu0 %v487_v48  ;;  %685 = vmatprep.subr.mxu1 %v489_v49  ;;  %v5838_v48 = vld [vmem:[#allocation11 + $0xf0] sm:$0xff]  ;;  %v5842_v49 = vld [vmem:[#allocation11 + $0xc8] sm:$0xff] }
  0x80   :  { %573 = vmatpush1.msra.mxu0 %v486_v50  ;;  %686 = vmatpush1.msra.mxu1 %v488_v51  ;;  %v5844_v50 = vld [vmem:[#allocation11 + $0xd8] sm:$0xff]  ;;  %v5850_v51 = vld [vmem:[#allocation11 + $0xc0] sm:$0xff] }
  0x81   :  { %574 = vmatprep.subr.mxu0 %v483_v52  ;;  %687 = vmatprep.subr.mxu1 %v485_v53  ;;  %v5852_v52 = vld [vmem:[#allocation11 + $0xd0] sm:$0xff]  ;;  %v5860_v53 = vld [vmem:[#allocation11 + $0xb8] sm:$0xff] }
  0x82   :  { %308 = vmatprep.mubr.f32.mxu0 %v8569_v0  ;;  %421 = vmatprep.mubr.f32.mxu1 %v8569_v0 }
  0x83   :  { %575 = vmatpush1.msra.mxu0 %v482_v54  ;;  %688 = vmatpush1.msra.mxu1 %v484_v55  ;;  %v5864_v54 = vld [vmem:[#allocation11 + $0xa0] sm:$0xff]  ;;  %v5866_v55 = vld [vmem:[#allocation11 + $0xb0] sm:$0xff] }
  0x84   :  { %309 = vmatmul.mubr.f32.gmra.mxu0 %v5703_v56  ;;  %422 = vmatmul.mubr.f32.gmra.mxu1 %v5703_v56 }
  0x85   :  { %576 = vmatprep.subr.mxu0 %v479_v57  ;;  %689 = vmatprep.subr.mxu1 %v481_v58  ;;  %v5870_v57 = vld [vmem:[#allocation11 + $0x88] sm:$0xff]  ;;  %v5872_v58 = vld [vmem:[#allocation11 + $0x98] sm:$0xff] }
  0x86   :  { %577 = vmatpush1.msra.mxu0 %v478_v59  ;;  %690 = vmatpush1.msra.mxu1 %v480_v60  ;;  %v5878_v59 = vld [vmem:[#allocation11 + $0x80] sm:$0xff]  ;;  %v5880_v60 = vld [vmem:[#allocation11 + $0x90] sm:$0xff] }
  0x87   :  { %578 = vmatprep.subr.mxu0 %v475_v61  ;;  %691 = vmatprep.subr.mxu1 %v477_v62  ;;  %v5888_v61 = vld [vmem:[#allocation11 + $0x78] sm:$0xff]  ;;  %v5892_v62 = vld [vmem:[#allocation11 + $0x60] sm:$0xff] }
  0x88   :  { %314 = vmatprep.mubr.f32.mxu0 %v8569_v0  ;;  %427 = vmatprep.mubr.f32.mxu1 %v8569_v0 }
  0x89   :  { %579 = vmatpush1.msra.mxu0 %v474_v63  ;;  %692 = vmatpush1.msra.mxu1 %v476_v1  ;;  %v5894_v63 = vld [vmem:[#allocation11 + $0x70] sm:$0xff]  ;;  %v5898_v1 = vld [vmem:[#allocation11 + $0x48] sm:$0xff] }
  0x8a   :  { %315 = vmatmul.mubr.f32.gmra.mxu0 %v5712_v3  ;;  %428 = vmatmul.mubr.f32.gmra.mxu1 %v5712_v3  ;;  %8991 = vst [vmem:[#allocation23_spill] sm:$0xff] %v5898_v1 }
  0x8b   :  { %580 = vmatprep.subr.mxu0 %v471_v4  ;;  %693 = vmatprep.subr.mxu1 %v473_v5  ;;  %v5900_v4 = vld [vmem:[#allocation11 + $0x58] sm:$0xff]  ;;  %v5906_v5 = vld [vmem:[#allocation11 + $0x40] sm:$0xff] }
  0x8c   :  { %581 = vmatpush1.msra.mxu0 %v470_v6  ;;  %694 = vmatpush1.msra.mxu1 %v472_v7  ;;  %8992 = vst [vmem:[#allocation24_spill] sm:$0xff] %v5900_v4  ;;  %8993 = vst [vmem:[#allocation25_spill] sm:$0xff] %v5906_v5  ;;  %v5908_v6 = vld [vmem:[#allocation11 + $0x50] sm:$0xff]  ;;  %v5916_v7 = vld [vmem:[#allocation11 + $0x38] sm:$0xff] }
  0x8d   :  { %582 = vmatprep.subr.mxu0 %v467_v8  ;;  %695 = vmatprep.subr.mxu1 %v469_v9  ;;  %8994 = vst [vmem:[#allocation26_spill] sm:$0xff] %v5908_v6  ;;  %8996 = vst [vmem:[#allocation28_spill] sm:$0xff] %v5916_v7  ;;  %v5920_v8 = vld [vmem:[#allocation11 + $0x20] sm:$0xff]  ;;  %v5922_v9 = vld [vmem:[#allocation11 + $0x30] sm:$0xff] }
  0x8e   :  { %583 = vmatpush1.msra.mxu0 %v466_v10  ;;  %616 = vmatprep.mubr.f32.mxu0 %v8569_v0  ;;  %8997 = vst [vmem:[#allocation29_spill] sm:$0xff] %v5920_v8  ;;  %8998 = vst [vmem:[#allocation30_spill] sm:$0xff] %v5922_v9  ;;  %v5926_v10 = vld [vmem:[#allocation11 + $0x8] sm:$0xff] }
  0x8f   :  { %696 = vmatpush1.msra.mxu1 %v468_v12  ;;  %729 = vmatprep.mubr.f32.mxu1 %v8569_v0  ;;  %8999 = vst [vmem:[#allocation31_spill] sm:$0xff] %v5926_v10  ;;  %v5928_v12 = vld [vmem:[#allocation11 + $0x18] sm:$0xff] }
  0x90   :  { %617 = vmatmul.mubr.f32.vlgmr.msra.gmra.mxu0 %v5651_v2  ;;  %730 = vmatmul.mubr.f32.vlgmr.msra.gmra.mxu1 %v5651_v2  ;;  %v5746_v2 = vld [vmem:[#allocation11 + $0x1a8] sm:$0xff]  ;;  %9000 = vst [vmem:[#allocation32_spill] sm:$0xff] %v5928_v12 }
  0x91   :  { %943 = vmatprep.subr.mxu0 %v5719_v13  ;;  %1014 = vmatprep.subr.mxu1 %v5721_v14 }
  0x92   :  { %944 = vmatpush1.msra.mxu0 %v5724_v15  ;;  %1015 = vmatpush1.msra.mxu1 %v5726_v16 }
  0x93   :  { %945 = vmatprep.subr.mxu0 %v5730_v17  ;;  %1016 = vmatprep.subr.mxu1 %v5732_v18 }
  0x94   :  { %622 = vmatprep.mubr.f32.mxu0 %v8569_v0  ;;  %735 = vmatprep.mubr.f32.mxu1 %v8569_v0 }
  0x95   :  { %946 = vmatpush1.msra.mxu0 %v5738_v19  ;;  %1017 = vmatpush1.msra.mxu1 %v5740_v21 }
  0x96   :  { %623 = vmatmul.mubr.f32.gmra.mxu0 %v5658_v11  ;;  %736 = vmatmul.mubr.f32.gmra.mxu1 %v5658_v11  ;;  %v5774_v11 = vld [vmem:[#allocation11 + $0x168] sm:$0xff] }
  0x97   :  { %947 = vmatprep.subr.mxu0 %v5746_v2  ;;  %1018 = vmatprep.subr.mxu1 %v5748_v22 }
  0x98   :  { %948 = vmatpush1.msra.mxu0 %v5752_v23  ;;  %1019 = vmatpush1.msra.mxu1 %v5754_v24 }
  0x99   :  { %949 = vmatprep.subr.mxu0 %v5758_v25  ;;  %1020 = vmatprep.subr.mxu1 %v5760_v26 }
  0x9a   :  { %628 = vmatprep.mubr.f32.mxu0 %v8569_v0  ;;  %741 = vmatprep.mubr.f32.mxu1 %v8569_v0 }
  0x9b   :  { %950 = vmatpush1.msra.mxu0 %v5766_v27  ;;  %1021 = vmatpush1.msra.mxu1 %v5768_v28 }
  0x9c   :  { %629 = vmatmul.mubr.f32.gmra.mxu0 %v5667_v20  ;;  %742 = vmatmul.mubr.f32.gmra.mxu1 %v5667_v20  ;;  %v5802_v20 = vld [vmem:[#allocation11 + $0x128] sm:$0xff] }
  0x9d   :  { %951 = vmatprep.subr.mxu0 %v5774_v11  ;;  %1022 = vmatprep.subr.mxu1 %v5776_v30 }
  0x9e   :  { %952 = vmatpush1.msra.mxu0 %v5780_v31  ;;  %1023 = vmatpush1.msra.mxu1 %v5782_v32 }
  0x9f   :  { %953 = vmatprep.subr.mxu0 %v5786_v33  ;;  %1024 = vmatprep.subr.mxu1 %v5788_v34 }
  0xa0   :  { %634 = vmatprep.mubr.f32.mxu0 %v8569_v0  ;;  %747 = vmatprep.mubr.f32.mxu1 %v8569_v0 }
  0xa1   :  { %954 = vmatpush1.msra.mxu0 %v5794_v35  ;;  %1025 = vmatpush1.msra.mxu1 %v5796_v36 }
  0xa2   :  { %635 = vmatmul.mubr.f32.gmra.mxu0 %v5676_v29  ;;  %748 = vmatmul.mubr.f32.gmra.mxu1 %v5676_v29  ;;  %v5830_v29 = vld [vmem:[#allocation11 + $0xe8] sm:$0xff] }
  0xa3   :  { %955 = vmatprep.subr.mxu0 %v5802_v20  ;;  %1026 = vmatprep.subr.mxu1 %v5804_v37 }
  0xa4   :  { %956 = vmatpush1.msra.mxu0 %v5808_v39  ;;  %1027 = vmatpush1.msra.mxu1 %v5810_v40 }
  0xa5   :  { %957 = vmatprep.subr.mxu0 %v5814_v41  ;;  %1028 = vmatprep.subr.mxu1 %v5816_v42 }
  0xa6   :  { %640 = vmatprep.mubr.f32.mxu0 %v8569_v0  ;;  %753 = vmatprep.mubr.f32.mxu1 %v8569_v0 }
  0xa7   :  { %958 = vmatpush1.msra.mxu0 %v5822_v43  ;;  %1029 = vmatpush1.msra.mxu1 %v5824_v44 }
  0xa8   :  { %641 = vmatmul.mubr.f32.gmra.mxu0 %v5685_v38  ;;  %754 = vmatmul.mubr.f32.gmra.mxu1 %v5685_v38  ;;  %v5858_v38 = vld [vmem:[#allocation11 + $0xa8] sm:$0xff] }
  0xa9   :  { %959 = vmatprep.subr.mxu0 %v5830_v29  ;;  %1030 = vmatprep.subr.mxu1 %v5832_v45 }
  0xaa   :  { %960 = vmatpush1.msra.mxu0 %v5836_v46  ;;  %1031 = vmatpush1.msra.mxu1 %v5838_v48 }
  0xab   :  { %961 = vmatprep.subr.mxu0 %v5842_v49  ;;  %1032 = vmatprep.subr.mxu1 %v5844_v50 }
  0xac   :  { %646 = vmatprep.mubr.f32.mxu0 %v8569_v0  ;;  %759 = vmatprep.mubr.f32.mxu1 %v8569_v0 }
  0xad   :  { %962 = vmatpush1.msra.mxu0 %v5850_v51  ;;  %1033 = vmatpush1.msra.mxu1 %v5852_v52 }
  0xae   :  { %647 = vmatmul.mubr.f32.gmra.mxu0 %v5694_v47  ;;  %760 = vmatmul.mubr.f32.gmra.mxu1 %v5694_v47  ;;  %v5886_v47 = vld [vmem:[#allocation11 + $0x68] sm:$0xff] }
  0xaf   :  { %963 = vmatprep.subr.mxu0 %v5858_v38  ;;  %1034 = vmatprep.subr.mxu1 %v5860_v53 }
  0xb0   :  { %964 = vmatpush1.msra.mxu0 %v5864_v54  ;;  %1035 = vmatpush1.msra.mxu1 %v5866_v55 }
  0xb1   :  { %965 = vmatprep.subr.mxu0 %v5870_v57  ;;  %1036 = vmatprep.subr.mxu1 %v5872_v58 }
  0xb2   :  { %652 = vmatprep.mubr.f32.mxu0 %v8569_v0  ;;  %765 = vmatprep.mubr.f32.mxu1 %v8569_v0 }
  0xb3   :  { %966 = vmatpush1.msra.mxu0 %v5878_v59  ;;  %1037 = vmatpush1.msra.mxu1 %v5880_v60 }
  0xb4   :  { %653 = vmatmul.mubr.f32.gmra.mxu0 %v5703_v56  ;;  %766 = vmatmul.mubr.f32.gmra.mxu1 %v5703_v56  ;;  %v5914_v56 = vld [vmem:[#allocation11 + $0x28] sm:$0xff] }
  0xb5   :  { %967 = vmatprep.subr.mxu0 %v5886_v47  ;;  %1038 = vmatprep.subr.mxu1 %v5888_v61  ;;  %8995 = vst [vmem:[#allocation27_spill] sm:$0xff] %v5914_v56 }
  0xb6   :  { %968 = vmatpush1.msra.mxu0 %v5892_v62  ;;  %1039 = vmatpush1.msra.mxu1 %v5894_v63 }
  0xb7   :  { %969 = vmatprep.subr.mxu0 %v5898_v1  ;;  %1040 = vmatprep.subr.mxu1 %v5900_v4  ;;  %v5968_v4 = vld [vmem:[#allocation12 + $0x1b8] sm:$0xff]  ;;  %v5972_v1 = vld [vmem:[#allocation12 + $0x1a0] sm:$0xff] }
  0xb8   :  { %658 = vmatprep.mubr.f32.mxu0 %v8569_v0  ;;  %771 = vmatprep.mubr.f32.mxu1 %v8569_v0  ;;  %v5932_v0 = vld [vmem:[#allocation11] sm:$0xff]  ;;  %9013 = vst [vmem:[#allocation44_spill] sm:$0xff] %v5968_v4  ;;  %9014 = vst [vmem:[#allocation45_spill] sm:$0xff] %v5972_v1 }
  0xb9   :  { %970 = vmatpush1.msra.mxu0 %v5906_v5  ;;  %1041 = vmatpush1.msra.mxu1 %v5908_v6  ;;  %9001 = vst [vmem:[#allocation33_spill] sm:$0xff] %v5932_v0  ;;  %v5936_v6 = vld [vmem:[#allocation11 + $0x10] sm:$0xff]  ;;  %v5942_v5 = vld [vmem:[#allocation12 + $0x1e8] sm:$0xff] }
  0xba   :  { %659 = vmatmul.mubr.f32.gmra.mxu0 %v5712_v3  ;;  %772 = vmatmul.mubr.f32.gmra.mxu1 %v5712_v3  ;;  %9002 = vst [vmem:[#allocation34_spill] sm:$0xff] %v5936_v6  ;;  %v9003_v3 = vmov 0.0   ;;  %9004 = vst [vmem:[#allocation35_spill] sm:$0xff] %v5942_v5 }
  0xbb   :  { %971 = vmatprep.subr.mxu0 %v5914_v56  ;;  %1042 = vmatprep.subr.mxu1 %v5916_v7  ;;  %v5944_v56 = vld [vmem:[#allocation12 + $0x1f8] sm:$0xff]  ;;  %v5966_v7 = vld [vmem:[#allocation12 + $0x1a8] sm:$0xff] }
  0xbc   :  { %972 = vmatpush1.msra.mxu0 %v5920_v8  ;;  %1043 = vmatpush1.msra.mxu1 %v5922_v9  ;;  %9005 = vst [vmem:[#allocation36_spill] sm:$0xff] %v5944_v56  ;;  %v5948_v8 = vld [vmem:[#allocation12 + $0x1e0] sm:$0xff]  ;;  %v5950_v9 = vld [vmem:[#allocation12 + $0x1f0] sm:$0xff]  ;;  %9012 = vst [vmem:[#allocation43_spill] sm:$0xff] %v5966_v7 }
  0xbd   :  { %973 = vmatprep.subr.mxu0 %v5926_v10  ;;  %1044 = vmatprep.subr.mxu1 %v5928_v12  ;;  %9006 = vst [vmem:[#allocation37_spill] sm:$0xff] %v5948_v8  ;;  %9007 = vst [vmem:[#allocation38_spill] sm:$0xff] %v5950_v9  ;;  %v5954_v12 = vld [vmem:[#allocation12 + $0x1c8] sm:$0xff]  ;;  %v5960_v10 = vld [vmem:[#allocation12 + $0x1c0] sm:$0xff] }
  0xbe   :  { %974 = vmatpush1.msra.mxu0 %v5932_v0  ;;  %1007 = vmatprep.mubr.f32.mxu0 %v9003_v3  ;;  %9008 = vst [vmem:[#allocation39_spill] sm:$0xff] %v5954_v12  ;;  %v5956_v0 = vld [vmem:[#allocation12 + $0x1d8] sm:$0xff]  ;;  %9010 = vst [vmem:[#allocation41_spill] sm:$0xff] %v5960_v10 }
  0xbf   :  { %1045 = vmatpush1.msra.mxu1 %v5936_v6  ;;  %1078 = vmatprep.mubr.f32.mxu1 %v9003_v3  ;;  %9009 = vst [vmem:[#allocation40_spill] sm:$0xff] %v5956_v0  ;;  %v5962_v6 = vld [vmem:[#allocation12 + $0x1d0] sm:$0xff] }
  0xc0   :  { %1008 = vmatmul.mubr.f32.vlgmr.msra.gmra.mxu0 %v9003_v3  ;;  %1079 = vmatmul.mubr.f32.vlgmr.msra.gmra.mxu1 %v9003_v3  ;;  %9011 = vst [vmem:[#allocation42_spill] sm:$0xff] %v5962_v6 }
  0xc1   :  { %1094 = vmatprep.subr.mxu0 %v5942_v5  ;;  %1165 = vmatprep.subr.mxu1 %v5944_v56  ;;  %v5974_v5 = vld [vmem:[#allocation12 + $0x1b0] sm:$0xff]  ;;  %v5978_v56 = vld [vmem:[#allocation12 + $0x188] sm:$0xff] }
  0xc2   :  { %1095 = vmatpush1.msra.mxu0 %v5948_v8  ;;  %1166 = vmatpush1.msra.mxu1 %v5950_v9  ;;  %9015 = vst [vmem:[#allocation46_spill] sm:$0xff] %v5974_v5  ;;  %9016 = vst [vmem:[#allocation47_spill] sm:$0xff] %v5978_v56  ;;  %v5980_v8 = vld [vmem:[#allocation12 + $0x198] sm:$0xff]  ;;  %v5984_v9 = vld [vmem:[#allocation12 + $0x180] sm:$0xff] }
  0xc3   :  { %1096 = vmatprep.subr.mxu0 %v5954_v12  ;;  %1167 = vmatprep.subr.mxu1 %v5956_v0  ;;  %9017 = vst [vmem:[#allocation48_spill] sm:$0xff] %v5980_v8  ;;  %9018 = vst [vmem:[#allocation49_spill] sm:$0xff] %v5984_v9  ;;  %v5986_v12 = vld [vmem:[#allocation12 + $0x190] sm:$0xff]  ;;  %v5990_v0 = vld [vmem:[#allocation12 + $0x168] sm:$0xff] }
  0xc4   :  { %1097 = vmatpush1.msra.mxu0 %v5960_v10  ;;  %1168 = vmatpush1.msra.mxu1 %v5962_v6  ;;  %9019 = vst [vmem:[#allocation50_spill] sm:$0xff] %v5986_v12  ;;  %9020 = vst [vmem:[#allocation51_spill] sm:$0xff] %v5990_v0  ;;  %v5992_v10 = vld [vmem:[#allocation12 + $0x178] sm:$0xff]  ;;  %v5996_v6 = vld [vmem:[#allocation12 + $0x160] sm:$0xff] }
  0xc5   :  { %1098 = vmatprep.subr.mxu0 %v5966_v7  ;;  %1169 = vmatprep.subr.mxu1 %v5968_v4  ;;  %9021 = vst [vmem:[#allocation52_spill] sm:$0xff] %v5992_v10  ;;  %9022 = vst [vmem:[#allocation53_spill] sm:$0xff] %v5996_v6  ;;  %v5998_v7 = vld [vmem:[#allocation12 + $0x170] sm:$0xff]  ;;  %v6002_v4 = vld [vmem:[#allocation12 + $0x148] sm:$0xff] }
  0xc6   :  { %1099 = vmatpush1.msra.mxu0 %v5972_v1  ;;  %1170 = vmatpush1.msra.mxu1 %v5974_v5  ;;  %9023 = vst [vmem:[#allocation54_spill] sm:$0xff] %v5998_v7  ;;  %9024 = vst [vmem:[#allocation55_spill] sm:$0xff] %v6002_v4  ;;  %v6004_v1 = vld [vmem:[#allocation12 + $0x158] sm:$0xff]  ;;  %v6008_v5 = vld [vmem:[#allocation12 + $0x140] sm:$0xff] }
  0xc7   :  { %1100 = vmatprep.subr.mxu0 %v5978_v56  ;;  %1171 = vmatprep.subr.mxu1 %v5980_v8  ;;  %9025 = vst [vmem:[#allocation56_spill] sm:$0xff] %v6004_v1  ;;  %9026 = vst [vmem:[#allocation57_spill] sm:$0xff] %v6008_v5  ;;  %v6010_v56 = vld [vmem:[#allocation12 + $0x150] sm:$0xff]  ;;  %v6014_v8 = vld [vmem:[#allocation12 + $0x128] sm:$0xff] }
  0xc8   :  { %1101 = vmatpush1.msra.mxu0 %v5984_v9  ;;  %1172 = vmatpush1.msra.mxu1 %v5986_v12  ;;  %9027 = vst [vmem:[#allocation58_spill] sm:$0xff] %v6010_v56  ;;  %9028 = vst [vmem:[#allocation59_spill] sm:$0xff] %v6014_v8  ;;  %v6016_v9 = vld [vmem:[#allocation12 + $0x138] sm:$0xff]  ;;  %v6020_v12 = vld [vmem:[#allocation12 + $0x120] sm:$0xff] }
  0xc9   :  { %1102 = vmatprep.subr.mxu0 %v5990_v0  ;;  %1173 = vmatprep.subr.mxu1 %v5992_v10  ;;  %9029 = vst [vmem:[#allocation60_spill] sm:$0xff] %v6016_v9  ;;  %9030 = vst [vmem:[#allocation61_spill] sm:$0xff] %v6020_v12  ;;  %v6022_v0 = vld [vmem:[#allocation12 + $0x130] sm:$0xff]  ;;  %v6026_v10 = vld [vmem:[#allocation12 + $0x108] sm:$0xff] }
  0xca   :  { %1103 = vmatpush1.msra.mxu0 %v5996_v6  ;;  %1174 = vmatpush1.msra.mxu1 %v5998_v7  ;;  %9031 = vst [vmem:[#allocation62_spill] sm:$0xff] %v6022_v0  ;;  %9032 = vst [vmem:[#allocation63_spill] sm:$0xff] %v6026_v10  ;;  %v6028_v6 = vld [vmem:[#allocation12 + $0x118] sm:$0xff]  ;;  %v6032_v7 = vld [vmem:[#allocation12 + $0x100] sm:$0xff] }
  0xcb   :  { %1104 = vmatprep.subr.mxu0 %v6002_v4  ;;  %1175 = vmatprep.subr.mxu1 %v6004_v1  ;;  %9033 = vst [vmem:[#allocation64_spill] sm:$0xff] %v6028_v6  ;;  %9034 = vst [vmem:[#allocation65_spill] sm:$0xff] %v6032_v7  ;;  %v6034_v4 = vld [vmem:[#allocation12 + $0x110] sm:$0xff]  ;;  %v6038_v1 = vld [vmem:[#allocation12 + $0xe8] sm:$0xff] }
  0xcc   :  { %1105 = vmatpush1.msra.mxu0 %v6008_v5  ;;  %1176 = vmatpush1.msra.mxu1 %v6010_v56  ;;  %9035 = vst [vmem:[#allocation66_spill] sm:$0xff] %v6034_v4  ;;  %9036 = vst [vmem:[#allocation67_spill] sm:$0xff] %v6038_v1  ;;  %v6040_v5 = vld [vmem:[#allocation12 + $0xf8] sm:$0xff]  ;;  %v6044_v56 = vld [vmem:[#allocation12 + $0xe0] sm:$0xff] }
  0xcd   :  { %1106 = vmatprep.subr.mxu0 %v6014_v8  ;;  %1177 = vmatprep.subr.mxu1 %v6016_v9  ;;  %9037 = vst [vmem:[#allocation68_spill] sm:$0xff] %v6040_v5  ;;  %9038 = vst [vmem:[#allocation69_spill] sm:$0xff] %v6044_v56  ;;  %v6046_v8 = vld [vmem:[#allocation12 + $0xf0] sm:$0xff]  ;;  %v6050_v9 = vld [vmem:[#allocation12 + $0xc8] sm:$0xff] }
  0xce   :  { %1107 = vmatpush1.msra.mxu0 %v6020_v12  ;;  %1178 = vmatpush1.msra.mxu1 %v6022_v0  ;;  %9039 = vst [vmem:[#allocation70_spill] sm:$0xff] %v6046_v8  ;;  %9040 = vst [vmem:[#allocation71_spill] sm:$0xff] %v6050_v9  ;;  %v6052_v12 = vld [vmem:[#allocation12 + $0xd8] sm:$0xff]  ;;  %v6056_v0 = vld [vmem:[#allocation12 + $0xc0] sm:$0xff] }
  0xcf   :  { %1108 = vmatprep.subr.mxu0 %v6026_v10  ;;  %1179 = vmatprep.subr.mxu1 %v6028_v6  ;;  %9041 = vst [vmem:[#allocation72_spill] sm:$0xff] %v6052_v12  ;;  %9042 = vst [vmem:[#allocation73_spill] sm:$0xff] %v6056_v0  ;;  %v6058_v10 = vld [vmem:[#allocation12 + $0xd0] sm:$0xff]  ;;  %v6062_v6 = vld [vmem:[#allocation12 + $0xa8] sm:$0xff] }
  0xd0   :  { %1109 = vmatpush1.msra.mxu0 %v6032_v7  ;;  %1180 = vmatpush1.msra.mxu1 %v6034_v4  ;;  %9043 = vst [vmem:[#allocation74_spill] sm:$0xff] %v6058_v10  ;;  %9044 = vst [vmem:[#allocation75_spill] sm:$0xff] %v6062_v6  ;;  %v6064_v7 = vld [vmem:[#allocation12 + $0xb8] sm:$0xff]  ;;  %v6068_v4 = vld [vmem:[#allocation12 + $0xa0] sm:$0xff] }
  0xd1   :  { %1110 = vmatprep.subr.mxu0 %v6038_v1  ;;  %1181 = vmatprep.subr.mxu1 %v6040_v5  ;;  %9045 = vst [vmem:[#allocation76_spill] sm:$0xff] %v6064_v7  ;;  %9046 = vst [vmem:[#allocation77_spill] sm:$0xff] %v6068_v4  ;;  %v6070_v1 = vld [vmem:[#allocation12 + $0xb0] sm:$0xff]  ;;  %v6074_v5 = vld [vmem:[#allocation12 + $0x88] sm:$0xff] }
  0xd2   :  { %1111 = vmatpush1.msra.mxu0 %v6044_v56  ;;  %1182 = vmatpush1.msra.mxu1 %v6046_v8  ;;  %9047 = vst [vmem:[#allocation78_spill] sm:$0xff] %v6070_v1  ;;  %9048 = vst [vmem:[#allocation79_spill] sm:$0xff] %v6074_v5  ;;  %v6076_v56 = vld [vmem:[#allocation12 + $0x98] sm:$0xff]  ;;  %v6080_v8 = vld [vmem:[#allocation12 + $0x80] sm:$0xff] }
  0xd3   :  { %1112 = vmatprep.subr.mxu0 %v6050_v9  ;;  %1183 = vmatprep.subr.mxu1 %v6052_v12  ;;  %9049 = vst [vmem:[#allocation80_spill] sm:$0xff] %v6076_v56  ;;  %9050 = vst [vmem:[#allocation81_spill] sm:$0xff] %v6080_v8  ;;  %v6082_v9 = vld [vmem:[#allocation12 + $0x90] sm:$0xff]  ;;  %v6086_v12 = vld [vmem:[#allocation12 + $0x68] sm:$0xff] }
  0xd4   :  { %1113 = vmatpush1.msra.mxu0 %v6056_v0  ;;  %1184 = vmatpush1.msra.mxu1 %v6058_v10  ;;  %9051 = vst [vmem:[#allocation82_spill] sm:$0xff] %v6082_v9  ;;  %9052 = vst [vmem:[#allocation83_spill] sm:$0xff] %v6086_v12  ;;  %v6088_v0 = vld [vmem:[#allocation12 + $0x78] sm:$0xff]  ;;  %v6092_v10 = vld [vmem:[#allocation12 + $0x60] sm:$0xff] }
  0xd5   :  { %1114 = vmatprep.subr.mxu0 %v6062_v6  ;;  %1185 = vmatprep.subr.mxu1 %v6064_v7  ;;  %9053 = vst [vmem:[#allocation84_spill] sm:$0xff] %v6088_v0  ;;  %9054 = vst [vmem:[#allocation85_spill] sm:$0xff] %v6092_v10  ;;  %v6094_v6 = vld [vmem:[#allocation12 + $0x70] sm:$0xff]  ;;  %v6098_v7 = vld [vmem:[#allocation12 + $0x48] sm:$0xff] }
  0xd6   :  { %1115 = vmatpush1.msra.mxu0 %v6068_v4  ;;  %1186 = vmatpush1.msra.mxu1 %v6070_v1  ;;  %9055 = vst [vmem:[#allocation86_spill] sm:$0xff] %v6094_v6  ;;  %9056 = vst [vmem:[#allocation87_spill] sm:$0xff] %v6098_v7  ;;  %v6100_v4 = vld [vmem:[#allocation12 + $0x58] sm:$0xff]  ;;  %v6104_v1 = vld [vmem:[#allocation12 + $0x40] sm:$0xff] }
  0xd7   :  { %1116 = vmatprep.subr.mxu0 %v6074_v5  ;;  %1187 = vmatprep.subr.mxu1 %v6076_v56  ;;  %9057 = vst [vmem:[#allocation88_spill] sm:$0xff] %v6100_v4  ;;  %v6106_v5 = vld [vmem:[#allocation12 + $0x50] sm:$0xff]  ;;  %v6110_v56 = vld [vmem:[#allocation12 + $0x28] sm:$0xff] }
  0xd8   :  { %1117 = vmatpush1.msra.mxu0 %v6080_v8  ;;  %1188 = vmatpush1.msra.mxu1 %v6082_v9  ;;  %v6112_v8 = vld [vmem:[#allocation12 + $0x38] sm:$0xff]  ;;  %v6116_v9 = vld [vmem:[#allocation12 + $0x20] sm:$0xff] }
  0xd9   :  { %1118 = vmatprep.subr.mxu0 %v6086_v12  ;;  %1189 = vmatprep.subr.mxu1 %v6088_v0  ;;  %9058 = vst [vmem:[#allocation89_spill] sm:$0xff] %v6112_v8  ;;  %9059 = vst [vmem:[#allocation90_spill] sm:$0xff] %v6116_v9  ;;  %v6118_v12 = vld [vmem:[#allocation12 + $0x30] sm:$0xff]  ;;  %v6123_v0 = vld [vmem:[%s8555_s1] sm:$0xff]  ;;  %s4566_s1 = sshll.u32 %s5542_s21, 4  ;;  %s4567_s1 = int_to_ptr.vmem [resolvable:$true] %s4566_s1 }
  0xda   :  { %1119 = vmatpush1.msra.mxu0 %v6092_v10  ;;  %1190 = vmatpush1.msra.mxu1 %v6094_v6  ;;  %9060 = vst [vmem:[#allocation91_spill] sm:$0xff] %v6118_v12  ;;  %v6127_v6 = vld [vmem:[#allocation12 + $0x8] sm:$0xff]  ;;  %v6129_v10 = vld [vmem:[#allocation12 + $0x18] sm:$0xff]  ;;  %vm1288_vm0 = vcmp.gt.s32.totalorder %v6123_v0, 0  ;;  %vm1671_vm1 = vcmp.gt.s32.totalorder %v6123_v0, 1  ;;  %vm1289_vm2 = vcmp.gt.s32.totalorder %v6123_v0, 7  ;;  %p5486_p12 = scmp.lt.s32.totalorder %s4567_s1, %s4567_s1 }
  0xdb   :  { %1120 = vmatprep.subr.mxu0 %v6098_v7  ;;  %1191 = vmatprep.subr.mxu1 %v6100_v4  ;;  %v6133_v4 = vld [vmem:[#allocation12] sm:$0xff]  ;;  %v6137_v7 = vld [vmem:[#allocation12 + $0x10] sm:$0xff]  ;;  %vm1672_vm3 = vcmp.gt.s32.totalorder %v6123_v0, 6  ;;  %vm2055_vm4 = vcmp.gt.s32.totalorder %v6123_v0, 2  ;;  %vm2056_vm5 = vcmp.gt.s32.totalorder %v6123_v0, 5  ;;  %vm2439_vm6 = vcmp.gt.s32.totalorder %v6123_v0, 3 }
  0xdc   :  { %1121 = vmatpush1.msra.mxu0 %v6104_v1  ;;  %1192 = vmatpush1.msra.mxu1 %v6106_v5  ;;  %9061 = vst [vmem:[#allocation92_spill] sm:$0xff] %v6133_v4  ;;  %9062 = vst [vmem:[#allocation93_spill] sm:$0xff] %v6137_v7  ;;  %vm2440_vm7 = vcmp.gt.s32.totalorder %v6123_v0, 4  ;;  %v4394_v0 = vld [vmem:[%s8556_s2 + $0x8] sm:$0xff]  ;;  %s5481_s8 = scalar_lea.vmem %s4567_s1, 16 }
  0xdd   :  { %1122 = vmatprep.subr.mxu0 %v6110_v56  ;;  %1193 = vmatprep.subr.mxu1 %v6112_v8  ;;  %p5482_p11 = scmp.ne.s32.totalorder %s4567_s1, %s5481_s8 }
  0xde   :  { %1123 = vmatpush1.msra.mxu0 %v6116_v9  ;;  %1194 = vmatpush1.msra.mxu1 %v6118_v12  ;;  %v5541_v9 = vmov 0  }
  0xdf   :  { %1124 = vmatprep.subr.mxu0 %v6127_v6  ;;  %1195 = vmatprep.subr.mxu1 %v6129_v10  ;;  %v1290_v12 = vsel %vm1288_vm0, 1, %v5541_v9  ;;  %v1673_v8 = vsel %vm1671_vm1, 1, %v5541_v9 }
  0xe0   :  { %1125 = vmatpush1.msra.mxu0 %v6133_v4  ;;  %1158 = vmatprep.mubr.f32.mxu0 %v9003_v3  ;;  %v1680_v4 = vsel %vm1672_vm3, 1, %v5541_v9 }
  0xe1   :  { %1196 = vmatpush1.msra.mxu1 %v6137_v7  ;;  %1229 = vmatprep.mubr.f32.mxu1 %v9003_v3  ;;  %v1297_v7 = vsel %vm1289_vm2, 1, %v5541_v9 }
  0xe2   :  { %1159 = vmatmul.mubr.f32.vlgmr.msra.gmra.mxu0 %v9003_v3  ;;  %1230 = vmatmul.mubr.f32.vlgmr.msra.gmra.mxu1 %v9003_v3 }
  0xe3   :  { %4815 = vset.pattern.permute.xlu0 %v5541_v9  ;;  %4816 = vset.pattern.permute.xlu1 %v5541_v9 }
  0xe4   :  { %1292 = vperm.xlu0 %4815, %v1290_v12   ;;  %1675 = vperm.xlu1 %4816, %v1673_v8   ;;  %v2057_v8 = vsel %vm2055_vm4, 1, %v5541_v9 }
  0xe5   :  { %1326 = vmatprep.subr.mxu0 %v5719_v13  ;;  %1397 = vmatprep.subr.mxu1 %v5721_v14  ;;  %v2064_v13 = vsel %vm2056_vm5, 1, %v5541_v9  ;;  %v4599_v14 = vsel %vm1288_vm0, 1.0, %v9003_v3 }
  0xe6   :  { %1327 = vmatpush1.msra.mxu0 %v5724_v15  ;;  %1398 = vmatpush1.msra.mxu1 %v5726_v16  ;;  %v4611_v15 = vsel %vm1671_vm1, 1.0, %v9003_v3  ;;  %v4619_v16 = vsel %vm2055_vm4, 1.0, %v9003_v3 }
  0xe7   :  { %1328 = vmatprep.subr.mxu0 %v5730_v17  ;;  %1399 = vmatprep.subr.mxu1 %v5732_v18  ;;  %v2441_v17 = vsel %vm2439_vm6, 1, %v5541_v9  ;;  %v4627_v18 = vsel %vm2439_vm6, 1.0, %v9003_v3 }
  0xe8   :  { %1299 = vperm.xlu0 %4815, %v1297_v7   ;;  %1682 = vperm.xlu1 %4816, %v1680_v4  }
  0xe9   :  { %1329 = vmatpush1.msra.mxu0 %v5738_v19  ;;  %1400 = vmatpush1.msra.mxu1 %v5740_v21  ;;  %v2448_v19 = vsel %vm2440_vm7, 1, %v5541_v9  ;;  %v4817_v21 = vpack.i.bf16 %v4611_v15, %v4599_v14 }
  0xea   :  { %1330 = vmatprep.subr.mxu0 %v5746_v2  ;;  %1401 = vmatprep.subr.mxu1 %v5748_v22  ;;  %v4822_v2 = vpack.i.bf16 %v4627_v18, %v4619_v16  ;;  %v4600_v22 = vsel %vm1289_vm2, 1.0, %v9003_v3 }
  0xeb   :  { %1331 = vmatpush1.msra.mxu0 %v5752_v23  ;;  %1402 = vmatpush1.msra.mxu1 %v5754_v24  ;;  %v4620_v23 = vsel %vm2056_vm5, 1.0, %v9003_v3  ;;  %v4628_v24 = vsel %vm2440_vm7, 1.0, %v9003_v3 }
  0xec   :  { %2059 = vperm.xlu0 %4815, %v2057_v8   ;;  %2066 = vperm.xlu1 %4816, %v2064_v13  }
  0xed   :  { %1332 = vmatprep.subr.mxu0 %v5758_v25  ;;  %1403 = vmatprep.subr.mxu1 %v5760_v26  ;;  %v4612_v25 = vsel %vm1672_vm3, 1.0, %v9003_v3  ;;  %v4827_v26 = vpack.i.bf16 %v4620_v23, %v4628_v24  ;;  %vm4328_vm3 = vcmask 7168  }
  0xee   :  { %1333 = vmatpush1.msra.mxu0 %v5766_v27  ;;  %1404 = vmatpush1.msra.mxu1 %v5768_v28  ;;  %v4832_v27 = vpack.i.bf16 %v4600_v22, %v4612_v25  ;;  %v4397_v28 = vld [vmem:[%s8556_s2 + $0x20] sm:$0xff] }
  0xef   :  { %1334 = vmatprep.subr.mxu0 %v5774_v11  ;;  %1405 = vmatprep.subr.mxu1 %v5776_v30  ;;  %v9063_v11 = vld [vmem:[#allocation23_spill] sm:$0xff]  ;;  %v9064_v30 = vld [vmem:[#allocation24_spill] sm:$0xff] }
  0xf0   :  { %2443 = vperm.xlu0 %4815, %v2441_v17   ;;  %2450 = vperm.xlu1 %4816, %v2448_v19  }
  0xf1   :  { %1335 = vmatpush1.msra.mxu0 %v5780_v31  ;;  %1406 = vmatpush1.msra.mxu1 %v5782_v32  ;;  %v9065_v31 = vld [vmem:[#allocation25_spill] sm:$0xff]  ;;  %v9066_v32 = vld [vmem:[#allocation26_spill] sm:$0xff] }
  0xf2   :  { %1336 = vmatprep.subr.mxu0 %v5786_v33  ;;  %1407 = vmatprep.subr.mxu1 %v5788_v34  ;;  %v9067_v33 = vld [vmem:[#allocation27_spill] sm:$0xff]  ;;  %v9068_v34 = vld [vmem:[#allocation28_spill] sm:$0xff] }
  0xf3   :  { %1337 = vmatpush1.msra.mxu0 %v5794_v35  ;;  %1408 = vmatpush1.msra.mxu1 %v5796_v36  ;;  %v9069_v35 = vld [vmem:[#allocation29_spill] sm:$0xff]  ;;  %v9070_v36 = vld [vmem:[#allocation30_spill] sm:$0xff] }
  0xf4   :  { %4818 = vperm.xlu0 %4815, %v4817_v21   ;;  %4823 = vperm.xlu1 %4816, %v4822_v2  }
  0xf5   :  { %1338 = vmatprep.subr.mxu0 %v5802_v20  ;;  %1409 = vmatprep.subr.mxu1 %v5804_v37  ;;  %v9071_v20 = vld [vmem:[#allocation31_spill] sm:$0xff]  ;;  %v9072_v37 = vld [vmem:[#allocation32_spill] sm:$0xff] }
  0xf6   :  { %1339 = vmatpush1.msra.mxu0 %v5808_v39  ;;  %1410 = vmatpush1.msra.mxu1 %v5810_v40  ;;  %v9073_v39 = vld [vmem:[#allocation33_spill] sm:$0xff]  ;;  %v9074_v40 = vld [vmem:[#allocation34_spill] sm:$0xff] }
  0xf7   :  { %1340 = vmatprep.subr.mxu0 %v5814_v41  ;;  %1411 = vmatprep.subr.mxu1 %v5816_v42  ;;  %v9075_v41 = vld [vmem:[#allocation35_spill] sm:$0xff]  ;;  %v9076_v42 = vld [vmem:[#allocation36_spill] sm:$0xff] }
  0xf8   :  { %4828 = vperm.xlu0 %4815, %v4827_v26   ;;  %4833 = vperm.xlu1 %4816, %v4832_v27  }
  0xf9   :  { %1341 = vmatpush1.msra.mxu0 %v5822_v43  ;;  %1412 = vmatpush1.msra.mxu1 %v5824_v44  ;;  %v8642_v43 = vlaneseq }
  0xfa   :  { %1342 = vmatprep.subr.mxu0 %v5830_v29  ;;  %1413 = vmatprep.subr.mxu1 %v5832_v45 }
  0xfb   :  { %1343 = vmatpush1.msra.mxu0 %v5836_v46  ;;  %1414 = vmatpush1.msra.mxu1 %v5838_v48  ;;  %v6266_v44 = vshrl.u32 %v8642_v43, 7 }
  0xfc   :  { %4405 = vperm.xlu0 %4815, %v4394_v0   ;;  %1344 = vmatprep.subr.mxu0 %v5842_v49  ;;  %v186_v49 = vld [vmem:[%s8559_s5] sm:$0xf]  ;;  %s5485_s5 = scalar_lea.vmem %s4567_s1, 32 }
  0xfd   :  { %1415 = vmatprep.subr.mxu1 %v5844_v50  ;;  %1345 = vmatpush1.msra.mxu0 %v5850_v51  ;;  %v190_v46 = vsub.s32 0, %v6266_v44  ;;  %v198_v48 = vsub.s32 2, %v6266_v44  ;;  %p5487_p13 = scmp.lt.s32.totalorder %s5485_s5, %s5481_s8 }
  0xfe   :  { %1416 = vmatpush1.msra.mxu1 %v5852_v52  ;;  %1346 = vmatprep.subr.mxu0 %v5858_v38  ;;  %v194_v52 = vsub.s32 1, %v6266_v44  ;;  %v202_v38 = vsub.s32 3, %v6266_v44 }
  0xff   :  { %1417 = vmatprep.subr.mxu1 %v5860_v53  ;;  %1347 = vmatpush1.msra.mxu0 %v5864_v54  ;;  %v6285_v53 = vrot.slane %v186_v49, %v190_v46  ;;  %v6289_v54 = vrot.slane %v186_v49, %v198_v48  ;;  %p5488_p0 = por %p5487_p13, %p5486_p12 }
 0x100   :  { %4414 = vperm.xlu0 %4815, %v4397_v28   ;;  %1418 = vmatpush1.msra.mxu1 %v5866_v55 }
 0x101   :  { %1348 = vmatprep.subr.mxu0 %v5870_v57  ;;  %1419 = vmatprep.subr.mxu1 %v5872_v58  ;;  %v6293_v58 = vrot.slane %v186_v49, %v194_v52  ;;  %p5489_p1 = pnand %p5488_p0, %p5482_p11 }
 0x102   :  { %1349 = vmatpush1.msra.mxu0 %v5878_v59  ;;  %1420 = vmatpush1.msra.mxu1 %v5880_v60  ;;  %v6297_v59 = vrot.slane %v186_v49, %v202_v38 }
 0x103   :  { %1350 = vmatprep.subr.mxu0 %v5886_v47  ;;  %1421 = vmatprep.subr.mxu1 %v5888_v61 }
 0x104   :  { %1351 = vmatpush1.msra.mxu0 %v5892_v62  ;;  %1422 = vmatpush1.msra.mxu1 %v5894_v63 }
 0x105   :  { %1352 = vmatprep.subr.mxu0 %v9063_v11  ;;  %1423 = vmatprep.subr.mxu1 %v9064_v30 }
 0x106   :  { %1353 = vmatpush1.msra.mxu0 %v9065_v31  ;;  %1424 = vmatpush1.msra.mxu1 %v9066_v32 }
 0x107   :  { %1354 = vmatprep.subr.mxu0 %v9067_v33  ;;  %1425 = vmatprep.subr.mxu1 %v9068_v34 }
 0x108   :  { %1355 = vmatpush1.msra.mxu0 %v9069_v35  ;;  %1426 = vmatpush1.msra.mxu1 %v9070_v36 }
 0x109   :  { %1356 = vmatprep.subr.mxu0 %v9071_v20  ;;  %1427 = vmatprep.subr.mxu1 %v9072_v37 }
 0x10a   :  { %1357 = vmatpush1.msra.mxu0 %v9073_v39  ;;  %1390 = vmatprep.mubr.f32.mxu0 %v9003_v3 }
 0x10b   :  { %1428 = vmatpush1.msra.mxu1 %v9074_v40  ;;  %1461 = vmatprep.mubr.f32.mxu1 %v9003_v3 }
 0x10c   :  { %1477 = vmatprep.subr.mxu0 %v9075_v41  ;;  %1548 = vmatprep.subr.mxu1 %v9076_v42 }
 0x120   :  { %v6268_v29 = vpop.f32.mrf.mxu0  ;;  %v6270_v45 = vpop.f32.mrf.mxu1 }
 0x122   :  { %v6277_v50 = vpop.f32.mrf.mxu0  ;;  %v6279_v51 = vpop.f32.mrf.mxu1 }
 0x126   :  { %v280_v55 = vpop.f32.mrf.mxu0  ;;  %v393_v57 = vpop.f32.mrf.mxu1 }
 0x127   :  { %v6300_v60 = vadd.f32 %v280_v55, %v6285_v53  ;;  %v6303_v47 = vadd.f32 %v393_v57, %v6289_v54 }
 0x128   :  { %v282_v61 = vpop.f32.mrf.mxu0  ;;  %v395_v62 = vpop.f32.mrf.mxu1 }
 0x129   :  { %v6306_v63 = vadd.f32 %v282_v61, %v6293_v58  ;;  %v6309_v4 = vadd.f32 %v395_v62, %v6297_v59 }
 0x12c   :  { %v286_v7 = vpop.f32.mrf.mxu0  ;;  %v399_v9 = vpop.f32.mrf.mxu1 }
 0x12d   :  { %v6312_v12 = vadd.f32 %v286_v7, %v6285_v53  ;;  %v6315_v8 = vadd.f32 %v399_v9, %v6289_v54 }
 0x12e   :  { %v288_v13 = vpop.f32.mrf.mxu0  ;;  %v401_v14 = vpop.f32.mrf.mxu1 }
 0x12f   :  { %9077 = vst [vmem:[#allocation23_spill] sm:$0xff] %v6312_v12  ;;  %9078 = vst [vmem:[#allocation24_spill] sm:$0xff] %v6315_v8  ;;  %v6318_v15 = vadd.f32 %v288_v13, %v6293_v58  ;;  %v6321_v16 = vadd.f32 %v401_v14, %v6297_v59  ;;  %v530_v13 = vld [vmem:[%s8561_s7] sm:$0xf]  ;;  %v6731_v8 = vld [vmem:[#allocation11 + $0x98] sm:$0xff] }
 0x130   :  { %v6740_v12 = vld [vmem:[#allocation11 + $0x68] sm:$0xff] }
 0x131   :  { %9079 = vst [vmem:[#allocation25_spill] sm:$0xff] %v6318_v15  ;;  %9080 = vst [vmem:[#allocation26_spill] sm:$0xff] %v6321_v16  ;;  %v6734_v16 = vld [vmem:[#allocation11 + $0x80] sm:$0xff]  ;;  %v6737_v15 = vld [vmem:[#allocation11 + $0x90] sm:$0xff] }
 0x132   :  { %v292_v17 = vpop.f32.mrf.mxu0  ;;  %v405_v18 = vpop.f32.mrf.mxu1 }
 0x133   :  { %v6324_v19 = vadd.f32 %v292_v17, %v6285_v53  ;;  %v6327_v21 = vadd.f32 %v405_v18, %v6289_v54 }
 0x134   :  { %v294_v2 = vpop.f32.mrf.mxu0  ;;  %v407_v22 = vpop.f32.mrf.mxu1 }
 0x135   :  { %9081 = vst [vmem:[#allocation27_spill] sm:$0xff] %v6324_v19  ;;  %9082 = vst [vmem:[#allocation28_spill] sm:$0xff] %v6327_v21  ;;  %v6330_v23 = vadd.f32 %v294_v2, %v6293_v58  ;;  %v6333_v24 = vadd.f32 %v407_v22, %v6297_v59  ;;  %v6707_v21 = vld [vmem:[#allocation11 + $0xd8] sm:$0xff]  ;;  %v6716_v19 = vld [vmem:[#allocation11 + $0xa8] sm:$0xff] }
 0x137   :  { %9083 = vst [vmem:[#allocation29_spill] sm:$0xff] %v6330_v23  ;;  %9084 = vst [vmem:[#allocation30_spill] sm:$0xff] %v6333_v24  ;;  %v6710_v24 = vld [vmem:[#allocation11 + $0xc0] sm:$0xff]  ;;  %v6713_v23 = vld [vmem:[#allocation11 + $0xd0] sm:$0xff] }
 0x138   :  { %v298_v25 = vpop.f32.mrf.mxu0  ;;  %v411_v26 = vpop.f32.mrf.mxu1 }
 0x139   :  { %v6336_v27 = vadd.f32 %v298_v25, %v6285_v53  ;;  %v6339_v0 = vadd.f32 %v411_v26, %v6289_v54  ;;  %v6388_v26 = vrot.slane %v530_v13, %v190_v46 }
 0x13a   :  { %v300_v28 = vpop.f32.mrf.mxu0  ;;  %v413_v11 = vpop.f32.mrf.mxu1 }
 0x13b   :  { %9085 = vst [vmem:[#allocation31_spill] sm:$0xff] %v6336_v27  ;;  %9086 = vst [vmem:[#allocation32_spill] sm:$0xff] %v6339_v0  ;;  %v6342_v30 = vadd.f32 %v300_v28, %v6293_v58  ;;  %v6345_v31 = vadd.f32 %v413_v11, %v6297_v59  ;;  %v6392_v28 = vrot.slane %v530_v13, %v198_v48  ;;  %v6683_v0 = vld [vmem:[#allocation11 + $0x118] sm:$0xff]  ;;  %v6692_v27 = vld [vmem:[#allocation11 + $0xe8] sm:$0xff] }
 0x13c   :  { %v6396_v11 = vrot.slane %v530_v13, %v194_v52 }
 0x13d   :  { %9087 = vst [vmem:[#allocation33_spill] sm:$0xff] %v6342_v30  ;;  %9088 = vst [vmem:[#allocation34_spill] sm:$0xff] %v6345_v31  ;;  %v6686_v31 = vld [vmem:[#allocation11 + $0x100] sm:$0xff]  ;;  %v6689_v30 = vld [vmem:[#allocation11 + $0x110] sm:$0xff] }
 0x13e   :  { %v304_v32 = vpop.f32.mrf.mxu0  ;;  %v417_v33 = vpop.f32.mrf.mxu1 }
 0x13f   :  { %v6348_v34 = vadd.f32 %v304_v32, %v6285_v53  ;;  %v6351_v35 = vadd.f32 %v417_v33, %v6289_v54  ;;  %v6400_v32 = vrot.slane %v530_v13, %v202_v38 }
 0x140   :  { %v306_v36 = vpop.f32.mrf.mxu0  ;;  %v419_v20 = vpop.f32.mrf.mxu1 }
 0x141   :  { %9089 = vst [vmem:[#allocation35_spill] sm:$0xff] %v6348_v34  ;;  %9090 = vst [vmem:[#allocation36_spill] sm:$0xff] %v6351_v35  ;;  %v6354_v37 = vadd.f32 %v306_v36, %v6293_v58  ;;  %v6357_v39 = vadd.f32 %v419_v20, %v6297_v59 }
 0x143   :  { %9091 = vst [vmem:[#allocation94_spill] sm:$0xff] %v6354_v37  ;;  %9092 = vst [vmem:[#allocation95_spill] sm:$0xff] %v6357_v39 }
 0x144   :  { %v310_v40 = vpop.f32.mrf.mxu0  ;;  %v423_v41 = vpop.f32.mrf.mxu1 }
 0x145   :  { %v6360_v42 = vadd.f32 %v310_v40, %v6285_v53  ;;  %v6363_v49 = vadd.f32 %v423_v41, %v6289_v54 }
 0x146   :  { %v312_v55 = vpop.f32.mrf.mxu0  ;;  %v425_v57 = vpop.f32.mrf.mxu1 }
 0x147   :  { %9093 = vst [vmem:[#allocation96_spill] sm:$0xff] %v6360_v42  ;;  %9094 = vst [vmem:[#allocation97_spill] sm:$0xff] %v6363_v49  ;;  %v6366_v61 = vadd.f32 %v312_v55, %v6293_v58  ;;  %v6369_v62 = vadd.f32 %v425_v57, %v6297_v59 }
 0x149   :  { %9095 = vst [vmem:[#allocation98_spill] sm:$0xff] %v6366_v61  ;;  %9096 = vst [vmem:[#allocation99_spill] sm:$0xff] %v6369_v62 }
 0x14a   :  { %v316_v7 = vpop.f32.mrf.mxu0  ;;  %v429_v9 = vpop.f32.mrf.mxu1 }
 0x14b   :  { %v6375_v14 = vadd.f32 %v316_v7, %v6285_v53  ;;  %v6378_v17 = vadd.f32 %v429_v9, %v6289_v54 }
 0x14c   :  { %v318_v18 = vpop.f32.mrf.mxu0  ;;  %v431_v2 = vpop.f32.mrf.mxu1 }
 0x14d   :  { %9097 = vst [vmem:[#allocation100_spill] sm:$0xff] %v6375_v14  ;;  %9098 = vst [vmem:[#allocation101_spill] sm:$0xff] %v6378_v17  ;;  %v6381_v22 = vadd.f32 %v318_v18, %v6293_v58  ;;  %v6384_v25 = vadd.f32 %v431_v2, %v6297_v59 }
 0x14f   :  { %9099 = vst [vmem:[#allocation102_spill] sm:$0xff] %v6381_v22  ;;  %9100 = vst [vmem:[#allocation103_spill] sm:$0xff] %v6384_v25 }
 0x150   :  { %v618_v33 = vpop.f32.mrf.mxu0  ;;  %v731_v36 = vpop.f32.mrf.mxu1 }
 0x151   :  { %v6403_v20 = vadd.f32 %v618_v33, %v6388_v26  ;;  %v6406_v46 = vadd.f32 %v731_v36, %v6392_v28 }
 0x152   :  { %v620_v40 = vpop.f32.mrf.mxu0  ;;  %v733_v41 = vpop.f32.mrf.mxu1 }
 0x153   :  { %9101 = vst [vmem:[#allocation104_spill] sm:$0xff] %v6403_v20  ;;  %9102 = vst [vmem:[#allocation105_spill] sm:$0xff] %v6406_v46  ;;  %v6409_v48 = vadd.f32 %v620_v40, %v6396_v11  ;;  %v6412_v52 = vadd.f32 %v733_v41, %v6400_v32  ;;  %v4393_v41 = vld [vmem:[%s8556_s2] sm:$0xff] }
 0x154   :  { %4402 = vperm.xlu1 %4816, %v4393_v41  }
 0x155   :  { %9103 = vst [vmem:[#allocation106_spill] sm:$0xff] %v6409_v48  ;;  %9104 = vst [vmem:[#allocation107_spill] sm:$0xff] %v6412_v52 }
 0x156   :  { %v624_v55 = vpop.f32.mrf.mxu0  ;;  %v737_v44 = vpop.f32.mrf.mxu1 }
 0x157   :  { %v6415_v38 = vadd.f32 %v624_v55, %v6388_v26  ;;  %v6418_v57 = vadd.f32 %v737_v44, %v6392_v28 }
 0x158   :  { %v626_v7 = vpop.f32.mrf.mxu0  ;;  %v739_v9 = vpop.f32.mrf.mxu1 }
 0x159   :  { %9105 = vst [vmem:[#allocation108_spill] sm:$0xff] %v6415_v38  ;;  %9106 = vst [vmem:[#allocation109_spill] sm:$0xff] %v6418_v57  ;;  %v6421_v13 = vadd.f32 %v626_v7, %v6396_v11  ;;  %v6424_v18 = vadd.f32 %v739_v9, %v6400_v32 }
 0x15b   :  { %9107 = vst [vmem:[#allocation110_spill] sm:$0xff] %v6421_v13  ;;  %9108 = vst [vmem:[#allocation111_spill] sm:$0xff] %v6424_v18 }
 0x15c   :  { %v630_v2 = vpop.f32.mrf.mxu0  ;;  %v743_v33 = vpop.f32.mrf.mxu1 }
 0x15d   :  { %v6427_v36 = vadd.f32 %v630_v2, %v6388_v26  ;;  %v6430_v40 = vadd.f32 %v743_v33, %v6392_v28  ;;  %v4395_v2 = vld [vmem:[%s8556_s2 + $0x10] sm:$0xff] }
 0x15e   :  { %v632_v55 = vpop.f32.mrf.mxu0  ;;  %v745_v44 = vpop.f32.mrf.mxu1  ;;  %4408 = vperm.xlu1 %4816, %v4395_v2  }
 0x15f   :  { %9109 = vst [vmem:[#allocation112_spill] sm:$0xff] %v6427_v36  ;;  %9110 = vst [vmem:[#allocation113_spill] sm:$0xff] %v6430_v40  ;;  %v6436_v7 = vadd.f32 %v632_v55, %v6396_v11  ;;  %v6439_v9 = vadd.f32 %v745_v44, %v6400_v32 }
 0x161   :  { %9111 = vst [vmem:[#allocation114_spill] sm:$0xff] %v6436_v7  ;;  %9112 = vst [vmem:[#allocation115_spill] sm:$0xff] %v6439_v9  ;;  %v275_v9 = vadd.f32 %v6268_v29, %v6285_v53  ;;  %v388_v29 = vadd.f32 %v6270_v45, %v6289_v54 }
 0x162   :  { %v636_v43 = vpop.f32.mrf.mxu0  ;;  %v749_v33 = vpop.f32.mrf.mxu1 }
 0x163   :  { %v6445_v46 = vadd.f32 %v636_v43, %v6388_v26  ;;  %v6448_v52 = vadd.f32 %v749_v33, %v6392_v28 }
 0x164   :  { %v638_v41 = vpop.f32.mrf.mxu0  ;;  %v751_v48 = vpop.f32.mrf.mxu1 }
 0x165   :  { %9113 = vst [vmem:[#allocation116_spill] sm:$0xff] %v6445_v46  ;;  %9114 = vst [vmem:[#allocation117_spill] sm:$0xff] %v6448_v52  ;;  %v6451_v55 = vadd.f32 %v638_v41, %v6396_v11  ;;  %v6454_v44 = vadd.f32 %v751_v48, %v6400_v32  ;;  %v390_v52 = vadd.f32 %v6279_v51, %v6297_v59  ;;  %v6680_v46 = vld [vmem:[#allocation11 + $0x108] sm:$0xff] }
 0x167   :  { %9115 = vst [vmem:[#allocation118_spill] sm:$0xff] %v6451_v55  ;;  %9116 = vst [vmem:[#allocation119_spill] sm:$0xff] %v6454_v44 }
 0x168   :  { %v642_v20 = vpop.f32.mrf.mxu0  ;;  %v755_v17 = vpop.f32.mrf.mxu1 }
 0x169   :  { %v6457_v25 = vadd.f32 %v642_v20, %v6388_v26  ;;  %v6460_v2 = vadd.f32 %v755_v17, %v6392_v28 }
 0x16a   :  { %v644_v43 = vpop.f32.mrf.mxu0  ;;  %v757_v22 = vpop.f32.mrf.mxu1 }
 0x16b   :  { %9117 = vst [vmem:[#allocation120_spill] sm:$0xff] %v6457_v25  ;;  %9118 = vst [vmem:[#allocation121_spill] sm:$0xff] %v6460_v2  ;;  %v6463_v33 = vadd.f32 %v644_v43, %v6396_v11  ;;  %v6466_v14 = vadd.f32 %v757_v22, %v6400_v32  ;;  %v6695_v2 = vld [vmem:[#allocation11 + $0xf8] sm:$0xff]  ;;  %v6704_v25 = vld [vmem:[#allocation11 + $0xc8] sm:$0xff] }
 0x16d   :  { %9119 = vst [vmem:[#allocation122_spill] sm:$0xff] %v6463_v33  ;;  %9120 = vst [vmem:[#allocation123_spill] sm:$0xff] %v6466_v14  ;;  %v6698_v14 = vld [vmem:[#allocation11 + $0xe0] sm:$0xff]  ;;  %v6701_v33 = vld [vmem:[#allocation11 + $0xf0] sm:$0xff] }
 0x16e   :  { %v648_v41 = vpop.f32.mrf.mxu0  ;;  %v761_v57 = vpop.f32.mrf.mxu1 }
 0x16f   :  { %v6469_v48 = vadd.f32 %v648_v41, %v6388_v26  ;;  %v6472_v18 = vadd.f32 %v761_v57, %v6392_v28 }
 0x170   :  { %v650_v20 = vpop.f32.mrf.mxu0  ;;  %v763_v13 = vpop.f32.mrf.mxu1 }
 0x171   :  { %9121 = vst [vmem:[#allocation124_spill] sm:$0xff] %v6469_v48  ;;  %9122 = vst [vmem:[#allocation125_spill] sm:$0xff] %v6472_v18  ;;  %v6475_v17 = vadd.f32 %v650_v20, %v6396_v11  ;;  %v6478_v38 = vadd.f32 %v763_v13, %v6400_v32  ;;  %v6719_v18 = vld [vmem:[#allocation11 + $0xb8] sm:$0xff]  ;;  %v6728_v48 = vld [vmem:[#allocation11 + $0x88] sm:$0xff] }
 0x173   :  { %9123 = vst [vmem:[#allocation126_spill] sm:$0xff] %v6475_v17  ;;  %9124 = vst [vmem:[#allocation127_spill] sm:$0xff] %v6478_v38  ;;  %v6722_v38 = vld [vmem:[#allocation11 + $0xa0] sm:$0xff]  ;;  %v6725_v17 = vld [vmem:[#allocation11 + $0xb0] sm:$0xff] }
 0x174   :  { %v654_v43 = vpop.f32.mrf.mxu0  ;;  %v767_v49 = vpop.f32.mrf.mxu1 }
 0x175   :  { %v6481_v22 = vadd.f32 %v654_v43, %v6388_v26  ;;  %v6484_v62 = vadd.f32 %v767_v49, %v6392_v28  ;;  %v277_v43 = vadd.f32 %v6277_v50, %v6293_v58 }
 0x176   :  { %v656_v41 = vpop.f32.mrf.mxu0  ;;  %v769_v61 = vpop.f32.mrf.mxu1 }
 0x177   :  { %v6487_v57 = vadd.f32 %v656_v41, %v6396_v11  ;;  %v6490_v42 = vadd.f32 %v769_v61, %v6400_v32 }
 0x17a   :  { %v660_v20 = vpop.f32.mrf.mxu0  ;;  %v773_v13 = vpop.f32.mrf.mxu1 }
 0x17c   :  { %v662_v40 = vpop.f32.mrf.mxu0  ;;  %v775_v49 = vpop.f32.mrf.mxu1 }
 0x17d   :  { %v663_v59 = vadd.f32 %v662_v40, %v6396_v11  ;;  %v776_v11 = vadd.f32 %v775_v49, %v6400_v32  ;;  %v9127_v32 = vld [vmem:[#allocation38_spill] sm:$0xff]  ;;  %v9129_v49 = vld [vmem:[#allocation40_spill] sm:$0xff] }
 0x180   :  { %v1009_v7 = vpop.f32.mrf.mxu0  ;;  %v1080_v41 = vpop.f32.mrf.mxu1 }
 0x181   :  { %v1085_v36 = vadd.f32 %v1009_v7, %v275_v9  ;;  %v1087_v53 = vadd.f32 %v1080_v41, %v388_v29 }
 0x182   :  { %v1011_v35 = vpop.f32.mrf.mxu0  ;;  %v1082_v61 = vpop.f32.mrf.mxu1 }
 0x183   :  { %v4593_v39 = vmul.f32 -1.442695, %v1085_v36  ;;  %v1086_v37 = vadd.f32 %v1011_v35, %v277_v43  ;;  %v1088_v44 = vadd.f32 %v1082_v61, %v390_v52 }
 0x185   :  { %4837 = vpow2.f32 %v4593_v39  ;;  %v4594_v34 = vmul.f32 -1.442695, %v1086_v37  ;;  %v4595_v55 = vmul.f32 -1.442695, %v1088_v44  ;;  %v661_v39 = vadd.f32 %v660_v20, %v6388_v26 }
 0x186   :  { %v774_v20 = vadd.f32 %v773_v13, %v6392_v28  ;;  %v9126_v28 = vld [vmem:[#allocation37_spill] sm:$0xff]  ;;  %v9128_v13 = vld [vmem:[#allocation39_spill] sm:$0xff] }
 0x187   :  { %4839 = vpow2.f32 %v4594_v34 }
 0x188   :  { %4841 = vtanh.f32 %v1087_v53 }
 0x189   :  { %4843 = vpow2.f32 %v4595_v55 }
 0x192   :  { %v4838_v50 = vpop.eup %4837 }
 0x193   :  { %v1243_v58 = vadd.f32 1.0, %v4838_v50 }
 0x194   :  { %v4840_v7 = vpop.eup %4839 }
 0x195   :  { %4845 = vrcp.f32 %v1243_v58  ;;  %v1249_v35 = vadd.f32 1.0, %v4840_v7  ;;  %v4842_v37 = vpop.eup %4841 }
 0x196   :  { %v4844_v34 = vpop.eup %4843 }
 0x197   :  { %4847 = vrcp.f32 %v1249_v35  ;;  %v1256_v9 = vadd.f32 1.0, %v4844_v34 }
 0x1a2   :  { %v4846_v36 = vpop.eup %4845  ;;  %v1160_v51 = vpop.f32.mrf.mxu0 }
 0x1a3   :  { %v1260_v52 = vmul.f32 %v4846_v36, %v4842_v37  ;;  %v1236_v45 = vadd.f32 %v1160_v51, %v661_v39  ;;  %v1231_v53 = vpop.f32.mrf.mxu1  ;;  %v6507_v36 = vpop.permute.xlu0 %1292 }
 0x1a4   :  { %v4848_v54 = vpop.eup %4847  ;;  %v1162_v44 = vpop.f32.mrf.mxu0  ;;  %v1238_v37 = vadd.f32 %v1231_v53, %v774_v20  ;;  %9125 = vst [vmem:[#allocation128_spill] sm:$0xff] %v6507_v36  ;;  %vm1294_vm8 = vcmp.eq.s32.totalorder %v6507_v36, 1  ;;  %v9139_v53 = vld [vmem:[#allocation50_spill] sm:$0xff]  ;;  %v6880_v36 = vld [vmem:[#allocation12 + $0x148] sm:$0xff] }
 0x1a5   :  { %v1259_v43 = vmul.f32 0.0, %v4848_v54  ;;  %v4596_v41 = vmul.f32 -1.442695, %v1236_v45  ;;  %v1237_v61 = vadd.f32 %v1162_v44, %v663_v59  ;;  %v1233_v26 = vpop.f32.mrf.mxu1  ;;  %v9131_v45 = vld [vmem:[#allocation42_spill] sm:$0xff]  ;;  %v9132_v54 = vld [vmem:[#allocation43_spill] sm:$0xff]  ;;  %v9134_v44 = vld [vmem:[#allocation45_spill] sm:$0xff] }
 0x1a6   :  { %v1239_v40 = vadd.f32 %v1233_v26, %v776_v11  ;;  %v9140_v26 = vld [vmem:[#allocation51_spill] sm:$0xff]  ;;  %v9141_v11 = vld [vmem:[#allocation52_spill] sm:$0xff]  ;;  %v9143_v20 = vld [vmem:[#allocation54_spill] sm:$0xff]  ;;  %9189 = vst [vmem:[#allocation43_spill] sm:$0xff] %v6680_v46 }
 0x1a7   :  { %v6502_v55 = vadd.f32 %v1260_v52, %v1259_v43  ;;  %4849 = vpow2.f32 %v4596_v41  ;;  %v4597_v29 = vmul.f32 -1.442695, %v1237_v61  ;;  %v9130_v52 = vld [vmem:[#allocation41_spill] sm:$0xff]  ;;  %v9135_v43 = vld [vmem:[#allocation46_spill] sm:$0xff]  ;;  %v9136_v41 = vld [vmem:[#allocation47_spill] sm:$0xff]  ;;  %9191 = vst [vmem:[#allocation45_spill] sm:$0xff] %v6686_v31 }
 0x1a8   :  { %4851 = vrcp.f32 %v1256_v9  ;;  %v4598_v50 = vmul.f32 -1.442695, %v1239_v40  ;;  %v9133_v9 = vld [vmem:[#allocation44_spill] sm:$0xff]  ;;  %v9142_v40 = vld [vmem:[#allocation53_spill] sm:$0xff]  ;;  %9192 = vst [vmem:[#allocation46_spill] sm:$0xff] %v6689_v30  ;;  %9193 = vst [vmem:[#allocation47_spill] sm:$0xff] %v6692_v27 }
 0x1a9   :  { %4853 = vtanh.f32 %v6502_v55  ;;  %v9137_v61 = vld [vmem:[#allocation48_spill] sm:$0xff]  ;;  %9190 = vst [vmem:[#allocation44_spill] sm:$0xff] %v6683_v0  ;;  %9196 = vst [vmem:[#allocation50_spill] sm:$0xff] %v6701_v33 }
 0x1aa   :  { %4855 = vpow2.f32 %v4597_v29  ;;  %v9138_v29 = vld [vmem:[#allocation49_spill] sm:$0xff]  ;;  %9194 = vst [vmem:[#allocation48_spill] sm:$0xff] %v6695_v2  ;;  %9197 = vst [vmem:[#allocation51_spill] sm:$0xff] %v6704_v25 }
 0x1ab   :  { %4857 = vpow2.f32 %v4598_v50  ;;  %v9144_v50 = vld [vmem:[#allocation55_spill] sm:$0xff]  ;;  %9195 = vst [vmem:[#allocation49_spill] sm:$0xff] %v6698_v14  ;;  %9198 = vst [vmem:[#allocation52_spill] sm:$0xff] %v6707_v21 }
 0x1ac   :  { %9199 = vst [vmem:[#allocation53_spill] sm:$0xff] %v6710_v24  ;;  %9200 = vst [vmem:[#allocation54_spill] sm:$0xff] %v6713_v23 }
 0x1ad   :  { %9201 = vst [vmem:[#allocation55_spill] sm:$0xff] %v6716_v19 }
 0x1b4   :  { %v4850_v58 = vpop.eup %4849 }
 0x1b5   :  { %v4852_v7 = vpop.eup %4851  ;;  %v1267_v35 = vadd.f32 1.0, %v4850_v58  ;;  %v9145_v58 = vld [vmem:[#allocation56_spill] sm:$0xff] }
 0x1b6   :  { %v4854_v34 = vpop.eup %4853  ;;  %9202 = vst [vmem:[#allocation56_spill] sm:$0xff] %v6719_v18 }
 0x1b7   :  { %v4856_v39 = vpop.eup %4855  ;;  %v6509_v51 = vmul.f32 %v4854_v34, %v4852_v7  ;;  %4859 = vrcp.f32 %v1267_v35  ;;  %v9146_v35 = vld [vmem:[#allocation57_spill] sm:$0xff] }
 0x1b8   :  { %v1273_v59 = vadd.f32 1.0, %v4856_v39  ;;  %4861 = vtanh.f32 %v1238_v37  ;;  %v4858_v7 = vpop.eup %4857  ;;  %v9147_v37 = vld [vmem:[#allocation58_spill] sm:$0xff]  ;;  %v9148_v39 = vld [vmem:[#allocation59_spill] sm:$0xff]  ;;  %9203 = vst [vmem:[#allocation57_spill] sm:$0xff] %v6722_v38 }
 0x1b9   :  { %4601 = vmatmul.mubr.msk.f32.vlgmr.msra.gmra.mxu0 %vm1294_vm8, %v6509_v51  ;;  %4602 = vmatmul.mubr.msk.f32.vlgmr.msra.gmra.mxu1 %vm1294_vm8, %v6509_v51  ;;  %9204 = vst [vmem:[#allocation58_spill] sm:$0xff] %v6725_v17  ;;  %9205 = vst [vmem:[#allocation59_spill] sm:$0xff] %v6728_v48 }
 0x1ba   :  { %4863 = vrcp.f32 %v1273_v59  ;;  %1478 = vmatpush1.msra.mxu0 %v9126_v28  ;;  %1549 = vmatpush1.msra.mxu1 %v9127_v32  ;;  %v9149_v59 = vld [vmem:[#allocation60_spill] sm:$0xff]  ;;  %v9150_v32 = vld [vmem:[#allocation61_spill] sm:$0xff] }
 0x1bb   :  { %1479 = vmatprep.subr.mxu0 %v9128_v13  ;;  %1550 = vmatprep.subr.mxu1 %v9129_v49  ;;  %v9151_v13 = vld [vmem:[#allocation62_spill] sm:$0xff]  ;;  %9206 = vst [vmem:[#allocation60_spill] sm:$0xff] %v6731_v8  ;;  %9207 = vst [vmem:[#allocation61_spill] sm:$0xff] %v6734_v16 }
 0x1bc   :  { %1480 = vmatpush1.msra.mxu0 %v9130_v52  ;;  %1551 = vmatpush1.msra.mxu1 %v9131_v45  ;;  %v1280_v52 = vadd.f32 1.0, %v4858_v7  ;;  %v9152_v45 = vld [vmem:[#allocation63_spill] sm:$0xff]  ;;  %9208 = vst [vmem:[#allocation62_spill] sm:$0xff] %v6737_v15 }
 0x1bd   :  { %1481 = vmatprep.subr.mxu0 %v9132_v54  ;;  %1552 = vmatprep.subr.mxu1 %v9133_v9  ;;  %v9153_v54 = vld [vmem:[#allocation64_spill] sm:$0xff]  ;;  %v9164_v7 = vld [vmem:[#allocation75_spill] sm:$0xff]  ;;  %9209 = vst [vmem:[#allocation63_spill] sm:$0xff] %v6740_v12 }
 0x1be   :  { %1482 = vmatpush1.msra.mxu0 %v9134_v44  ;;  %1553 = vmatpush1.msra.mxu1 %v9135_v43  ;;  %v9154_v43 = vld [vmem:[#allocation65_spill] sm:$0xff]  ;;  %4865 = vrcp.f32 %v1280_v52 }
 0x1bf   :  { %1483 = vmatprep.subr.mxu0 %v9136_v41  ;;  %1554 = vmatprep.subr.mxu1 %v9137_v61  ;;  %v9155_v41 = vld [vmem:[#allocation66_spill] sm:$0xff]  ;;  %v9156_v61 = vld [vmem:[#allocation67_spill] sm:$0xff]  ;;  %v9174_v52 = vld [vmem:[#allocation85_spill] sm:$0xff] }
 0x1c0   :  { %1484 = vmatpush1.msra.mxu0 %v9138_v29  ;;  %1555 = vmatpush1.msra.mxu1 %v9139_v53  ;;  %v9157_v29 = vld [vmem:[#allocation68_spill] sm:$0xff] }
 0x1c1   :  { %1485 = vmatprep.subr.mxu0 %v9140_v26  ;;  %1556 = vmatprep.subr.mxu1 %v9141_v11  ;;  %v9158_v26 = vld [vmem:[#allocation69_spill] sm:$0xff]  ;;  %v9159_v11 = vld [vmem:[#allocation70_spill] sm:$0xff] }
 0x1c2   :  { %1486 = vmatpush1.msra.mxu0 %v9142_v40  ;;  %1557 = vmatpush1.msra.mxu1 %v9143_v20  ;;  %v9160_v40 = vld [vmem:[#allocation71_spill] sm:$0xff]  ;;  %v9161_v20 = vld [vmem:[#allocation72_spill] sm:$0xff] }
 0x1c3   :  { %1487 = vmatprep.subr.mxu0 %v9144_v50  ;;  %1558 = vmatprep.subr.mxu1 %v9145_v58  ;;  %v9162_v50 = vld [vmem:[#allocation73_spill] sm:$0xff]  ;;  %v9163_v58 = vld [vmem:[#allocation74_spill] sm:$0xff] }
 0x1c4   :  { %1488 = vmatpush1.msra.mxu0 %v9146_v35  ;;  %1559 = vmatpush1.msra.mxu1 %v9147_v37  ;;  %v4860_v34 = vpop.eup %4859  ;;  %v9165_v35 = vld [vmem:[#allocation76_spill] sm:$0xff]  ;;  %v9166_v37 = vld [vmem:[#allocation77_spill] sm:$0xff] }
 0x1c5   :  { %1489 = vmatprep.subr.mxu0 %v9148_v39  ;;  %1560 = vmatprep.subr.mxu1 %v9149_v59  ;;  %v4862_v28 = vpop.eup %4861  ;;  %v9168_v39 = vld [vmem:[#allocation79_spill] sm:$0xff]  ;;  %v9169_v59 = vld [vmem:[#allocation80_spill] sm:$0xff] }
 0x1c6   :  { %1490 = vmatpush1.msra.mxu0 %v9150_v32  ;;  %1561 = vmatpush1.msra.mxu1 %v9151_v13  ;;  %v1284_v44 = vmul.f32 %v4862_v28, %v4860_v34  ;;  %v9167_v34 = vld [vmem:[#allocation78_spill] sm:$0xff]  ;;  %v9170_v28 = vld [vmem:[#allocation81_spill] sm:$0xff]  ;;  %v9172_v13 = vld [vmem:[#allocation83_spill] sm:$0xff] }
 0x1c7   :  { %v4864_v49 = vpop.eup %4863  ;;  %1491 = vmatprep.subr.mxu0 %v9152_v45  ;;  %1562 = vmatprep.subr.mxu1 %v9153_v54  ;;  %v9171_v32 = vld [vmem:[#allocation82_spill] sm:$0xff]  ;;  %v9176_v54 = vld [vmem:[#allocation87_spill] sm:$0xff] }
 0x1c8   :  { %v1283_v9 = vmul.f32 0.0, %v4864_v49  ;;  %1492 = vmatpush1.msra.mxu0 %v9154_v43  ;;  %1563 = vmatpush1.msra.mxu1 %v9155_v41  ;;  %v9173_v49 = vld [vmem:[#allocation84_spill] sm:$0xff]  ;;  %v9175_v45 = vld [vmem:[#allocation86_spill] sm:$0xff]  ;;  %v9180_v41 = vld [vmem:[#allocation91_spill] sm:$0xff] }
 0x1c9   :  { %1493 = vmatprep.subr.mxu0 %v9156_v61  ;;  %1564 = vmatprep.subr.mxu1 %v9157_v29  ;;  %v9179_v43 = vld [vmem:[#allocation90_spill] sm:$0xff]  ;;  %v9181_v29 = vld [vmem:[#allocation92_spill] sm:$0xff] }
 0x1ca   :  { %v6550_v53 = vadd.f32 %v1284_v44, %v1283_v9  ;;  %1494 = vmatpush1.msra.mxu0 %v9158_v26  ;;  %1565 = vmatpush1.msra.mxu1 %v9159_v11  ;;  %v9177_v9 = vld [vmem:[#allocation88_spill] sm:$0xff]  ;;  %v9178_v44 = vld [vmem:[#allocation89_spill] sm:$0xff]  ;;  %9236 = vst [vmem:[#allocation90_spill] sm:$0xff] %v6880_v36 }
 0x1cb   :  { %1495 = vmatprep.subr.mxu0 %v9160_v40  ;;  %1566 = vmatprep.subr.mxu1 %v9161_v20  ;;  %v4866_v61 = vpop.eup %4865  ;;  %v9182_v26 = vld [vmem:[#allocation93_spill] sm:$0xff]  ;;  %v6589_v11 = vld [vmem:[#allocation11 + $0x1e8] sm:$0xff] }
 0x1cc   :  { %4867 = vtanh.f32 %v6550_v53  ;;  %1496 = vmatpush1.msra.mxu0 %v9162_v50  ;;  %1567 = vmatpush1.msra.mxu1 %v9163_v58  ;;  %v6605_v40 = vld [vmem:[#allocation11 + $0x1f0] sm:$0xff]  ;;  %v6608_v20 = vld [vmem:[#allocation11 + $0x1c8] sm:$0xff]  ;;  %v6611_v50 = vld [vmem:[#allocation11 + $0x1d8] sm:$0xff] }
 0x1cd   :  { %1497 = vmatprep.subr.mxu0 %v9164_v7  ;;  %1568 = vmatprep.subr.mxu1 %v9165_v35  ;;  %v6614_v58 = vld [vmem:[#allocation11 + $0x1c0] sm:$0xff]  ;;  %v6617_v7 = vld [vmem:[#allocation11 + $0x1d0] sm:$0xff]  ;;  %v6620_v35 = vld [vmem:[#allocation11 + $0x1a8] sm:$0xff] }
 0x1ce   :  { %1498 = vmatpush1.msra.mxu0 %v9166_v37  ;;  %1569 = vmatpush1.msra.mxu1 %v9167_v34  ;;  %v6623_v37 = vld [vmem:[#allocation11 + $0x1b8] sm:$0xff]  ;;  %v6626_v34 = vld [vmem:[#allocation11 + $0x1a0] sm:$0xff] }
 0x1cf   :  { %1499 = vmatprep.subr.mxu0 %v9168_v39  ;;  %1570 = vmatprep.subr.mxu1 %v9169_v59  ;;  %v6629_v39 = vld [vmem:[#allocation11 + $0x1b0] sm:$0xff]  ;;  %v6632_v59 = vld [vmem:[#allocation11 + $0x188] sm:$0xff] }
 0x1d0   :  { %1500 = vmatpush1.msra.mxu0 %v9170_v28  ;;  %1571 = vmatpush1.msra.mxu1 %v9171_v32  ;;  %v6635_v28 = vld [vmem:[#allocation11 + $0x198] sm:$0xff]  ;;  %v6638_v32 = vld [vmem:[#allocation11 + $0x180] sm:$0xff] }
 0x1d1   :  { %1501 = vmatprep.subr.mxu0 %v9172_v13  ;;  %1572 = vmatprep.subr.mxu1 %v9173_v49  ;;  %v6641_v13 = vld [vmem:[#allocation11 + $0x190] sm:$0xff]  ;;  %v6644_v49 = vld [vmem:[#allocation11 + $0x168] sm:$0xff] }
 0x1d2   :  { %1502 = vmatpush1.msra.mxu0 %v9174_v52  ;;  %1573 = vmatpush1.msra.mxu1 %v9175_v45  ;;  %v6647_v52 = vld [vmem:[#allocation11 + $0x178] sm:$0xff]  ;;  %v6650_v45 = vld [vmem:[#allocation11 + $0x160] sm:$0xff] }
 0x1d3   :  { %1503 = vmatprep.subr.mxu0 %v9176_v54  ;;  %1574 = vmatprep.subr.mxu1 %v9177_v9  ;;  %v6653_v54 = vld [vmem:[#allocation11 + $0x170] sm:$0xff]  ;;  %v6656_v9 = vld [vmem:[#allocation11 + $0x148] sm:$0xff] }
 0x1d4   :  { %1504 = vmatpush1.msra.mxu0 %v6104_v1  ;;  %1575 = vmatpush1.msra.mxu1 %v6106_v5  ;;  %v6585_v5 = vpop.permute.xlu0 %1299 }
 0x1d5   :  { %1505 = vmatprep.subr.mxu0 %v6110_v56  ;;  %1576 = vmatprep.subr.mxu1 %v9178_v44  ;;  %9183 = vst [vmem:[#allocation37_spill] sm:$0xff] %v6585_v5  ;;  %vm1301_vm9 = vcmp.eq.s32.totalorder %v6585_v5, 1  ;;  %v6659_v44 = vld [vmem:[#allocation11 + $0x158] sm:$0xff]  ;;  %v9284_v5 = vld [vmem:[#allocation55_spill] sm:$0xff] }
 0x1d6   :  { %1506 = vmatpush1.msra.mxu0 %v9179_v43  ;;  %1577 = vmatpush1.msra.mxu1 %v9180_v41  ;;  %v6662_v43 = vld [vmem:[#allocation11 + $0x140] sm:$0xff]  ;;  %v6665_v41 = vld [vmem:[#allocation11 + $0x150] sm:$0xff] }
 0x1d7   :  { %1507 = vmatprep.subr.mxu0 %v6127_v6  ;;  %1578 = vmatprep.subr.mxu1 %v6129_v10  ;;  %v6592_v6 = vld [vmem:[#allocation11 + $0x1f8] sm:$0xff]  ;;  %v6602_v10 = vld [vmem:[#allocation11 + $0x1e0] sm:$0xff]  ;;  %9184 = vst [vmem:[#allocation38_spill] sm:$0xff] %v6665_v41 }
 0x1d8   :  { %1508 = vmatpush1.msra.mxu0 %v9181_v29  ;;  %1541 = vmatprep.mubr.f32.mxu0 %v9003_v3  ;;  %v6671_v29 = vld [vmem:[#allocation11 + $0x138] sm:$0xff] }
 0x1d9   :  { %v4868_v1 = vpop.eup %4867  ;;  %1579 = vmatpush1.msra.mxu1 %v9182_v26  ;;  %1612 = vmatprep.mubr.f32.mxu1 %v9003_v3  ;;  %9186 = vst [vmem:[#allocation40_spill] sm:$0xff] %v6671_v29  ;;  %v6677_v26 = vld [vmem:[#allocation11 + $0x130] sm:$0xff] }
 0x1da   :  { %v6587_v56 = vmul.f32 %v4868_v1, %v4866_v61  ;;  %1710 = vmatprep.subr.mxu0 %v6589_v11  ;;  %1781 = vmatprep.subr.mxu1 %v6592_v6  ;;  %v6668_v61 = vld [vmem:[#allocation11 + $0x128] sm:$0xff]  ;;  %v6674_v1 = vld [vmem:[#allocation11 + $0x120] sm:$0xff]  ;;  %9188 = vst [vmem:[#allocation42_spill] sm:$0xff] %v6677_v26 }
 0x1db   :  { %9185 = vst [vmem:[#allocation39_spill] sm:$0xff] %v6668_v61  ;;  %9187 = vst [vmem:[#allocation41_spill] sm:$0xff] %v6674_v1 }
 0x1dc   :  { %4603 = vmatmul.mubr.msk.f32.vlgmr.msra.gmra.mxu0 %vm1301_vm9, %v6587_v56  ;;  %4604 = vmatmul.mubr.msk.f32.vlgmr.msra.gmra.mxu1 %vm1301_vm9, %v6587_v56 }
 0x1dd   :  { %1711 = vmatpush1.msra.mxu0 %v6602_v10  ;;  %1782 = vmatpush1.msra.mxu1 %v6605_v40 }
 0x1de   :  { %1712 = vmatprep.subr.mxu0 %v6608_v20  ;;  %1783 = vmatprep.subr.mxu1 %v6611_v50 }
 0x1df   :  { %1713 = vmatpush1.msra.mxu0 %v6614_v58  ;;  %1784 = vmatpush1.msra.mxu1 %v6617_v7 }
 0x1e0   :  { %1714 = vmatprep.subr.mxu0 %v6620_v35  ;;  %1785 = vmatprep.subr.mxu1 %v6623_v37 }
 0x1e1   :  { %1715 = vmatpush1.msra.mxu0 %v6626_v34  ;;  %1786 = vmatpush1.msra.mxu1 %v6629_v39 }
 0x1e2   :  { %1716 = vmatprep.subr.mxu0 %v6632_v59  ;;  %1787 = vmatprep.subr.mxu1 %v6635_v28 }
 0x1e3   :  { %1717 = vmatpush1.msra.mxu0 %v6638_v32  ;;  %1788 = vmatpush1.msra.mxu1 %v6641_v13 }
 0x1e4   :  { %1718 = vmatprep.subr.mxu0 %v6644_v49  ;;  %1789 = vmatprep.subr.mxu1 %v6647_v52 }
 0x1e5   :  { %1719 = vmatpush1.msra.mxu0 %v6650_v45  ;;  %1790 = vmatpush1.msra.mxu1 %v6653_v54 }
 0x1e6   :  { %1720 = vmatprep.subr.mxu0 %v6656_v9  ;;  %1791 = vmatprep.subr.mxu1 %v6659_v44 }
 0x1e7   :  { %1721 = vmatpush1.msra.mxu0 %v6662_v43  ;;  %1792 = vmatpush1.msra.mxu1 %v6665_v41 }
 0x1e8   :  { %1722 = vmatprep.subr.mxu0 %v6668_v61  ;;  %1793 = vmatprep.subr.mxu1 %v6671_v29 }
 0x1e9   :  { %1723 = vmatpush1.msra.mxu0 %v6674_v1  ;;  %1794 = vmatpush1.msra.mxu1 %v6677_v26 }
 0x1ea   :  { %1724 = vmatprep.subr.mxu0 %v6680_v46  ;;  %1795 = vmatprep.subr.mxu1 %v6683_v0 }
 0x1eb   :  { %1725 = vmatpush1.msra.mxu0 %v6686_v31  ;;  %1796 = vmatpush1.msra.mxu1 %v6689_v30 }
 0x1ec   :  { %1726 = vmatprep.subr.mxu0 %v6692_v27  ;;  %1797 = vmatprep.subr.mxu1 %v6695_v2 }
 0x1ed   :  { %1727 = vmatpush1.msra.mxu0 %v6698_v14  ;;  %1798 = vmatpush1.msra.mxu1 %v6701_v33 }
 0x1ee   :  { %1728 = vmatprep.subr.mxu0 %v6704_v25  ;;  %1799 = vmatprep.subr.mxu1 %v6707_v21 }
 0x1ef   :  { %1729 = vmatpush1.msra.mxu0 %v6710_v24  ;;  %1800 = vmatpush1.msra.mxu1 %v6713_v23 }
 0x1f0   :  { %1730 = vmatprep.subr.mxu0 %v6716_v19  ;;  %1801 = vmatprep.subr.mxu1 %v6719_v18 }
 0x1f1   :  { %1731 = vmatpush1.msra.mxu0 %v6722_v38  ;;  %1802 = vmatpush1.msra.mxu1 %v6725_v17  ;;  %v6743_v17 = vld [vmem:[#allocation11 + $0x78] sm:$0xff] }
 0x1f2   :  { %1732 = vmatprep.subr.mxu0 %v6728_v48  ;;  %1803 = vmatprep.subr.mxu1 %v6731_v8  ;;  %9210 = vst [vmem:[#allocation64_spill] sm:$0xff] %v6743_v17  ;;  %v6746_v48 = vld [vmem:[#allocation11 + $0x60] sm:$0xff]  ;;  %v6749_v8 = vld [vmem:[#allocation11 + $0x70] sm:$0xff] }
 0x1f3   :  { %1733 = vmatpush1.msra.mxu0 %v6734_v16  ;;  %1804 = vmatpush1.msra.mxu1 %v6737_v15  ;;  %9211 = vst [vmem:[#allocation65_spill] sm:$0xff] %v6746_v48  ;;  %9212 = vst [vmem:[#allocation66_spill] sm:$0xff] %v6749_v8  ;;  %v6752_v16 = vld [vmem:[#allocation11 + $0x48] sm:$0xff]  ;;  %v6755_v15 = vld [vmem:[#allocation11 + $0x58] sm:$0xff] }
 0x1f4   :  { %1734 = vmatprep.subr.mxu0 %v6740_v12  ;;  %1805 = vmatprep.subr.mxu1 %v6743_v17  ;;  %9213 = vst [vmem:[#allocation67_spill] sm:$0xff] %v6752_v16  ;;  %9214 = vst [vmem:[#allocation68_spill] sm:$0xff] %v6755_v15  ;;  %v6758_v12 = vld [vmem:[#allocation11 + $0x40] sm:$0xff]  ;;  %v6761_v17 = vld [vmem:[#allocation11 + $0x50] sm:$0xff] }
 0x1f5   :  { %1735 = vmatpush1.msra.mxu0 %v6746_v48  ;;  %1806 = vmatpush1.msra.mxu1 %v6749_v8  ;;  %9215 = vst [vmem:[#allocation69_spill] sm:$0xff] %v6758_v12  ;;  %9216 = vst [vmem:[#allocation70_spill] sm:$0xff] %v6761_v17  ;;  %v6764_v48 = vld [vmem:[#allocation11 + $0x28] sm:$0xff]  ;;  %v6767_v8 = vld [vmem:[#allocation11 + $0x38] sm:$0xff] }
 0x1f6   :  { %1736 = vmatprep.subr.mxu0 %v6752_v16  ;;  %1807 = vmatprep.subr.mxu1 %v6755_v15  ;;  %9217 = vst [vmem:[#allocation71_spill] sm:$0xff] %v6764_v48  ;;  %9218 = vst [vmem:[#allocation72_spill] sm:$0xff] %v6767_v8  ;;  %v6770_v16 = vld [vmem:[#allocation11 + $0x20] sm:$0xff]  ;;  %v6773_v15 = vld [vmem:[#allocation11 + $0x30] sm:$0xff] }
 0x1f7   :  { %1737 = vmatpush1.msra.mxu0 %v6758_v12  ;;  %1808 = vmatpush1.msra.mxu1 %v6761_v17  ;;  %9219 = vst [vmem:[#allocation73_spill] sm:$0xff] %v6770_v16  ;;  %9220 = vst [vmem:[#allocation74_spill] sm:$0xff] %v6773_v15  ;;  %v6776_v12 = vld [vmem:[#allocation11 + $0x8] sm:$0xff]  ;;  %v6779_v17 = vld [vmem:[#allocation11 + $0x18] sm:$0xff] }
 0x1f8   :  { %1738 = vmatprep.subr.mxu0 %v6764_v48  ;;  %1809 = vmatprep.subr.mxu1 %v6767_v8  ;;  %9221 = vst [vmem:[#allocation75_spill] sm:$0xff] %v6776_v12  ;;  %9222 = vst [vmem:[#allocation76_spill] sm:$0xff] %v6779_v17  ;;  %v6782_v48 = vld [vmem:[#allocation11] sm:$0xff]  ;;  %v6786_v8 = vld [vmem:[#allocation11 + $0x10] sm:$0xff] }
 0x1f9   :  { %1739 = vmatpush1.msra.mxu0 %v6770_v16  ;;  %1810 = vmatpush1.msra.mxu1 %v6773_v15  ;;  %9223 = vst [vmem:[#allocation77_spill] sm:$0xff] %v6782_v48  ;;  %9224 = vst [vmem:[#allocation78_spill] sm:$0xff] %v6786_v8  ;;  %v6790_v15 = vld [vmem:[#allocation12 + $0x1e8] sm:$0xff] }
 0x1fa   :  { %1740 = vmatprep.subr.mxu0 %v6776_v12  ;;  %1811 = vmatprep.subr.mxu1 %v6779_v17  ;;  %9225 = vst [vmem:[#allocation79_spill] sm:$0xff] %v6790_v15  ;;  %v6793_v12 = vld [vmem:[#allocation12 + $0x1f8] sm:$0xff] }
 0x1fb   :  { %1741 = vmatpush1.msra.mxu0 %v6782_v48  ;;  %1774 = vmatprep.mubr.f32.mxu0 %v9003_v3  ;;  %9226 = vst [vmem:[#allocation80_spill] sm:$0xff] %v6793_v12 }
 0x1fc   :  { %1812 = vmatpush1.msra.mxu1 %v6786_v8  ;;  %1845 = vmatprep.mubr.f32.mxu1 %v9003_v3 }
 0x1fd   :  { %1861 = vmatprep.subr.mxu0 %v6790_v15  ;;  %1932 = vmatprep.subr.mxu1 %v6793_v12 }
 0x279   :  { %v1392_v17 = vpop.f32.mrf.mxu0  ;;  %v1463_v19 = vpop.f32.mrf.mxu1 }
 0x27a   :  { %v1468_v16 = vadd.f32 %v1392_v17, %v6300_v60  ;;  %v1470_v15 = vadd.f32 %v1463_v19, %v6303_v47  ;;  %v6804_v19 = vpop.permute.xlu1 %1675 }
 0x27b   :  { %v1394_v48 = vpop.f32.mrf.mxu0  ;;  %v1465_v23 = vpop.f32.mrf.mxu1  ;;  %9227 = vst [vmem:[#allocation81_spill] sm:$0xff] %v6804_v19  ;;  %vm1677_vm10 = vcmp.eq.s32.totalorder %v6804_v19, 1 }
 0x27c   :  { %v4605_v38 = vmul.f32 -1.442695, %v1468_v16  ;;  %v1469_v18 = vadd.f32 %v1394_v48, %v6306_v63  ;;  %v1471_v24 = vadd.f32 %v1465_v23, %v6309_v4  ;;  %v1296_v4 = vsel %vm1294_vm8, %v6502_v55, 0.0 }
 0x27e   :  { %4869 = vpow2.f32 %v4605_v38  ;;  %v4606_v8 = vmul.f32 -1.442695, %v1469_v18  ;;  %v4607_v21 = vmul.f32 -1.442695, %v1471_v24 }
 0x280   :  { %4871 = vpow2.f32 %v4606_v8 }
 0x281   :  { %4873 = vpow2.f32 %v4607_v21 }
 0x282   :  { %4875 = vtanh.f32 %v1470_v15 }
 0x28b   :  { %v4870_v25 = vpop.eup %4869 }
 0x28c   :  { %v1626_v33 = vadd.f32 1.0, %v4870_v25 }
 0x28d   :  { %v4872_v12 = vpop.eup %4871 }
 0x28e   :  { %4877 = vrcp.f32 %v1626_v33  ;;  %v1632_v60 = vadd.f32 1.0, %v4872_v12  ;;  %v4874_v16 = vpop.eup %4873 }
 0x28f   :  { %v4876_v63 = vpop.eup %4875  ;;  %v1639_v18 = vadd.f32 1.0, %v4874_v16 }
 0x290   :  { %4879 = vrcp.f32 %v1632_v60 }
 0x291   :  { %4881 = vrcp.f32 %v1639_v18 }
 0x29b   :  { %v4878_v48 = vpop.eup %4877 }
 0x29c   :  { %v1643_v38 = vmul.f32 %v4878_v48, %v4876_v63  ;;  %v1543_v8 = vpop.f32.mrf.mxu0  ;;  %v1614_v25 = vpop.f32.mrf.mxu1 }
 0x29d   :  { %v4880_v17 = vpop.eup %4879  ;;  %v1619_v47 = vadd.f32 %v1543_v8, %v6481_v22  ;;  %v1621_v16 = vadd.f32 %v1614_v25, %v6484_v62  ;;  %v6826_v62 = vld [vmem:[#allocation12 + $0x1e0] sm:$0xff]  ;;  %v6847_v25 = vld [vmem:[#allocation12 + $0x1b8] sm:$0xff] }
 0x29e   :  { %v1642_v21 = vmul.f32 %v4880_v17, %v1296_v4  ;;  %v1545_v15 = vpop.f32.mrf.mxu0  ;;  %v1616_v22 = vpop.f32.mrf.mxu1 }
 0x29f   :  { %v4608_v12 = vmul.f32 -1.442695, %v1619_v47  ;;  %v1620_v23 = vadd.f32 %v1545_v15, %v6487_v57  ;;  %v1622_v60 = vadd.f32 %v1616_v22, %v6490_v42  ;;  %v4882_v48 = vpop.eup %4881  ;;  %v6835_v15 = vld [vmem:[#allocation12 + $0x1d8] sm:$0xff]  ;;  %v6853_v22 = vld [vmem:[#allocation12 + $0x1b0] sm:$0xff] }
 0x2a0   :  { %v1644_v24 = vadd.f32 %v1643_v38, %v1642_v21  ;;  %v6829_v21 = vld [vmem:[#allocation12 + $0x1f0] sm:$0xff] }
 0x2a1   :  { %4883 = vpow2.f32 %v4608_v12  ;;  %v4609_v33 = vmul.f32 -1.442695, %v1620_v23  ;;  %v4610_v63 = vmul.f32 -1.442695, %v1622_v60  ;;  %v6838_v12 = vld [vmem:[#allocation12 + $0x1c0] sm:$0xff]  ;;  %v6841_v23 = vld [vmem:[#allocation12 + $0x1d0] sm:$0xff] }
 0x2a2   :  { %4885 = vtanh.f32 %v1644_v24  ;;  %v6810_v55 = vsel %vm1677_vm10, %v1644_v24, %v1296_v4  ;;  %v6817_v4 = vsel %vm1294_vm8, %v6509_v51, 0.0  ;;  %v6832_v51 = vld [vmem:[#allocation12 + $0x1c8] sm:$0xff] }
 0x2a3   :  { %4887 = vpow2.f32 %v4609_v33  ;;  %9228 = vst [vmem:[#allocation82_spill] sm:$0xff] %v6817_v4  ;;  %v6844_v24 = vld [vmem:[#allocation12 + $0x1a8] sm:$0xff]  ;;  %v6850_v33 = vld [vmem:[#allocation12 + $0x1a0] sm:$0xff] }
 0x2a4   :  { %4889 = vtanh.f32 %v1621_v16  ;;  %v6856_v60 = vld [vmem:[#allocation12 + $0x188] sm:$0xff]  ;;  %v6859_v16 = vld [vmem:[#allocation12 + $0x198] sm:$0xff] }
 0x2a5   :  { %4891 = vpow2.f32 %v4610_v63  ;;  %v6862_v63 = vld [vmem:[#allocation12 + $0x180] sm:$0xff] }
 0x2a6   :  { %9230 = vst [vmem:[#allocation84_spill] sm:$0xff] %v6862_v63 }
 0x2ae   :  { %v4884_v8 = vpop.eup %4883 }
 0x2af   :  { %v4886_v57 = vpop.eup %4885  ;;  %v1650_v38 = vadd.f32 1.0, %v4884_v8  ;;  %v6868_v8 = vld [vmem:[#allocation12 + $0x168] sm:$0xff] }
 0x2b0   :  { %v4888_v18 = vpop.eup %4887  ;;  %v1646_v17 = vmul.f32 %v4886_v57, %v4882_v48  ;;  %v6865_v48 = vld [vmem:[#allocation12 + $0x190] sm:$0xff]  ;;  %9232 = vst [vmem:[#allocation86_spill] sm:$0xff] %v6868_v8  ;;  %v6871_v57 = vld [vmem:[#allocation12 + $0x178] sm:$0xff] }
 0x2b1   :  { %4893 = vrcp.f32 %v1650_v38  ;;  %v1656_v47 = vadd.f32 1.0, %v4888_v18  ;;  %9231 = vst [vmem:[#allocation85_spill] sm:$0xff] %v6865_v48  ;;  %9233 = vst [vmem:[#allocation87_spill] sm:$0xff] %v6871_v57  ;;  %v4890_v38 = vpop.eup %4889  ;;  %v6874_v18 = vld [vmem:[#allocation12 + $0x160] sm:$0xff] }
 0x2b2   :  { %v6822_v42 = vsel %vm1677_vm10, %v1646_v17, %v6817_v4  ;;  %9234 = vst [vmem:[#allocation88_spill] sm:$0xff] %v6874_v18  ;;  %v6877_v17 = vld [vmem:[#allocation12 + $0x170] sm:$0xff]  ;;  %v6883_v4 = vld [vmem:[#allocation12 + $0x158] sm:$0xff] }
 0x2b3   :  { %9229 = vst [vmem:[#allocation83_spill] sm:$0xff] %v6822_v42  ;;  %4895 = vrcp.f32 %v1656_v47  ;;  %1775 = vmatmul.mubr.f32.vlgmr.msra.gmra.mxu0 %v6822_v42  ;;  %1846 = vmatmul.mubr.f32.vlgmr.msra.gmra.mxu1 %v6822_v42  ;;  %9235 = vst [vmem:[#allocation89_spill] sm:$0xff] %v6877_v17  ;;  %v4892_v47 = vpop.eup %4891 }
 0x2b4   :  { %1862 = vmatpush1.msra.mxu0 %v6826_v62  ;;  %1933 = vmatpush1.msra.mxu1 %v6829_v21  ;;  %9237 = vst [vmem:[#allocation91_spill] sm:$0xff] %v6883_v4 }
 0x2b5   :  { %1863 = vmatprep.subr.mxu0 %v6832_v51  ;;  %1934 = vmatprep.subr.mxu1 %v6835_v15 }
 0x2b6   :  { %1864 = vmatpush1.msra.mxu0 %v6838_v12  ;;  %1935 = vmatpush1.msra.mxu1 %v6841_v23 }
 0x2b7   :  { %1865 = vmatprep.subr.mxu0 %v6844_v24  ;;  %1936 = vmatprep.subr.mxu1 %v6847_v25 }
 0x2b8   :  { %1866 = vmatpush1.msra.mxu0 %v6850_v33  ;;  %1937 = vmatpush1.msra.mxu1 %v6853_v22 }
 0x2b9   :  { %1867 = vmatprep.subr.mxu0 %v6856_v60  ;;  %1938 = vmatprep.subr.mxu1 %v6859_v16 }
 0x2ba   :  { %1868 = vmatpush1.msra.mxu0 %v6862_v63  ;;  %1939 = vmatpush1.msra.mxu1 %v6865_v48  ;;  %v6895_v48 = vld [vmem:[#allocation12 + $0x138] sm:$0xff]  ;;  %v1663_v63 = vadd.f32 1.0, %v4892_v47  ;;  %v6919_v47 = vpop.permute.xlu1 %1682 }
 0x2bb   :  { %1869 = vmatprep.subr.mxu0 %v6868_v8  ;;  %1940 = vmatprep.subr.mxu1 %v6871_v57  ;;  %v6886_v57 = vld [vmem:[#allocation12 + $0x140] sm:$0xff]  ;;  %v6889_v8 = vld [vmem:[#allocation12 + $0x150] sm:$0xff]  ;;  %9241 = vst [vmem:[#allocation130_spill] sm:$0xff] %v6895_v48  ;;  %9247 = vst [vmem:[#allocation136_spill] sm:$0xff] %v6919_v47  ;;  %vm1684_vm11 = vcmp.eq.s32.totalorder %v6919_v47, 1 }
 0x2bc   :  { %1870 = vmatpush1.msra.mxu0 %v6874_v18  ;;  %1941 = vmatpush1.msra.mxu1 %v6877_v17  ;;  %9238 = vst [vmem:[#allocation92_spill] sm:$0xff] %v6886_v57  ;;  %9239 = vst [vmem:[#allocation93_spill] sm:$0xff] %v6889_v8  ;;  %v6892_v17 = vld [vmem:[#allocation12 + $0x128] sm:$0xff]  ;;  %4897 = vrcp.f32 %v1663_v63 }
 0x2bd   :  { %1871 = vmatprep.subr.mxu0 %v6880_v36  ;;  %1942 = vmatprep.subr.mxu1 %v6883_v4  ;;  %9240 = vst [vmem:[#allocation129_spill] sm:$0xff] %v6892_v17  ;;  %v1303_v4 = vsel %vm1301_vm9, %v6550_v53, 0.0  ;;  %v6916_v53 = vld [vmem:[#allocation12 + $0x110] sm:$0xff] }
 0x2be   :  { %v4894_v19 = vpop.eup %4893  ;;  %1872 = vmatpush1.msra.mxu0 %v6886_v57  ;;  %1943 = vmatpush1.msra.mxu1 %v6889_v8  ;;  %v6901_v57 = vld [vmem:[#allocation12 + $0x120] sm:$0xff]  ;;  %v6904_v8 = vld [vmem:[#allocation12 + $0x130] sm:$0xff]  ;;  %9246 = vst [vmem:[#allocation135_spill] sm:$0xff] %v6916_v53 }
 0x2bf   :  { %v1667_v18 = vmul.f32 %v4894_v19, %v4890_v38  ;;  %1873 = vmatprep.subr.mxu0 %v6892_v17  ;;  %1944 = vmatprep.subr.mxu1 %v6895_v48  ;;  %9242 = vst [vmem:[#allocation131_spill] sm:$0xff] %v6904_v8  ;;  %v6907_v38 = vld [vmem:[#allocation12 + $0x108] sm:$0xff]  ;;  %v6910_v48 = vld [vmem:[#allocation12 + $0x118] sm:$0xff]  ;;  %v6913_v17 = vld [vmem:[#allocation12 + $0x100] sm:$0xff] }
 0x2c0   :  { %v4896_v36 = vpop.eup %4895  ;;  %1874 = vmatpush1.msra.mxu0 %v6901_v57  ;;  %1945 = vmatpush1.msra.mxu1 %v6904_v8  ;;  %9243 = vst [vmem:[#allocation132_spill] sm:$0xff] %v6907_v38  ;;  %9244 = vst [vmem:[#allocation133_spill] sm:$0xff] %v6910_v48  ;;  %v9285_v47 = vld [vmem:[#allocation56_spill] sm:$0xff] }
 0x2c1   :  { %v1666_v19 = vmul.f32 %v4896_v36, %v1303_v4  ;;  %1875 = vmatprep.subr.mxu0 %v6907_v38  ;;  %1946 = vmatprep.subr.mxu1 %v6910_v48  ;;  %9245 = vst [vmem:[#allocation134_spill] sm:$0xff] %v6913_v17  ;;  %v6921_v36 = vld [vmem:[#allocation12 + $0xe8] sm:$0xff]  ;;  %v6924_v38 = vld [vmem:[#allocation12 + $0xf8] sm:$0xff]  ;;  %v6928_v48 = vld [vmem:[#allocation12 + $0xe0] sm:$0xff] }
 0x2c2   :  { %1876 = vmatpush1.msra.mxu0 %v6913_v17  ;;  %1947 = vmatpush1.msra.mxu1 %v6916_v53  ;;  %9248 = vst [vmem:[#allocation137_spill] sm:$0xff] %v6921_v36  ;;  %9249 = vst [vmem:[#allocation138_spill] sm:$0xff] %v6924_v38  ;;  %v6931_v17 = vld [vmem:[#allocation12 + $0xf0] sm:$0xff] }
 0x2c3   :  { %v1668_v8 = vadd.f32 %v1667_v18, %v1666_v19  ;;  %1877 = vmatprep.subr.mxu0 %v6921_v36  ;;  %1948 = vmatprep.subr.mxu1 %v6924_v38  ;;  %9250 = vst [vmem:[#allocation139_spill] sm:$0xff] %v6928_v48  ;;  %9251 = vst [vmem:[#allocation140_spill] sm:$0xff] %v6931_v17  ;;  %v6934_v18 = vld [vmem:[#allocation12 + $0xc8] sm:$0xff]  ;;  %v6937_v19 = vld [vmem:[#allocation12 + $0xd8] sm:$0xff] }
 0x2c4   :  { %1878 = vmatpush1.msra.mxu0 %v6928_v48  ;;  %1949 = vmatpush1.msra.mxu1 %v6931_v17  ;;  %9252 = vst [vmem:[#allocation141_spill] sm:$0xff] %v6934_v18  ;;  %9253 = vst [vmem:[#allocation142_spill] sm:$0xff] %v6937_v19  ;;  %v6944_v38 = vld [vmem:[#allocation12 + $0xc0] sm:$0xff]  ;;  %v6947_v48 = vld [vmem:[#allocation12 + $0xd0] sm:$0xff] }
 0x2c5   :  { %1879 = vmatprep.subr.mxu0 %v6934_v18  ;;  %1950 = vmatprep.subr.mxu1 %v6937_v19  ;;  %4899 = vtanh.f32 %v1668_v8  ;;  %v6942_v63 = vsel %vm1684_vm11, %v1668_v8, %v1303_v4  ;;  %9254 = vst [vmem:[#allocation143_spill] sm:$0xff] %v6944_v38  ;;  %9255 = vst [vmem:[#allocation144_spill] sm:$0xff] %v6947_v48  ;;  %v6950_v17 = vld [vmem:[#allocation12 + $0xa8] sm:$0xff]  ;;  %v6953_v18 = vld [vmem:[#allocation12 + $0xb8] sm:$0xff] }
 0x2c6   :  { %1880 = vmatpush1.msra.mxu0 %v6944_v38  ;;  %1951 = vmatpush1.msra.mxu1 %v6947_v48  ;;  %9256 = vst [vmem:[#allocation145_spill] sm:$0xff] %v6950_v17  ;;  %9257 = vst [vmem:[#allocation146_spill] sm:$0xff] %v6953_v18  ;;  %v6956_v19 = vld [vmem:[#allocation12 + $0xa0] sm:$0xff]  ;;  %v6959_v4 = vld [vmem:[#allocation12 + $0xb0] sm:$0xff] }
 0x2c7   :  { %1881 = vmatprep.subr.mxu0 %v6950_v17  ;;  %1952 = vmatprep.subr.mxu1 %v6953_v18  ;;  %9258 = vst [vmem:[#allocation147_spill] sm:$0xff] %v6956_v19  ;;  %9259 = vst [vmem:[#allocation148_spill] sm:$0xff] %v6959_v4  ;;  %v6962_v8 = vld [vmem:[#allocation12 + $0x88] sm:$0xff]  ;;  %v6965_v48 = vld [vmem:[#allocation12 + $0x98] sm:$0xff] }
 0x2c8   :  { %1882 = vmatpush1.msra.mxu0 %v6956_v19  ;;  %1953 = vmatpush1.msra.mxu1 %v6959_v4  ;;  %9260 = vst [vmem:[#allocation149_spill] sm:$0xff] %v6962_v8  ;;  %9261 = vst [vmem:[#allocation150_spill] sm:$0xff] %v6965_v48  ;;  %v6968_v17 = vld [vmem:[#allocation12 + $0x80] sm:$0xff]  ;;  %v6971_v18 = vld [vmem:[#allocation12 + $0x90] sm:$0xff] }
 0x2c9   :  { %1883 = vmatprep.subr.mxu0 %v6962_v8  ;;  %1954 = vmatprep.subr.mxu1 %v6965_v48  ;;  %9262 = vst [vmem:[#allocation151_spill] sm:$0xff] %v6968_v17  ;;  %9263 = vst [vmem:[#allocation152_spill] sm:$0xff] %v6971_v18  ;;  %v6974_v19 = vld [vmem:[#allocation12 + $0x68] sm:$0xff]  ;;  %v6977_v4 = vld [vmem:[#allocation12 + $0x78] sm:$0xff] }
 0x2ca   :  { %1884 = vmatpush1.msra.mxu0 %v6968_v17  ;;  %1955 = vmatpush1.msra.mxu1 %v6971_v18  ;;  %9264 = vst [vmem:[#allocation153_spill] sm:$0xff] %v6974_v19  ;;  %9265 = vst [vmem:[#allocation154_spill] sm:$0xff] %v6977_v4  ;;  %v6980_v8 = vld [vmem:[#allocation12 + $0x60] sm:$0xff]  ;;  %v6983_v48 = vld [vmem:[#allocation12 + $0x70] sm:$0xff] }
 0x2cb   :  { %1885 = vmatprep.subr.mxu0 %v6974_v19  ;;  %1956 = vmatprep.subr.mxu1 %v6977_v4  ;;  %9266 = vst [vmem:[#allocation155_spill] sm:$0xff] %v6980_v8  ;;  %9267 = vst [vmem:[#allocation156_spill] sm:$0xff] %v6983_v48  ;;  %v6986_v17 = vld [vmem:[#allocation12 + $0x48] sm:$0xff]  ;;  %v6989_v18 = vld [vmem:[#allocation12 + $0x58] sm:$0xff] }
 0x2cc   :  { %1886 = vmatpush1.msra.mxu0 %v6980_v8  ;;  %1957 = vmatpush1.msra.mxu1 %v6983_v48  ;;  %9268 = vst [vmem:[#allocation157_spill] sm:$0xff] %v6986_v17  ;;  %9269 = vst [vmem:[#allocation158_spill] sm:$0xff] %v6989_v18  ;;  %v6992_v19 = vld [vmem:[#allocation12 + $0x40] sm:$0xff]  ;;  %v6995_v4 = vld [vmem:[#allocation12 + $0x50] sm:$0xff] }
 0x2cd   :  { %1887 = vmatprep.subr.mxu0 %v6986_v17  ;;  %1958 = vmatprep.subr.mxu1 %v6989_v18  ;;  %9270 = vst [vmem:[#allocation159_spill] sm:$0xff] %v6992_v19  ;;  %9271 = vst [vmem:[#allocation160_spill] sm:$0xff] %v6995_v4  ;;  %v6998_v8 = vld [vmem:[#allocation12 + $0x28] sm:$0xff]  ;;  %v7001_v48 = vld [vmem:[#allocation12 + $0x38] sm:$0xff] }
 0x2ce   :  { %1888 = vmatpush1.msra.mxu0 %v6992_v19  ;;  %1959 = vmatpush1.msra.mxu1 %v6995_v4  ;;  %9272 = vst [vmem:[#allocation161_spill] sm:$0xff] %v6998_v8  ;;  %v7004_v17 = vld [vmem:[#allocation12 + $0x20] sm:$0xff]  ;;  %v7007_v18 = vld [vmem:[#allocation12 + $0x30] sm:$0xff]  ;;  %v4898_v19 = vpop.eup %4897  ;;  %v7010_v38 = vld [vmem:[#allocation12 + $0x8] sm:$0xff] }
 0x2cf   :  { %1889 = vmatprep.subr.mxu0 %v6998_v8  ;;  %1960 = vmatprep.subr.mxu1 %v7001_v48  ;;  %9273 = vst [vmem:[#allocation162_spill] sm:$0xff] %v7004_v17  ;;  %9274 = vst [vmem:[#allocation163_spill] sm:$0xff] %v7007_v18  ;;  %v7013_v4 = vld [vmem:[#allocation12 + $0x18] sm:$0xff]  ;;  %v7016_v36 = vld [vmem:[#allocation12] sm:$0xff] }
 0x2d0   :  { %1890 = vmatpush1.msra.mxu0 %v7004_v17  ;;  %1961 = vmatpush1.msra.mxu1 %v7007_v18  ;;  %9275 = vst [vmem:[#allocation164_spill] sm:$0xff] %v7010_v38  ;;  %9276 = vst [vmem:[#allocation165_spill] sm:$0xff] %v7016_v36  ;;  %v7020_v17 = vld [vmem:[#allocation12 + $0x10] sm:$0xff] }
 0x2d1   :  { %1891 = vmatprep.subr.mxu0 %v7010_v38  ;;  %1962 = vmatprep.subr.mxu1 %v7013_v4  ;;  %v7027_v38 = vsel %vm1301_vm9, %v6587_v56, 0.0  ;;  %v9279_v56 = vld [vmem:[#allocation50_spill] sm:$0xff] }
 0x2d2   :  { %v4900_v8 = vpop.eup %4899  ;;  %1892 = vmatpush1.msra.mxu0 %v7016_v36  ;;  %1925 = vmatprep.mubr.f32.mxu0 %v9003_v3  ;;  %9277 = vst [vmem:[#allocation166_spill] sm:$0xff] %v7027_v38 }
 0x2d3   :  { %1963 = vmatpush1.msra.mxu1 %v7020_v17  ;;  %1996 = vmatprep.mubr.f32.mxu1 %v9003_v3  ;;  %v1670_v18 = vmul.f32 %v4900_v8, %v4898_v19  ;;  %v9281_v19 = vld [vmem:[#allocation52_spill] sm:$0xff]  ;;  %v9282_v8 = vld [vmem:[#allocation53_spill] sm:$0xff] }
 0x2d4   :  { %2094 = vmatprep.subr.mxu0 %v6589_v11  ;;  %2165 = vmatprep.subr.mxu1 %v6592_v6 }
 0x2d5   :  { %v7034_v36 = vsel %vm1684_vm11, %v1670_v18, %v7027_v38  ;;  %v9280_v18 = vld [vmem:[#allocation51_spill] sm:$0xff]  ;;  %v9283_v38 = vld [vmem:[#allocation54_spill] sm:$0xff] }
 0x2d6   :  { %9278 = vst [vmem:[#allocation167_spill] sm:$0xff] %v7034_v36  ;;  %1926 = vmatmul.mubr.f32.vlgmr.msra.gmra.mxu0 %v7034_v36  ;;  %1997 = vmatmul.mubr.f32.vlgmr.msra.gmra.mxu1 %v7034_v36 }
 0x2d7   :  { %2095 = vmatpush1.msra.mxu0 %v6602_v10  ;;  %2166 = vmatpush1.msra.mxu1 %v6605_v40 }
 0x2d8   :  { %2096 = vmatprep.subr.mxu0 %v6608_v20  ;;  %2167 = vmatprep.subr.mxu1 %v6611_v50 }
 0x2d9   :  { %2097 = vmatpush1.msra.mxu0 %v6614_v58  ;;  %2168 = vmatpush1.msra.mxu1 %v6617_v7 }
 0x2da   :  { %2098 = vmatprep.subr.mxu0 %v6620_v35  ;;  %2169 = vmatprep.subr.mxu1 %v6623_v37 }
 0x2db   :  { %2099 = vmatpush1.msra.mxu0 %v6626_v34  ;;  %2170 = vmatpush1.msra.mxu1 %v6629_v39 }
 0x2dc   :  { %2100 = vmatprep.subr.mxu0 %v6632_v59  ;;  %2171 = vmatprep.subr.mxu1 %v6635_v28 }
 0x2dd   :  { %2101 = vmatpush1.msra.mxu0 %v6638_v32  ;;  %2172 = vmatpush1.msra.mxu1 %v6641_v13 }
 0x2de   :  { %2102 = vmatprep.subr.mxu0 %v6644_v49  ;;  %2173 = vmatprep.subr.mxu1 %v6647_v52 }
 0x2df   :  { %2103 = vmatpush1.msra.mxu0 %v6650_v45  ;;  %2174 = vmatpush1.msra.mxu1 %v6653_v54 }
 0x2e0   :  { %2104 = vmatprep.subr.mxu0 %v6656_v9  ;;  %2175 = vmatprep.subr.mxu1 %v6659_v44 }
 0x2e1   :  { %2105 = vmatpush1.msra.mxu0 %v6662_v43  ;;  %2176 = vmatpush1.msra.mxu1 %v6665_v41  ;;  %v9314_v41 = vld [vmem:[#allocation124_spill] sm:$0xff] }
 0x2e2   :  { %2106 = vmatprep.subr.mxu0 %v6668_v61  ;;  %2177 = vmatprep.subr.mxu1 %v6671_v29 }
 0x2e3   :  { %2107 = vmatpush1.msra.mxu0 %v6674_v1  ;;  %2178 = vmatpush1.msra.mxu1 %v6677_v26  ;;  %v9313_v1 = vld [vmem:[#allocation24_spill] sm:$0xff] }
 0x2e4   :  { %2108 = vmatprep.subr.mxu0 %v6680_v46  ;;  %2179 = vmatprep.subr.mxu1 %v6683_v0  ;;  %v9312_v46 = vld [vmem:[#allocation26_spill] sm:$0xff] }
 0x2e5   :  { %2109 = vmatpush1.msra.mxu0 %v6686_v31  ;;  %2180 = vmatpush1.msra.mxu1 %v6689_v30  ;;  %v9286_v30 = vld [vmem:[#allocation57_spill] sm:$0xff] }
 0x2e6   :  { %2110 = vmatprep.subr.mxu0 %v6692_v27  ;;  %2181 = vmatprep.subr.mxu1 %v6695_v2  ;;  %v9287_v27 = vld [vmem:[#allocation58_spill] sm:$0xff]  ;;  %v9288_v2 = vld [vmem:[#allocation59_spill] sm:$0xff] }
 0x2e7   :  { %2111 = vmatpush1.msra.mxu0 %v6698_v14  ;;  %2182 = vmatpush1.msra.mxu1 %v9279_v56  ;;  %v9289_v14 = vld [vmem:[#allocation60_spill] sm:$0xff]  ;;  %v9290_v56 = vld [vmem:[#allocation61_spill] sm:$0xff] }
 0x2e8   :  { %2112 = vmatprep.subr.mxu0 %v9280_v18  ;;  %2183 = vmatprep.subr.mxu1 %v9281_v19  ;;  %v9291_v18 = vld [vmem:[#allocation62_spill] sm:$0xff]  ;;  %v9292_v19 = vld [vmem:[#allocation63_spill] sm:$0xff] }
 0x2e9   :  { %2113 = vmatpush1.msra.mxu0 %v9282_v8  ;;  %2184 = vmatpush1.msra.mxu1 %v9283_v38  ;;  %v9293_v8 = vld [vmem:[#allocation64_spill] sm:$0xff]  ;;  %v9294_v38 = vld [vmem:[#allocation65_spill] sm:$0xff] }
 0x2ea   :  { %2114 = vmatprep.subr.mxu0 %v9284_v5  ;;  %2185 = vmatprep.subr.mxu1 %v9285_v47  ;;  %v9295_v5 = vld [vmem:[#allocation66_spill] sm:$0xff]  ;;  %v9296_v47 = vld [vmem:[#allocation67_spill] sm:$0xff] }
 0x2eb   :  { %2115 = vmatpush1.msra.mxu0 %v9286_v30  ;;  %2186 = vmatpush1.msra.mxu1 %v9287_v27  ;;  %v9297_v30 = vld [vmem:[#allocation68_spill] sm:$0xff]  ;;  %v9298_v27 = vld [vmem:[#allocation69_spill] sm:$0xff] }
 0x2ec   :  { %2116 = vmatprep.subr.mxu0 %v9288_v2  ;;  %2187 = vmatprep.subr.mxu1 %v9289_v14  ;;  %v9299_v2 = vld [vmem:[#allocation70_spill] sm:$0xff]  ;;  %v9300_v14 = vld [vmem:[#allocation71_spill] sm:$0xff] }
 0x2ed   :  { %2117 = vmatpush1.msra.mxu0 %v9290_v56  ;;  %2188 = vmatpush1.msra.mxu1 %v9291_v18  ;;  %v9301_v56 = vld [vmem:[#allocation72_spill] sm:$0xff]  ;;  %v9302_v18 = vld [vmem:[#allocation73_spill] sm:$0xff] }
 0x2ee   :  { %2118 = vmatprep.subr.mxu0 %v9292_v19  ;;  %2189 = vmatprep.subr.mxu1 %v9293_v8  ;;  %v9303_v19 = vld [vmem:[#allocation74_spill] sm:$0xff]  ;;  %v9304_v8 = vld [vmem:[#allocation75_spill] sm:$0xff] }
 0x2ef   :  { %2119 = vmatpush1.msra.mxu0 %v9294_v38  ;;  %2190 = vmatpush1.msra.mxu1 %v9295_v5  ;;  %v9305_v38 = vld [vmem:[#allocation76_spill] sm:$0xff]  ;;  %v9306_v5 = vld [vmem:[#allocation77_spill] sm:$0xff] }
 0x2f0   :  { %2120 = vmatprep.subr.mxu0 %v9296_v47  ;;  %2191 = vmatprep.subr.mxu1 %v9297_v30  ;;  %v9307_v30 = vld [vmem:[#allocation78_spill] sm:$0xff] }
 0x2f1   :  { %2121 = vmatpush1.msra.mxu0 %v9298_v27  ;;  %2192 = vmatpush1.msra.mxu1 %v9299_v2  ;;  %v9308_v2 = vld [vmem:[#allocation79_spill] sm:$0xff] }
 0x2f2   :  { %2122 = vmatprep.subr.mxu0 %v9300_v14  ;;  %2193 = vmatprep.subr.mxu1 %v9301_v56  ;;  %v9309_v14 = vld [vmem:[#allocation80_spill] sm:$0xff] }
 0x2f3   :  { %2123 = vmatpush1.msra.mxu0 %v9302_v18  ;;  %2194 = vmatpush1.msra.mxu1 %v9303_v19  ;;  %v9310_v18 = vld [vmem:[#allocation23_spill] sm:$0xff] }
 0x2f4   :  { %2124 = vmatprep.subr.mxu0 %v9304_v8  ;;  %2195 = vmatprep.subr.mxu1 %v9305_v38  ;;  %v9311_v8 = vld [vmem:[#allocation25_spill] sm:$0xff] }
 0x2f5   :  { %2125 = vmatpush1.msra.mxu0 %v9306_v5  ;;  %2158 = vmatprep.mubr.f32.mxu0 %v9003_v3 }
 0x2f6   :  { %2196 = vmatpush1.msra.mxu1 %v9307_v30  ;;  %2229 = vmatprep.mubr.f32.mxu1 %v9003_v3 }
 0x2f7   :  { %2245 = vmatprep.subr.mxu0 %v9308_v2  ;;  %2316 = vmatprep.subr.mxu1 %v9309_v14 }
 0x373   :  { %v1776_v56 = vpop.f32.mrf.mxu0  ;;  %v1847_v38 = vpop.f32.mrf.mxu1 }
 0x374   :  { %v1852_v27 = vadd.f32 %v1776_v56, %v9310_v18  ;;  %v1854_v29 = vadd.f32 %v1847_v38, %v9313_v1  ;;  %v7111_v38 = vpop.permute.xlu0 %2059 }
 0x375   :  { %v1778_v19 = vpop.f32.mrf.mxu0  ;;  %v1849_v0 = vpop.f32.mrf.mxu1  ;;  %9316 = vst [vmem:[#allocation23_spill] sm:$0xff] %v7111_v38  ;;  %vm2061_vm12 = vcmp.eq.s32.totalorder %v7111_v38, 1  ;;  %v9332_v38 = vld [vmem:[#allocation131_spill] sm:$0xff] }
 0x376   :  { %v4613_v47 = vmul.f32 -1.442695, %v1852_v27  ;;  %v1853_v31 = vadd.f32 %v1778_v19, %v9311_v8  ;;  %v1855_v30 = vadd.f32 %v1849_v0, %v9312_v46 }
 0x378   :  { %4901 = vpow2.f32 %v4613_v47  ;;  %v4614_v5 = vmul.f32 -1.442695, %v1853_v31  ;;  %v4615_v26 = vmul.f32 -1.442695, %v1855_v30 }
 0x37a   :  { %4903 = vpow2.f32 %v4614_v5 }
 0x37b   :  { %4905 = vpow2.f32 %v4615_v26 }
 0x37c   :  { %4907 = vtanh.f32 %v1854_v29 }
 0x385   :  { %v4902_v2 = vpop.eup %4901 }
 0x386   :  { %v2010_v61 = vadd.f32 1.0, %v4902_v2  ;;  %v9315_v2 = vld [vmem:[#allocation126_spill] sm:$0xff] }
 0x387   :  { %v4904_v14 = vpop.eup %4903 }
 0x388   :  { %4909 = vrcp.f32 %v2010_v61  ;;  %v2016_v56 = vadd.f32 1.0, %v4904_v14  ;;  %v4906_v27 = vpop.eup %4905 }
 0x389   :  { %v4908_v18 = vpop.eup %4907  ;;  %v2023_v31 = vadd.f32 1.0, %v4906_v27  ;;  %v9317_v27 = vld [vmem:[#allocation127_spill] sm:$0xff] }
 0x38a   :  { %4911 = vrcp.f32 %v2016_v56 }
 0x38b   :  { %4913 = vrcp.f32 %v2023_v31 }
 0x395   :  { %v4910_v19 = vpop.eup %4909 }
 0x396   :  { %v2027_v47 = vmul.f32 %v4910_v19, %v4908_v18  ;;  %v1927_v5 = vpop.f32.mrf.mxu0  ;;  %v1998_v14 = vpop.f32.mrf.mxu1  ;;  %v9318_v19 = vld [vmem:[#allocation125_spill] sm:$0xff] }
 0x397   :  { %v4912_v8 = vpop.eup %4911  ;;  %v2003_v0 = vadd.f32 %v1927_v5, %v9314_v41  ;;  %v2005_v5 = vadd.f32 %v1998_v14, %v9318_v19  ;;  %v9322_v14 = vld [vmem:[#allocation86_spill] sm:$0xff] }
 0x398   :  { %v2026_v30 = vmul.f32 %v4912_v8, %v6810_v55  ;;  %v1929_v46 = vpop.f32.mrf.mxu0  ;;  %v2000_v56 = vpop.f32.mrf.mxu1 }
 0x399   :  { %v4616_v1 = vmul.f32 -1.442695, %v2003_v0  ;;  %v2004_v26 = vadd.f32 %v1929_v46, %v9315_v2  ;;  %v2006_v18 = vadd.f32 %v2000_v56, %v9317_v27  ;;  %v9324_v27 = vld [vmem:[#allocation88_spill] sm:$0xff] }
 0x39a   :  { %v2028_v61 = vadd.f32 %v2027_v47, %v2026_v30  ;;  %v4914_v47 = vpop.eup %4913 }
 0x39b   :  { %4915 = vpow2.f32 %v4616_v1  ;;  %v4617_v29 = vmul.f32 -1.442695, %v2004_v26  ;;  %v4618_v8 = vmul.f32 -1.442695, %v2006_v18  ;;  %v9320_v26 = vld [vmem:[#allocation84_spill] sm:$0xff]  ;;  %v9325_v18 = vld [vmem:[#allocation89_spill] sm:$0xff] }
 0x39c   :  { %4917 = vtanh.f32 %v2028_v61  ;;  %v7117_v41 = vsel %vm2061_vm12, %v2028_v61, %v6810_v55  ;;  %v9321_v61 = vld [vmem:[#allocation85_spill] sm:$0xff] }
 0x39d   :  { %4919 = vpow2.f32 %v4617_v29  ;;  %v9323_v29 = vld [vmem:[#allocation87_spill] sm:$0xff] }
 0x39e   :  { %4921 = vtanh.f32 %v2005_v5  ;;  %v9326_v5 = vld [vmem:[#allocation90_spill] sm:$0xff] }
 0x39f   :  { %4923 = vpow2.f32 %v4618_v8  ;;  %v9327_v8 = vld [vmem:[#allocation91_spill] sm:$0xff] }
 0x3a8   :  { %v4916_v31 = vpop.eup %4915 }
 0x3a9   :  { %v4918_v0 = vpop.eup %4917  ;;  %v2034_v30 = vadd.f32 1.0, %v4916_v31  ;;  %v9328_v31 = vld [vmem:[#allocation92_spill] sm:$0xff] }
 0x3aa   :  { %v4920_v46 = vpop.eup %4919  ;;  %v2030_v1 = vmul.f32 %v4918_v0, %v4914_v47  ;;  %v9329_v0 = vld [vmem:[#allocation93_spill] sm:$0xff] }
 0x3ab   :  { %4925 = vrcp.f32 %v2034_v30  ;;  %v2040_v2 = vadd.f32 1.0, %v4920_v46  ;;  %v4922_v56 = vpop.eup %4921  ;;  %v9330_v46 = vld [vmem:[#allocation129_spill] sm:$0xff] }
 0x3ac   :  { %v7124_v55 = vsel %vm2061_vm12, %v2030_v1, %v6822_v42  ;;  %v4924_v19 = vpop.eup %4923  ;;  %v9331_v1 = vld [vmem:[#allocation130_spill] sm:$0xff] }
 0x3ad   :  { %9319 = vst [vmem:[#allocation25_spill] sm:$0xff] %v7124_v55  ;;  %4927 = vrcp.f32 %v2040_v2  ;;  %2159 = vmatmul.mubr.f32.vlgmr.msra.gmra.mxu0 %v7124_v55  ;;  %2230 = vmatmul.mubr.f32.vlgmr.msra.gmra.mxu1 %v7124_v55  ;;  %v2047_v42 = vadd.f32 1.0, %v4924_v19  ;;  %v9338_v19 = vld [vmem:[#allocation138_spill] sm:$0xff] }
 0x3ae   :  { %2246 = vmatpush1.msra.mxu0 %v6826_v62  ;;  %2317 = vmatpush1.msra.mxu1 %v6829_v21 }
 0x3af   :  { %2247 = vmatprep.subr.mxu0 %v6832_v51  ;;  %2318 = vmatprep.subr.mxu1 %v6835_v15  ;;  %4929 = vrcp.f32 %v2047_v42  ;;  %v9346_v42 = vld [vmem:[#allocation146_spill] sm:$0xff] }
 0x3b0   :  { %2248 = vmatpush1.msra.mxu0 %v6838_v12  ;;  %2319 = vmatpush1.msra.mxu1 %v6841_v23 }
 0x3b1   :  { %2249 = vmatprep.subr.mxu0 %v6844_v24  ;;  %2320 = vmatprep.subr.mxu1 %v6847_v25 }
 0x3b2   :  { %2250 = vmatpush1.msra.mxu0 %v6850_v33  ;;  %2321 = vmatpush1.msra.mxu1 %v6853_v22 }
 0x3b3   :  { %2251 = vmatprep.subr.mxu0 %v6856_v60  ;;  %2322 = vmatprep.subr.mxu1 %v6859_v16 }
 0x3b4   :  { %2252 = vmatpush1.msra.mxu0 %v9320_v26  ;;  %2323 = vmatpush1.msra.mxu1 %v9321_v61 }
 0x3b5   :  { %2253 = vmatprep.subr.mxu0 %v9322_v14  ;;  %2324 = vmatprep.subr.mxu1 %v9323_v29 }
 0x3b6   :  { %2254 = vmatpush1.msra.mxu0 %v9324_v27  ;;  %2325 = vmatpush1.msra.mxu1 %v9325_v18  ;;  %v9333_v18 = vld [vmem:[#allocation132_spill] sm:$0xff] }
 0x3b7   :  { %2255 = vmatprep.subr.mxu0 %v9326_v5  ;;  %2326 = vmatprep.subr.mxu1 %v9327_v8  ;;  %v9334_v8 = vld [vmem:[#allocation133_spill] sm:$0xff] }
 0x3b8   :  { %v4926_v47 = vpop.eup %4925  ;;  %2256 = vmatpush1.msra.mxu0 %v9328_v31  ;;  %2327 = vmatpush1.msra.mxu1 %v9329_v0  ;;  %v9335_v31 = vld [vmem:[#allocation134_spill] sm:$0xff] }
 0x3b9   :  { %v2051_v30 = vmul.f32 %v4926_v47, %v4922_v56  ;;  %2257 = vmatprep.subr.mxu0 %v9330_v46  ;;  %2328 = vmatprep.subr.mxu1 %v9331_v1  ;;  %v7159_v56 = vpop.permute.xlu1 %2066  ;;  %v9337_v1 = vld [vmem:[#allocation137_spill] sm:$0xff] }
 0x3ba   :  { %v4928_v2 = vpop.eup %4927  ;;  %2258 = vmatpush1.msra.mxu0 %v6901_v57  ;;  %2329 = vmatpush1.msra.mxu1 %v9332_v38  ;;  %9336 = vst [vmem:[#allocation26_spill] sm:$0xff] %v7159_v56  ;;  %vm2068_vm13 = vcmp.eq.s32.totalorder %v7159_v56, 1  ;;  %v9339_v38 = vld [vmem:[#allocation139_spill] sm:$0xff] }
 0x3bb   :  { %v2050_v5 = vmul.f32 %v4928_v2, %v6942_v63  ;;  %2259 = vmatprep.subr.mxu0 %v9333_v18  ;;  %2330 = vmatprep.subr.mxu1 %v9334_v8  ;;  %v9340_v2 = vld [vmem:[#allocation140_spill] sm:$0xff]  ;;  %v9341_v18 = vld [vmem:[#allocation141_spill] sm:$0xff]  ;;  %v9342_v8 = vld [vmem:[#allocation142_spill] sm:$0xff] }
 0x3bc   :  { %2260 = vmatpush1.msra.mxu0 %v9335_v31  ;;  %2331 = vmatpush1.msra.mxu1 %v6916_v53  ;;  %v9351_v53 = vld [vmem:[#allocation151_spill] sm:$0xff] }
 0x3bd   :  { %v2052_v47 = vadd.f32 %v2051_v30, %v2050_v5  ;;  %2261 = vmatprep.subr.mxu0 %v9337_v1  ;;  %2332 = vmatprep.subr.mxu1 %v9338_v19  ;;  %v9343_v30 = vld [vmem:[#allocation143_spill] sm:$0xff]  ;;  %v9344_v19 = vld [vmem:[#allocation144_spill] sm:$0xff]  ;;  %v9345_v1 = vld [vmem:[#allocation145_spill] sm:$0xff] }
 0x3be   :  { %2262 = vmatpush1.msra.mxu0 %v9339_v38  ;;  %2333 = vmatpush1.msra.mxu1 %v9340_v2  ;;  %v9347_v38 = vld [vmem:[#allocation147_spill] sm:$0xff]  ;;  %v9348_v2 = vld [vmem:[#allocation148_spill] sm:$0xff] }
 0x3bf   :  { %2263 = vmatprep.subr.mxu0 %v9341_v18  ;;  %2334 = vmatprep.subr.mxu1 %v9342_v8  ;;  %4931 = vtanh.f32 %v2052_v47  ;;  %v7171_v5 = vsel %vm2068_vm13, %v2052_v47, %v6942_v63  ;;  %v9349_v18 = vld [vmem:[#allocation149_spill] sm:$0xff]  ;;  %v9350_v8 = vld [vmem:[#allocation150_spill] sm:$0xff]  ;;  %v9352_v63 = vld [vmem:[#allocation152_spill] sm:$0xff] }
 0x3c0   :  { %2264 = vmatpush1.msra.mxu0 %v9343_v30  ;;  %2335 = vmatpush1.msra.mxu1 %v9344_v19  ;;  %v9353_v47 = vld [vmem:[#allocation153_spill] sm:$0xff]  ;;  %v9354_v30 = vld [vmem:[#allocation154_spill] sm:$0xff]  ;;  %v9355_v19 = vld [vmem:[#allocation155_spill] sm:$0xff] }
 0x3c1   :  { %2265 = vmatprep.subr.mxu0 %v9345_v1  ;;  %2336 = vmatprep.subr.mxu1 %v9346_v42  ;;  %v9356_v1 = vld [vmem:[#allocation156_spill] sm:$0xff]  ;;  %v9357_v42 = vld [vmem:[#allocation157_spill] sm:$0xff] }
 0x3c2   :  { %2266 = vmatpush1.msra.mxu0 %v9347_v38  ;;  %2337 = vmatpush1.msra.mxu1 %v9348_v2  ;;  %v9358_v38 = vld [vmem:[#allocation158_spill] sm:$0xff]  ;;  %v9359_v2 = vld [vmem:[#allocation159_spill] sm:$0xff] }
 0x3c3   :  { %2267 = vmatprep.subr.mxu0 %v9349_v18  ;;  %2338 = vmatprep.subr.mxu1 %v9350_v8  ;;  %v9360_v18 = vld [vmem:[#allocation160_spill] sm:$0xff]  ;;  %v9361_v8 = vld [vmem:[#allocation161_spill] sm:$0xff] }
 0x3c4   :  { %2268 = vmatpush1.msra.mxu0 %v9351_v53  ;;  %2339 = vmatpush1.msra.mxu1 %v9352_v63  ;;  %v9362_v63 = vld [vmem:[#allocation162_spill] sm:$0xff]  ;;  %v7548_v56 = vld [vmem:[#allocation11 + $0x28] sm:$0xff] }
 0x3c5   :  { %2269 = vmatprep.subr.mxu0 %v9353_v47  ;;  %2340 = vmatprep.subr.mxu1 %v9354_v30  ;;  %v9363_v47 = vld [vmem:[#allocation163_spill] sm:$0xff]  ;;  %v4930_v30 = vpop.eup %4929 }
 0x3c6   :  { %2270 = vmatpush1.msra.mxu0 %v9355_v19  ;;  %2341 = vmatpush1.msra.mxu1 %v9356_v1  ;;  %v9364_v19 = vld [vmem:[#allocation164_spill] sm:$0xff]  ;;  %v9365_v1 = vld [vmem:[#allocation165_spill] sm:$0xff] }
 0x3c7   :  { %2271 = vmatprep.subr.mxu0 %v9357_v42  ;;  %2342 = vmatprep.subr.mxu1 %v9358_v38 }
 0x3c8   :  { %2272 = vmatpush1.msra.mxu0 %v9359_v2  ;;  %2343 = vmatpush1.msra.mxu1 %v9360_v18 }
 0x3c9   :  { %2273 = vmatprep.subr.mxu0 %v9361_v8  ;;  %2344 = vmatprep.subr.mxu1 %v7001_v48 }
 0x3ca   :  { %2274 = vmatpush1.msra.mxu0 %v9362_v63  ;;  %2345 = vmatpush1.msra.mxu1 %v9363_v47 }
 0x3cb   :  { %2275 = vmatprep.subr.mxu0 %v9364_v19  ;;  %2346 = vmatprep.subr.mxu1 %v7013_v4 }
 0x3cc   :  { %v4932_v42 = vpop.eup %4931  ;;  %2276 = vmatpush1.msra.mxu0 %v9365_v1  ;;  %2309 = vmatprep.mubr.f32.mxu0 %v9003_v3 }
 0x3cd   :  { %2347 = vmatpush1.msra.mxu1 %v7020_v17  ;;  %2380 = vmatprep.mubr.f32.mxu1 %v9003_v3  ;;  %v2054_v8 = vmul.f32 %v4932_v42, %v4930_v30  ;;  %v9391_v30 = vld [vmem:[#allocation62_spill] sm:$0xff]  ;;  %v9392_v42 = vld [vmem:[#allocation63_spill] sm:$0xff] }
 0x3ce   :  { %2478 = vmatprep.subr.mxu0 %v6589_v11  ;;  %2549 = vmatprep.subr.mxu1 %v6592_v6  ;;  %v9367_v11 = vld [vmem:[#allocation38_spill] sm:$0xff]  ;;  %v9368_v6 = vld [vmem:[#allocation39_spill] sm:$0xff] }
 0x3cf   :  { %v7206_v19 = vsel %vm2068_vm13, %v2054_v8, %v7034_v36  ;;  %v9390_v8 = vld [vmem:[#allocation61_spill] sm:$0xff] }
 0x3d0   :  { %9366 = vst [vmem:[#allocation24_spill] sm:$0xff] %v7206_v19  ;;  %2310 = vmatmul.mubr.f32.vlgmr.msra.gmra.mxu0 %v7206_v19  ;;  %2381 = vmatmul.mubr.f32.vlgmr.msra.gmra.mxu1 %v7206_v19  ;;  %v7539_v36 = vld [vmem:[#allocation11 + $0x58] sm:$0xff] }
 0x3d1   :  { %2479 = vmatpush1.msra.mxu0 %v6602_v10  ;;  %2550 = vmatpush1.msra.mxu1 %v6605_v40  ;;  %v9369_v10 = vld [vmem:[#allocation40_spill] sm:$0xff]  ;;  %v9370_v40 = vld [vmem:[#allocation41_spill] sm:$0xff] }
 0x3d2   :  { %2480 = vmatprep.subr.mxu0 %v6608_v20  ;;  %2551 = vmatprep.subr.mxu1 %v6611_v50  ;;  %v9371_v20 = vld [vmem:[#allocation42_spill] sm:$0xff]  ;;  %v9372_v50 = vld [vmem:[#allocation43_spill] sm:$0xff] }
 0x3d3   :  { %2481 = vmatpush1.msra.mxu0 %v6614_v58  ;;  %2552 = vmatpush1.msra.mxu1 %v6617_v7  ;;  %v9373_v58 = vld [vmem:[#allocation44_spill] sm:$0xff]  ;;  %v9374_v7 = vld [vmem:[#allocation45_spill] sm:$0xff] }
 0x3d4   :  { %2482 = vmatprep.subr.mxu0 %v6620_v35  ;;  %2553 = vmatprep.subr.mxu1 %v6623_v37  ;;  %v9375_v35 = vld [vmem:[#allocation46_spill] sm:$0xff]  ;;  %v9376_v37 = vld [vmem:[#allocation47_spill] sm:$0xff] }
 0x3d5   :  { %2483 = vmatpush1.msra.mxu0 %v6626_v34  ;;  %2554 = vmatpush1.msra.mxu1 %v6629_v39  ;;  %v9377_v34 = vld [vmem:[#allocation48_spill] sm:$0xff]  ;;  %v9378_v39 = vld [vmem:[#allocation49_spill] sm:$0xff] }
 0x3d6   :  { %2484 = vmatprep.subr.mxu0 %v6632_v59  ;;  %2555 = vmatprep.subr.mxu1 %v6635_v28  ;;  %v9379_v59 = vld [vmem:[#allocation50_spill] sm:$0xff]  ;;  %v9380_v28 = vld [vmem:[#allocation51_spill] sm:$0xff] }
 0x3d7   :  { %2485 = vmatpush1.msra.mxu0 %v6638_v32  ;;  %2556 = vmatpush1.msra.mxu1 %v6641_v13  ;;  %v9381_v32 = vld [vmem:[#allocation52_spill] sm:$0xff]  ;;  %v9382_v13 = vld [vmem:[#allocation53_spill] sm:$0xff]  ;;  %9480 = vst [vmem:[#allocation50_spill] sm:$0xff] %v7539_v36 }
 0x3d8   :  { %2486 = vmatprep.subr.mxu0 %v6644_v49  ;;  %2557 = vmatprep.subr.mxu1 %v6647_v52  ;;  %v9383_v49 = vld [vmem:[#allocation54_spill] sm:$0xff]  ;;  %v9384_v52 = vld [vmem:[#allocation55_spill] sm:$0xff]  ;;  %9483 = vst [vmem:[#allocation53_spill] sm:$0xff] %v7548_v56 }
 0x3d9   :  { %2487 = vmatpush1.msra.mxu0 %v6650_v45  ;;  %2558 = vmatpush1.msra.mxu1 %v6653_v54  ;;  %v9385_v45 = vld [vmem:[#allocation56_spill] sm:$0xff]  ;;  %v9386_v54 = vld [vmem:[#allocation57_spill] sm:$0xff] }
 0x3da   :  { %2488 = vmatprep.subr.mxu0 %v6656_v9  ;;  %2559 = vmatprep.subr.mxu1 %v6659_v44  ;;  %v9387_v9 = vld [vmem:[#allocation58_spill] sm:$0xff]  ;;  %v9388_v44 = vld [vmem:[#allocation59_spill] sm:$0xff] }
 0x3db   :  { %2489 = vmatpush1.msra.mxu0 %v6662_v43  ;;  %2560 = vmatpush1.msra.mxu1 %v9367_v11  ;;  %v9389_v43 = vld [vmem:[#allocation60_spill] sm:$0xff] }
 0x3dc   :  { %2490 = vmatprep.subr.mxu0 %v9368_v6  ;;  %2561 = vmatprep.subr.mxu1 %v9369_v10  ;;  %v9393_v11 = vld [vmem:[#allocation64_spill] sm:$0xff]  ;;  %v9394_v6 = vld [vmem:[#allocation65_spill] sm:$0xff]  ;;  %v9395_v10 = vld [vmem:[#allocation66_spill] sm:$0xff] }
 0x3dd   :  { %2491 = vmatpush1.msra.mxu0 %v9370_v40  ;;  %2562 = vmatpush1.msra.mxu1 %v9371_v20  ;;  %v9396_v40 = vld [vmem:[#allocation67_spill] sm:$0xff]  ;;  %v9397_v20 = vld [vmem:[#allocation68_spill] sm:$0xff] }
 0x3de   :  { %2492 = vmatprep.subr.mxu0 %v9372_v50  ;;  %2563 = vmatprep.subr.mxu1 %v9373_v58  ;;  %v9398_v50 = vld [vmem:[#allocation69_spill] sm:$0xff]  ;;  %v9399_v58 = vld [vmem:[#allocation70_spill] sm:$0xff] }
 0x3df   :  { %2493 = vmatpush1.msra.mxu0 %v9374_v7  ;;  %2564 = vmatpush1.msra.mxu1 %v9375_v35  ;;  %v9400_v7 = vld [vmem:[#allocation71_spill] sm:$0xff]  ;;  %v9401_v35 = vld [vmem:[#allocation72_spill] sm:$0xff] }
 0x3e0   :  { %2494 = vmatprep.subr.mxu0 %v9376_v37  ;;  %2565 = vmatprep.subr.mxu1 %v9377_v34  ;;  %v9402_v37 = vld [vmem:[#allocation73_spill] sm:$0xff]  ;;  %v9403_v34 = vld [vmem:[#allocation74_spill] sm:$0xff] }
 0x3e1   :  { %2495 = vmatpush1.msra.mxu0 %v9378_v39  ;;  %2566 = vmatpush1.msra.mxu1 %v9379_v59  ;;  %v9404_v39 = vld [vmem:[#allocation75_spill] sm:$0xff]  ;;  %v9405_v59 = vld [vmem:[#allocation76_spill] sm:$0xff] }
 0x3e2   :  { %2496 = vmatprep.subr.mxu0 %v9380_v28  ;;  %2567 = vmatprep.subr.mxu1 %v9381_v32  ;;  %v9406_v28 = vld [vmem:[#allocation77_spill] sm:$0xff]  ;;  %v9407_v32 = vld [vmem:[#allocation78_spill] sm:$0xff] }
 0x3e3   :  { %2497 = vmatpush1.msra.mxu0 %v9382_v13  ;;  %2568 = vmatpush1.msra.mxu1 %v9383_v49  ;;  %v9408_v13 = vld [vmem:[#allocation79_spill] sm:$0xff]  ;;  %v9409_v49 = vld [vmem:[#allocation80_spill] sm:$0xff] }
 0x3e4   :  { %2498 = vmatprep.subr.mxu0 %v9384_v52  ;;  %2569 = vmatprep.subr.mxu1 %v9385_v45  ;;  %v9410_v45 = vld [vmem:[#allocation27_spill] sm:$0xff] }
 0x3e5   :  { %2499 = vmatpush1.msra.mxu0 %v9386_v54  ;;  %2570 = vmatpush1.msra.mxu1 %v9387_v9 }
 0x3e6   :  { %2500 = vmatprep.subr.mxu0 %v9388_v44  ;;  %2571 = vmatprep.subr.mxu1 %v9389_v43  ;;  %v9411_v43 = vld [vmem:[#allocation29_spill] sm:$0xff] }
 0x3e7   :  { %2501 = vmatpush1.msra.mxu0 %v9390_v8  ;;  %2572 = vmatpush1.msra.mxu1 %v9391_v30 }
 0x3e8   :  { %2502 = vmatprep.subr.mxu0 %v9392_v42  ;;  %2573 = vmatprep.subr.mxu1 %v9393_v11 }
 0x3e9   :  { %2503 = vmatpush1.msra.mxu0 %v9394_v6  ;;  %2574 = vmatpush1.msra.mxu1 %v9395_v10  ;;  %v9412_v6 = vld [vmem:[#allocation30_spill] sm:$0xff] }
 0x3ea   :  { %2504 = vmatprep.subr.mxu0 %v9396_v40  ;;  %2575 = vmatprep.subr.mxu1 %v9397_v20  ;;  %v9413_v20 = vld [vmem:[#allocation28_spill] sm:$0xff] }
 0x3eb   :  { %2505 = vmatpush1.msra.mxu0 %v9398_v50  ;;  %2576 = vmatpush1.msra.mxu1 %v9399_v58 }
 0x3ec   :  { %2506 = vmatprep.subr.mxu0 %v9400_v7  ;;  %2577 = vmatprep.subr.mxu1 %v9401_v35 }
 0x3ed   :  { %2507 = vmatpush1.msra.mxu0 %v9402_v37  ;;  %2578 = vmatpush1.msra.mxu1 %v9403_v34 }
 0x3ee   :  { %2508 = vmatprep.subr.mxu0 %v9404_v39  ;;  %2579 = vmatprep.subr.mxu1 %v9405_v59 }
 0x3ef   :  { %2509 = vmatpush1.msra.mxu0 %v9406_v28  ;;  %2542 = vmatprep.mubr.f32.mxu0 %v9003_v3 }
 0x3f0   :  { %2580 = vmatpush1.msra.mxu1 %v9407_v32  ;;  %2613 = vmatprep.mubr.f32.mxu1 %v9003_v3 }
 0x3f1   :  { %2629 = vmatprep.subr.mxu0 %v9408_v13  ;;  %2700 = vmatprep.subr.mxu1 %v9409_v49 }
 0x46d   :  { %v2160_v52 = vpop.f32.mrf.mxu0  ;;  %v2231_v30 = vpop.f32.mrf.mxu1 }
 0x46e   :  { %v2236_v54 = vadd.f32 %v2160_v52, %v9410_v45  ;;  %v2238_v50 = vadd.f32 %v2231_v30, %v9413_v20  ;;  %v9414_v52 = vld [vmem:[#allocation120_spill] sm:$0xff]  ;;  %v7283_v30 = vpop.permute.xlu0 %2443  ;;  %v9416_v20 = vld [vmem:[#allocation123_spill] sm:$0xff] }
 0x46f   :  { %v2162_v9 = vpop.f32.mrf.mxu0  ;;  %v2233_v11 = vpop.f32.mrf.mxu1  ;;  %vm2445_vm14 = vcmp.eq.s32.totalorder %v7283_v30, 1 }
 0x470   :  { %v4621_v44 = vmul.f32 -1.442695, %v2236_v54  ;;  %v2237_v8 = vadd.f32 %v2162_v9, %v9411_v43  ;;  %v2239_v10 = vadd.f32 %v2233_v11, %v9412_v6  ;;  %v9415_v43 = vld [vmem:[#allocation122_spill] sm:$0xff] }
 0x472   :  { %4933 = vpow2.f32 %v4621_v44  ;;  %v4622_v42 = vmul.f32 -1.442695, %v2237_v8  ;;  %v4623_v40 = vmul.f32 -1.442695, %v2239_v10 }
 0x474   :  { %4935 = vpow2.f32 %v4622_v42 }
 0x475   :  { %4937 = vpow2.f32 %v4623_v40 }
 0x476   :  { %4939 = vtanh.f32 %v2238_v50 }
 0x47f   :  { %v4934_v58 = vpop.eup %4933 }
 0x480   :  { %v2394_v7 = vadd.f32 1.0, %v4934_v58  ;;  %v9417_v58 = vld [vmem:[#allocation121_spill] sm:$0xff] }
 0x481   :  { %v4936_v35 = vpop.eup %4935 }
 0x482   :  { %4941 = vrcp.f32 %v2394_v7  ;;  %v2400_v37 = vadd.f32 1.0, %v4936_v35  ;;  %v4938_v34 = vpop.eup %4937 }
 0x483   :  { %v4940_v39 = vpop.eup %4939  ;;  %v2407_v32 = vadd.f32 1.0, %v4938_v34 }
 0x484   :  { %4943 = vrcp.f32 %v2400_v37 }
 0x485   :  { %4945 = vrcp.f32 %v2407_v32 }
 0x48f   :  { %v4942_v59 = vpop.eup %4941 }
 0x490   :  { %v2411_v28 = vmul.f32 %v4942_v59, %v4940_v39  ;;  %v2311_v13 = vpop.f32.mrf.mxu0  ;;  %v2382_v11 = vpop.f32.mrf.mxu1 }
 0x491   :  { %v4944_v49 = vpop.eup %4943  ;;  %v2387_v45 = vadd.f32 %v2311_v13, %v9414_v52  ;;  %v2389_v7 = vadd.f32 %v2382_v11, %v9417_v58  ;;  %v9431_v52 = vld [vmem:[#allocation140_spill] sm:$0xff]  ;;  %v9445_v58 = vld [vmem:[#allocation155_spill] sm:$0xff] }
 0x492   :  { %v2410_v54 = vmul.f32 %v4944_v49, %v7117_v41  ;;  %v2313_v9 = vpop.f32.mrf.mxu0  ;;  %v2384_v40 = vpop.f32.mrf.mxu1  ;;  %v9429_v49 = vld [vmem:[#allocation138_spill] sm:$0xff]  ;;  %v9439_v11 = vld [vmem:[#allocation148_spill] sm:$0xff] }
 0x493   :  { %v4624_v44 = vmul.f32 -1.442695, %v2387_v45  ;;  %v2388_v8 = vadd.f32 %v2313_v9, %v9415_v43  ;;  %v2390_v50 = vadd.f32 %v2384_v40, %v9416_v20  ;;  %v4946_v37 = vpop.eup %4945  ;;  %v9432_v45 = vld [vmem:[#allocation141_spill] sm:$0xff]  ;;  %v9434_v9 = vld [vmem:[#allocation143_spill] sm:$0xff]  ;;  %v9441_v40 = vld [vmem:[#allocation150_spill] sm:$0xff] }
 0x494   :  { %v2412_v42 = vadd.f32 %v2411_v28, %v2410_v54  ;;  %v9433_v54 = vld [vmem:[#allocation142_spill] sm:$0xff]  ;;  %v9436_v43 = vld [vmem:[#allocation145_spill] sm:$0xff] }
 0x495   :  { %4947 = vpow2.f32 %v4624_v44  ;;  %v4625_v6 = vmul.f32 -1.442695, %v2388_v8  ;;  %v4626_v35 = vmul.f32 -1.442695, %v2390_v50  ;;  %v9435_v44 = vld [vmem:[#allocation144_spill] sm:$0xff]  ;;  %v9437_v8 = vld [vmem:[#allocation146_spill] sm:$0xff] }
 0x496   :  { %4949 = vtanh.f32 %v2412_v42  ;;  %v7289_v10 = vsel %vm2445_vm14, %v2412_v42, %v7117_v41  ;;  %v9438_v42 = vld [vmem:[#allocation147_spill] sm:$0xff]  ;;  %v9443_v20 = vld [vmem:[#allocation153_spill] sm:$0xff]  ;;  %v9444_v50 = vld [vmem:[#allocation154_spill] sm:$0xff] }
 0x497   :  { %4951 = vpow2.f32 %v4625_v6  ;;  %v9440_v6 = vld [vmem:[#allocation149_spill] sm:$0xff] }
 0x498   :  { %4953 = vtanh.f32 %v2389_v7  ;;  %v9446_v7 = vld [vmem:[#allocation156_spill] sm:$0xff] }
 0x499   :  { %4955 = vpow2.f32 %v4626_v35  ;;  %v9447_v35 = vld [vmem:[#allocation157_spill] sm:$0xff] }
 0x4a2   :  { %v4948_v34 = vpop.eup %4947 }
 0x4a3   :  { %v4950_v39 = vpop.eup %4949  ;;  %v2418_v59 = vadd.f32 1.0, %v4948_v34  ;;  %v9449_v34 = vld [vmem:[#allocation164_spill] sm:$0xff] }
 0x4a4   :  { %v4952_v28 = vpop.eup %4951  ;;  %v2414_v32 = vmul.f32 %v4950_v39, %v4946_v37  ;;  %v9448_v37 = vld [vmem:[#allocation161_spill] sm:$0xff] }
 0x4a5   :  { %4957 = vrcp.f32 %v2418_v59  ;;  %v2424_v13 = vadd.f32 1.0, %v4952_v28  ;;  %v7401_v59 = vld [vmem:[#allocation11 + $0x1d0] sm:$0xff]  ;;  %v7404_v28 = vld [vmem:[#allocation11 + $0x1a8] sm:$0xff] }
 0x4a6   :  { %v7296_v41 = vsel %vm2445_vm14, %v2414_v32, %v7124_v55  ;;  %v7407_v32 = vld [vmem:[#allocation11 + $0x1b8] sm:$0xff]  ;;  %v7545_v55 = vld [vmem:[#allocation11 + $0x50] sm:$0xff] }
 0x4a7   :  { %9418 = vst [vmem:[#allocation124_spill] sm:$0xff] %v7296_v41  ;;  %4959 = vrcp.f32 %v2424_v13  ;;  %2543 = vmatmul.mubr.f32.vlgmr.msra.gmra.mxu0 %v7296_v41  ;;  %2614 = vmatmul.mubr.f32.vlgmr.msra.gmra.mxu1 %v7296_v41  ;;  %v7410_v13 = vld [vmem:[#allocation11 + $0x1a0] sm:$0xff]  ;;  %9482 = vst [vmem:[#allocation52_spill] sm:$0xff] %v7545_v55 }
 0x4a8   :  { %2630 = vmatpush1.msra.mxu0 %v6826_v62  ;;  %2701 = vmatpush1.msra.mxu1 %v6829_v21  ;;  %v4954_v62 = vpop.eup %4953  ;;  %v9419_v21 = vld [vmem:[#allocation89_spill] sm:$0xff] }
 0x4a9   :  { %2631 = vmatprep.subr.mxu0 %v6832_v51  ;;  %2702 = vmatprep.subr.mxu1 %v6835_v15  ;;  %v4956_v51 = vpop.eup %4955  ;;  %v9420_v15 = vld [vmem:[#allocation90_spill] sm:$0xff] }
 0x4aa   :  { %2632 = vmatpush1.msra.mxu0 %v6838_v12  ;;  %2703 = vmatpush1.msra.mxu1 %v6841_v23  ;;  %v9421_v12 = vld [vmem:[#allocation91_spill] sm:$0xff] }
 0x4ab   :  { %2633 = vmatprep.subr.mxu0 %v6844_v24  ;;  %2704 = vmatprep.subr.mxu1 %v6847_v25  ;;  %v9422_v24 = vld [vmem:[#allocation92_spill] sm:$0xff] }
 0x4ac   :  { %2634 = vmatpush1.msra.mxu0 %v6850_v33  ;;  %2705 = vmatpush1.msra.mxu1 %v6853_v22  ;;  %v9423_v33 = vld [vmem:[#allocation130_spill] sm:$0xff] }
 0x4ad   :  { %2635 = vmatprep.subr.mxu0 %v6856_v60  ;;  %2706 = vmatprep.subr.mxu1 %v6859_v16  ;;  %v2431_v60 = vadd.f32 1.0, %v4956_v51  ;;  %v9424_v16 = vld [vmem:[#allocation131_spill] sm:$0xff]  ;;  %v7419_v51 = vld [vmem:[#allocation11 + $0x198] sm:$0xff] }
 0x4ae   :  { %2636 = vmatpush1.msra.mxu0 %v9320_v26  ;;  %2707 = vmatpush1.msra.mxu1 %v9321_v61  ;;  %v9425_v61 = vld [vmem:[#allocation132_spill] sm:$0xff] }
 0x4af   :  { %2637 = vmatprep.subr.mxu0 %v9322_v14  ;;  %2708 = vmatprep.subr.mxu1 %v9323_v29  ;;  %v9426_v14 = vld [vmem:[#allocation133_spill] sm:$0xff]  ;;  %v9427_v29 = vld [vmem:[#allocation135_spill] sm:$0xff]  ;;  %4961 = vrcp.f32 %v2431_v60 }
 0x4b0   :  { %2638 = vmatpush1.msra.mxu0 %v9324_v27  ;;  %2709 = vmatpush1.msra.mxu1 %v9419_v21  ;;  %v7331_v27 = vpop.permute.xlu1 %2450  ;;  %v7416_v21 = vld [vmem:[#allocation11 + $0x188] sm:$0xff]  ;;  %v7443_v60 = vld [vmem:[#allocation11 + $0x158] sm:$0xff] }
 0x4b1   :  { %2639 = vmatprep.subr.mxu0 %v9420_v15  ;;  %2710 = vmatprep.subr.mxu1 %v9421_v12  ;;  %vm2452_vm15 = vcmp.eq.s32.totalorder %v7331_v27, 1  ;;  %v7422_v15 = vld [vmem:[#allocation11 + $0x180] sm:$0xff]  ;;  %v7425_v12 = vld [vmem:[#allocation11 + $0x190] sm:$0xff]  ;;  %v7610_v27 = vld [vmem:[#allocation12 + $0x1d8] sm:$0xff] }
 0x4b2   :  { %v4958_v23 = vpop.eup %4957  ;;  %2640 = vmatpush1.msra.mxu0 %v9422_v24  ;;  %2711 = vmatpush1.msra.mxu1 %v9329_v0  ;;  %v7431_v24 = vld [vmem:[#allocation11 + $0x178] sm:$0xff] }
 0x4b3   :  { %v2435_v25 = vmul.f32 %v4958_v23, %v4954_v62  ;;  %2641 = vmatprep.subr.mxu0 %v9330_v46  ;;  %2712 = vmatprep.subr.mxu1 %v9423_v33  ;;  %v9428_v46 = vld [vmem:[#allocation137_spill] sm:$0xff]  ;;  %v7428_v23 = vld [vmem:[#allocation11 + $0x168] sm:$0xff] }
 0x4b4   :  { %v4960_v22 = vpop.eup %4959  ;;  %2642 = vmatpush1.msra.mxu0 %v6901_v57  ;;  %2713 = vmatpush1.msra.mxu1 %v9424_v16  ;;  %v9430_v57 = vld [vmem:[#allocation139_spill] sm:$0xff]  ;;  %v7413_v62 = vld [vmem:[#allocation11 + $0x1b0] sm:$0xff] }
 0x4b5   :  { %v2434_v26 = vmul.f32 %v4960_v22, %v7171_v5  ;;  %2643 = vmatprep.subr.mxu0 %v9425_v61  ;;  %2714 = vmatprep.subr.mxu1 %v9426_v14  ;;  %v7437_v33 = vld [vmem:[#allocation11 + $0x170] sm:$0xff]  ;;  %v7440_v22 = vld [vmem:[#allocation11 + $0x148] sm:$0xff]  ;;  %v7446_v16 = vld [vmem:[#allocation11 + $0x140] sm:$0xff] }
 0x4b6   :  { %2644 = vmatpush1.msra.mxu0 %v9335_v31  ;;  %2715 = vmatpush1.msra.mxu1 %v9427_v29  ;;  %v7452_v61 = vld [vmem:[#allocation11 + $0x128] sm:$0xff]  ;;  %v7455_v14 = vld [vmem:[#allocation11 + $0x138] sm:$0xff]  ;;  %v7458_v29 = vld [vmem:[#allocation11 + $0x120] sm:$0xff] }
 0x4b7   :  { %v2436_v0 = vadd.f32 %v2435_v25, %v2434_v26  ;;  %2645 = vmatprep.subr.mxu0 %v9428_v46  ;;  %2716 = vmatprep.subr.mxu1 %v9429_v49  ;;  %v7434_v25 = vld [vmem:[#allocation11 + $0x160] sm:$0xff]  ;;  %v7449_v26 = vld [vmem:[#allocation11 + $0x150] sm:$0xff]  ;;  %9451 = vst [vmem:[#allocation127_spill] sm:$0xff] %v7452_v61  ;;  %9452 = vst [vmem:[#allocation125_spill] sm:$0xff] %v7455_v14 }
 0x4b8   :  { %2646 = vmatpush1.msra.mxu0 %v9430_v57  ;;  %2717 = vmatpush1.msra.mxu1 %v9431_v52  ;;  %9453 = vst [vmem:[#allocation84_spill] sm:$0xff] %v7458_v29  ;;  %v7464_v46 = vld [vmem:[#allocation11 + $0x108] sm:$0xff]  ;;  %v7467_v49 = vld [vmem:[#allocation11 + $0x118] sm:$0xff]  ;;  %v7470_v57 = vld [vmem:[#allocation11 + $0x100] sm:$0xff] }
 0x4b9   :  { %2647 = vmatprep.subr.mxu0 %v9432_v45  ;;  %2718 = vmatprep.subr.mxu1 %v9433_v54  ;;  %4963 = vtanh.f32 %v2436_v0  ;;  %v7343_v31 = vsel %vm2452_vm15, %v2436_v0, %v7171_v5  ;;  %v9442_v5 = vld [vmem:[#allocation152_spill] sm:$0xff]  ;;  %9455 = vst [vmem:[#allocation86_spill] sm:$0xff] %v7464_v46  ;;  %9456 = vst [vmem:[#allocation87_spill] sm:$0xff] %v7467_v49  ;;  %v7479_v54 = vld [vmem:[#allocation11 + $0xf8] sm:$0xff] }
 0x4ba   :  { %2648 = vmatpush1.msra.mxu0 %v9434_v9  ;;  %2719 = vmatpush1.msra.mxu1 %v9435_v44  ;;  %v7461_v0 = vld [vmem:[#allocation11 + $0x130] sm:$0xff]  ;;  %9457 = vst [vmem:[#allocation88_spill] sm:$0xff] %v7470_v57  ;;  %v7476_v45 = vld [vmem:[#allocation11 + $0xe8] sm:$0xff]  ;;  %9460 = vst [vmem:[#allocation134_spill] sm:$0xff] %v7479_v54 }
 0x4bb   :  { %2649 = vmatprep.subr.mxu0 %v9436_v43  ;;  %2720 = vmatprep.subr.mxu1 %v9437_v8  ;;  %9454 = vst [vmem:[#allocation85_spill] sm:$0xff] %v7461_v0  ;;  %v7473_v52 = vld [vmem:[#allocation11 + $0x110] sm:$0xff]  ;;  %9459 = vst [vmem:[#allocation129_spill] sm:$0xff] %v7476_v45  ;;  %v7482_v9 = vld [vmem:[#allocation11 + $0xe0] sm:$0xff] }
 0x4bc   :  { %2650 = vmatpush1.msra.mxu0 %v9438_v42  ;;  %2721 = vmatpush1.msra.mxu1 %v9439_v11  ;;  %9458 = vst [vmem:[#allocation93_spill] sm:$0xff] %v7473_v52  ;;  %9461 = vst [vmem:[#allocation151_spill] sm:$0xff] %v7482_v9  ;;  %v7485_v44 = vld [vmem:[#allocation11 + $0xf0] sm:$0xff]  ;;  %v7488_v43 = vld [vmem:[#allocation11 + $0xc8] sm:$0xff] }
 0x4bd   :  { %2651 = vmatprep.subr.mxu0 %v9440_v6  ;;  %2722 = vmatprep.subr.mxu1 %v9441_v40  ;;  %9462 = vst [vmem:[#allocation158_spill] sm:$0xff] %v7485_v44  ;;  %9463 = vst [vmem:[#allocation159_spill] sm:$0xff] %v7488_v43  ;;  %v7491_v8 = vld [vmem:[#allocation11 + $0xd8] sm:$0xff]  ;;  %v7494_v42 = vld [vmem:[#allocation11 + $0xc0] sm:$0xff] }
 0x4be   :  { %2652 = vmatpush1.msra.mxu0 %v9351_v53  ;;  %2723 = vmatpush1.msra.mxu1 %v9442_v5  ;;  %v4962_v53 = vpop.eup %4961  ;;  %9464 = vst [vmem:[#allocation160_spill] sm:$0xff] %v7491_v8  ;;  %9465 = vst [vmem:[#allocation162_spill] sm:$0xff] %v7494_v42  ;;  %v7497_v11 = vld [vmem:[#allocation11 + $0xd0] sm:$0xff]  ;;  %v7500_v6 = vld [vmem:[#allocation11 + $0xa8] sm:$0xff] }
 0x4bf   :  { %2653 = vmatprep.subr.mxu0 %v9443_v20  ;;  %2724 = vmatprep.subr.mxu1 %v9444_v50  ;;  %9466 = vst [vmem:[#allocation163_spill] sm:$0xff] %v7497_v11  ;;  %9467 = vst [vmem:[#allocation165_spill] sm:$0xff] %v7500_v6  ;;  %v7503_v40 = vld [vmem:[#allocation11 + $0xb8] sm:$0xff]  ;;  %v7506_v5 = vld [vmem:[#allocation11 + $0xa0] sm:$0xff] }
 0x4c0   :  { %2654 = vmatpush1.msra.mxu0 %v9445_v58  ;;  %2725 = vmatpush1.msra.mxu1 %v9446_v7  ;;  %9468 = vst [vmem:[#allocation38_spill] sm:$0xff] %v7503_v40  ;;  %9469 = vst [vmem:[#allocation39_spill] sm:$0xff] %v7506_v5  ;;  %v7509_v20 = vld [vmem:[#allocation11 + $0xb0] sm:$0xff]  ;;  %v7512_v50 = vld [vmem:[#allocation11 + $0x88] sm:$0xff] }
 0x4c1   :  { %2655 = vmatprep.subr.mxu0 %v9447_v35  ;;  %2726 = vmatprep.subr.mxu1 %v9358_v38  ;;  %9470 = vst [vmem:[#allocation40_spill] sm:$0xff] %v7509_v20  ;;  %9471 = vst [vmem:[#allocation41_spill] sm:$0xff] %v7512_v50  ;;  %v7515_v58 = vld [vmem:[#allocation11 + $0x98] sm:$0xff]  ;;  %v7518_v7 = vld [vmem:[#allocation11 + $0x80] sm:$0xff] }
 0x4c2   :  { %2656 = vmatpush1.msra.mxu0 %v9359_v2  ;;  %2727 = vmatpush1.msra.mxu1 %v9360_v18  ;;  %v7376_v18 = vld [vmem:[#allocation11 + $0x1f8] sm:$0xff]  ;;  %v7392_v2 = vld [vmem:[#allocation11 + $0x1c8] sm:$0xff]  ;;  %9472 = vst [vmem:[#allocation42_spill] sm:$0xff] %v7515_v58  ;;  %9473 = vst [vmem:[#allocation43_spill] sm:$0xff] %v7518_v7 }
 0x4c3   :  { %2657 = vmatprep.subr.mxu0 %v9448_v37  ;;  %2728 = vmatprep.subr.mxu1 %v7001_v48  ;;  %v7373_v48 = vld [vmem:[#allocation11 + $0x1e8] sm:$0xff]  ;;  %v7521_v35 = vld [vmem:[#allocation11 + $0x90] sm:$0xff] }
 0x4c4   :  { %2658 = vmatpush1.msra.mxu0 %v9362_v63  ;;  %2729 = vmatpush1.msra.mxu1 %v9363_v47  ;;  %v7395_v63 = vld [vmem:[#allocation11 + $0x1d8] sm:$0xff]  ;;  %v7398_v47 = vld [vmem:[#allocation11 + $0x1c0] sm:$0xff]  ;;  %9474 = vst [vmem:[#allocation44_spill] sm:$0xff] %v7521_v35  ;;  %v7524_v37 = vld [vmem:[#allocation11 + $0x68] sm:$0xff] }
 0x4c5   :  { %2659 = vmatprep.subr.mxu0 %v9449_v34  ;;  %2730 = vmatprep.subr.mxu1 %v7013_v4  ;;  %9475 = vst [vmem:[#allocation45_spill] sm:$0xff] %v7524_v37  ;;  %v7530_v34 = vld [vmem:[#allocation11 + $0x60] sm:$0xff] }
 0x4c6   :  { %v4964_v39 = vpop.eup %4963  ;;  %2660 = vmatpush1.msra.mxu0 %v9365_v1  ;;  %2693 = vmatprep.mubr.f32.mxu0 %v9003_v3  ;;  %v7389_v1 = vld [vmem:[#allocation11 + $0x1f0] sm:$0xff]  ;;  %9477 = vst [vmem:[#allocation47_spill] sm:$0xff] %v7530_v34  ;;  %v9550_v30 = vld [vmem:[#allocation162_spill] sm:$0xff] }
 0x4c7   :  { %2731 = vmatpush1.msra.mxu1 %v7020_v17  ;;  %2764 = vmatprep.mubr.f32.mxu1 %v9003_v3  ;;  %v2438_v38 = vmul.f32 %v4964_v39, %v4962_v53  ;;  %v7386_v17 = vld [vmem:[#allocation11 + $0x1e0] sm:$0xff]  ;;  %v7527_v53 = vld [vmem:[#allocation11 + $0x78] sm:$0xff]  ;;  %v7533_v39 = vld [vmem:[#allocation11 + $0x70] sm:$0xff] }
 0x4c8   :  { %2838 = vmatprep.subr.mxu0 %v7373_v48  ;;  %2909 = vmatprep.subr.mxu1 %v7376_v18  ;;  %9476 = vst [vmem:[#allocation46_spill] sm:$0xff] %v7527_v53  ;;  %9478 = vst [vmem:[#allocation48_spill] sm:$0xff] %v7533_v39 }
 0x4c9   :  { %v7382_v4 = vsel %vm2452_vm15, %v2438_v38, %v7206_v19  ;;  %v7536_v38 = vld [vmem:[#allocation11 + $0x48] sm:$0xff]  ;;  %v7542_v19 = vld [vmem:[#allocation11 + $0x40] sm:$0xff] }
 0x4ca   :  { %9450 = vst [vmem:[#allocation126_spill] sm:$0xff] %v7382_v4  ;;  %2694 = vmatmul.mubr.f32.vlgmr.msra.gmra.mxu0 %v7382_v4  ;;  %2765 = vmatmul.mubr.f32.vlgmr.msra.gmra.mxu1 %v7382_v4  ;;  %9479 = vst [vmem:[#allocation49_spill] sm:$0xff] %v7536_v38 }
 0x4cb   :  { %2839 = vmatpush1.msra.mxu0 %v7386_v17  ;;  %2910 = vmatpush1.msra.mxu1 %v7389_v1  ;;  %9481 = vst [vmem:[#allocation51_spill] sm:$0xff] %v7542_v19 }
 0x4cc   :  { %2840 = vmatprep.subr.mxu0 %v7392_v2  ;;  %2911 = vmatprep.subr.mxu1 %v7395_v63 }
 0x4cd   :  { %2841 = vmatpush1.msra.mxu0 %v7398_v47  ;;  %2912 = vmatpush1.msra.mxu1 %v7401_v59 }
 0x4ce   :  { %2842 = vmatprep.subr.mxu0 %v7404_v28  ;;  %2913 = vmatprep.subr.mxu1 %v7407_v32 }
 0x4cf   :  { %2843 = vmatpush1.msra.mxu0 %v7410_v13  ;;  %2914 = vmatpush1.msra.mxu1 %v7413_v62 }
 0x4d0   :  { %2844 = vmatprep.subr.mxu0 %v7416_v21  ;;  %2915 = vmatprep.subr.mxu1 %v7419_v51 }
 0x4d1   :  { %2845 = vmatpush1.msra.mxu0 %v7422_v15  ;;  %2916 = vmatpush1.msra.mxu1 %v7425_v12 }
 0x4d2   :  { %2846 = vmatprep.subr.mxu0 %v7428_v23  ;;  %2917 = vmatprep.subr.mxu1 %v7431_v24 }
 0x4d3   :  { %2847 = vmatpush1.msra.mxu0 %v7434_v25  ;;  %2918 = vmatpush1.msra.mxu1 %v7437_v33 }
 0x4d4   :  { %2848 = vmatprep.subr.mxu0 %v7440_v22  ;;  %2919 = vmatprep.subr.mxu1 %v7443_v60 }
 0x4d5   :  { %2849 = vmatpush1.msra.mxu0 %v7446_v16  ;;  %2920 = vmatpush1.msra.mxu1 %v7449_v26 }
 0x4d6   :  { %2850 = vmatprep.subr.mxu0 %v7452_v61  ;;  %2921 = vmatprep.subr.mxu1 %v7455_v14 }
 0x4d7   :  { %2851 = vmatpush1.msra.mxu0 %v7458_v29  ;;  %2922 = vmatpush1.msra.mxu1 %v7461_v0 }
 0x4d8   :  { %2852 = vmatprep.subr.mxu0 %v7464_v46  ;;  %2923 = vmatprep.subr.mxu1 %v7467_v49 }
 0x4d9   :  { %2853 = vmatpush1.msra.mxu0 %v7470_v57  ;;  %2924 = vmatpush1.msra.mxu1 %v7473_v52 }
 0x4da   :  { %2854 = vmatprep.subr.mxu0 %v7476_v45  ;;  %2925 = vmatprep.subr.mxu1 %v7479_v54 }
 0x4db   :  { %2855 = vmatpush1.msra.mxu0 %v7482_v9  ;;  %2926 = vmatpush1.msra.mxu1 %v7485_v44 }
 0x4dc   :  { %2856 = vmatprep.subr.mxu0 %v7488_v43  ;;  %2927 = vmatprep.subr.mxu1 %v7491_v8 }
 0x4dd   :  { %2857 = vmatpush1.msra.mxu0 %v7494_v42  ;;  %2928 = vmatpush1.msra.mxu1 %v7497_v11  ;;  %v9497_v42 = vld [vmem:[#allocation116_spill] sm:$0xff] }
 0x4de   :  { %2858 = vmatprep.subr.mxu0 %v7500_v6  ;;  %2929 = vmatprep.subr.mxu1 %v7503_v40 }
 0x4df   :  { %2859 = vmatpush1.msra.mxu0 %v7506_v5  ;;  %2930 = vmatpush1.msra.mxu1 %v7509_v20 }
 0x4e0   :  { %2860 = vmatprep.subr.mxu0 %v7512_v50  ;;  %2931 = vmatprep.subr.mxu1 %v7515_v58  ;;  %v9495_v50 = vld [vmem:[#allocation34_spill] sm:$0xff] }
 0x4e1   :  { %2861 = vmatpush1.msra.mxu0 %v7518_v7  ;;  %2932 = vmatpush1.msra.mxu1 %v7521_v35 }
 0x4e2   :  { %2862 = vmatprep.subr.mxu0 %v7524_v37  ;;  %2933 = vmatprep.subr.mxu1 %v7527_v53  ;;  %v9494_v37 = vld [vmem:[#allocation33_spill] sm:$0xff] }
 0x4e3   :  { %2863 = vmatpush1.msra.mxu0 %v7530_v34  ;;  %2934 = vmatpush1.msra.mxu1 %v7533_v39  ;;  %v7551_v39 = vld [vmem:[#allocation11 + $0x38] sm:$0xff] }
 0x4e4   :  { %2864 = vmatprep.subr.mxu0 %v7536_v38  ;;  %2935 = vmatprep.subr.mxu1 %v7539_v36  ;;  %9484 = vst [vmem:[#allocation54_spill] sm:$0xff] %v7551_v39  ;;  %v7554_v38 = vld [vmem:[#allocation11 + $0x20] sm:$0xff]  ;;  %v7557_v36 = vld [vmem:[#allocation11 + $0x30] sm:$0xff] }
 0x4e5   :  { %2865 = vmatpush1.msra.mxu0 %v7542_v19  ;;  %2936 = vmatpush1.msra.mxu1 %v7545_v55  ;;  %9485 = vst [vmem:[#allocation55_spill] sm:$0xff] %v7554_v38  ;;  %9486 = vst [vmem:[#allocation56_spill] sm:$0xff] %v7557_v36  ;;  %v7560_v19 = vld [vmem:[#allocation11 + $0x8] sm:$0xff]  ;;  %v7563_v55 = vld [vmem:[#allocation11 + $0x18] sm:$0xff] }
 0x4e6   :  { %2866 = vmatprep.subr.mxu0 %v7548_v56  ;;  %2937 = vmatprep.subr.mxu1 %v7551_v39  ;;  %9487 = vst [vmem:[#allocation57_spill] sm:$0xff] %v7560_v19  ;;  %9488 = vst [vmem:[#allocation58_spill] sm:$0xff] %v7563_v55  ;;  %v7566_v56 = vld [vmem:[#allocation11] sm:$0xff]  ;;  %v7570_v39 = vld [vmem:[#allocation11 + $0x10] sm:$0xff] }
 0x4e7   :  { %2867 = vmatpush1.msra.mxu0 %v7554_v38  ;;  %2938 = vmatpush1.msra.mxu1 %v7557_v36  ;;  %9489 = vst [vmem:[#allocation59_spill] sm:$0xff] %v7566_v56  ;;  %9490 = vst [vmem:[#allocation60_spill] sm:$0xff] %v7570_v39  ;;  %v7574_v36 = vld [vmem:[#allocation12 + $0x1e8] sm:$0xff] }
 0x4e8   :  { %2868 = vmatprep.subr.mxu0 %v7560_v19  ;;  %2939 = vmatprep.subr.mxu1 %v7563_v55  ;;  %9491 = vst [vmem:[#allocation61_spill] sm:$0xff] %v7574_v36  ;;  %v7577_v19 = vld [vmem:[#allocation12 + $0x1f8] sm:$0xff]  ;;  %v9493_v38 = vld [vmem:[#allocation31_spill] sm:$0xff] }
 0x4e9   :  { %2869 = vmatpush1.msra.mxu0 %v7566_v56  ;;  %2902 = vmatprep.mubr.f32.mxu0 %v9003_v3  ;;  %9492 = vst [vmem:[#allocation62_spill] sm:$0xff] %v7577_v19 }
 0x4ea   :  { %2940 = vmatpush1.msra.mxu1 %v7570_v39  ;;  %2973 = vmatprep.mubr.f32.mxu1 %v9003_v3 }
 0x4eb   :  { %2989 = vmatprep.subr.mxu0 %v7574_v36  ;;  %3060 = vmatprep.subr.mxu1 %v7577_v19  ;;  %v9496_v36 = vld [vmem:[#allocation32_spill] sm:$0xff] }
 0x567   :  { %v2544_v55 = vpop.f32.mrf.mxu0  ;;  %v2615_v7 = vpop.f32.mrf.mxu1 }
 0x568   :  { %v2620_v34 = vadd.f32 %v2544_v55, %v9493_v38  ;;  %v2622_v40 = vadd.f32 %v2615_v7, %v9496_v36 }
 0x569   :  { %v2546_v56 = vpop.f32.mrf.mxu0  ;;  %v2617_v58 = vpop.f32.mrf.mxu1 }
 0x56a   :  { %v4629_v53 = vmul.f32 -1.442695, %v2620_v34  ;;  %v2621_v35 = vadd.f32 %v2546_v56, %v9494_v37  ;;  %v2623_v20 = vadd.f32 %v2617_v58, %v9495_v50 }
 0x56c   :  { %4965 = vpow2.f32 %v4629_v53  ;;  %v4630_v39 = vmul.f32 -1.442695, %v2621_v35  ;;  %v4631_v5 = vmul.f32 -1.442695, %v2623_v20 }
 0x56e   :  { %4967 = vpow2.f32 %v4630_v39 }
 0x56f   :  { %4969 = vpow2.f32 %v4631_v5 }
 0x570   :  { %4971 = vtanh.f32 %v2622_v40 }
 0x579   :  { %v4966_v6 = vpop.eup %4965 }
 0x57a   :  { %v2778_v11 = vadd.f32 1.0, %v4966_v6  ;;  %v9498_v6 = vld [vmem:[#allocation118_spill] sm:$0xff] }
 0x57b   :  { %v4968_v19 = vpop.eup %4967 }
 0x57c   :  { %4973 = vrcp.f32 %v2778_v11  ;;  %v2784_v55 = vadd.f32 1.0, %v4968_v19  ;;  %v4970_v34 = vpop.eup %4969 }
 0x57d   :  { %v4972_v56 = vpop.eup %4971  ;;  %v2791_v35 = vadd.f32 1.0, %v4970_v34 }
 0x57e   :  { %4975 = vrcp.f32 %v2784_v55 }
 0x57f   :  { %4977 = vrcp.f32 %v2791_v35 }
 0x589   :  { %v4974_v37 = vpop.eup %4973 }
 0x58a   :  { %v2795_v53 = vmul.f32 %v4974_v37, %v4972_v56  ;;  %v2695_v39 = vpop.f32.mrf.mxu0  ;;  %v2766_v19 = vpop.f32.mrf.mxu1  ;;  %v9500_v56 = vld [vmem:[#allocation117_spill] sm:$0xff] }
 0x58b   :  { %v4976_v38 = vpop.eup %4975  ;;  %v2771_v50 = vadd.f32 %v2695_v39, %v9497_v42  ;;  %v9499_v42 = vld [vmem:[#allocation119_spill] sm:$0xff]  ;;  %v2773_v37 = vadd.f32 %v2766_v19, %v9500_v56  ;;  %v7628_v56 = vld [vmem:[#allocation12 + $0x1b0] sm:$0xff] }
 0x58c   :  { %v2794_v20 = vmul.f32 %v4976_v38, %v7289_v10  ;;  %v2697_v36 = vpop.f32.mrf.mxu0  ;;  %v2768_v55 = vpop.f32.mrf.mxu1  ;;  %v7613_v19 = vld [vmem:[#allocation12 + $0x1c0] sm:$0xff]  ;;  %9502 = vst [vmem:[#allocation64_spill] sm:$0xff] %v7628_v56 }
 0x58d   :  { %v4632_v58 = vmul.f32 -1.442695, %v2771_v50  ;;  %v2772_v5 = vadd.f32 %v2697_v36, %v9498_v6  ;;  %v2774_v34 = vadd.f32 %v2768_v55, %v9499_v42  ;;  %v4978_v38 = vpop.eup %4977  ;;  %v7601_v6 = vld [vmem:[#allocation12 + $0x1e0] sm:$0xff]  ;;  %v7619_v55 = vld [vmem:[#allocation12 + $0x1a8] sm:$0xff]  ;;  %v7622_v42 = vld [vmem:[#allocation12 + $0x1b8] sm:$0xff] }
 0x58e   :  { %v2796_v7 = vadd.f32 %v2795_v53, %v2794_v20 }
 0x58f   :  { %4979 = vpow2.f32 %v4632_v58  ;;  %v4633_v11 = vmul.f32 -1.442695, %v2772_v5  ;;  %v4634_v39 = vmul.f32 -1.442695, %v2774_v34  ;;  %v7604_v5 = vld [vmem:[#allocation12 + $0x1f0] sm:$0xff]  ;;  %v7625_v34 = vld [vmem:[#allocation12 + $0x1a0] sm:$0xff] }
 0x590   :  { %4981 = vtanh.f32 %v2796_v7  ;;  %v7590_v40 = vsel %vm2452_vm15, %v2796_v7, %v7289_v10  ;;  %v7607_v7 = vld [vmem:[#allocation12 + $0x1c8] sm:$0xff] }
 0x591   :  { %4983 = vpow2.f32 %v4633_v11  ;;  %v7616_v11 = vld [vmem:[#allocation12 + $0x1d0] sm:$0xff] }
 0x592   :  { %4985 = vtanh.f32 %v2773_v37  ;;  %v7631_v37 = vld [vmem:[#allocation12 + $0x188] sm:$0xff] }
 0x593   :  { %4987 = vpow2.f32 %v4634_v39  ;;  %9503 = vst [vmem:[#allocation65_spill] sm:$0xff] %v7631_v37  ;;  %v7634_v39 = vld [vmem:[#allocation12 + $0x198] sm:$0xff] }
 0x594   :  { %9504 = vst [vmem:[#allocation66_spill] sm:$0xff] %v7634_v39 }
 0x59c   :  { %v4980_v50 = vpop.eup %4979 }
 0x59d   :  { %v4982_v53 = vpop.eup %4981  ;;  %v2802_v35 = vadd.f32 1.0, %v4980_v50  ;;  %v7640_v50 = vld [vmem:[#allocation12 + $0x190] sm:$0xff] }
 0x59e   :  { %v4984_v20 = vpop.eup %4983  ;;  %v2798_v36 = vmul.f32 %v4982_v53, %v4978_v38  ;;  %v7637_v38 = vld [vmem:[#allocation12 + $0x180] sm:$0xff]  ;;  %9506 = vst [vmem:[#allocation68_spill] sm:$0xff] %v7640_v50  ;;  %v7643_v53 = vld [vmem:[#allocation12 + $0x168] sm:$0xff] }
 0x59f   :  { %4989 = vrcp.f32 %v2802_v35  ;;  %v2808_v58 = vadd.f32 1.0, %v4984_v20  ;;  %9505 = vst [vmem:[#allocation67_spill] sm:$0xff] %v7637_v38  ;;  %9507 = vst [vmem:[#allocation69_spill] sm:$0xff] %v7643_v53  ;;  %v7646_v35 = vld [vmem:[#allocation12 + $0x178] sm:$0xff]  ;;  %v4986_v20 = vpop.eup %4985 }
 0x5a0   :  { %v7597_v10 = vsel %vm2452_vm15, %v2798_v36, %v7296_v41  ;;  %9508 = vst [vmem:[#allocation70_spill] sm:$0xff] %v7646_v35  ;;  %v7649_v36 = vld [vmem:[#allocation12 + $0x160] sm:$0xff]  ;;  %v4988_v41 = vpop.eup %4987 }
 0x5a1   :  { %9501 = vst [vmem:[#allocation63_spill] sm:$0xff] %v7597_v10  ;;  %4991 = vrcp.f32 %v2808_v58  ;;  %2903 = vmatmul.mubr.f32.vlgmr.msra.gmra.mxu0 %v7597_v10  ;;  %2974 = vmatmul.mubr.f32.vlgmr.msra.gmra.mxu1 %v7597_v10  ;;  %9509 = vst [vmem:[#allocation71_spill] sm:$0xff] %v7649_v36  ;;  %v7652_v58 = vld [vmem:[#allocation12 + $0x170] sm:$0xff] }
 0x5a2   :  { %2990 = vmatpush1.msra.mxu0 %v7601_v6  ;;  %3061 = vmatpush1.msra.mxu1 %v7604_v5  ;;  %9510 = vst [vmem:[#allocation72_spill] sm:$0xff] %v7652_v58 }
 0x5a3   :  { %2991 = vmatprep.subr.mxu0 %v7607_v7  ;;  %3062 = vmatprep.subr.mxu1 %v7610_v27 }
 0x5a4   :  { %2992 = vmatpush1.msra.mxu0 %v7613_v19  ;;  %3063 = vmatpush1.msra.mxu1 %v7616_v11 }
 0x5a5   :  { %2993 = vmatprep.subr.mxu0 %v7619_v55  ;;  %3064 = vmatprep.subr.mxu1 %v7622_v42 }
 0x5a6   :  { %2994 = vmatpush1.msra.mxu0 %v7625_v34  ;;  %3065 = vmatpush1.msra.mxu1 %v7628_v56  ;;  %v7673_v56 = vld [vmem:[#allocation12 + $0x120] sm:$0xff] }
 0x5a7   :  { %2995 = vmatprep.subr.mxu0 %v7631_v37  ;;  %3066 = vmatprep.subr.mxu1 %v7634_v39  ;;  %v7664_v39 = vld [vmem:[#allocation12 + $0x150] sm:$0xff]  ;;  %v7670_v37 = vld [vmem:[#allocation12 + $0x138] sm:$0xff]  ;;  %9516 = vst [vmem:[#allocation78_spill] sm:$0xff] %v7673_v56 }
 0x5a8   :  { %2996 = vmatpush1.msra.mxu0 %v7637_v38  ;;  %3067 = vmatpush1.msra.mxu1 %v7640_v50  ;;  %v7655_v38 = vld [vmem:[#allocation12 + $0x148] sm:$0xff]  ;;  %v7658_v50 = vld [vmem:[#allocation12 + $0x158] sm:$0xff]  ;;  %9515 = vst [vmem:[#allocation77_spill] sm:$0xff] %v7670_v37 }
 0x5a9   :  { %2997 = vmatprep.subr.mxu0 %v7643_v53  ;;  %3068 = vmatprep.subr.mxu1 %v7646_v35  ;;  %9511 = vst [vmem:[#allocation73_spill] sm:$0xff] %v7655_v38  ;;  %9512 = vst [vmem:[#allocation74_spill] sm:$0xff] %v7658_v50  ;;  %v7661_v35 = vld [vmem:[#allocation12 + $0x140] sm:$0xff] }
 0x5aa   :  { %2998 = vmatpush1.msra.mxu0 %v7649_v36  ;;  %3069 = vmatpush1.msra.mxu1 %v7652_v58  ;;  %9513 = vst [vmem:[#allocation75_spill] sm:$0xff] %v7661_v35  ;;  %v7667_v58 = vld [vmem:[#allocation12 + $0x128] sm:$0xff] }
 0x5ab   :  { %2999 = vmatprep.subr.mxu0 %v7655_v38  ;;  %3070 = vmatprep.subr.mxu1 %v7658_v50  ;;  %9514 = vst [vmem:[#allocation76_spill] sm:$0xff] %v7667_v58  ;;  %v2815_v50 = vadd.f32 1.0, %v4988_v41  ;;  %v7689_v41 = vld [vmem:[#allocation12 + $0x110] sm:$0xff] }
 0x5ac   :  { %v4990_v53 = vpop.eup %4989  ;;  %3000 = vmatpush1.msra.mxu0 %v7661_v35  ;;  %3071 = vmatpush1.msra.mxu1 %v7664_v39  ;;  %v7676_v35 = vld [vmem:[#allocation12 + $0x130] sm:$0xff] }
 0x5ad   :  { %v2819_v36 = vmul.f32 %v4990_v53, %v4986_v20  ;;  %3001 = vmatprep.subr.mxu0 %v7667_v58  ;;  %3072 = vmatprep.subr.mxu1 %v7670_v37  ;;  %9517 = vst [vmem:[#allocation79_spill] sm:$0xff] %v7676_v35  ;;  %v7680_v20 = vld [vmem:[#allocation12 + $0x108] sm:$0xff]  ;;  %v7683_v58 = vld [vmem:[#allocation12 + $0x118] sm:$0xff]  ;;  %v7686_v37 = vld [vmem:[#allocation12 + $0x100] sm:$0xff]  ;;  %4993 = vrcp.f32 %v2815_v50 }
 0x5ae   :  { %v4992_v38 = vpop.eup %4991  ;;  %3002 = vmatpush1.msra.mxu0 %v7673_v56  ;;  %3073 = vmatpush1.msra.mxu1 %v7676_v35  ;;  %9518 = vst [vmem:[#allocation80_spill] sm:$0xff] %v7680_v20  ;;  %9519 = vst [vmem:[#allocation27_spill] sm:$0xff] %v7683_v58  ;;  %v7692_v35 = vld [vmem:[#allocation12 + $0xe8] sm:$0xff] }
 0x5af   :  { %v2818_v53 = vmul.f32 %v4992_v38, %v7343_v31  ;;  %3003 = vmatprep.subr.mxu0 %v7680_v20  ;;  %3074 = vmatprep.subr.mxu1 %v7683_v58  ;;  %9520 = vst [vmem:[#allocation29_spill] sm:$0xff] %v7686_v37  ;;  %9521 = vst [vmem:[#allocation30_spill] sm:$0xff] %v7692_v35  ;;  %v7695_v38 = vld [vmem:[#allocation12 + $0xf8] sm:$0xff]  ;;  %v7698_v20 = vld [vmem:[#allocation12 + $0xe0] sm:$0xff] }
 0x5b0   :  { %3004 = vmatpush1.msra.mxu0 %v7686_v37  ;;  %3075 = vmatpush1.msra.mxu1 %v7689_v41  ;;  %9522 = vst [vmem:[#allocation28_spill] sm:$0xff] %v7695_v38  ;;  %9523 = vst [vmem:[#allocation120_spill] sm:$0xff] %v7698_v20  ;;  %v7701_v58 = vld [vmem:[#allocation12 + $0xf0] sm:$0xff]  ;;  %v7704_v37 = vld [vmem:[#allocation12 + $0xc8] sm:$0xff] }
 0x5b1   :  { %v2820_v56 = vadd.f32 %v2819_v36, %v2818_v53  ;;  %3005 = vmatprep.subr.mxu0 %v7692_v35  ;;  %3076 = vmatprep.subr.mxu1 %v7695_v38  ;;  %9524 = vst [vmem:[#allocation122_spill] sm:$0xff] %v7701_v58  ;;  %9525 = vst [vmem:[#allocation123_spill] sm:$0xff] %v7704_v37  ;;  %v7707_v36 = vld [vmem:[#allocation12 + $0xd8] sm:$0xff]  ;;  %v7715_v53 = vld [vmem:[#allocation12 + $0xc0] sm:$0xff] }
 0x5b2   :  { %3006 = vmatpush1.msra.mxu0 %v7698_v20  ;;  %3077 = vmatpush1.msra.mxu1 %v7701_v58  ;;  %9526 = vst [vmem:[#allocation121_spill] sm:$0xff] %v7707_v36  ;;  %9527 = vst [vmem:[#allocation89_spill] sm:$0xff] %v7715_v53  ;;  %v7718_v20 = vld [vmem:[#allocation12 + $0xd0] sm:$0xff]  ;;  %v7721_v58 = vld [vmem:[#allocation12 + $0xa8] sm:$0xff] }
 0x5b3   :  { %3007 = vmatprep.subr.mxu0 %v7704_v37  ;;  %3078 = vmatprep.subr.mxu1 %v7707_v36  ;;  %4995 = vtanh.f32 %v2820_v56  ;;  %v7713_v50 = vsel %vm2445_vm14, %v2820_v56, %v7343_v31  ;;  %9528 = vst [vmem:[#allocation90_spill] sm:$0xff] %v7718_v20  ;;  %9529 = vst [vmem:[#allocation91_spill] sm:$0xff] %v7721_v58  ;;  %v7724_v37 = vld [vmem:[#allocation12 + $0xb8] sm:$0xff]  ;;  %v7727_v36 = vld [vmem:[#allocation12 + $0xa0] sm:$0xff] }
 0x5b4   :  { %3008 = vmatpush1.msra.mxu0 %v7715_v53  ;;  %3079 = vmatpush1.msra.mxu1 %v7718_v20  ;;  %9530 = vst [vmem:[#allocation92_spill] sm:$0xff] %v7724_v37  ;;  %9531 = vst [vmem:[#allocation130_spill] sm:$0xff] %v7727_v36  ;;  %v7730_v31 = vld [vmem:[#allocation12 + $0xb0] sm:$0xff]  ;;  %v7733_v56 = vld [vmem:[#allocation12 + $0x88] sm:$0xff] }
 0x5b5   :  { %3009 = vmatprep.subr.mxu0 %v7721_v58  ;;  %3080 = vmatprep.subr.mxu1 %v7724_v37  ;;  %9532 = vst [vmem:[#allocation131_spill] sm:$0xff] %v7730_v31  ;;  %9533 = vst [vmem:[#allocation132_spill] sm:$0xff] %v7733_v56  ;;  %v7736_v20 = vld [vmem:[#allocation12 + $0x98] sm:$0xff]  ;;  %v7739_v58 = vld [vmem:[#allocation12 + $0x80] sm:$0xff] }
 0x5b6   :  { %3010 = vmatpush1.msra.mxu0 %v7727_v36  ;;  %3081 = vmatpush1.msra.mxu1 %v7730_v31  ;;  %9534 = vst [vmem:[#allocation133_spill] sm:$0xff] %v7736_v20  ;;  %9535 = vst [vmem:[#allocation135_spill] sm:$0xff] %v7739_v58  ;;  %v7742_v37 = vld [vmem:[#allocation12 + $0x90] sm:$0xff]  ;;  %v7745_v36 = vld [vmem:[#allocation12 + $0x68] sm:$0xff] }
 0x5b7   :  { %3011 = vmatprep.subr.mxu0 %v7733_v56  ;;  %3082 = vmatprep.subr.mxu1 %v7736_v20  ;;  %9536 = vst [vmem:[#allocation137_spill] sm:$0xff] %v7742_v37  ;;  %9537 = vst [vmem:[#allocation138_spill] sm:$0xff] %v7745_v36  ;;  %v7748_v31 = vld [vmem:[#allocation12 + $0x78] sm:$0xff]  ;;  %v7751_v56 = vld [vmem:[#allocation12 + $0x60] sm:$0xff] }
 0x5b8   :  { %3012 = vmatpush1.msra.mxu0 %v7739_v58  ;;  %3083 = vmatpush1.msra.mxu1 %v7742_v37  ;;  %9538 = vst [vmem:[#allocation139_spill] sm:$0xff] %v7748_v31  ;;  %9539 = vst [vmem:[#allocation140_spill] sm:$0xff] %v7751_v56  ;;  %v7754_v20 = vld [vmem:[#allocation12 + $0x70] sm:$0xff]  ;;  %v7757_v58 = vld [vmem:[#allocation12 + $0x48] sm:$0xff] }
 0x5b9   :  { %3013 = vmatprep.subr.mxu0 %v7745_v36  ;;  %3084 = vmatprep.subr.mxu1 %v7748_v31  ;;  %9540 = vst [vmem:[#allocation141_spill] sm:$0xff] %v7754_v20  ;;  %9541 = vst [vmem:[#allocation142_spill] sm:$0xff] %v7757_v58  ;;  %v7760_v37 = vld [vmem:[#allocation12 + $0x58] sm:$0xff]  ;;  %v7763_v36 = vld [vmem:[#allocation12 + $0x40] sm:$0xff] }
 0x5ba   :  { %3014 = vmatpush1.msra.mxu0 %v7751_v56  ;;  %3085 = vmatpush1.msra.mxu1 %v7754_v20  ;;  %9542 = vst [vmem:[#allocation143_spill] sm:$0xff] %v7760_v37  ;;  %9543 = vst [vmem:[#allocation144_spill] sm:$0xff] %v7763_v36  ;;  %v7766_v31 = vld [vmem:[#allocation12 + $0x50] sm:$0xff]  ;;  %v7769_v56 = vld [vmem:[#allocation12 + $0x28] sm:$0xff] }
 0x5bb   :  { %3015 = vmatprep.subr.mxu0 %v7757_v58  ;;  %3086 = vmatprep.subr.mxu1 %v7760_v37  ;;  %9544 = vst [vmem:[#allocation145_spill] sm:$0xff] %v7766_v31  ;;  %9545 = vst [vmem:[#allocation146_spill] sm:$0xff] %v7769_v56  ;;  %v7772_v20 = vld [vmem:[#allocation12 + $0x38] sm:$0xff]  ;;  %v7775_v58 = vld [vmem:[#allocation12 + $0x20] sm:$0xff] }
 0x5bc   :  { %3016 = vmatpush1.msra.mxu0 %v7763_v36  ;;  %3087 = vmatpush1.msra.mxu1 %v7766_v31  ;;  %9546 = vst [vmem:[#allocation147_spill] sm:$0xff] %v7775_v58  ;;  %v7778_v37 = vld [vmem:[#allocation12 + $0x30] sm:$0xff]  ;;  %v4994_v36 = vpop.eup %4993  ;;  %v7781_v53 = vld [vmem:[#allocation12 + $0x8] sm:$0xff]  ;;  %v7784_v31 = vld [vmem:[#allocation12 + $0x18] sm:$0xff] }
 0x5bd   :  { %3017 = vmatprep.subr.mxu0 %v7769_v56  ;;  %3088 = vmatprep.subr.mxu1 %v7772_v20  ;;  %9547 = vst [vmem:[#allocation148_spill] sm:$0xff] %v7778_v37  ;;  %9548 = vst [vmem:[#allocation149_spill] sm:$0xff] %v7781_v53  ;;  %v7787_v38 = vld [vmem:[#allocation12] sm:$0xff] }
 0x5be   :  { %3018 = vmatpush1.msra.mxu0 %v7775_v58  ;;  %3089 = vmatpush1.msra.mxu1 %v7778_v37  ;;  %9549 = vst [vmem:[#allocation150_spill] sm:$0xff] %v7784_v31  ;;  %v7791_v58 = vld [vmem:[#allocation12 + $0x10] sm:$0xff] }
 0x5bf   :  { %3019 = vmatprep.subr.mxu0 %v7781_v53  ;;  %3090 = vmatprep.subr.mxu1 %v7784_v31 }
 0x5c0   :  { %v4996_v56 = vpop.eup %4995  ;;  %3020 = vmatpush1.msra.mxu0 %v7787_v38  ;;  %3053 = vmatprep.mubr.f32.mxu0 %v9003_v3 }
 0x5c1   :  { %3091 = vmatpush1.msra.mxu1 %v7791_v58  ;;  %3124 = vmatprep.mubr.f32.mxu1 %v9003_v3  ;;  %v2822_v37 = vmul.f32 %v4996_v56, %v4994_v36  ;;  %v9552_v36 = vld [vmem:[#allocation165_spill] sm:$0xff]  ;;  %v9553_v56 = vld [vmem:[#allocation38_spill] sm:$0xff] }
 0x5c2   :  { %3198 = vmatprep.subr.mxu0 %v7373_v48  ;;  %3269 = vmatprep.subr.mxu1 %v7376_v18 }
 0x5c3   :  { %v7800_v31 = vsel %vm2445_vm14, %v2822_v37, %v7382_v4  ;;  %v9551_v37 = vld [vmem:[#allocation163_spill] sm:$0xff] }
 0x5c4   :  { %3054 = vmatmul.mubr.f32.vlgmr.msra.gmra.mxu0 %v7800_v31  ;;  %3125 = vmatmul.mubr.f32.vlgmr.msra.gmra.mxu1 %v7800_v31  ;;  %v9554_v4 = vld [vmem:[#allocation39_spill] sm:$0xff] }
 0x5c5   :  { %3199 = vmatpush1.msra.mxu0 %v7386_v17  ;;  %3270 = vmatpush1.msra.mxu1 %v7389_v1 }
 0x5c6   :  { %3200 = vmatprep.subr.mxu0 %v7392_v2  ;;  %3271 = vmatprep.subr.mxu1 %v7395_v63 }
 0x5c7   :  { %3201 = vmatpush1.msra.mxu0 %v7398_v47  ;;  %3272 = vmatpush1.msra.mxu1 %v7401_v59 }
 0x5c8   :  { %3202 = vmatprep.subr.mxu0 %v7404_v28  ;;  %3273 = vmatprep.subr.mxu1 %v7407_v32 }
 0x5c9   :  { %3203 = vmatpush1.msra.mxu0 %v7410_v13  ;;  %3274 = vmatpush1.msra.mxu1 %v7413_v62 }
 0x5ca   :  { %3204 = vmatprep.subr.mxu0 %v7416_v21  ;;  %3275 = vmatprep.subr.mxu1 %v7419_v51 }
 0x5cb   :  { %3205 = vmatpush1.msra.mxu0 %v7422_v15  ;;  %3276 = vmatpush1.msra.mxu1 %v7425_v12 }
 0x5cc   :  { %3206 = vmatprep.subr.mxu0 %v7428_v23  ;;  %3277 = vmatprep.subr.mxu1 %v7431_v24 }
 0x5cd   :  { %3207 = vmatpush1.msra.mxu0 %v7434_v25  ;;  %3278 = vmatpush1.msra.mxu1 %v7437_v33 }
 0x5ce   :  { %3208 = vmatprep.subr.mxu0 %v7440_v22  ;;  %3279 = vmatprep.subr.mxu1 %v7443_v60 }
 0x5cf   :  { %3209 = vmatpush1.msra.mxu0 %v7446_v16  ;;  %3280 = vmatpush1.msra.mxu1 %v7449_v26 }
 0x5d0   :  { %3210 = vmatprep.subr.mxu0 %v7452_v61  ;;  %3281 = vmatprep.subr.mxu1 %v7455_v14  ;;  %v9582_v14 = vld [vmem:[#allocation112_spill] sm:$0xff] }
 0x5d1   :  { %3211 = vmatpush1.msra.mxu0 %v7458_v29  ;;  %3282 = vmatpush1.msra.mxu1 %v7461_v0  ;;  %v9581_v29 = vld [vmem:[#allocation36_spill] sm:$0xff] }
 0x5d2   :  { %3212 = vmatprep.subr.mxu0 %v7464_v46  ;;  %3283 = vmatprep.subr.mxu1 %v7467_v49  ;;  %v9580_v46 = vld [vmem:[#allocation95_spill] sm:$0xff] }
 0x5d3   :  { %3213 = vmatpush1.msra.mxu0 %v7470_v57  ;;  %3284 = vmatpush1.msra.mxu1 %v7473_v52 }
 0x5d4   :  { %3214 = vmatprep.subr.mxu0 %v7476_v45  ;;  %3285 = vmatprep.subr.mxu1 %v7479_v54  ;;  %v9555_v45 = vld [vmem:[#allocation40_spill] sm:$0xff]  ;;  %v9556_v54 = vld [vmem:[#allocation41_spill] sm:$0xff] }
 0x5d5   :  { %3215 = vmatpush1.msra.mxu0 %v7482_v9  ;;  %3286 = vmatpush1.msra.mxu1 %v7485_v44  ;;  %v9557_v9 = vld [vmem:[#allocation42_spill] sm:$0xff]  ;;  %v9558_v44 = vld [vmem:[#allocation43_spill] sm:$0xff] }
 0x5d6   :  { %3216 = vmatprep.subr.mxu0 %v7488_v43  ;;  %3287 = vmatprep.subr.mxu1 %v7491_v8  ;;  %v9559_v43 = vld [vmem:[#allocation44_spill] sm:$0xff]  ;;  %v9560_v8 = vld [vmem:[#allocation45_spill] sm:$0xff] }
 0x5d7   :  { %3217 = vmatpush1.msra.mxu0 %v9550_v30  ;;  %3288 = vmatpush1.msra.mxu1 %v9551_v37  ;;  %v9561_v30 = vld [vmem:[#allocation46_spill] sm:$0xff]  ;;  %v9562_v37 = vld [vmem:[#allocation47_spill] sm:$0xff] }
 0x5d8   :  { %3218 = vmatprep.subr.mxu0 %v9552_v36  ;;  %3289 = vmatprep.subr.mxu1 %v9553_v56  ;;  %v9563_v36 = vld [vmem:[#allocation48_spill] sm:$0xff]  ;;  %v9564_v56 = vld [vmem:[#allocation49_spill] sm:$0xff] }
 0x5d9   :  { %3219 = vmatpush1.msra.mxu0 %v9554_v4  ;;  %3290 = vmatpush1.msra.mxu1 %v9555_v45  ;;  %v9565_v4 = vld [vmem:[#allocation50_spill] sm:$0xff]  ;;  %v9566_v45 = vld [vmem:[#allocation51_spill] sm:$0xff] }
 0x5da   :  { %3220 = vmatprep.subr.mxu0 %v9556_v54  ;;  %3291 = vmatprep.subr.mxu1 %v9557_v9  ;;  %v9567_v54 = vld [vmem:[#allocation52_spill] sm:$0xff]  ;;  %v9568_v9 = vld [vmem:[#allocation53_spill] sm:$0xff] }
 0x5db   :  { %3221 = vmatpush1.msra.mxu0 %v9558_v44  ;;  %3292 = vmatpush1.msra.mxu1 %v9559_v43  ;;  %v9569_v44 = vld [vmem:[#allocation54_spill] sm:$0xff]  ;;  %v9570_v43 = vld [vmem:[#allocation55_spill] sm:$0xff] }
 0x5dc   :  { %3222 = vmatprep.subr.mxu0 %v9560_v8  ;;  %3293 = vmatprep.subr.mxu1 %v9561_v30  ;;  %v9571_v8 = vld [vmem:[#allocation56_spill] sm:$0xff]  ;;  %v9572_v30 = vld [vmem:[#allocation57_spill] sm:$0xff] }
 0x5dd   :  { %3223 = vmatpush1.msra.mxu0 %v9562_v37  ;;  %3294 = vmatpush1.msra.mxu1 %v9563_v36  ;;  %v9573_v37 = vld [vmem:[#allocation58_spill] sm:$0xff]  ;;  %v9574_v36 = vld [vmem:[#allocation59_spill] sm:$0xff] }
 0x5de   :  { %3224 = vmatprep.subr.mxu0 %v9564_v56  ;;  %3295 = vmatprep.subr.mxu1 %v9565_v4  ;;  %v9575_v56 = vld [vmem:[#allocation60_spill] sm:$0xff] }
 0x5df   :  { %3225 = vmatpush1.msra.mxu0 %v9566_v45  ;;  %3296 = vmatpush1.msra.mxu1 %v9567_v54  ;;  %v9576_v45 = vld [vmem:[#allocation61_spill] sm:$0xff] }
 0x5e0   :  { %3226 = vmatprep.subr.mxu0 %v9568_v9  ;;  %3297 = vmatprep.subr.mxu1 %v9569_v44  ;;  %v9577_v9 = vld [vmem:[#allocation62_spill] sm:$0xff] }
 0x5e1   :  { %3227 = vmatpush1.msra.mxu0 %v9570_v43  ;;  %3298 = vmatpush1.msra.mxu1 %v9571_v8  ;;  %v9578_v43 = vld [vmem:[#allocation35_spill] sm:$0xff] }
 0x5e2   :  { %3228 = vmatprep.subr.mxu0 %v9572_v30  ;;  %3299 = vmatprep.subr.mxu1 %v9573_v37  ;;  %v9579_v30 = vld [vmem:[#allocation94_spill] sm:$0xff] }
 0x5e3   :  { %3229 = vmatpush1.msra.mxu0 %v9574_v36  ;;  %3262 = vmatprep.mubr.f32.mxu0 %v9003_v3 }
 0x5e4   :  { %3300 = vmatpush1.msra.mxu1 %v9575_v56  ;;  %3333 = vmatprep.mubr.f32.mxu1 %v9003_v3 }
 0x5e5   :  { %3349 = vmatprep.subr.mxu0 %v9576_v45  ;;  %3420 = vmatprep.subr.mxu1 %v9577_v9 }
 0x661   :  { %v2904_v44 = vpop.f32.mrf.mxu0  ;;  %v2975_v37 = vpop.f32.mrf.mxu1 }
 0x662   :  { %v2980_v54 = vadd.f32 %v2904_v44, %v9578_v43  ;;  %v2982_v0 = vadd.f32 %v2975_v37, %v9581_v29 }
 0x663   :  { %v2906_v8 = vpop.f32.mrf.mxu0  ;;  %v2977_v52 = vpop.f32.mrf.mxu1 }
 0x664   :  { %v4635_v4 = vmul.f32 -1.442695, %v2980_v54  ;;  %v2981_v57 = vadd.f32 %v2906_v8, %v9579_v30  ;;  %v2983_v56 = vadd.f32 %v2977_v52, %v9580_v46 }
 0x666   :  { %4997 = vpow2.f32 %v4635_v4  ;;  %v4636_v36 = vmul.f32 -1.442695, %v2981_v57  ;;  %v4637_v49 = vmul.f32 -1.442695, %v2983_v56 }
 0x668   :  { %4999 = vpow2.f32 %v4636_v36 }
 0x669   :  { %5001 = vpow2.f32 %v4637_v49 }
 0x66a   :  { %5003 = vtanh.f32 %v2982_v0 }
 0x673   :  { %v4998_v45 = vpop.eup %4997 }
 0x674   :  { %v3138_v61 = vadd.f32 1.0, %v4998_v45  ;;  %v9583_v45 = vld [vmem:[#allocation114_spill] sm:$0xff] }
 0x675   :  { %v5000_v9 = vpop.eup %4999 }
 0x676   :  { %5005 = vrcp.f32 %v3138_v61  ;;  %v3144_v44 = vadd.f32 1.0, %v5000_v9  ;;  %v5002_v54 = vpop.eup %5001  ;;  %v9591_v9 = vld [vmem:[#allocation68_spill] sm:$0xff] }
 0x677   :  { %v5004_v43 = vpop.eup %5003  ;;  %v3151_v57 = vadd.f32 1.0, %v5002_v54 }
 0x678   :  { %5007 = vrcp.f32 %v3144_v44 }
 0x679   :  { %5009 = vrcp.f32 %v3151_v57 }
 0x683   :  { %v5006_v8 = vpop.eup %5005 }
 0x684   :  { %v3155_v4 = vmul.f32 %v5006_v8, %v5004_v43  ;;  %v3055_v30 = vpop.f32.mrf.mxu0  ;;  %v3126_v61 = vpop.f32.mrf.mxu1  ;;  %v9586_v8 = vld [vmem:[#allocation113_spill] sm:$0xff] }
 0x685   :  { %v5008_v36 = vpop.eup %5007  ;;  %v3131_v46 = vadd.f32 %v3055_v30, %v9582_v14  ;;  %v9585_v14 = vld [vmem:[#allocation115_spill] sm:$0xff]  ;;  %v3133_v30 = vadd.f32 %v3126_v61, %v9586_v8  ;;  %v9589_v61 = vld [vmem:[#allocation66_spill] sm:$0xff] }
 0x686   :  { %v3154_v52 = vmul.f32 %v5008_v36, %v7590_v40  ;;  %v3057_v29 = vpop.f32.mrf.mxu0  ;;  %v3128_v54 = vpop.f32.mrf.mxu1  ;;  %v9594_v8 = vld [vmem:[#allocation71_spill] sm:$0xff] }
 0x687   :  { %v4638_v37 = vmul.f32 -1.442695, %v3131_v46  ;;  %v3132_v49 = vadd.f32 %v3057_v29, %v9583_v45  ;;  %v3134_v43 = vadd.f32 %v3128_v54, %v9585_v14  ;;  %v5010_v46 = vpop.eup %5009  ;;  %v9592_v54 = vld [vmem:[#allocation69_spill] sm:$0xff]  ;;  %v9593_v14 = vld [vmem:[#allocation70_spill] sm:$0xff] }
 0x688   :  { %v3156_v56 = vadd.f32 %v3155_v4, %v3154_v52 }
 0x689   :  { %5011 = vpow2.f32 %v4638_v37  ;;  %v4639_v0 = vmul.f32 -1.442695, %v3132_v49  ;;  %v4640_v36 = vmul.f32 -1.442695, %v3134_v43  ;;  %v9587_v49 = vld [vmem:[#allocation64_spill] sm:$0xff] }
 0x68a   :  { %5013 = vtanh.f32 %v3156_v56  ;;  %v7880_v44 = vsel %vm2068_vm13, %v3156_v56, %v7590_v40  ;;  %v9588_v56 = vld [vmem:[#allocation65_spill] sm:$0xff] }
 0x68b   :  { %5015 = vpow2.f32 %v4639_v0  ;;  %v9590_v0 = vld [vmem:[#allocation67_spill] sm:$0xff] }
 0x68c   :  { %5017 = vtanh.f32 %v3133_v30  ;;  %v9595_v30 = vld [vmem:[#allocation72_spill] sm:$0xff] }
 0x68d   :  { %5019 = vpow2.f32 %v4640_v36 }
 0x696   :  { %v5012_v29 = vpop.eup %5011 }
 0x697   :  { %v5014_v4 = vpop.eup %5013  ;;  %v3162_v57 = vadd.f32 1.0, %v5012_v29  ;;  %v9597_v29 = vld [vmem:[#allocation74_spill] sm:$0xff] }
 0x698   :  { %v5016_v52 = vpop.eup %5015  ;;  %v3158_v37 = vmul.f32 %v5014_v4, %v5010_v46  ;;  %v9596_v46 = vld [vmem:[#allocation73_spill] sm:$0xff] }
 0x699   :  { %5021 = vrcp.f32 %v3162_v57  ;;  %v3168_v45 = vadd.f32 1.0, %v5016_v52  ;;  %v5018_v43 = vpop.eup %5017  ;;  %v9598_v57 = vld [vmem:[#allocation75_spill] sm:$0xff] }
 0x69a   :  { %v7887_v40 = vsel %vm2068_vm13, %v3158_v37, %v7597_v10  ;;  %v5020_v36 = vpop.eup %5019  ;;  %v9599_v37 = vld [vmem:[#allocation76_spill] sm:$0xff] }
 0x69b   :  { %5023 = vrcp.f32 %v3168_v45  ;;  %3263 = vmatmul.mubr.f32.vlgmr.msra.gmra.mxu0 %v7887_v40  ;;  %3334 = vmatmul.mubr.f32.vlgmr.msra.gmra.mxu1 %v7887_v40  ;;  %v9600_v45 = vld [vmem:[#allocation77_spill] sm:$0xff] }
 0x69c   :  { %3350 = vmatpush1.msra.mxu0 %v7601_v6  ;;  %3421 = vmatpush1.msra.mxu1 %v7604_v5 }
 0x69d   :  { %3351 = vmatprep.subr.mxu0 %v7607_v7  ;;  %3422 = vmatprep.subr.mxu1 %v7610_v27 }
 0x69e   :  { %3352 = vmatpush1.msra.mxu0 %v7613_v19  ;;  %3423 = vmatpush1.msra.mxu1 %v7616_v11 }
 0x69f   :  { %3353 = vmatprep.subr.mxu0 %v7619_v55  ;;  %3424 = vmatprep.subr.mxu1 %v7622_v42 }
 0x6a0   :  { %3354 = vmatpush1.msra.mxu0 %v7625_v34  ;;  %3425 = vmatpush1.msra.mxu1 %v9587_v49 }
 0x6a1   :  { %3355 = vmatprep.subr.mxu0 %v9588_v56  ;;  %3426 = vmatprep.subr.mxu1 %v9589_v61 }
 0x6a2   :  { %3356 = vmatpush1.msra.mxu0 %v9590_v0  ;;  %3427 = vmatpush1.msra.mxu1 %v9591_v9 }
 0x6a3   :  { %3357 = vmatprep.subr.mxu0 %v9592_v54  ;;  %3428 = vmatprep.subr.mxu1 %v9593_v14  ;;  %v3175_v54 = vadd.f32 1.0, %v5020_v36  ;;  %v9603_v14 = vld [vmem:[#allocation80_spill] sm:$0xff] }
 0x6a4   :  { %3358 = vmatpush1.msra.mxu0 %v9594_v8  ;;  %3429 = vmatpush1.msra.mxu1 %v9595_v30  ;;  %v9601_v8 = vld [vmem:[#allocation78_spill] sm:$0xff]  ;;  %v9602_v30 = vld [vmem:[#allocation79_spill] sm:$0xff]  ;;  %v9607_v36 = vld [vmem:[#allocation120_spill] sm:$0xff] }
 0x6a5   :  { %3359 = vmatprep.subr.mxu0 %v9596_v46  ;;  %3430 = vmatprep.subr.mxu1 %v9597_v29  ;;  %v9604_v29 = vld [vmem:[#allocation27_spill] sm:$0xff]  ;;  %5025 = vrcp.f32 %v3175_v54  ;;  %v9615_v54 = vld [vmem:[#allocation92_spill] sm:$0xff] }
 0x6a6   :  { %v5022_v4 = vpop.eup %5021  ;;  %3360 = vmatpush1.msra.mxu0 %v9598_v57  ;;  %3431 = vmatpush1.msra.mxu1 %v7664_v39  ;;  %v9605_v57 = vld [vmem:[#allocation29_spill] sm:$0xff] }
 0x6a7   :  { %v3179_v52 = vmul.f32 %v5022_v4, %v5018_v43  ;;  %3361 = vmatprep.subr.mxu0 %v9599_v37  ;;  %3432 = vmatprep.subr.mxu1 %v9600_v45  ;;  %v9606_v4 = vld [vmem:[#allocation28_spill] sm:$0xff] }
 0x6a8   :  { %v5024_v10 = vpop.eup %5023  ;;  %3362 = vmatpush1.msra.mxu0 %v9601_v8  ;;  %3433 = vmatpush1.msra.mxu1 %v9602_v30  ;;  %v9608_v8 = vld [vmem:[#allocation122_spill] sm:$0xff]  ;;  %v9609_v30 = vld [vmem:[#allocation123_spill] sm:$0xff] }
 0x6a9   :  { %v3178_v46 = vmul.f32 %v5024_v10, %v7713_v50  ;;  %3363 = vmatprep.subr.mxu0 %v9603_v14  ;;  %3434 = vmatprep.subr.mxu1 %v9604_v29  ;;  %v9610_v10 = vld [vmem:[#allocation121_spill] sm:$0xff]  ;;  %v9658_v14 = vld [vmem:[#allocation46_spill] sm:$0xff] }
 0x6aa   :  { %3364 = vmatpush1.msra.mxu0 %v9605_v57  ;;  %3435 = vmatpush1.msra.mxu1 %v7689_v41 }
 0x6ab   :  { %v3180_v43 = vadd.f32 %v3179_v52, %v3178_v46  ;;  %3365 = vmatprep.subr.mxu0 %v7692_v35  ;;  %3436 = vmatprep.subr.mxu1 %v9606_v4  ;;  %v9612_v46 = vld [vmem:[#allocation89_spill] sm:$0xff]  ;;  %v9613_v52 = vld [vmem:[#allocation90_spill] sm:$0xff]  ;;  %v9614_v35 = vld [vmem:[#allocation91_spill] sm:$0xff] }
 0x6ac   :  { %3366 = vmatpush1.msra.mxu0 %v9607_v36  ;;  %3437 = vmatpush1.msra.mxu1 %v9608_v8  ;;  %v9616_v36 = vld [vmem:[#allocation130_spill] sm:$0xff]  ;;  %v9617_v8 = vld [vmem:[#allocation131_spill] sm:$0xff] }
 0x6ad   :  { %3367 = vmatprep.subr.mxu0 %v9609_v30  ;;  %3438 = vmatprep.subr.mxu1 %v9610_v10  ;;  %5027 = vtanh.f32 %v3180_v43  ;;  %v7931_v57 = vsel %vm2061_vm12, %v3180_v43, %v7713_v50  ;;  %v9618_v30 = vld [vmem:[#allocation132_spill] sm:$0xff]  ;;  %v9619_v10 = vld [vmem:[#allocation133_spill] sm:$0xff]  ;;  %v9620_v4 = vld [vmem:[#allocation135_spill] sm:$0xff] }
 0x6ae   :  { %3368 = vmatpush1.msra.mxu0 %v9612_v46  ;;  %3439 = vmatpush1.msra.mxu1 %v9613_v52  ;;  %v9621_v50 = vld [vmem:[#allocation137_spill] sm:$0xff]  ;;  %v9622_v43 = vld [vmem:[#allocation138_spill] sm:$0xff]  ;;  %v9623_v46 = vld [vmem:[#allocation139_spill] sm:$0xff] }
 0x6af   :  { %3369 = vmatprep.subr.mxu0 %v9614_v35  ;;  %3440 = vmatprep.subr.mxu1 %v9615_v54  ;;  %v9624_v52 = vld [vmem:[#allocation140_spill] sm:$0xff]  ;;  %v9625_v35 = vld [vmem:[#allocation141_spill] sm:$0xff]  ;;  %v9626_v54 = vld [vmem:[#allocation142_spill] sm:$0xff] }
 0x6b0   :  { %3370 = vmatpush1.msra.mxu0 %v9616_v36  ;;  %3441 = vmatpush1.msra.mxu1 %v9617_v8  ;;  %v9627_v36 = vld [vmem:[#allocation143_spill] sm:$0xff]  ;;  %v9628_v8 = vld [vmem:[#allocation144_spill] sm:$0xff] }
 0x6b1   :  { %3371 = vmatprep.subr.mxu0 %v9618_v30  ;;  %3442 = vmatprep.subr.mxu1 %v9619_v10  ;;  %v9629_v30 = vld [vmem:[#allocation145_spill] sm:$0xff]  ;;  %v9630_v10 = vld [vmem:[#allocation146_spill] sm:$0xff] }
 0x6b2   :  { %3372 = vmatpush1.msra.mxu0 %v9620_v4  ;;  %3443 = vmatpush1.msra.mxu1 %v9621_v50  ;;  %v9631_v4 = vld [vmem:[#allocation147_spill] sm:$0xff] }
 0x6b3   :  { %3373 = vmatprep.subr.mxu0 %v9622_v43  ;;  %3444 = vmatprep.subr.mxu1 %v9623_v46  ;;  %v9632_v43 = vld [vmem:[#allocation148_spill] sm:$0xff]  ;;  %v5026_v46 = vpop.eup %5025 }
 0x6b4   :  { %3374 = vmatpush1.msra.mxu0 %v9624_v52  ;;  %3445 = vmatpush1.msra.mxu1 %v9625_v35  ;;  %v9633_v52 = vld [vmem:[#allocation150_spill] sm:$0xff] }
 0x6b5   :  { %3375 = vmatprep.subr.mxu0 %v9626_v54  ;;  %3446 = vmatprep.subr.mxu1 %v9627_v36 }
 0x6b6   :  { %3376 = vmatpush1.msra.mxu0 %v9628_v8  ;;  %3447 = vmatpush1.msra.mxu1 %v9629_v30 }
 0x6b7   :  { %3377 = vmatprep.subr.mxu0 %v9630_v10  ;;  %3448 = vmatprep.subr.mxu1 %v7772_v20 }
 0x6b8   :  { %3378 = vmatpush1.msra.mxu0 %v9631_v4  ;;  %3449 = vmatpush1.msra.mxu1 %v9632_v43 }
 0x6b9   :  { %3379 = vmatprep.subr.mxu0 %v7781_v53  ;;  %3450 = vmatprep.subr.mxu1 %v9633_v52 }
 0x6ba   :  { %v5028_v54 = vpop.eup %5027  ;;  %3380 = vmatpush1.msra.mxu0 %v7787_v38  ;;  %3413 = vmatprep.mubr.f32.mxu0 %v9003_v3 }
 0x6bb   :  { %3451 = vmatpush1.msra.mxu1 %v7791_v58  ;;  %3484 = vmatprep.mubr.f32.mxu1 %v9003_v3  ;;  %v3182_v10 = vmul.f32 %v5028_v54, %v5026_v46  ;;  %v9660_v46 = vld [vmem:[#allocation48_spill] sm:$0xff]  ;;  %v9661_v54 = vld [vmem:[#allocation47_spill] sm:$0xff] }
 0x6bc   :  { %3629 = vmatprep.subr.mxu1 %v7376_v18  ;;  %3558 = vmatprep.subr.mxu0 %v7373_v48  ;;  %v9634_v48 = vld [vmem:[#allocation125_spill] sm:$0xff]  ;;  %v9635_v18 = vld [vmem:[#allocation127_spill] sm:$0xff] }
 0x6bd   :  { %v7966_v53 = vsel %vm2061_vm12, %v3182_v10, %v7800_v31  ;;  %v9659_v10 = vld [vmem:[#allocation45_spill] sm:$0xff] }
 0x6be   :  { %3414 = vmatmul.mubr.f32.vlgmr.msra.gmra.mxu0 %v7966_v53  ;;  %3485 = vmatmul.mubr.f32.vlgmr.msra.gmra.mxu1 %v7966_v53 }
 0x6bf   :  { %3630 = vmatpush1.msra.mxu1 %v7389_v1  ;;  %3559 = vmatpush1.msra.mxu0 %v7386_v17  ;;  %v9636_v17 = vld [vmem:[#allocation85_spill] sm:$0xff]  ;;  %v9637_v1 = vld [vmem:[#allocation84_spill] sm:$0xff] }
 0x6c0   :  { %3631 = vmatprep.subr.mxu1 %v7395_v63  ;;  %3560 = vmatprep.subr.mxu0 %v7392_v2  ;;  %v9638_v2 = vld [vmem:[#allocation87_spill] sm:$0xff]  ;;  %v9639_v63 = vld [vmem:[#allocation86_spill] sm:$0xff] }
 0x6c1   :  { %3632 = vmatpush1.msra.mxu1 %v7401_v59  ;;  %3561 = vmatpush1.msra.mxu0 %v7398_v47  ;;  %v9640_v47 = vld [vmem:[#allocation93_spill] sm:$0xff]  ;;  %v9641_v59 = vld [vmem:[#allocation88_spill] sm:$0xff] }
 0x6c2   :  { %3633 = vmatprep.subr.mxu1 %v7407_v32  ;;  %3562 = vmatprep.subr.mxu0 %v7404_v28  ;;  %v9642_v28 = vld [vmem:[#allocation134_spill] sm:$0xff]  ;;  %v9643_v32 = vld [vmem:[#allocation129_spill] sm:$0xff] }
 0x6c3   :  { %3634 = vmatpush1.msra.mxu1 %v7413_v62  ;;  %3563 = vmatpush1.msra.mxu0 %v7410_v13  ;;  %v9644_v13 = vld [vmem:[#allocation158_spill] sm:$0xff]  ;;  %v9645_v62 = vld [vmem:[#allocation151_spill] sm:$0xff] }
 0x6c4   :  { %3635 = vmatprep.subr.mxu1 %v7419_v51  ;;  %3564 = vmatprep.subr.mxu0 %v7416_v21  ;;  %v9646_v21 = vld [vmem:[#allocation160_spill] sm:$0xff]  ;;  %v9647_v51 = vld [vmem:[#allocation159_spill] sm:$0xff] }
 0x6c5   :  { %3636 = vmatpush1.msra.mxu1 %v7425_v12  ;;  %3565 = vmatpush1.msra.mxu0 %v7422_v15  ;;  %v9648_v15 = vld [vmem:[#allocation163_spill] sm:$0xff]  ;;  %v9649_v12 = vld [vmem:[#allocation162_spill] sm:$0xff] }
 0x6c6   :  { %3637 = vmatprep.subr.mxu1 %v7431_v24  ;;  %3566 = vmatprep.subr.mxu0 %v7428_v23  ;;  %v9650_v23 = vld [vmem:[#allocation38_spill] sm:$0xff]  ;;  %v9651_v24 = vld [vmem:[#allocation165_spill] sm:$0xff] }
 0x6c7   :  { %3638 = vmatpush1.msra.mxu1 %v7437_v33  ;;  %3567 = vmatpush1.msra.mxu0 %v7434_v25  ;;  %v9652_v25 = vld [vmem:[#allocation40_spill] sm:$0xff]  ;;  %v9653_v33 = vld [vmem:[#allocation39_spill] sm:$0xff] }
 0x6c8   :  { %3639 = vmatprep.subr.mxu1 %v7443_v60  ;;  %3568 = vmatprep.subr.mxu0 %v7440_v22  ;;  %v9654_v22 = vld [vmem:[#allocation42_spill] sm:$0xff]  ;;  %v9655_v60 = vld [vmem:[#allocation41_spill] sm:$0xff] }
 0x6c9   :  { %3640 = vmatpush1.msra.mxu1 %v7449_v26  ;;  %3569 = vmatpush1.msra.mxu0 %v7446_v16  ;;  %v9656_v16 = vld [vmem:[#allocation44_spill] sm:$0xff]  ;;  %v9657_v26 = vld [vmem:[#allocation43_spill] sm:$0xff] }
 0x6ca   :  { %3641 = vmatprep.subr.mxu1 %v9634_v48  ;;  %3570 = vmatprep.subr.mxu0 %v9635_v18  ;;  %v9662_v48 = vld [vmem:[#allocation50_spill] sm:$0xff]  ;;  %v9663_v18 = vld [vmem:[#allocation49_spill] sm:$0xff] }
 0x6cb   :  { %3642 = vmatpush1.msra.mxu1 %v9636_v17  ;;  %3571 = vmatpush1.msra.mxu0 %v9637_v1  ;;  %v9664_v17 = vld [vmem:[#allocation52_spill] sm:$0xff]  ;;  %v9665_v1 = vld [vmem:[#allocation51_spill] sm:$0xff] }
 0x6cc   :  { %3643 = vmatprep.subr.mxu1 %v9638_v2  ;;  %3572 = vmatprep.subr.mxu0 %v9639_v63  ;;  %v9666_v2 = vld [vmem:[#allocation54_spill] sm:$0xff]  ;;  %v9667_v63 = vld [vmem:[#allocation53_spill] sm:$0xff] }
 0x6cd   :  { %3644 = vmatpush1.msra.mxu1 %v9640_v47  ;;  %3573 = vmatpush1.msra.mxu0 %v9641_v59  ;;  %v9668_v47 = vld [vmem:[#allocation56_spill] sm:$0xff]  ;;  %v9669_v59 = vld [vmem:[#allocation55_spill] sm:$0xff] }
 0x6ce   :  { %3645 = vmatprep.subr.mxu1 %v9642_v28  ;;  %3574 = vmatprep.subr.mxu0 %v9643_v32  ;;  %v9670_v28 = vld [vmem:[#allocation58_spill] sm:$0xff]  ;;  %v9671_v32 = vld [vmem:[#allocation57_spill] sm:$0xff] }
 0x6cf   :  { %3646 = vmatpush1.msra.mxu1 %v9644_v13  ;;  %3575 = vmatpush1.msra.mxu0 %v9645_v62  ;;  %v9672_v13 = vld [vmem:[#allocation60_spill] sm:$0xff]  ;;  %v9673_v62 = vld [vmem:[#allocation59_spill] sm:$0xff] }
 0x6d0   :  { %3647 = vmatprep.subr.mxu1 %v9646_v21  ;;  %3576 = vmatprep.subr.mxu0 %v9647_v51  ;;  %v9674_v21 = vld [vmem:[#allocation62_spill] sm:$0xff]  ;;  %v9675_v51 = vld [vmem:[#allocation61_spill] sm:$0xff] }
 0x6d1   :  { %3648 = vmatpush1.msra.mxu1 %v9648_v15  ;;  %3577 = vmatpush1.msra.mxu0 %v9649_v12  ;;  %v9676_v12 = vld [vmem:[#allocation96_spill] sm:$0xff] }
 0x6d2   :  { %3649 = vmatprep.subr.mxu1 %v9650_v23  ;;  %3578 = vmatprep.subr.mxu0 %v9651_v24 }
 0x6d3   :  { %3650 = vmatpush1.msra.mxu1 %v9652_v25  ;;  %3579 = vmatpush1.msra.mxu0 %v9653_v33  ;;  %v9677_v33 = vld [vmem:[#allocation98_spill] sm:$0xff] }
 0x6d4   :  { %3651 = vmatprep.subr.mxu1 %v9654_v22  ;;  %3580 = vmatprep.subr.mxu0 %v9655_v60 }
 0x6d5   :  { %3652 = vmatpush1.msra.mxu1 %v9656_v16  ;;  %3581 = vmatpush1.msra.mxu0 %v9657_v26 }
 0x6d6   :  { %3653 = vmatprep.subr.mxu1 %v9658_v14  ;;  %3582 = vmatprep.subr.mxu0 %v9659_v10  ;;  %v9678_v14 = vld [vmem:[#allocation99_spill] sm:$0xff] }
 0x6d7   :  { %3654 = vmatpush1.msra.mxu1 %v9660_v46  ;;  %3583 = vmatpush1.msra.mxu0 %v9661_v54  ;;  %v9679_v54 = vld [vmem:[#allocation97_spill] sm:$0xff] }
 0x6d8   :  { %3655 = vmatprep.subr.mxu1 %v9662_v48  ;;  %3584 = vmatprep.subr.mxu0 %v9663_v18 }
 0x6d9   :  { %3656 = vmatpush1.msra.mxu1 %v9664_v17  ;;  %3585 = vmatpush1.msra.mxu0 %v9665_v1 }
 0x6da   :  { %3657 = vmatprep.subr.mxu1 %v9666_v2  ;;  %3586 = vmatprep.subr.mxu0 %v9667_v63 }
 0x6db   :  { %3658 = vmatpush1.msra.mxu1 %v9668_v47  ;;  %3587 = vmatpush1.msra.mxu0 %v9669_v59 }
 0x6dc   :  { %3659 = vmatprep.subr.mxu1 %v9670_v28  ;;  %3588 = vmatprep.subr.mxu0 %v9671_v32 }
 0x6dd   :  { %3660 = vmatpush1.msra.mxu1 %v9672_v13  ;;  %3589 = vmatpush1.msra.mxu0 %v9673_v62 }
 0x6de   :  { %3622 = vmatprep.mubr.f32.mxu0 %v9003_v3  ;;  %3693 = vmatprep.mubr.f32.mxu1 %v9003_v3 }
 0x6df   :  { %3779 = vmatprep.subr.mxu1 %v9674_v21  ;;  %3708 = vmatprep.subr.mxu0 %v9675_v51  ;;  %v9680_v21 = vld [vmem:[#allocation108_spill] sm:$0xff] }
 0x75b   :  { %v3264_v15 = vpop.f32.mrf.mxu0  ;;  %v3335_v60 = vpop.f32.mrf.mxu1 }
 0x75c   :  { %v3340_v23 = vadd.f32 %v3264_v15, %v9676_v12  ;;  %v3342_v48 = vadd.f32 %v3335_v60, %v9679_v54  ;;  %v9684_v54 = vld [vmem:[#allocation109_spill] sm:$0xff] }
 0x75d   :  { %v3266_v24 = vpop.f32.mrf.mxu0  ;;  %v3337_v26 = vpop.f32.mrf.mxu1 }
 0x75e   :  { %v4641_v25 = vmul.f32 -1.442695, %v3340_v23  ;;  %v3341_v22 = vadd.f32 %v3266_v24, %v9677_v33  ;;  %v3343_v10 = vadd.f32 %v3337_v26, %v9678_v14  ;;  %v9681_v24 = vld [vmem:[#allocation110_spill] sm:$0xff] }
 0x760   :  { %5029 = vpow2.f32 %v4641_v25  ;;  %v4642_v16 = vmul.f32 -1.442695, %v3341_v22  ;;  %v4643_v46 = vmul.f32 -1.442695, %v3343_v10  ;;  %v9683_v10 = vld [vmem:[#allocation111_spill] sm:$0xff] }
 0x762   :  { %5031 = vpow2.f32 %v4642_v16  ;;  %v9708_v16 = vld [vmem:[#allocation130_spill] sm:$0xff] }
 0x763   :  { %5033 = vpow2.f32 %v4643_v46 }
 0x764   :  { %5035 = vtanh.f32 %v3342_v48 }
 0x76d   :  { %v5030_v18 = vpop.eup %5029 }
 0x76e   :  { %v3498_v17 = vadd.f32 1.0, %v5030_v18 }
 0x76f   :  { %v5032_v1 = vpop.eup %5031 }
 0x770   :  { %5037 = vrcp.f32 %v3498_v17  ;;  %v3504_v2 = vadd.f32 1.0, %v5032_v1  ;;  %v5034_v63 = vpop.eup %5033 }
 0x771   :  { %v5036_v47 = vpop.eup %5035  ;;  %v3511_v32 = vadd.f32 1.0, %v5034_v63 }
 0x772   :  { %5039 = vrcp.f32 %v3504_v2 }
 0x773   :  { %5041 = vrcp.f32 %v3511_v32  ;;  %v9693_v32 = vld [vmem:[#allocation78_spill] sm:$0xff] }
 0x77d   :  { %v5038_v59 = vpop.eup %5037 }
 0x77e   :  { %v3515_v28 = vmul.f32 %v5038_v59, %v5036_v47  ;;  %v3415_v13 = vpop.f32.mrf.mxu0  ;;  %v3486_v22 = vpop.f32.mrf.mxu1 }
 0x77f   :  { %v5040_v62 = vpop.eup %5039  ;;  %v3491_v51 = vadd.f32 %v3415_v13, %v9680_v21  ;;  %v3493_v48 = vadd.f32 %v3486_v22, %v9684_v54  ;;  %v9706_v22 = vld [vmem:[#allocation91_spill] sm:$0xff]  ;;  %v9713_v54 = vld [vmem:[#allocation138_spill] sm:$0xff] }
 0x780   :  { %v3514_v15 = vmul.f32 %v5040_v62, %v7880_v44  ;;  %v3417_v12 = vpop.f32.mrf.mxu0  ;;  %v3488_v14 = vpop.f32.mrf.mxu1  ;;  %v9694_v62 = vld [vmem:[#allocation80_spill] sm:$0xff] }
 0x781   :  { %v4644_v23 = vmul.f32 -1.442695, %v3491_v51  ;;  %v3492_v25 = vadd.f32 %v3417_v12, %v9681_v24  ;;  %v3494_v46 = vadd.f32 %v3488_v14, %v9683_v10  ;;  %v5042_v17 = vpop.eup %5041  ;;  %v9698_v51 = vld [vmem:[#allocation122_spill] sm:$0xff]  ;;  %v9700_v12 = vld [vmem:[#allocation121_spill] sm:$0xff]  ;;  %v9710_v10 = vld [vmem:[#allocation132_spill] sm:$0xff] }
 0x782   :  { %v3516_v33 = vadd.f32 %v3515_v28, %v3514_v15  ;;  %v9699_v15 = vld [vmem:[#allocation120_spill] sm:$0xff]  ;;  %v9703_v24 = vld [vmem:[#allocation90_spill] sm:$0xff]  ;;  %v9709_v14 = vld [vmem:[#allocation133_spill] sm:$0xff] }
 0x783   :  { %5043 = vpow2.f32 %v4644_v23  ;;  %v4645_v60 = vmul.f32 -1.442695, %v3492_v25  ;;  %v4646_v18 = vmul.f32 -1.442695, %v3494_v46  ;;  %v9701_v23 = vld [vmem:[#allocation123_spill] sm:$0xff]  ;;  %v9704_v25 = vld [vmem:[#allocation89_spill] sm:$0xff] }
 0x784   :  { %5045 = vtanh.f32 %v3516_v33  ;;  %v8046_v26 = vsel %vm1684_vm11, %v3516_v33, %v7880_v44  ;;  %v9705_v33 = vld [vmem:[#allocation92_spill] sm:$0xff]  ;;  %v9712_v46 = vld [vmem:[#allocation139_spill] sm:$0xff] }
 0x785   :  { %5047 = vpow2.f32 %v4645_v60  ;;  %v9707_v60 = vld [vmem:[#allocation131_spill] sm:$0xff] }
 0x786   :  { %5049 = vtanh.f32 %v3493_v48  ;;  %v9714_v48 = vld [vmem:[#allocation140_spill] sm:$0xff] }
 0x787   :  { %5051 = vpow2.f32 %v4646_v18  ;;  %v9715_v18 = vld [vmem:[#allocation142_spill] sm:$0xff] }
 0x790   :  { %v5044_v1 = vpop.eup %5043 }
 0x791   :  { %v5046_v2 = vpop.eup %5045  ;;  %v3522_v63 = vadd.f32 1.0, %v5044_v1 }
 0x792   :  { %v5048_v47 = vpop.eup %5047  ;;  %v3518_v59 = vmul.f32 %v5046_v2, %v5042_v17  ;;  %v8119_v17 = vpop.permute.xlu0 %4818 }
 0x793   :  { %5053 = vrcp.f32 %v3522_v63  ;;  %v3528_v28 = vadd.f32 1.0, %v5048_v47  ;;  %v4820_v1 = vunpack.i.l.bf16 %v8119_v17  ;;  %v3936_v63 = vld [vmem:[#allocation14 + $0x58] sm:$0xff]  ;;  %v3935_v47 = vld [vmem:[#allocation14 + $0x50] sm:$0xff] }
 0x794   :  { %v8053_v44 = vsel %vm1684_vm11, %v3518_v59, %v7887_v40  ;;  %v3934_v59 = vld [vmem:[#allocation14 + $0x48] sm:$0xff] }
 0x795   :  { %5055 = vrcp.f32 %v3528_v28  ;;  %3623 = vmatmul.mubr.f32.vlgmr.msra.gmra.mxu0 %v8053_v44  ;;  %3694 = vmatmul.mubr.f32.vlgmr.msra.gmra.mxu1 %v8053_v44  ;;  %v3933_v28 = vld [vmem:[#allocation14 + $0x40] sm:$0xff] }
 0x796   :  { %3780 = vmatpush1.msra.mxu1 %v7604_v5  ;;  %3709 = vmatpush1.msra.mxu0 %v7601_v6  ;;  %v9685_v6 = vld [vmem:[#allocation70_spill] sm:$0xff]  ;;  %v9686_v5 = vld [vmem:[#allocation69_spill] sm:$0xff] }
 0x797   :  { %3781 = vmatprep.subr.mxu1 %v7610_v27  ;;  %3710 = vmatprep.subr.mxu0 %v7607_v7  ;;  %v5050_v7 = vpop.eup %5049  ;;  %v9687_v27 = vld [vmem:[#allocation72_spill] sm:$0xff] }
 0x798   :  { %3782 = vmatpush1.msra.mxu1 %v7616_v11  ;;  %3711 = vmatpush1.msra.mxu0 %v7613_v19  ;;  %v9688_v19 = vld [vmem:[#allocation71_spill] sm:$0xff]  ;;  %v5052_v11 = vpop.eup %5051 }
 0x799   :  { %3783 = vmatprep.subr.mxu1 %v7622_v42  ;;  %3712 = vmatprep.subr.mxu0 %v7619_v55  ;;  %v9689_v55 = vld [vmem:[#allocation74_spill] sm:$0xff]  ;;  %v9690_v42 = vld [vmem:[#allocation73_spill] sm:$0xff] }
 0x79a   :  { %3784 = vmatpush1.msra.mxu1 %v9587_v49  ;;  %3713 = vmatpush1.msra.mxu0 %v7625_v34  ;;  %v9691_v49 = vld [vmem:[#allocation75_spill] sm:$0xff] }
 0x79b   :  { %3785 = vmatprep.subr.mxu1 %v9589_v61  ;;  %3714 = vmatprep.subr.mxu0 %v9588_v56 }
 0x79c   :  { %3786 = vmatpush1.msra.mxu1 %v9591_v9  ;;  %3715 = vmatpush1.msra.mxu0 %v9590_v0  ;;  %v3535_v0 = vadd.f32 1.0, %v5052_v11  ;;  %v9692_v9 = vld [vmem:[#allocation79_spill] sm:$0xff]  ;;  %v3927_v11 = vld [vmem:[#allocation14 + $0x10] sm:$0xff] }
 0x79d   :  { %3787 = vmatprep.subr.mxu1 %v9685_v6  ;;  %3716 = vmatprep.subr.mxu0 %v9686_v5  ;;  %v3932_v6 = vld [vmem:[#allocation14 + $0x38] sm:$0xff]  ;;  %v3931_v5 = vld [vmem:[#allocation14 + $0x30] sm:$0xff] }
 0x79e   :  { %3788 = vmatpush1.msra.mxu1 %v9687_v27  ;;  %3717 = vmatpush1.msra.mxu0 %v9688_v19  ;;  %5057 = vrcp.f32 %v3535_v0  ;;  %v3929_v27 = vld [vmem:[#allocation14 + $0x20] sm:$0xff]  ;;  %v3928_v19 = vld [vmem:[#allocation14 + $0x18] sm:$0xff] }
 0x79f   :  { %3789 = vmatprep.subr.mxu1 %v9689_v55  ;;  %3718 = vmatprep.subr.mxu0 %v9690_v42  ;;  %v3926_v55 = vld [vmem:[#allocation14 + $0x8] sm:$0xff]  ;;  %v3925_v42 = vld [vmem:[#allocation14] sm:$0xff] }
 0x7a0   :  { %v5054_v34 = vpop.eup %5053  ;;  %3790 = vmatpush1.msra.mxu1 %v7664_v39  ;;  %3719 = vmatpush1.msra.mxu0 %v9691_v49  ;;  %v9695_v39 = vld [vmem:[#allocation29_spill] sm:$0xff]  ;;  %v8141_v49 = vpop.permute.xlu1 %4823 }
 0x7a1   :  { %v3539_v56 = vmul.f32 %v5054_v34, %v5050_v7  ;;  %3791 = vmatprep.subr.mxu1 %v9600_v45  ;;  %3720 = vmatprep.subr.mxu0 %v9599_v37  ;;  %v9696_v45 = vld [vmem:[#allocation28_spill] sm:$0xff]  ;;  %v9697_v37 = vld [vmem:[#allocation30_spill] sm:$0xff]  ;;  %v4821_v34 = vunpack.i.h.bf16 %v8119_v17 }
 0x7a2   :  { %v5056_v61 = vpop.eup %5055  ;;  %3792 = vmatpush1.msra.mxu1 %v9692_v9  ;;  %3721 = vmatpush1.msra.mxu0 %v9693_v32  ;;  %v3930_v7 = vld [vmem:[#allocation14 + $0x28] sm:$0xff]  ;;  %v9720_v9 = vld [vmem:[#allocation25_spill] sm:$0xff] }
 0x7a3   :  { %v3538_v13 = vmul.f32 %v5056_v61, %v7931_v57  ;;  %3793 = vmatprep.subr.mxu1 %v9604_v29  ;;  %3722 = vmatprep.subr.mxu0 %v9694_v62  ;;  %v9719_v61 = vld [vmem:[#allocation83_spill] sm:$0xff]  ;;  %v4826_v62 = vunpack.i.h.bf16 %v8141_v49 }
 0x7a4   :  { %3794 = vmatpush1.msra.mxu1 %v7689_v41  ;;  %3723 = vmatpush1.msra.mxu0 %v9695_v39  ;;  %v1693_v0 = vmul.f32 %v4821_v34, %v9719_v61 }
 0x7a5   :  { %v3540_v21 = vadd.f32 %v3539_v56, %v3538_v13  ;;  %3795 = vmatprep.subr.mxu1 %v9696_v45  ;;  %3724 = vmatprep.subr.mxu0 %v9697_v37  ;;  %v4825_v56 = vunpack.i.l.bf16 %v8141_v49  ;;  %v8150_v13 = vpop.permute.xlu0 %4828  ;;  %v9722_v37 = vld [vmem:[#allocation63_spill] sm:$0xff] }
 0x7a6   :  { %3796 = vmatpush1.msra.mxu1 %v9698_v51  ;;  %3725 = vmatpush1.msra.mxu0 %v9699_v15  ;;  %v4830_v39 = vunpack.i.l.bf16 %v8150_v13  ;;  %v4831_v15 = vunpack.i.h.bf16 %v8150_v13 }
 0x7a7   :  { %3797 = vmatprep.subr.mxu1 %v9700_v12  ;;  %3726 = vmatprep.subr.mxu0 %v9701_v23  ;;  %5059 = vtanh.f32 %v3540_v21  ;;  %v8097_v41 = vsel %vm1677_vm10, %v3540_v21, %v7931_v57  ;;  %v9711_v57 = vld [vmem:[#allocation135_spill] sm:$0xff]  ;;  %v2077_v32 = vmul.f32 %v4825_v56, %v9720_v9  ;;  %v9721_v21 = vld [vmem:[#allocation124_spill] sm:$0xff]  ;;  %v8161_v12 = vpop.permute.xlu1 %4833 }
 0x7a8   :  { %3798 = vmatpush1.msra.mxu1 %v9703_v24  ;;  %3727 = vmatpush1.msra.mxu0 %v9704_v25  ;;  %v2461_v45 = vmul.f32 %v4826_v62, %v9721_v21  ;;  %v2827_v51 = vmul.f32 %v4830_v39, %v9722_v37  ;;  %v4835_v23 = vunpack.i.l.bf16 %v8161_v12  ;;  %v3187_v29 = vmul.f32 %v4831_v15, %v7887_v40  ;;  %v3956_v25 = vld [vmem:[#allocation14 + $0xf8] sm:$0xff]  ;;  %v3951_v40 = vld [vmem:[#allocation14 + $0xd0] sm:$0xff] }
 0x7a9   :  { %3799 = vmatprep.subr.mxu1 %v9705_v33  ;;  %3728 = vmatprep.subr.mxu0 %v9706_v22  ;;  %v3955_v33 = vld [vmem:[#allocation14 + $0xf0] sm:$0xff]  ;;  %v3954_v22 = vld [vmem:[#allocation14 + $0xe8] sm:$0xff] }
 0x7aa   :  { %3800 = vmatpush1.msra.mxu1 %v9707_v60  ;;  %3729 = vmatpush1.msra.mxu0 %v9708_v16  ;;  %v3547_v24 = vmul.f32 %v4835_v23, %v8053_v44  ;;  %v3953_v60 = vld [vmem:[#allocation14 + $0xe0] sm:$0xff]  ;;  %v3952_v16 = vld [vmem:[#allocation14 + $0xd8] sm:$0xff]  ;;  %v9727_v37 = vld [vmem:[#allocation104_spill] sm:$0xff] }
 0x7ab   :  { %3801 = vmatprep.subr.mxu1 %v9709_v14  ;;  %3730 = vmatprep.subr.mxu0 %v9710_v10  ;;  %v3950_v14 = vld [vmem:[#allocation14 + $0xc8] sm:$0xff]  ;;  %v3949_v10 = vld [vmem:[#allocation14 + $0xc0] sm:$0xff] }
 0x7ac   :  { %3802 = vmatpush1.msra.mxu1 %v9621_v50  ;;  %3731 = vmatpush1.msra.mxu0 %v9711_v57  ;;  %v9716_v50 = vld [vmem:[#allocation146_spill] sm:$0xff] }
 0x7ad   :  { %3803 = vmatprep.subr.mxu1 %v9712_v46  ;;  %3732 = vmatprep.subr.mxu0 %v9713_v54  ;;  %v3948_v57 = vld [vmem:[#allocation14 + $0xb8] sm:$0xff]  ;;  %v3947_v46 = vld [vmem:[#allocation14 + $0xb0] sm:$0xff]  ;;  %v3946_v54 = vld [vmem:[#allocation14 + $0xa8] sm:$0xff] }
 0x7ae   :  { %3804 = vmatpush1.msra.mxu1 %v9625_v35  ;;  %3733 = vmatpush1.msra.mxu0 %v9714_v48  ;;  %v5058_v35 = vpop.eup %5057  ;;  %v3945_v48 = vld [vmem:[#allocation14 + $0xa0] sm:$0xff] }
 0x7af   :  { %3805 = vmatprep.subr.mxu1 %v9627_v36  ;;  %3734 = vmatprep.subr.mxu0 %v9715_v18  ;;  %v9717_v36 = vld [vmem:[#allocation149_spill] sm:$0xff] }
 0x7b0   :  { %3806 = vmatpush1.msra.mxu1 %v9629_v30  ;;  %3735 = vmatpush1.msra.mxu0 %v9628_v8  ;;  %v3940_v30 = vld [vmem:[#allocation14 + $0x78] sm:$0xff] }
 0x7b1   :  { %3807 = vmatprep.subr.mxu1 %v7772_v20  ;;  %3736 = vmatprep.subr.mxu0 %v9716_v50  ;;  %v9718_v8 = vld [vmem:[#allocation82_spill] sm:$0xff]  ;;  %v3943_v50 = vld [vmem:[#allocation14 + $0x90] sm:$0xff] }
 0x7b2   :  { %3808 = vmatpush1.msra.mxu1 %v9632_v43  ;;  %3737 = vmatpush1.msra.mxu0 %v9631_v4  ;;  %v1310_v4 = vmul.f32 %v4820_v1, %v9718_v8  ;;  %v3939_v43 = vld [vmem:[#allocation14 + $0x70] sm:$0xff]  ;;  %v3944_v18 = vld [vmem:[#allocation14 + $0x98] sm:$0xff] }
 0x7b3   :  { %3809 = vmatprep.subr.mxu1 %v9633_v52  ;;  %3738 = vmatprep.subr.mxu0 %v9717_v36  ;;  %v3941_v36 = vld [vmem:[#allocation14 + $0x80] sm:$0xff] }
 0x7b4   :  { %v5060_v2 = vpop.eup %5059  ;;  %3810 = vmatpush1.msra.mxu1 %v7791_v58  ;;  %3739 = vmatpush1.msra.mxu0 %v7787_v38  ;;  %v3938_v58 = vld [vmem:[#allocation14 + $0x68] sm:$0xff]  ;;  %v3937_v38 = vld [vmem:[#allocation14 + $0x60] sm:$0xff] }
 0x7b5   :  { %3772 = vmatprep.mubr.f32.mxu0 %v9003_v3  ;;  %3843 = vmatprep.mubr.f32.mxu1 %v9003_v3  ;;  %v3542_v20 = vmul.f32 %v5060_v2, %v5058_v35  ;;  %v3942_v35 = vld [vmem:[#allocation14 + $0x88] sm:$0xff] }
 0x7b6   :  { %4754 = vmatprep.subr.mxu1 %v3940_v30  ;;  %4710 = vmatprep.subr.mxu0 %v3956_v25  ;;  %v9723_v2 = vld [vmem:[#allocation100_spill] sm:$0xff] }
 0x7b7   :  { %v8136_v52 = vsel %vm1677_vm10, %v3542_v20, %v7966_v53 }
 0x7b8   :  { %3773 = vmatmul.mubr.f32.vlgmr.msra.gmra.mxu0 %v8136_v52  ;;  %3844 = vmatmul.mubr.f32.vlgmr.msra.gmra.mxu1 %v8136_v52 }
 0x7b9   :  { %4755 = vmatpush3.msra.mxu1 %v3940_v30  ;;  %4786 = vmatprep.mubr.f32.mxu1 %v1310_v4 }
 0x7ba   :  { %4756 = vmatprep.subr.mxu1 %v3939_v43  ;;  %4711 = vmatpush3.msra.mxu0 %v3956_v25 }
 0x7bb   :  { %4757 = vmatpush3.msra.mxu1 %v3939_v43  ;;  %4712 = vmatprep.subr.mxu0 %v3955_v33  ;;  %v9724_v43 = vld [vmem:[#allocation102_spill] sm:$0xff] }
 0x7bc   :  { %4758 = vmatprep.subr.mxu1 %v3938_v58  ;;  %4713 = vmatpush3.msra.mxu0 %v3955_v33  ;;  %v9728_v33 = vld [vmem:[#allocation106_spill] sm:$0xff] }
 0x7bd   :  { %4759 = vmatpush3.msra.mxu1 %v3938_v58  ;;  %4714 = vmatprep.subr.mxu0 %v3954_v22 }
 0x7be   :  { %4760 = vmatprep.subr.mxu1 %v3937_v38  ;;  %4715 = vmatpush3.msra.mxu0 %v3954_v22 }
 0x7bf   :  { %4761 = vmatpush3.msra.mxu1 %v3937_v38  ;;  %4716 = vmatprep.subr.mxu0 %v3953_v60 }
 0x7c0   :  { %4762 = vmatprep.subr.mxu1 %v3936_v63  ;;  %4717 = vmatpush3.msra.mxu0 %v3953_v60 }
 0x7c1   :  { %4763 = vmatpush3.msra.mxu1 %v3936_v63  ;;  %4718 = vmatprep.subr.mxu0 %v3952_v16 }
 0x7c2   :  { %4764 = vmatprep.subr.mxu1 %v3935_v47  ;;  %4719 = vmatpush3.msra.mxu0 %v3952_v16 }
 0x7c3   :  { %4765 = vmatpush3.msra.mxu1 %v3935_v47  ;;  %4720 = vmatprep.subr.mxu0 %v3951_v40 }
 0x7c4   :  { %4766 = vmatprep.subr.mxu1 %v3934_v59  ;;  %4721 = vmatpush3.msra.mxu0 %v3951_v40 }
 0x7c5   :  { %4767 = vmatpush3.msra.mxu1 %v3934_v59  ;;  %4722 = vmatprep.subr.mxu0 %v3950_v14  ;;  %v9725_v59 = vld [vmem:[#allocation103_spill] sm:$0xff] }
 0x7c6   :  { %4768 = vmatprep.subr.mxu1 %v3933_v28  ;;  %4723 = vmatpush3.msra.mxu0 %v3950_v14 }
 0x7c7   :  { %4769 = vmatpush3.msra.mxu1 %v3933_v28  ;;  %4724 = vmatprep.subr.mxu0 %v3949_v10 }
 0x7c8   :  { %4770 = vmatprep.subr.mxu1 %v3932_v6  ;;  %4725 = vmatpush3.msra.mxu0 %v3949_v10  ;;  %v9729_v10 = vld [vmem:[#allocation107_spill] sm:$0xff] }
 0x7c9   :  { %4771 = vmatpush3.msra.mxu1 %v3932_v6  ;;  %4726 = vmatprep.subr.mxu0 %v3948_v57 }
 0x7ca   :  { %4772 = vmatprep.subr.mxu1 %v3931_v5  ;;  %4727 = vmatpush3.msra.mxu0 %v3948_v57 }
 0x7cb   :  { %4773 = vmatpush3.msra.mxu1 %v3931_v5  ;;  %4728 = vmatprep.subr.mxu0 %v3947_v46  ;;  %v9726_v5 = vld [vmem:[#allocation101_spill] sm:$0xff] }
 0x7cc   :  { %4774 = vmatprep.subr.mxu1 %v3930_v7  ;;  %4729 = vmatpush3.msra.mxu0 %v3947_v46  ;;  %v9730_v46 = vld [vmem:[#allocation105_spill] sm:$0xff] }
 0x7cd   :  { %4775 = vmatpush3.msra.mxu1 %v3930_v7  ;;  %4730 = vmatprep.subr.mxu0 %v3946_v54 }
 0x7ce   :  { %4776 = vmatprep.subr.mxu1 %v3929_v27  ;;  %4731 = vmatpush3.msra.mxu0 %v3946_v54 }
 0x7cf   :  { %4777 = vmatpush3.msra.mxu1 %v3929_v27  ;;  %4732 = vmatprep.subr.mxu0 %v3945_v48 }
 0x7d0   :  { %4778 = vmatprep.subr.mxu1 %v3928_v19  ;;  %4733 = vmatpush3.msra.mxu0 %v3945_v48 }
 0x7d1   :  { %4779 = vmatpush3.msra.mxu1 %v3928_v19  ;;  %4734 = vmatprep.subr.mxu0 %v3944_v18 }
 0x7d2   :  { %4780 = vmatprep.subr.mxu1 %v3927_v11  ;;  %4735 = vmatpush3.msra.mxu0 %v3944_v18 }
 0x7d3   :  { %4781 = vmatpush3.msra.mxu1 %v3927_v11  ;;  %4736 = vmatprep.subr.mxu0 %v3943_v50 }
 0x7d4   :  { %4782 = vmatprep.subr.mxu1 %v3926_v55  ;;  %4737 = vmatpush3.msra.mxu0 %v3943_v50 }
 0x7d5   :  { %4783 = vmatpush3.msra.mxu1 %v3926_v55  ;;  %4738 = vmatprep.subr.mxu0 %v3942_v35 }
 0x7d6   :  { %4784 = vmatprep.subr.mxu1 %v3925_v42  ;;  %4739 = vmatpush3.msra.mxu0 %v3942_v35 }
 0x7d7   :  { %4785 = vmatpush3.msra.mxu1 %v3925_v42  ;;  %4740 = vmatprep.subr.mxu0 %v3941_v36 }
 0x7d8   :  { %4787 = vmatmul.mubr.f32.vlgmr.msra.gmra.mxu1 %v1693_v0  ;;  %4741 = vmatpush3.msra.mxu0 %v3941_v36 }
 0x7d9   :  { %4789 = vmatprep.mubr.f32.mxu1 %v2077_v32 }
 0x7dc   :  { %4790 = vmatmul.mubr.f32.gmra.mxu1 %v2461_v45 }
 0x7dd   :  { %4792 = vmatprep.mubr.f32.mxu1 %v2827_v51 }
 0x7e0   :  { %4793 = vmatmul.mubr.f32.gmra.mxu1 %v3187_v29 }
 0x7e1   :  { %4795 = vmatprep.mubr.f32.mxu1 %v3547_v24 }
 0x855   :  { %v3624_v30 = vpop.f32.mrf.mxu0  ;;  %v3695_v38 = vpop.f32.mrf.mxu1 }
 0x856   :  { %v3700_v20 = vadd.f32 %v3624_v30, %v9723_v2  ;;  %v3702_v7 = vadd.f32 %v3695_v38, %v9726_v5  ;;  %v4836_v2 = vunpack.i.h.bf16 %v8161_v12 }
 0x857   :  { %v3626_v8 = vpop.f32.mrf.mxu0  ;;  %v3697_v47 = vpop.f32.mrf.mxu1 }
 0x858   :  { %v4647_v4 = vmul.f32 -1.442695, %v3700_v20  ;;  %v3701_v58 = vadd.f32 %v3626_v8, %v9724_v43  ;;  %v3703_v28 = vadd.f32 %v3697_v47, %v9725_v59  ;;  %v4398_v8 = vld [vmem:[%s8556_s2 + $0x28] sm:$0xff] }
 0x85a   :  { %5061 = vpow2.f32 %v4647_v4  ;;  %v4648_v63 = vmul.f32 -1.442695, %v3701_v58  ;;  %v4649_v6 = vmul.f32 -1.442695, %v3703_v28 }
 0x85c   :  { %5063 = vpow2.f32 %v4648_v63 }
 0x85d   :  { %5065 = vpow2.f32 %v4649_v6 }
 0x85e   :  { %5067 = vtanh.f32 %v3702_v7 }
 0x867   :  { %v5062_v27 = vpop.eup %5061 }
 0x868   :  { %v3857_v19 = vadd.f32 1.0, %v5062_v27 }
 0x869   :  { %v5064_v11 = vpop.eup %5063 }
 0x86a   :  { %5069 = vrcp.f32 %v3857_v19  ;;  %v3863_v55 = vadd.f32 1.0, %v5064_v11  ;;  %v5066_v42 = vpop.eup %5065 }
 0x86b   :  { %v5068_v61 = vpop.eup %5067  ;;  %v3870_v32 = vadd.f32 1.0, %v5066_v42  ;;  %v3550_v42 = vmul.f32 %v4821_v34, %v8136_v52  ;;  %v9736_v34 = vld [vmem:[#allocation166_spill] sm:$0xff] }
 0x86c   :  { %5071 = vrcp.f32 %v3863_v55 }
 0x86d   :  { %5073 = vrcp.f32 %v3870_v32 }
 0x877   :  { %v5070_v0 = vpop.eup %5069 }
 0x878   :  { %v3874_v9 = vmul.f32 %v5070_v0, %v5068_v61  ;;  %v3774_v21 = vpop.f32.mrf.mxu0  ;;  %v3845_v16 = vpop.f32.mrf.mxu1  ;;  %v2830_v61 = vmul.f32 %v4826_v62, %v7800_v31  ;;  %v9733_v0 = vld [vmem:[#allocation126_spill] sm:$0xff] }
 0x879   :  { %v5072_v45 = vpop.eup %5071  ;;  %v3850_v51 = vadd.f32 %v3774_v21, %v9727_v37  ;;  %v3852_v54 = vadd.f32 %v3845_v16, %v9730_v46 }
 0x87a   :  { %v3873_v29 = vmul.f32 %v5072_v45, %v8046_v26  ;;  %v3776_v24 = vpop.f32.mrf.mxu0  ;;  %v3847_v14 = vpop.f32.mrf.mxu1 }
 0x87b   :  { %v4650_v25 = vmul.f32 -1.442695, %v3850_v51  ;;  %v3851_v22 = vadd.f32 %v3776_v24, %v9728_v33  ;;  %v3853_v57 = vadd.f32 %v3847_v14, %v9729_v10  ;;  %v5074_v18 = vpop.eup %5073 }
 0x87c   :  { %v3875_v60 = vadd.f32 %v3874_v9, %v3873_v29  ;;  %v2470_v9 = vmul.f32 %v4830_v39, %v9733_v0  ;;  %v4653_v39 = vld [vmem:[%s8565_s11] ss:$0 sm:$0xff] }
 0x87d   :  { %5075 = vpow2.f32 %v4650_v25  ;;  %v4651_v40 = vmul.f32 -1.442695, %v3851_v22  ;;  %v4652_v48 = vmul.f32 -1.442695, %v3853_v57 }
 0x87e   :  { %5077 = vtanh.f32 %v3875_v60 }
 0x87f   :  { %5079 = vpow2.f32 %v4651_v40 }
 0x880   :  { %5081 = vtanh.f32 %v3852_v54 }
 0x881   :  { %5083 = vpow2.f32 %v4652_v48  ;;  %v4396_v48 = vld [vmem:[%s8556_s2 + $0x18] sm:$0xff] }
 0x88a   :  { %v5076_v50 = vpop.eup %5075 }
 0x88b   :  { %v5078_v26 = vpop.eup %5077  ;;  %v3881_v35 = vadd.f32 1.0, %v5076_v50  ;;  %v4399_v50 = vld [vmem:[%s8556_s2 + $0x30] sm:$0xff] }
 0x88c   :  { %v5080_v36 = vpop.eup %5079  ;;  %v3877_v30 = vmul.f32 %v5078_v26, %v5074_v18 }
 0x88d   :  { %5085 = vrcp.f32 %v3881_v35  ;;  %v3887_v20 = vadd.f32 1.0, %v5080_v36  ;;  %v5082_v58 = vpop.eup %5081 }
 0x88e   :  { %v3902_v4 = vsel %vm1301_vm9, %v3877_v30, %v8053_v44  ;;  %v5084_v38 = vpop.eup %5083 }
 0x88f   :  { %5087 = vrcp.f32 %v3887_v20  ;;  %v3904_v43 = vmul.f32 %v4836_v2, %v3902_v4  ;;  %v3894_v28 = vadd.f32 1.0, %v5084_v38  ;;  %v4400_v4 = vld [vmem:[%s8556_s2 + $0x38] sm:$0xff] }
 0x891   :  { %4796 = vmatmul.mubr.f32.gmra.mxu1 %v3904_v43  ;;  %5089 = vrcp.f32 %v3894_v28  ;;  %v4403_v43 = vpop.permute.xlu1 %4402 }
 0x895   :  { %v8247_v38 = vpop.permute.xlu1 %4408 }
 0x898   :  { %v4788_v31 = vpop.f32.mrf.mxu1 }
 0x89a   :  { %v5086_v63 = vpop.eup %5085  ;;  %v4128_v49 = vpop.f32.mrf.mxu1 }
 0x89b   :  { %v3898_v47 = vmul.f32 %v5086_v63, %v5082_v58  ;;  %v4406_v58 = vpop.permute.xlu0 %4405 }
 0x89c   :  { %v5088_v59 = vpop.eup %5087  ;;  %v4791_v21 = vpop.f32.mrf.mxu1 }
 0x89d   :  { %v3897_v6 = vmul.f32 %v5088_v59, %v8097_v41  ;;  %v3190_v41 = vmul.f32 %v4825_v56, %v7966_v53  ;;  %v1318_v56 = vmul.f32 %v4836_v2, %v9736_v34 }
 0x89e   :  { %v5090_v7 = vpop.eup %5089  ;;  %v4138_v51 = vpop.f32.mrf.mxu1 }
 0x89f   :  { %v3899_v5 = vadd.f32 %v3898_v47, %v3897_v6  ;;  %v8249_v63 = vpop.permute.xlu0 %4414  ;;  %v9737_v47 = vlaneseq }
 0x8a0   :  { %v4794_v22 = vpop.f32.mrf.mxu1 }
 0x8a1   :  { %5091 = vtanh.f32 %v3899_v5  ;;  %v8252_v59 = vand.u32 127, %v9737_v47 }
 0x8a2   :  { %v4148_v14 = vpop.f32.mrf.mxu1 }
 0x8a3   :  { %vm4425_vm0 = vcmp.eq.s32.totalorder %v8252_v59, %v4403_v43  ;;  %vm4426_vm1 = vcmp.eq.s32.totalorder %v8252_v59, %v4406_v58  ;;  %v8338_v43 = vld [vmem:[%s8557_s3 + $0x18] sm:$0xff]  ;;  %vm4427_vm10 = vcmp.eq.s32.totalorder %v8252_v59, %v8247_v38  ;;  %vm4429_vm11 = vcmp.eq.s32.totalorder %v8252_v59, %v8249_v63 }
 0x8ae   :  { %v5092_v27 = vpop.eup %5091 }
 0x8af   :  { %v3901_v19 = vmul.f32 %v5092_v27, %v5090_v7 }
 0x8b1   :  { %v3903_v44 = vsel %vm1294_vm8, %v3901_v19, %v8136_v52  ;;  %v9735_v52 = vld [vmem:[#allocation167_spill] sm:$0xff]  ;;  %v4654_v19 = vsel %vm4425_vm0, 1.0, %v9003_v3 }
 0x8b2   :  { %v3907_v55 = vmul.f32 %v4820_v1, %v3903_v44  ;;  %v9734_v1 = vld [vmem:[#allocation24_spill] sm:$0xff]  ;;  %v1702_v53 = vmul.f32 %v4835_v23, %v9735_v52 }
 0x8b3   :  { %v2086_v17 = vmul.f32 %v4831_v15, %v9734_v1 }
 0x8b4   :  { %4742 = vmatprep.mubr.f32.mxu0 %v3907_v55 }
 0x8b5   :  { %4743 = vmatmul.mubr.f32.vlgmr.msra.gmra.mxu0 %v3550_v42 }
 0x8b6   :  { %4745 = vmatprep.mubr.f32.mxu0 %v3190_v41 }
 0x8b9   :  { %4746 = vmatmul.mubr.f32.gmra.mxu0 %v2830_v61 }
 0x8ba   :  { %4748 = vmatprep.mubr.f32.mxu0 %v2470_v9 }
 0x8bd   :  { %4749 = vmatmul.mubr.f32.gmra.mxu0 %v2086_v17 }
 0x8be   :  { %4751 = vmatprep.mubr.f32.mxu0 %v1702_v53 }
 0x8c1   :  { %4752 = vmatmul.mubr.f32.gmra.mxu0 %v1318_v56 }
 0x951   :  { %v4797_v57 = vpop.f32.mrf.mxu1 }
 0x953   :  { %v4158_v36 = vpop.f32.mrf.mxu1 }
 0x975   :  { %v4744_v62 = vpop.f32.mrf.mxu0 }
 0x976   :  { %v4134_v32 = vadd.f32 %v4788_v31, %v4744_v62 }
 0x977   :  { %v4023_v13 = vpop.f32.mrf.mxu0 }
 0x978   :  { %v8211_v15 = vadd.f32 %v4653_v39, %v4134_v32  ;;  %v4129_v45 = vadd.f32 %v4128_v49, %v4023_v13 }
 0x979   :  { %v4747_v12 = vpop.f32.mrf.mxu0 }
 0x97a   :  { %v8213_v23 = vadd.f32 %v4653_v39, %v4129_v45  ;;  %v4144_v37 = vadd.f32 %v4791_v21, %v4747_v12  ;;  %4184 = vmax.xlane.f32.xlu1 %v8211_v15  ;;  %v4655_v45 = vsel %vm4426_vm1, 1.0, %v9003_v3 }
 0x97b   :  { %v4033_v29 = vpop.f32.mrf.mxu0 }
 0x97c   :  { %4182 = vmax.xlane.f32.xlu0 %v8213_v23  ;;  %v8217_v25 = vadd.f32 %v4653_v39, %v4144_v37  ;;  %v4139_v33 = vadd.f32 %v4138_v51, %v4033_v29 }
 0x97d   :  { %v4750_v24 = vpop.f32.mrf.mxu0 }
 0x97e   :  { %v8220_v16 = vadd.f32 %v4653_v39, %v4139_v33  ;;  %v4154_v40 = vadd.f32 %v4794_v22, %v4750_v24 }
 0x97f   :  { %v4043_v60 = vpop.f32.mrf.mxu0 }
 0x980   :  { %4188 = vmax.xlane.f32.xlu0 %v8217_v25  ;;  %v8223_v46 = vadd.f32 %v4653_v39, %v4154_v40  ;;  %v4149_v26 = vadd.f32 %v4148_v14, %v4043_v60  ;;  %v8301_v60 = vld [vmem:[%s8557_s3] sm:$0xff]  ;;  %v8310_v14 = vld [vmem:[%s8557_s3 + $0x8] sm:$0xff] }
 0x981   :  { %v4753_v10 = vpop.f32.mrf.mxu0 }
 0x982   :  { %v4164_v54 = vadd.f32 %v4797_v57, %v4753_v10  ;;  %v8235_v30 = vadd.f32 %v4653_v39, %v4149_v26  ;;  %v4532_v57 = vsel %vm4328_vm3, %v8301_v60, 0.0 }
 0x983   :  { %v4053_v35 = vpop.f32.mrf.mxu0 }
 0x984   :  { %4186 = vmax.xlane.f32.xlu0 %v8220_v16  ;;  %v8229_v18 = vadd.f32 %v4653_v39, %v4164_v54  ;;  %v4159_v2 = vadd.f32 %v4158_v36, %v4053_v35  ;;  %v4533_v54 = vsel %vm4328_vm3, %v8310_v14, 0.0 }
 0x985   :  { %v4534_v35 = vadd.f32 %v4533_v54, %v4532_v57 }
 0x986   :  { %v8238_v20 = vadd.f32 %v4653_v39, %v4159_v2 }
 0x988   :  { %4192 = vmax.xlane.f32.xlu0 %v8223_v46 }
 0x98b   :  { %4411 = vperm.xlu1 %4816, %v4396_v48  }
 0x98c   :  { %4196 = vmax.xlane.f32.xlu0 %v8229_v18 }
 0x9a2   :  { %4420 = vperm.xlu0 %4815, %v4399_v50   ;;  %v8320_v50 = vld [vmem:[%s8557_s3 + $0x10] sm:$0xff] }
 0x9a3   :  { %v4535_v2 = vsel %vm4328_vm3, %v8320_v50, 0.0 }
 0x9a4   :  { %v4536_v58 = vadd.f32 %v4535_v2, %v4534_v35 }
 0x9af   :  { %4190 = vmax.xlane.f32.xlu1 %v8235_v30 }
 0x9b3   :  { %4194 = vmax.xlane.f32.xlu1 %v8238_v20 }
 0x9c4   :  { %4417 = vperm.xlu1 %4816, %v4398_v8  }
 0x9c8   :  { %4423 = vperm.xlu1 %4816, %v4400_v4  }
 0xa03   :  { %v8254_v28 = vpop.xlane.xlu1 %4184 }
 0xa04   :  { %v4338_v6 = vsub.f32 %v8211_v15, %v8254_v28  ;;  %vm4201_vm4 = vcmp.eq.f32.partialorder %v8211_v15, %v8254_v28 }
 0xa05   :  { %v8259_v5 = vpop.xlane.xlu0 %4182  ;;  %v8329_v8 = vsel %vm4201_vm4, %v8252_v59, 128 }
 0xa06   :  { %v4347_v7 = vmul.f32 1.442695, %v4338_v6  ;;  %v4337_v27 = vsub.f32 %v8213_v23, %v8259_v5  ;;  %v4450_v12 = vmul.f32 %v4655_v45, %v4338_v6  ;;  %v4231_v28 = vshra.s32 %v8329_v8, 16 }
 0xa07   :  { %v4412_v13 = vpop.permute.xlu1 %4411  ;;  %v4537_v6 = vsel %vm4328_vm3, %v8338_v43, 0.0  ;;  %vm4200_vm12 = vcmp.eq.f32.partialorder %v8213_v23, %v8259_v5 }
 0xa08   :  { %5093 = vpow2.f32 %v4347_v7  ;;  %v4345_v11 = vmul.f32 1.442695, %v4337_v27  ;;  %v8264_v44 = vmul.f32 %v4654_v19, %v4337_v27  ;;  %vm4428_vm2 = vcmp.eq.s32.totalorder %v8252_v59, %v4412_v13 }
 0xa09   :  { %v8266_v55 = vpop.xlane.xlu0 %4188  ;;  %v4657_v37 = vsel %vm4428_vm2, 1.0, %v9003_v3  ;;  %v4538_v27 = vadd.f32 %v4537_v6, %v4536_v58  ;;  %v8348_v19 = vcvt.s32.f32 %v4231_v28 }
 0xa0a   :  { %5095 = vpow2.f32 %v4345_v11  ;;  %v4340_v41 = vsub.f32 %v8217_v25, %v8266_v55  ;;  %vm4203_vm6 = vcmp.eq.f32.partialorder %v8217_v25, %v8266_v55  ;;  %v8354_v55 = vld [vmem:[%s8557_s3 + $0x28] sm:$0xff] }
 0xa0b   :  { %v8344_v7 = vsel %vm4203_vm6, %v8252_v59, 128 }
 0xa0c   :  { %v4351_v1 = vmul.f32 1.442695, %v4340_v41  ;;  %v4452_v51 = vmul.f32 %v4657_v37, %v4340_v41  ;;  %v4259_v11 = vshra.s32 %v8344_v7, 16  ;;  %v8412_v37 = vsel %vm4200_vm12, %v8252_v59, 128 }
 0xa0d   :  { %v8268_v42 = vpop.xlane.xlu0 %4186 }
 0xa0e   :  { %v8274_v61 = vsub.f32 %v8220_v16, %v8268_v42  ;;  %vm4202_vm14 = vcmp.eq.f32.partialorder %v8220_v16, %v8268_v42 }
 0xa10   :  { %v4349_v0 = vmul.f32 1.442695, %v8274_v61 }
 0xa11   :  { %v8277_v9 = vpop.xlane.xlu0 %4192 }
 0xa12   :  { %5097 = vpow2.f32 %v4349_v0  ;;  %v4342_v17 = vsub.f32 %v8223_v46, %v8277_v9  ;;  %vm4205_vm8 = vcmp.eq.f32.partialorder %v8223_v46, %v8277_v9  ;;  %v8362_v46 = vld [vmem:[%s8557_s3 + $0x20] sm:$0xff] }
 0xa13   :  { %5099 = vpow2.f32 %v4351_v1  ;;  %v8357_v41 = vsel %vm4205_vm8, %v8252_v59, 128  ;;  %v4539_v0 = vsel %vm4328_vm3, %v8362_v46, 0.0  ;;  %v4541_v1 = vsel %vm4328_vm3, %v8354_v55, 0.0 }
 0xa14   :  { %v4355_v34 = vmul.f32 1.442695, %v4342_v17 }
 0xa15   :  { %v5094_v52 = vpop.eup %5093  ;;  %v8281_v53 = vpop.xlane.xlu0 %4196 }
 0xa16   :  { %v4344_v56 = vsub.f32 %v8229_v18, %v8281_v53  ;;  %4363 = vadd.xlane.f32.xlu1 %v5094_v52  ;;  %5101 = vpow2.f32 %v4355_v34  ;;  %vm4207_vm9 = vcmp.eq.f32.partialorder %v8229_v18, %v8281_v53  ;;  %v8371_v52 = vcvt.s32.f32 %v4259_v11  ;;  %v8380_v18 = vld [vmem:[%s8557_s3 + $0x30] sm:$0xff] }
 0xa17   :  { %v5096_v31 = vpop.eup %5095  ;;  %v4287_v34 = vshra.s32 %v8357_v41, 16  ;;  %v4258_v11 = vand.u32 65535, %v8344_v7 }
 0xa18   :  { %4361 = vadd.xlane.f32.xlu0 %v5096_v31  ;;  %v4359_v49 = vmul.f32 1.442695, %v4344_v56  ;;  %v4543_v31 = vsel %vm4328_vm3, %v8380_v18, 0.0 }
 0xa1a   :  { %5103 = vpow2.f32 %v4359_v49  ;;  %v8388_v49 = vcvt.s32.f32 %v4287_v34 }
 0xa1f   :  { %v5098_v62 = vpop.eup %5097 }
 0xa20   :  { %4365 = vadd.xlane.f32.xlu0 %v5098_v62  ;;  %v5100_v39 = vpop.eup %5099 }
 0xa23   :  { %v5102_v32 = vpop.eup %5101 }
 0xa24   :  { %4367 = vadd.xlane.f32.xlu0 %v5100_v39  ;;  %v8394_v39 = vld [vmem:[%s8557_s3 + $0x38] sm:$0xff] }
 0xa25   :  { %v4545_v13 = vsel %vm4328_vm3, %v8394_v39, 0.0 }
 0xa27   :  { %v5104_v21 = vpop.eup %5103 }
 0xa28   :  { %4371 = vadd.xlane.f32.xlu0 %v5102_v32  ;;  %v4656_v32 = vsel %vm4427_vm10, 1.0, %v9003_v3  ;;  %vm4530_vm10 = vcmask 0  }
 0xa29   :  { %v4451_v38 = vmul.f32 %v4656_v32, %v8274_v61 }
 0xa2c   :  { %4375 = vadd.xlane.f32.xlu0 %v5104_v21 }
 0xa30   :  { %4459 = vadd.xlane.f32.xlu0 %v4450_v12  ;;  %v4658_v12 = vsel %vm4429_vm11, 1.0, %v9003_v3 }
 0xa34   :  { %4463 = vadd.xlane.f32.xlu0 %v4452_v51  ;;  %v4217_v51 = vshra.s32 %v8412_v37, 16 }
 0xa38   :  { %v8289_v29 = vpop.xlane.xlu1 %4190 }
 0xa39   :  { %v8293_v24 = vsub.f32 %v8235_v30, %v8289_v29  ;;  %vm4204_vm15 = vcmp.eq.f32.partialorder %v8235_v30, %v8289_v29 }
 0xa3a   :  { %v8428_v16 = vsel %vm4204_vm15, %v8252_v59, 128 }
 0xa3b   :  { %v4353_v33 = vmul.f32 1.442695, %v8293_v24  ;;  %v4453_v63 = vmul.f32 %v4658_v12, %v8293_v24  ;;  %v8424_v24 = vcvt.s32.f32 %v4217_v51  ;;  %v4273_v42 = vshra.s32 %v8428_v16, 16 }
 0xa3c   :  { %v8296_v22 = vpop.xlane.xlu1 %4194 }
 0xa3d   :  { %5105 = vpow2.f32 %v4353_v33  ;;  %v8305_v40 = vsub.f32 %v8238_v20, %v8296_v22  ;;  %v8420_v33 = vsel %vm4202_vm14, %v8252_v59, 128  ;;  %vm4206_vm0 = vcmp.eq.f32.partialorder %v8238_v20, %v8296_v22 }
 0xa3e   :  { %v8440_v30 = vcvt.s32.f32 %v4273_v42 }
 0xa3f   :  { %v4357_v10 = vmul.f32 1.442695, %v8305_v40 }
 0xa40   :  { %v4418_v48 = vpop.permute.xlu1 %4417 }
 0xa41   :  { %5107 = vpow2.f32 %v4357_v10  ;;  %vm4430_vm5 = vcmp.eq.s32.totalorder %v8252_v59, %v4418_v48  ;;  %v4245_v10 = vshra.s32 %v8420_v33, 16 }
 0xa42   :  { %v4659_v26 = vsel %vm4430_vm5, 1.0, %v9003_v3 }
 0xa43   :  { %v4454_v36 = vmul.f32 %v4659_v26, %v4342_v17  ;;  %v4540_v17 = vadd.f32 %v4539_v0, %v4538_v27 }
 0xa44   :  { %v4424_v4 = vpop.permute.xlu1 %4423 }
 0xa45   :  { %vm4432_vm7 = vcmp.eq.s32.totalorder %v8252_v59, %v4424_v4  ;;  %4467 = vadd.xlane.f32.xlu0 %v4454_v36  ;;  %v4542_v53 = vadd.f32 %v4541_v1, %v4540_v17 }
 0xa46   :  { %v4661_v15 = vsel %vm4432_vm7, 1.0, %v9003_v3 }
 0xa47   :  { %v4456_v47 = vmul.f32 %v4661_v15, %v4344_v56  ;;  %v8375_v56 = vsel %vm4207_vm9, %v8252_v59, 128  ;;  %v4544_v21 = vadd.f32 %v4543_v31, %v4542_v53  ;;  %v4230_v15 = vand.u32 65535, %v8329_v8 }
 0xa48   :  { %v4315_v62 = vshra.s32 %v8375_v56, 16  ;;  %v4260_v53 = vcvt.s32.f32 %v4258_v11  ;;  %v4286_v31 = vand.u32 65535, %v8357_v41 }
 0xa49   :  { %4471 = vadd.xlane.f32.xlu0 %v4456_v47  ;;  %v4546_v61 = vadd.f32 %v4545_v13, %v4544_v21  ;;  %v4232_v27 = vcvt.s32.f32 %v4230_v15 }
 0xa4a   :  { %v5106_v25 = vpop.eup %5105  ;;  %v8405_v45 = vcvt.s32.f32 %v4315_v62 }
 0xa4b   :  { %4369 = vadd.xlane.f32.xlu1 %v5106_v25 }
 0xa4d   :  { %4234 = vmin.xlane.f32.xlu0 %v8348_v19 }
 0xa4e   :  { %v5108_v9 = vpop.eup %5107 }
 0xa4f   :  { %4373 = vadd.xlane.f32.xlu1 %v5108_v9 }
 0xa51   :  { %4262 = vmin.xlane.f32.xlu0 %v8371_v52 }
 0xa53   :  { %4457 = vadd.xlane.f32.xlu1 %v8264_v44  ;;  %v4421_v44 = vpop.permute.xlu0 %4420 }
 0xa54   :  { %vm4431_vm13 = vcmp.eq.s32.totalorder %v8252_v59, %v4421_v44 }
 0xa55   :  { %4290 = vmin.xlane.f32.xlu0 %v8388_v49  ;;  %v4660_v23 = vsel %vm4431_vm13, 1.0, %v9003_v3  ;;  %v8433_v3 = vcvt.s32.f32 %v4245_v10 }
 0xa56   :  { %v4455_v5 = vmul.f32 %v4660_v23, %v8305_v40  ;;  %v8437_v40 = vsel %vm4206_vm0, %v8252_v59, 128  ;;  %v4314_v23 = vand.u32 65535, %v8375_v56 }
 0xa57   :  { %4461 = vadd.xlane.f32.xlu1 %v4451_v38  ;;  %v4301_v29 = vshra.s32 %v8437_v40, 16 }
 0xa58   :  { %v4316_v56 = vcvt.s32.f32 %v4314_v23  ;;  %v4216_v23 = vand.u32 65535, %v8412_v37 }
 0xa59   :  { %4318 = vmin.xlane.f32.xlu0 %v8405_v45  ;;  %v8444_v57 = vcvt.s32.f32 %v4301_v29 }
 0xa5b   :  { %4465 = vadd.xlane.f32.xlu1 %v4453_v63 }
 0xa5d   :  { %4547 = vadd.xlane.f32.xlu0 %v4546_v61  ;;  %v4288_v61 = vcvt.s32.f32 %v4286_v31 }
 0xa5f   :  { %4469 = vadd.xlane.f32.xlu1 %v4455_v5 }
 0xa63   :  { %4220 = vmin.xlane.f32.xlu1 %v8424_v24 }
 0xa67   :  { %4248 = vmin.xlane.f32.xlu1 %v8433_v3 }
 0xa6b   :  { %4276 = vmin.xlane.f32.xlu1 %v8440_v30 }
 0xa6f   :  { %4304 = vmin.xlane.f32.xlu1 %v8444_v57 }
 0xa9f   :  { %v4364_v35 = vpop.xlane.xlu1 %4363 }
 0xaa0   :  { %5109 = vlog2.f32 %v4364_v35 }
 0xaa1   :  { %v4362_v20 = vpop.xlane.xlu0 %4361 }
 0xaa9   :  { %v4366_v22 = vpop.xlane.xlu0 %4365 }
 0xaad   :  { %v4368_v54 = vpop.xlane.xlu0 %4367  ;;  %v5110_v58 = vpop.eup %5109 }
 0xaae   :  { %5111 = vlog2.f32 %v4368_v54  ;;  %v4380_v6 = vmul.f32 0.6931472, %v5110_v58 }
 0xaaf   :  { %5113 = vlog2.f32 %v4362_v20 }
 0xab1   :  { %v4372_v48 = vpop.xlane.xlu0 %4371 }
 0xab2   :  { %5115 = vlog2.f32 %v4372_v48 }
 0xab3   :  { %5117 = vlog2.f32 %v4366_v22 }
 0xab5   :  { %v4376_v26 = vpop.xlane.xlu0 %4375 }
 0xab6   :  { %5119 = vlog2.f32 %v4376_v26 }
 0xab9   :  { %v4460_v59 = vpop.xlane.xlu0 %4459 }
 0xaba   :  { %v4474_v9 = vsub.f32 %v4460_v59, %v4380_v6 }
 0xabb   :  { %v5112_v28 = vpop.eup %5111 }
 0xabc   :  { %v5114_v0 = vpop.eup %5113  ;;  %v4384_v1 = vmul.f32 0.6931472, %v5112_v28  ;;  %v4490_v38 = vsub.f32 0.0, %v4474_v9 }
 0xabd   :  { %v4464_v36 = vpop.xlane.xlu0 %4463  ;;  %v4378_v32 = vmul.f32 0.6931472, %v5114_v0 }
 0xabf   :  { %v5116_v62 = vpop.eup %5115 }
 0xac0   :  { %v5118_v7 = vpop.eup %5117  ;;  %v4388_v12 = vmul.f32 0.6931472, %v5116_v62 }
 0xac1   :  { %v4382_v41 = vmul.f32 0.6931472, %v5118_v7 }
 0xac3   :  { %v5120_v51 = vpop.eup %5119 }
 0xac4   :  { %v4392_v35 = vmul.f32 0.6931472, %v5120_v51 }
 0xace   :  { %v4468_v2 = vpop.xlane.xlu0 %4467 }
 0xacf   :  { %v4478_v42 = vsub.f32 %v4468_v2, %v4388_v12 }
 0xad1   :  { %v4494_v2 = vsub.f32 0.0, %v4478_v42 }
 0xad2   :  { %v8447_v4 = vpop.xlane.xlu0 %4471 }
 0xad4   :  { %v4370_v47 = vpop.xlane.xlu1 %4369 }
 0xad5   :  { %5121 = vlog2.f32 %v4370_v47 }
 0xad6   :  { %v8450_v25 = vpop.xlane.xlu0 %4234 }
 0xad7   :  { %vm4236_vm1 = vcmp.eq.f32.partialorder %v8348_v19, %v8450_v25  ;;  %v4476_v19 = vsub.f32 %v4464_v36, %v4384_v1 }
 0xad8   :  { %v4374_v17 = vpop.xlane.xlu1 %4373  ;;  %v4237_v34 = vsel %vm4236_vm1, %v4232_v27, inf }
 0xad9   :  { %5123 = vlog2.f32 %v4374_v17  ;;  %4238 = vmin.xlane.f32.xlu0 %v4237_v34  ;;  %v4492_v10 = vsub.f32 0.0, %v4476_v19 }
 0xada   :  { %v8455_v8 = vpop.xlane.xlu0 %4262 }
 0xadb   :  { %vm4264_vm2 = vcmp.eq.f32.partialorder %v8371_v52, %v8455_v8  ;;  %v4498_v52 = vmul.f32 %v4490_v38, %v8310_v14  ;;  %v4500_v14 = vmul.f32 %v4492_v10, %v8338_v43  ;;  %v4272_v10 = vand.u32 65535, %v8428_v16 }
 0xadc   :  { %v4458_v21 = vpop.xlane.xlu1 %4457  ;;  %v4265_v44 = vsel %vm4264_vm2, %v4260_v53, inf  ;;  %v4502_v53 = vmul.f32 %v4494_v2, %v8354_v55  ;;  %v4241_v16 = vcvt.f32.s32 %v8450_v25 }
 0xadd   :  { %v4473_v13 = vsub.f32 %v4458_v21, %v4378_v32  ;;  %4266 = vmin.xlane.f32.xlu0 %v4265_v44  ;;  %v4506_v15 = vsel %vm4328_vm3, %v4498_v52, 0.0  ;;  %v4510_v43 = vsel %vm4328_vm3, %v4500_v14, 0.0 }
 0xade   :  { %v8460_v63 = vpop.xlane.xlu0 %4290  ;;  %v4514_v19 = vsel %vm4328_vm3, %v4502_v53, 0.0 }
 0xadf   :  { %v4489_v5 = vsub.f32 0.0, %v4473_v13  ;;  %vm4292_vm4 = vcmp.eq.f32.partialorder %v8388_v49, %v8460_v63 }
 0xae0   :  { %v4462_v29 = vpop.xlane.xlu1 %4461  ;;  %v4293_v20 = vsel %vm4292_vm4, %v4288_v61, inf }
 0xae1   :  { %v4497_v22 = vmul.f32 %v4489_v5, %v8301_v60  ;;  %v4475_v54 = vsub.f32 %v4462_v29, %v4382_v41  ;;  %4294 = vmin.xlane.f32.xlu0 %v4293_v20  ;;  %v4480_v60 = vsub.f32 %v8447_v4, %v4392_v35  ;;  %v4218_v41 = vcvt.s32.f32 %v4216_v23 }
 0xae2   :  { %v5122_v48 = vpop.eup %5121  ;;  %v8467_v26 = vpop.xlane.xlu0 %4318 }
 0xae3   :  { %v4505_v59 = vsel %vm4328_vm3, %v4497_v22, 0.0  ;;  %v4491_v36 = vsub.f32 0.0, %v4475_v54  ;;  %v4386_v49 = vmul.f32 0.6931472, %v5122_v48  ;;  %vm4320_vm5 = vcmp.eq.f32.partialorder %v8405_v45, %v8467_v26 }
 0xae4   :  { %v4466_v58 = vpop.xlane.xlu1 %4465  ;;  %v4321_v6 = vsel %vm4320_vm5, %v4316_v56, inf  ;;  %v4507_v11 = vadd.f32 %v4506_v15, %v4505_v59  ;;  %v4496_v45 = vsub.f32 0.0, %v4480_v60  ;;  %v4242_v48 = vshll.u32 %v4241_v16, 16 }
 0xae5   :  { %v4499_v47 = vmul.f32 %v4491_v36, %v8320_v50  ;;  %v4477_v28 = vsub.f32 %v4466_v58, %v4386_v49  ;;  %4322 = vmin.xlane.f32.xlu0 %v4321_v6 }
 0xae6   :  { %v5124_v27 = vpop.eup %5123  ;;  %v4504_v21 = vmul.f32 %v4496_v45, %v8394_v39  ;;  %v4244_v39 = vand.u32 65535, %v8420_v33  ;;  %v4300_v33 = vand.u32 65535, %v8437_v40  ;;  %v4548_v22 = vpop.xlane.xlu0 %4547  ;;  %v4297_v40 = vcvt.f32.s32 %v8460_v63 }
 0xae7   :  { %v4508_v0 = vsel %vm4328_vm3, %v4499_v47, 0.0  ;;  %v4493_v9 = vsub.f32 0.0, %v4477_v28  ;;  %v4390_v1 = vmul.f32 0.6931472, %v5124_v27  ;;  %v4549_v28 = vrot.slane %v4548_v22, 4 }
 0xae8   :  { %v4509_v17 = vadd.f32 %v4508_v0, %v4507_v11  ;;  %v4470_v34 = vpop.xlane.xlu1 %4469  ;;  %v4246_v52 = vcvt.s32.f32 %v4244_v39  ;;  %v4302_v20 = vcvt.s32.f32 %v4300_v33  ;;  %v4298_v14 = vshll.u32 %v4297_v40, 16 }
 0xae9   :  { %v4501_v4 = vmul.f32 %v4493_v9, %v8362_v46  ;;  %v4479_v31 = vsub.f32 %v4470_v34, %v4390_v1  ;;  %v4518_v46 = vsel %vm4328_vm3, %v4504_v21, 0.0  ;;  %v4550_v6 = vadd.f32 %v4549_v28, %v4548_v22 }
 0xaea   :  { %v4511_v50 = vadd.f32 %v4510_v43, %v4509_v17 }
 0xaeb   :  { %v4512_v62 = vsel %vm4328_vm3, %v4501_v4, 0.0  ;;  %v4495_v32 = vsub.f32 0.0, %v4479_v31  ;;  %v4551_v27 = vrot.slane %v4550_v6, 2 }
 0xaec   :  { %v4513_v7 = vadd.f32 %v4512_v62, %v4511_v50  ;;  %v8481_v38 = vpop.xlane.xlu1 %4220 }
 0xaed   :  { %v4503_v44 = vmul.f32 %v4495_v32, %v8380_v18  ;;  %vm4222_vm6 = vcmp.eq.f32.partialorder %v8424_v24, %v8481_v38  ;;  %v4274_v24 = vcvt.s32.f32 %v4272_v10  ;;  %v4552_v43 = vadd.f32 %v4551_v27, %v4550_v6 }
 0xaee   :  { %v4515_v13 = vadd.f32 %v4514_v19, %v4513_v7  ;;  %v4223_v18 = vsel %vm4222_vm6, %v4218_v41, inf }
 0xaef   :  { %v4516_v55 = vsel %vm4328_vm3, %v4503_v44, 0.0  ;;  %v4553_v62 = vrot.slane %v4552_v43, 1 }
 0xaf0   :  { %v4517_v12 = vadd.f32 %v4516_v55, %v4515_v13  ;;  %v8487_v61 = vpop.xlane.xlu1 %4248 }
 0xaf1   :  { %vm4250_vm7 = vcmp.eq.f32.partialorder %v8433_v3, %v8487_v61  ;;  %v4255_v34 = vcvt.f32.s32 %v8487_v61  ;;  %v4554_v55 = vadd.f32 %v4553_v62, %v4552_v43 }
 0xaf2   :  { %v4519_v5 = vadd.f32 %v4518_v46, %v4517_v12  ;;  %v4251_v42 = vsel %vm4250_vm7, %v4246_v52, inf }
 0xaf3   :  { %v4256_v32 = vshll.u32 %v4255_v34, 16 }
 0xaf4   :  { %4520 = vadd.xlane.f32.xlu1 %v4519_v5  ;;  %v8494_v51 = vpop.xlane.xlu1 %4276 }
 0xaf5   :  { %vm4278_vm8 = vcmp.eq.f32.partialorder %v8440_v30, %v8494_v51  ;;  %v4269_v30 = vcvt.f32.s32 %v8455_v8  ;;  %v4325_v8 = vcvt.f32.s32 %v8467_v26  ;;  %v4227_v26 = vcvt.f32.s32 %v8481_v38 }
 0xaf6   :  { %v4279_v29 = vsel %vm4278_vm8, %v4274_v24, inf  ;;  %v4283_v7 = vcvt.f32.s32 %v8494_v51 }
 0xaf7   :  { %v4270_v36 = vshll.u32 %v4269_v30, 16  ;;  %v4326_v58 = vshll.u32 %v4325_v8, 16  ;;  %v4228_v17 = vshll.u32 %v4227_v26, 16 }
 0xaf8   :  { %4224 = vmin.xlane.f32.xlu1 %v4223_v18  ;;  %v8501_v37 = vpop.xlane.xlu1 %4304  ;;  %v4284_v12 = vshll.u32 %v4283_v7, 16 }
 0xaf9   :  { %vm4306_vm9 = vcmp.eq.f32.partialorder %v8444_v57, %v8501_v37  ;;  %v4311_v61 = vcvt.f32.s32 %v8501_v37 }
 0xafa   :  { %v4307_v3 = vsel %vm4306_vm9, %v4302_v20, inf }
 0xafb   :  { %v4312_v41 = vshll.u32 %v4311_v61, 16 }
 0xafc   :  { %4252 = vmin.xlane.f32.xlu1 %v4251_v42 }
 0xb00   :  { %4280 = vmin.xlane.f32.xlu1 %v4279_v29 }
 0xb04   :  { %4308 = vmin.xlane.f32.xlu1 %v4307_v3 }
 0xb62   :  { %v4239_v54 = vpop.xlane.xlu0 %4238 }
 0xb63   :  { %v4240_v56 = vcvt.f32.s32 %v4239_v54 }
 0xb65   :  { %v4243_v35 = vadd.s32 %v4242_v48, %v4240_v56 }
 0xb66   :  { %v4267_v59 = vpop.xlane.xlu0 %4266 }
 0xb67   :  { %4330 = vst.msk [vmem:[%s8566_s12 + $0x8] sm:$0xff] %vm4328_vm3, %v4243_v35  ;;  %v4268_v57 = vcvt.f32.s32 %v4267_v59 }
 0xb69   :  { %v4271_v49 = vadd.s32 %v4270_v36, %v4268_v57 }
 0xb6a   :  { %v4295_v15 = vpop.xlane.xlu0 %4294 }
 0xb6b   :  { %4332 = vst.msk [vmem:[%s8566_s12 + $0x18] sm:$0xff] %vm4328_vm3, %v4271_v49  ;;  %v4296_v25 = vcvt.f32.s32 %v4295_v15 }
 0xb6d   :  { %v4299_v2 = vadd.s32 %v4298_v14, %v4296_v25 }
 0xb6e   :  { %v4323_v63 = vpop.xlane.xlu0 %4322 }
 0xb6f   :  { %4334 = vst.msk [vmem:[%s8566_s12 + $0x28] sm:$0xff] %vm4328_vm3, %v4299_v2  ;;  %v4324_v60 = vcvt.f32.s32 %v4323_v63 }
 0xb71   :  { %v4327_v47 = vadd.s32 %v4326_v58, %v4324_v60 }
 0xb73   :  { %4336 = vst.msk [vmem:[%s8566_s12 + $0x38] sm:$0xff] %vm4328_vm3, %v4327_v47 }
 0xb7d   :  { %v4521_v11 = vpop.xlane.xlu1 %4520 }
 0xb7e   :  { %v4522_v0 = vrot.slane %v4521_v11, 4 }
 0xb80   :  { %v4523_v9 = vadd.f32 %v4522_v0, %v4521_v11 }
 0xb81   :  { %v4225_v1 = vpop.xlane.xlu1 %4224 }
 0xb82   :  { %v4524_v53 = vrot.slane %v4523_v9, 2  ;;  %v4226_v45 = vcvt.f32.s32 %v4225_v1 }
 0xb84   :  { %v4229_v4 = vadd.s32 %v4228_v17, %v4226_v45  ;;  %v4525_v31 = vadd.f32 %v4524_v53, %v4523_v9 }
 0xb85   :  { %v4253_v50 = vpop.xlane.xlu1 %4252 }
 0xb86   :  { %4329 = vst.msk [vmem:[%s8566_s12] sm:$0xff] %vm4328_vm3, %v4229_v4  ;;  %v4254_v38 = vcvt.f32.s32 %v4253_v50  ;;  %v4526_v19 = vrot.slane %v4525_v31, 1 }
 0xb88   :  { %v4257_v21 = vadd.s32 %v4256_v32, %v4254_v38  ;;  %v4527_v44 = vadd.f32 %v4526_v19, %v4525_v31 }
 0xb89   :  { %v4281_v13 = vpop.xlane.xlu1 %4280 }
 0xb8a   :  { %4331 = vst.msk [vmem:[%s8566_s12 + $0x10] sm:$0xff] %vm4328_vm3, %v4257_v21  ;;  %v4282_v46 = vcvt.f32.s32 %v4281_v13 }
 0xb8b   :  { %4798 = vpush %v4527_v44 }
 0xb8c   :  { %4800 = vpush %v4554_v55  ;;  %v4285_v23 = vadd.s32 %v4284_v12, %v4282_v46 }
 0xb8d   :  { %v4309_v5 = vpop.xlane.xlu1 %4308 }
 0xb8e   :  { %4333 = vst.msk [vmem:[%s8566_s12 + $0x20] sm:$0xff] %vm4328_vm3, %v4285_v23  ;;  %v4310_v39 = vcvt.f32.s32 %v4309_v5 }
 0xb90   :  { %v4313_v51 = vadd.s32 %v4312_v41, %v4310_v39 }
 0xb92   :  { %4335 = vst.msk [vmem:[%s8566_s12 + $0x30] sm:$0xff] %vm4328_vm3, %v4313_v51 }
 0xbbc   :  { %s4799_s23 = spop %4798 }
 0xbbd   :  { %v4529_v18 = vstv %s4799_s23  ;;  %s4801_s24 = spop %4800 }
 0xbbe   :  { %v4556_v52 = vstv %s4801_s24  ;;  %4531 = vst.msk [vmem:[#allocation15] sm:$0x1] %vm4530_vm10, %v4529_v18 }
 0xbbf   :  { %5492 = shalt.err (!%p5489_p1)
}
 0xbc0   :  { %4569 = dma.vmem_to_hbm [thread:$0]  %s4567_s1, 16, %s8567_s13, [#allocation8]   ;;  %4557 = vst.msk [vmem:[#allocation16] sm:$0x1] %vm4530_vm10, %v4556_v52 }
 0xbc1   :  { %s5501_s7 = scalar_lea.vmem %s4577_s22, 16  ;;  %s5505_s18 = scalar_lea.vmem %s4577_s22, 32 }
 0xbc2   :  { %p5502_p2 = scmp.ne.s32.totalorder %s4577_s22, %s5501_s7  ;;  %p5506_p3 = scmp.lt.s32.totalorder %s4577_s22, %s4577_s22 }
 0xbc3   :  { %p5507_p4 = scmp.lt.s32.totalorder %s5505_s18, %s5501_s7 }
 0xbc5   :  { %p5508_p5 = por %p5507_p4, %p5506_p3 }
 0xbc7   :  { %p5509_p6 = pnand %p5508_p5, %p5502_p2 }
 0xbc9   :  { %5512 = shalt.err (!%p5509_p6)
}
 0xbca   :  { %4579 = dma.vmem_to_hbm [thread:$0]  %s4577_s22, 16, %s8568_s14, [#allocation17]  }
 0xbcb   :  { %5527 = dma.done.wait [#allocation8], 16  }
 0xbcc   :  { %5528 = vsyncadd [#allocation8], 4294967280 }
 0xbcd   :  { %5529 = dma.done.wait [#allocation17], 16  }
 0xbce   :  { %5530 = vsyncadd [#allocation17], 4294967280 }
 0xbcf   :  { %4588 = vsyncpa [#allocation7], 1 }
 0xbd0   :  { %4589 = vsyncpa [#allocation10], 1 }
 0xbd1   :  { %4590 = vsyncpa [#allocation13], 1 }
 0xbd2   :  { %4591 = vsyncpa [#allocation8], 1 }
 0xbd3   :  { %4592 = vsyncpa [#allocation17], 1 }

</bundles_post_ra>
